<compile_context>
chip_gen: v7x
topology: tpu7x:2x2x1
jax: 0.10.0
libtpu: 0.0.40
codegen_flags: <defaults>
</compile_context>

<pallas_src>
import jax
import jax.numpy as jnp
from jax.experimental import pallas as pl
from jax.experimental.pallas import tpu as pltpu


# ----------------------------------------------------------------------------
# Kernel A: fused 1x1 conv (block-diag matmul) + Sigmoid + LSTM input
# projection (both directions) + folded gate biases.
#   x2d    : [M, F*C]   (M = T*N, columns ordered (f, c), c fastest), f32
#   wbd    : [F*C, F*8] block-diagonal conv weight, bf16
#   bc     : [1, F*8]   tiled conv bias, f32
#   wih_fb : [F*8, 8*Hp] concat(W_ih_fwd^T, W_ih_bwd^T), gate-padded, bf16
#   bih_fb : [1, 8*Hp]   concat(bias_fwd, bias_bwd), gate-padded, f32
#   gx     : [M, 8*Hp]  bf16 (HBM intermediate halved vs f32)
# ----------------------------------------------------------------------------
def conv_proj_kernel(x_ref, wbd_ref, bc_ref, wih_ref, bih_ref, gx_ref):
    # 1x1 conv as a per-frequency channel mix; lane-dense (F*8) activation.
    seq = jax.nn.sigmoid(
        jnp.dot(x_ref[...].astype(jnp.bfloat16), wbd_ref[...],
                preferred_element_type=jnp.float32) + bc_ref[...])
    # Input projection for both LSTM directions, gate biases folded in here so
    # the recurrent kernel only adds h @ W_hh per step.
    gx = (jnp.dot(seq.astype(jnp.bfloat16), wih_ref[...],
                  preferred_element_type=jnp.float32) + bih_ref[...])
    gx_ref[...] = gx.astype(gx_ref.dtype)


def conv_input_proj(x2d, wbd, bc, wih_fb, bih_fb, *, bm_max=256):
    M, FC = x2d.shape
    F8 = wbd.shape[1]
    G = wih_fb.shape[1]
    # bm capped at 256: with bf16 gx blocks this stays well under the v5e
    # 16 MiB default scoped-VMEM limit even with double buffering.
    bm = M if M <= bm_max else bm_max
    return pl.pallas_call(
        conv_proj_kernel,
        out_shape=jax.ShapeDtypeStruct((M, G), jnp.bfloat16),
        grid=(pl.cdiv(M, bm),),
        in_specs=[
            pl.BlockSpec((bm, FC), lambda i: (i, 0)),
            pl.BlockSpec((FC, F8), lambda i: (0, 0)),
            pl.BlockSpec((1, F8), lambda i: (0, 0)),
            pl.BlockSpec((F8, G), lambda i: (0, 0)),
            pl.BlockSpec((1, G), lambda i: (0, 0)),
        ],
        out_specs=pl.BlockSpec((bm, G), lambda i: (i, 0)),
        compiler_params=pltpu.CompilerParams(
            dimension_semantics=("parallel",)),
    )(x2d, wbd, bc, wih_fb, bih_fb)


# ----------------------------------------------------------------------------
# Kernel B: fused bidirectional LSTM recurrence.
#   gx     : [T, N, 8*Hp]  bf16 precomputed x-gates (+bias), both directions
#   whh_fb : [2, Hp, 4*Hp] stacked recurrent weights (bf16, gate-padded)
#   out    : [T, N, 2*Hp]  bf16, forward hidden in [..., :Hp], backward in rest
# Grid = (direction, T): direction is "parallel" (one per TensorCore on v7x),
# T is "arbitrary" (sequential recurrence).  Per-timestep gx blocks keep VMEM
# independent of T and let the gx DMA overlap compute; h/c scratch persists
# across grid steps and is re-initialised at t == 0 (so also at the d switch).
# NOTE: the per-step h @ Whh matmul is weight-stream bound at small N; the
# real lever is batching more streams in N at the caller.
# ----------------------------------------------------------------------------
def bilstm_kernel(gx_ref, whh_ref, out_ref, h_scr, c_scr):
    Hp = h_scr.shape[1]

    @pl.when(pl.program_id(1) == 0)
    def _():
        h_scr[...] = jnp.zeros_like(h_scr)
        c_scr[...] = jnp.zeros_like(c_scr)

    # f32 gate accumulation; h LHS is bf16 (native MXU dtype).
    gates = gx_ref[0].astype(jnp.float32) + jnp.dot(
        h_scr[...], whh_ref[0], preferred_element_type=jnp.float32)
    # Hp = 640 (multiple of 128) => all gate slices are lane-aligned.
    i_g = jax.nn.sigmoid(gates[:, 0 * Hp:1 * Hp])
    f_g = jax.nn.sigmoid(gates[:, 1 * Hp:2 * Hp])
    g_g = jnp.tanh(gates[:, 2 * Hp:3 * Hp])
    o_g = jax.nn.sigmoid(gates[:, 3 * Hp:4 * Hp])
    c_new = f_g * c_scr[...] + i_g * g_g
    h_new = o_g * jnp.tanh(c_new)
    c_scr[...] = c_new
    h_bf = h_new.astype(jnp.bfloat16)       # single bf16 cast per step
    h_scr[...] = h_bf                       # next-step MXU LHS
    out_ref[0] = h_bf                       # bf16 HBM intermediate


def bilstm(gx, whh_fb):
    T, N, _ = gx.shape
    Hp = whh_fb.shape[1]

    def time_index(d, t):
        # d == 0 -> t (forward), d == 1 -> T-1-t (backward), in the index_map.
        return ((1 - d) * t + d * (T - 1 - t), 0, d)

    return pl.pallas_call(
        bilstm_kernel,
        out_shape=jax.ShapeDtypeStruct((T, N, 2 * Hp), jnp.bfloat16),
        grid=(2, T),
        in_specs=[
            pl.BlockSpec((1, N, 4 * Hp), time_index),
            pl.BlockSpec((1, Hp, 4 * Hp), lambda d, t: (d, 0, 0)),
        ],
        out_specs=pl.BlockSpec((1, N, Hp), time_index),
        scratch_shapes=[
            pltpu.VMEM((N, Hp), jnp.bfloat16),   # h (MXU LHS dtype)
            pltpu.VMEM((N, Hp), jnp.float32),    # c (keep f32)
        ],
        compiler_params=pltpu.CompilerParams(
            dimension_semantics=("parallel", "arbitrary")),
    )(gx, whh_fb)


# ----------------------------------------------------------------------------
# Kernel C: dense head  (Linear+ReLU) -> (Linear+ReLU) -> (Linear+Sigmoid)
#   x : [M, 2*Hp] bf16 (M = T*N); w3/w4/wo bf16 (padded), biases f32.
#   Output is lane-dense [M, Fp] (Fp = 128 >= F); wrapper slices [:, :F].
# ----------------------------------------------------------------------------
def mlp_head_kernel(x_ref, w3_ref, b3_ref, w4_ref, b4_ref, wo_ref, bo_ref,
                    o_ref):
    h = jnp.dot(x_ref[...], w3_ref[...],
                preferred_element_type=jnp.float32) + b3_ref[...]
    h = jnp.maximum(h, 0.0)
    h = jnp.dot(h.astype(jnp.bfloat16), w4_ref[...],
                preferred_element_type=jnp.float32) + b4_ref[...]
    h = jnp.maximum(h, 0.0)
    y = jnp.dot(h.astype(jnp.bfloat16), wo_ref[...],
                preferred_element_type=jnp.float32) + bo_ref[...]
    # TODO(synk): PARAM.sA_out_act is not defined in the provided source;
    # 'sigmoid' is assumed here (could be tanh or identity).
    o_ref[...] = jax.nn.sigmoid(y)


def mlp_head(x, w3, b3, w4, b4, wo, bo, *, bm_max=256):
    M, Din = x.shape
    D3 = w3.shape[1]
    D4 = w4.shape[1]
    Fp = wo.shape[1]
    bm = M if M <= bm_max else bm_max
    return pl.pallas_call(
        mlp_head_kernel,
        out_shape=jax.ShapeDtypeStruct((M, Fp), jnp.float32),
        grid=(pl.cdiv(M, bm),),
        in_specs=[
            pl.BlockSpec((bm, Din), lambda i: (i, 0)),
            pl.BlockSpec((Din, D3), lambda i: (0, 0)),
            pl.BlockSpec((1, D3), lambda i: (0, 0)),
            pl.BlockSpec((D3, D4), lambda i: (0, 0)),
            pl.BlockSpec((1, D4), lambda i: (0, 0)),
            pl.BlockSpec((D4, Fp), lambda i: (0, 0)),
            pl.BlockSpec((1, Fp), lambda i: (0, 0)),
        ],
        out_specs=pl.BlockSpec((bm, Fp), lambda i: (i, 0)),
        compiler_params=pltpu.CompilerParams(
            dimension_semantics=("parallel",)),
    )(x, w3, b3, w4, b4, wo, bo)


# ----------------------------------------------------------------------------
# Parameter construction.  Logical (module-faithful) 600-unit parameters are
# generated first, then packed/padded into TPU-friendly layouts:
#   - conv as a block-diagonal [F*C, F*8] matrix (lane-dense output), bf16,
#   - LSTM gate blocks zero-padded 600 -> 640 (lane-aligned slices), bf16,
#   - MLP dims zero-padded 600 -> 640, output padded F -> 128, bf16 weights.
# Zero padding keeps padded hidden units exactly zero, so results match the
# unpadded 600-unit module.
# ----------------------------------------------------------------------------
def init_params(key, channel_sA, frequency_dim, hidden=600, hidden_pad=640):
    C, F, H, Hp = channel_sA, frequency_dim, hidden, hidden_pad
    D = F * 8
    D3, D3p = 600, 640
    Fp = max(128, ((F + 127) // 128) * 128)   # lane-dense output width
    ks = jax.random.split(key, 16)
    s = 0.05

    def rnd(k, shape):
        return s * jax.random.normal(k, shape, dtype=jnp.float32)

    # --- logical parameters (shapes as in the PyTorch module) ---------------
    # NOTE for a real loader: conv_w corresponds to Conv2d.weight[:, :, 0, 0]
    # ([Cout=8, Cin=C]); wih_* / whh_* are the transposed LSTM weights.
    conv_w = rnd(ks[0], (8, C))
    conv_b = rnd(ks[1], (8,))
    wih_f = rnd(ks[2], (D, 4 * H))      # weight_ih_l0.T
    whh_f = rnd(ks[3], (H, 4 * H))      # weight_hh_l0.T
    b_f = rnd(ks[4], (1, 4 * H))        # bias_ih + bias_hh
    wih_b = rnd(ks[5], (D, 4 * H))
    whh_b = rnd(ks[6], (H, 4 * H))
    b_b = rnd(ks[7], (1, 4 * H))
    w3 = rnd(ks[8], (2 * H, D3)); b3 = rnd(ks[9], (1, D3))
    w4 = rnd(ks[10], (D3, D3)); b4 = rnd(ks[11], (1, D3))
    wo = rnd(ks[12], (D3, F)); bo = rnd(ks[13], (1, F))

    # --- TPU packed / padded forms -------------------------------------------
    # TODO(synk): at realistic frequency_dim (257-512) replace the block-diag
    # kron weight with a per-frequency [C, 8] formulation (F^2 sparsity wastes
    # MXU work / VMEM); harmless at F=16.
    wbd = jnp.kron(jnp.eye(F, dtype=jnp.float32), conv_w.T)      # [F*C, F*8]
    bc_tile = jnp.tile(conv_b, (F,))[None, :]                    # [1, F*8]

    def pad_gate_cols(w):
        lead = w.shape[:-1]
        w4g = w.reshape(lead + (4, H))
        w4g = jnp.pad(w4g, [(0, 0)] * len(lead) + [(0, 0), (0, Hp - H)])
        return w4g.reshape(lead + (4 * Hp,))

    wih_fb = jnp.concatenate(
        [pad_gate_cols(wih_f), pad_gate_cols(wih_b)], axis=1
    ).astype(jnp.bfloat16)                                       # [F*8, 8*Hp]
    bih_fb = jnp.concatenate(
        [pad_gate_cols(b_f), pad_gate_cols(b_b)], axis=1)        # [1, 8*Hp]
    whh_fb = jnp.stack([
        jnp.pad(pad_gate_cols(whh_f), [(0, Hp - H), (0, 0)]),
        jnp.pad(pad_gate_cols(whh_b), [(0, Hp - H), (0, 0)]),
    ]).astype(jnp.bfloat16)                                      # [2, Hp, 4*Hp]

    w3p = jnp.zeros((2 * Hp, D3p), jnp.float32)
    w3p = w3p.at[:H, :D3].set(w3[:H]).at[Hp:Hp + H, :D3].set(w3[H:])
    b3p = jnp.pad(b3, [(0, 0), (0, D3p - D3)])
    w4p = jnp.pad(w4, [(0, D3p - D3), (0, D3p - D3)])
    b4p = jnp.pad(b4, [(0, 0), (0, D3p - D3)])
    wop = jnp.zeros((D3p, Fp), jnp.float32).at[:D3, :F].set(wo)  # lane-dense
    bop = jnp.zeros((1, Fp), jnp.float32).at[:, :F].set(bo)

    return {
        "wbd": wbd.astype(jnp.bfloat16), "bc": bc_tile,
        "wih_fb": wih_fb, "bih_fb": bih_fb, "whh_fb": whh_fb,
        "w3": w3p.astype(jnp.bfloat16), "b3": b3p,
        "w4": w4p.astype(jnp.bfloat16), "b4": b4p,
        "wo": wop.astype(jnp.bfloat16), "bo": bop,
    }


# ----------------------------------------------------------------------------
# Full forward:  [N, C, F, T]  ->  [N, F, T]
# ----------------------------------------------------------------------------
@jax.jit
def stream_amplitude_postnet(feature_sA, params):
    N, C, F, T = feature_sA.shape
    Hp = params["whh_fb"].shape[1]

    # [N, C, F, T] -> [T, N, F, C] -> [T*N, F*C]: time-major rows, channel
    # fastest in columns, so the block-diagonal conv reproduces
    # torch.transpose(conv_out, 1, 3).reshape(N, T, F*8) element ordering.
    # TODO(synk): at realistic sizes fold this permute into Kernel A (index_map
    # over T + in-kernel reorder) to avoid one full XLA HBM pass over the input.
    x2d = jnp.transpose(feature_sA, (3, 0, 2, 1)).reshape(T * N, F * C)

    # p1_conv2d (+sigmoid) fused with the LSTM input projection (bf16 out).
    gx = conv_input_proj(x2d, params["wbd"], params["bc"],
                         params["wih_fb"], params["bih_fb"])     # [T*N, 8*Hp]
    gx = gx.reshape(T, N, 8 * Hp)

    # p2_blstm: fused bidirectional recurrence (bf16 out).
    blstm_out = bilstm(gx, params["whh_fb"])                     # [T, N, 2*Hp]

    # p3_dense -> p4_dense -> out_dense (+sigmoid), fused; lane-dense output.
    y = mlp_head(blstm_out.reshape(T * N, 2 * Hp),
                 params["w3"], params["b3"],
                 params["w4"], params["b4"],
                 params["wo"], params["bo"])                     # [T*N, Fp]
    y = y[:, :F].reshape(T, N, F)

    # [T, N, F] -> [N, F, T]  (== transpose(1, 2) of the batch-first output)
    return jnp.transpose(y, (1, 2, 0))


if __name__ == "__main__":
    N, C, F, T = 2, 4, 16, 8           # batch, channel_sA, frequency_dim, time
    key = jax.random.PRNGKey(0)
    k_x, k_p = jax.random.split(key)
    feature_sA = jax.random.normal(k_x, (N, C, F, T), dtype=jnp.float32)
    params = init_params(k_p, channel_sA=C, frequency_dim=F)

    out = stream_amplitude_postnet(feature_sA, params)
    out = jax.block_until_ready(out)
    assert out.shape == (N, F, T), out.shape
    assert bool(jnp.all(jnp.isfinite(out)))
    print("KERNEL_OK")
</pallas_src>

<mosaic_0001>
module attributes {stable_mosaic.version = 11 : i64} {
  func.func @conv_proj_kernel(%arg0: i32, %arg1: memref<16x64xf32, #tpu.memory_space<vmem>>, %arg2: memref<64x128xbf16, #tpu.memory_space<vmem>>, %arg3: memref<1x128xf32, #tpu.memory_space<vmem>>, %arg4: memref<128x5120xbf16, #tpu.memory_space<vmem>>, %arg5: memref<1x5120xf32, #tpu.memory_space<vmem>>, %arg6: memref<16x5120xbf16, #tpu.memory_space<vmem>>) attributes {dimension_semantics = [#tpu.dimension_semantics<parallel>], iteration_bounds = array<i64: 1>, scalar_prefetch = 0 : i64, scratch_operands = 0 : i64, tpu.core_type = #tpu.core_type<tc>, window_params = [{transform_indices = @transform_0, window_bounds = array<i64: 16, 64>}, {pipeline_mode = #tpu.pipeline_mode<synchronous>, transform_indices = @transform_1, window_bounds = array<i64: 64, 128>}, {pipeline_mode = #tpu.pipeline_mode<synchronous>, transform_indices = @transform_2, window_bounds = array<i64: 1, 128>}, {pipeline_mode = #tpu.pipeline_mode<synchronous>, transform_indices = @transform_3, window_bounds = array<i64: 128, 5120>}, {pipeline_mode = #tpu.pipeline_mode<synchronous>, transform_indices = @transform_4, window_bounds = array<i64: 1, 5120>}, {transform_indices = @transform_5, window_bounds = array<i64: 16, 5120>}]} {
    %c0 = arith.constant 0 : index
    %c0_0 = arith.constant 0 : index
    %0 = vector.load %arg1[%c0, %c0_0] : memref<16x64xf32, #tpu.memory_space<vmem>>, vector<16x64xf32>
    %1 = arith.truncf %0 : vector<16x64xf32> to vector<16x64xbf16>
    %c0_1 = arith.constant 0 : index
    %c0_2 = arith.constant 0 : index
    %2 = vector.load %arg2[%c0_1, %c0_2] : memref<64x128xbf16, #tpu.memory_space<vmem>>, vector<64x128xbf16>
    %cst = arith.constant dense<0.000000e+00> : vector<16x128xf32>
    %3 = tpu.matmul %1, %2, %cst {dimension_numbers = #tpu.dot_dimension_numbers<[1], [0], [0], [1], [0, 0, 1, 1], [], []>} : vector<16x64xbf16>, vector<64x128xbf16>, vector<16x128xf32> -> vector<16x128xf32>
    %c0_3 = arith.constant 0 : index
    %c0_4 = arith.constant 0 : index
    %4 = vector.load %arg3[%c0_3, %c0_4] : memref<1x128xf32, #tpu.memory_space<vmem>>, vector<1x128xf32>
    %5 = vector.broadcast %4 : vector<1x128xf32> to vector<16x128xf32>
    %6 = arith.addf %3, %5 : vector<16x128xf32>
    %7 = arith.negf %6 : vector<16x128xf32>
    %8 = math.exp %7 : vector<16x128xf32>
    %cst_5 = arith.constant 1.000000e+00 : f32
    %9 = vector.broadcast %cst_5 : f32 to vector<16x128xf32>
    %10 = arith.addf %9, %8 : vector<16x128xf32>
    %11 = arith.divf %9, %10 : vector<16x128xf32>
    %12 = arith.truncf %11 : vector<16x128xf32> to vector<16x128xbf16>
    %c0_6 = arith.constant 0 : index
    %c0_7 = arith.constant 0 : index
    %13 = vector.load %arg4[%c0_6, %c0_7] : memref<128x5120xbf16, #tpu.memory_space<vmem>>, vector<128x5120xbf16>
    %cst_8 = arith.constant dense<0.000000e+00> : vector<16x5120xf32>
    %14 = tpu.matmul %12, %13, %cst_8 {dimension_numbers = #tpu.dot_dimension_numbers<[1], [0], [0], [1], [0, 0, 1, 1], [], []>} : vector<16x128xbf16>, vector<128x5120xbf16>, vector<16x5120xf32> -> vector<16x5120xf32>
    %c0_9 = arith.constant 0 : index
    %c0_10 = arith.constant 0 : index
    %15 = vector.load %arg5[%c0_9, %c0_10] : memref<1x5120xf32, #tpu.memory_space<vmem>>, vector<1x5120xf32>
    %16 = vector.broadcast %15 : vector<1x5120xf32> to vector<16x5120xf32>
    %17 = arith.addf %14, %16 : vector<16x5120xf32>
    %18 = arith.truncf %17 : vector<16x5120xf32> to vector<16x5120xbf16>
    %c0_11 = arith.constant 0 : index
    %c0_12 = arith.constant 0 : index
    %19 = vector.load %arg6[%c0_11, %c0_12] : memref<16x5120xbf16, #tpu.memory_space<vmem>>, vector<16x5120xbf16>
    tpu.vector_store %arg6[%c0_11, %c0_12], %18 {strides = array<i32>} : memref<16x5120xbf16, #tpu.memory_space<vmem>>, vector<16x5120xbf16>,
    return
  }
  func.func @transform_0(%arg0: i32) -> (i32, i32) {
    %c0_i32 = arith.constant 0 : i32
    %c0_i32_0 = arith.constant 0 : i32
    return %arg0, %c0_i32 : i32, i32
  }
  func.func @transform_1(%arg0: i32) -> (i32, i32) {
    %c0_i32 = arith.constant 0 : i32
    %c0_i32_0 = arith.constant 0 : i32
    %c0_i32_1 = arith.constant 0 : i32
    return %c0_i32, %c0_i32_0 : i32, i32
  }
  func.func @transform_2(%arg0: i32) -> (i32, i32) {
    %c0_i32 = arith.constant 0 : i32
    %c0_i32_0 = arith.constant 0 : i32
    %c0_i32_1 = arith.constant 0 : i32
    return %c0_i32, %c0_i32_0 : i32, i32
  }
  func.func @transform_3(%arg0: i32) -> (i32, i32) {
    %c0_i32 = arith.constant 0 : i32
    %c0_i32_0 = arith.constant 0 : i32
    %c0_i32_1 = arith.constant 0 : i32
    return %c0_i32, %c0_i32_0 : i32, i32
  }
  func.func @transform_4(%arg0: i32) -> (i32, i32) {
    %c0_i32 = arith.constant 0 : i32
    %c0_i32_0 = arith.constant 0 : i32
    %c0_i32_1 = arith.constant 0 : i32
    return %c0_i32, %c0_i32_0 : i32, i32
  }
  func.func @transform_5(%arg0: i32) -> (i32, i32) {
    %c0_i32 = arith.constant 0 : i32
    %c0_i32_0 = arith.constant 0 : i32
    return %arg0, %c0_i32 : i32, i32
  }
}

module attributes {stable_mosaic.version = 11 : i64} {
  func.func @bilstm_kernel(%arg0: i32, %arg1: i32, %arg2: memref<1x2x2560xbf16, #tpu.memory_space<vmem>>, %arg3: memref<1x640x2560xbf16, #tpu.memory_space<vmem>>, %arg4: memref<1x2x640xbf16, #tpu.memory_space<vmem>>, %arg5: memref<2x640xbf16, #tpu.memory_space<vmem>>, %arg6: memref<2x640xf32, #tpu.memory_space<vmem>>) attributes {dimension_semantics = [#tpu.dimension_semantics<parallel>, #tpu.dimension_semantics<arbitrary>], iteration_bounds = array<i64: 2, 8>, scalar_prefetch = 0 : i64, scratch_operands = 2 : i64, tpu.core_type = #tpu.core_type<tc>, window_params = [{transform_indices = @transform_0, window_bounds = array<i64: 1, 2, 2560>}, {transform_indices = @transform_1, window_bounds = array<i64: 1, 640, 2560>}, {transform_indices = @transform_2, window_bounds = array<i64: 1, 2, 640>}]} {
    %c0_i32 = arith.constant 0 : i32
    %0 = arith.cmpi eq, %arg1, %c0_i32 : i32
    %1 = arith.extui %0 : i1 to i32
    %c0_i32_0 = arith.constant 0 : i32
    %2 = arith.cmpi ne, %1, %c0_i32_0 : i32
    scf.if %2 {
      %cst_20 = arith.constant 0.000000e+00 : bf16
      %43 = vector.broadcast %cst_20 : bf16 to vector<2x640xbf16>
      %c0_21 = arith.constant 0 : index
      %c0_22 = arith.constant 0 : index
      %44 = vector.load %arg5[%c0_21, %c0_22] : memref<2x640xbf16, #tpu.memory_space<vmem>>, vector<2x640xbf16>
      tpu.vector_store %arg5[%c0_21, %c0_22], %43 {strides = array<i32>} : memref<2x640xbf16, #tpu.memory_space<vmem>>, vector<2x640xbf16>,
      %cst_23 = arith.constant 0.000000e+00 : f32
      %45 = vector.broadcast %cst_23 : f32 to vector<2x640xf32>
      %c0_24 = arith.constant 0 : index
      %c0_25 = arith.constant 0 : index
      %46 = vector.load %arg6[%c0_24, %c0_25] : memref<2x640xf32, #tpu.memory_space<vmem>>, vector<2x640xf32>
      tpu.vector_store %arg6[%c0_24, %c0_25], %45 {strides = array<i32>} : memref<2x640xf32, #tpu.memory_space<vmem>>, vector<2x640xf32>,
    } else {
    }
    %c0 = arith.constant 0 : index
    %c0_1 = arith.constant 0 : index
    %c0_2 = arith.constant 0 : index
    %3 = vector.load %arg2[%c0, %c0_1, %c0_2] : memref<1x2x2560xbf16, #tpu.memory_space<vmem>>, vector<1x2x2560xbf16>
    %4 = vector.shape_cast %3 : vector<1x2x2560xbf16> to vector<2x2560xbf16>
    %5 = arith.extf %4 : vector<2x2560xbf16> to vector<2x2560xf32>
    %c0_3 = arith.constant 0 : index
    %c0_4 = arith.constant 0 : index
    %6 = vector.load %arg5[%c0_3, %c0_4] : memref<2x640xbf16, #tpu.memory_space<vmem>>, vector<2x640xbf16>
    %c0_5 = arith.constant 0 : index
    %c0_6 = arith.constant 0 : index
    %c0_7 = arith.constant 0 : index
    %7 = vector.load %arg3[%c0_5, %c0_6, %c0_7] : memref<1x640x2560xbf16, #tpu.memory_space<vmem>>, vector<1x640x2560xbf16>
    %8 = vector.shape_cast %7 : vector<1x640x2560xbf16> to vector<640x2560xbf16>
    %cst = arith.constant dense<0.000000e+00> : vector<2x2560xf32>
    %9 = tpu.matmul %6, %8, %cst {dimension_numbers = #tpu.dot_dimension_numbers<[1], [0], [0], [1], [0, 0, 1, 1], [], []>} : vector<2x640xbf16>, vector<640x2560xbf16>, vector<2x2560xf32> -> vector<2x2560xf32>
    %10 = arith.addf %5, %9 : vector<2x2560xf32>
    %11 = vector.extract_strided_slice %10 {offsets = [0, 0], sizes = [2, 640], strides = [1, 1]} : vector<2x2560xf32> to vector<2x640xf32>
    %12 = arith.negf %11 : vector<2x640xf32>
    %13 = math.exp %12 : vector<2x640xf32>
    %cst_8 = arith.constant 1.000000e+00 : f32
    %14 = vector.broadcast %cst_8 : f32 to vector<2x640xf32>
    %15 = arith.addf %14, %13 : vector<2x640xf32>
    %16 = arith.divf %14, %15 : vector<2x640xf32>
    %17 = vector.extract_strided_slice %10 {offsets = [0, 640], sizes = [2, 640], strides = [1, 1]} : vector<2x2560xf32> to vector<2x640xf32>
    %18 = arith.negf %17 : vector<2x640xf32>
    %19 = math.exp %18 : vector<2x640xf32>
    %cst_9 = arith.constant 1.000000e+00 : f32
    %20 = vector.broadcast %cst_9 : f32 to vector<2x640xf32>
    %21 = arith.addf %20, %19 : vector<2x640xf32>
    %22 = arith.divf %20, %21 : vector<2x640xf32>
    %23 = vector.extract_strided_slice %10 {offsets = [0, 1280], sizes = [2, 640], strides = [1, 1]} : vector<2x2560xf32> to vector<2x640xf32>
    %24 = math.tanh %23 : vector<2x640xf32>
    %25 = vector.extract_strided_slice %10 {offsets = [0, 1920], sizes = [2, 640], strides = [1, 1]} : vector<2x2560xf32> to vector<2x640xf32>
    %26 = arith.negf %25 : vector<2x640xf32>
    %27 = math.exp %26 : vector<2x640xf32>
    %cst_10 = arith.constant 1.000000e+00 : f32
    %28 = vector.broadcast %cst_10 : f32 to vector<2x640xf32>
    %29 = arith.addf %28, %27 : vector<2x640xf32>
    %30 = arith.divf %28, %29 : vector<2x640xf32>
    %c0_11 = arith.constant 0 : index
    %c0_12 = arith.constant 0 : index
    %31 = vector.load %arg6[%c0_11, %c0_12] : memref<2x640xf32, #tpu.memory_space<vmem>>, vector<2x640xf32>
    %32 = arith.mulf %22, %31 : vector<2x640xf32>
    %33 = arith.mulf %16, %24 : vector<2x640xf32>
    %34 = arith.addf %32, %33 : vector<2x640xf32>
    %35 = math.tanh %34 : vector<2x640xf32>
    %36 = arith.mulf %30, %35 : vector<2x640xf32>
    %c0_13 = arith.constant 0 : index
    %c0_14 = arith.constant 0 : index
    %37 = vector.load %arg6[%c0_13, %c0_14] : memref<2x640xf32, #tpu.memory_space<vmem>>, vector<2x640xf32>
    tpu.vector_store %arg6[%c0_13, %c0_14], %34 {strides = array<i32>} : memref<2x640xf32, #tpu.memory_space<vmem>>, vector<2x640xf32>,
    %38 = arith.truncf %36 : vector<2x640xf32> to vector<2x640xbf16>
    %c0_15 = arith.constant 0 : index
    %c0_16 = arith.constant 0 : index
    %39 = vector.load %arg5[%c0_15, %c0_16] : memref<2x640xbf16, #tpu.memory_space<vmem>>, vector<2x640xbf16>
    tpu.vector_store %arg5[%c0_15, %c0_16], %38 {strides = array<i32>} : memref<2x640xbf16, #tpu.memory_space<vmem>>, vector<2x640xbf16>,
    %c0_17 = arith.constant 0 : index
    %c0_18 = arith.constant 0 : index
    %c0_19 = arith.constant 0 : index
    %40 = vector.load %arg4[%c0_17, %c0_18, %c0_19] : memref<1x2x640xbf16, #tpu.memory_space<vmem>>, vector<1x2x640xbf16>
    %41 = vector.shape_cast %40 : vector<1x2x640xbf16> to vector<2x640xbf16>
    %42 = vector.shape_cast %38 : vector<2x640xbf16> to vector<1x2x640xbf16>
    tpu.vector_store %arg4[%c0_17, %c0_18, %c0_19], %42 {strides = array<i32>} : memref<1x2x640xbf16, #tpu.memory_space<vmem>>, vector<1x2x640xbf16>,
    return
  }
  func.func @transform_0(%arg0: i32, %arg1: i32) -> (i32, i32, i32) {
    %c1_i32 = arith.constant 1 : i32
    %0 = arith.subi %c1_i32, %arg0 : i32
    %1 = arith.muli %0, %arg1 : i32
    %c7_i32 = arith.constant 7 : i32
    %2 = arith.subi %c7_i32, %arg1 : i32
    %3 = arith.muli %arg0, %2 : i32
    %4 = arith.addi %1, %3 : i32
    %c0_i32 = arith.constant 0 : i32
    %c0_i32_0 = arith.constant 0 : i32
    return %4, %c0_i32, %arg0 : i32, i32, i32
  }
  func.func @transform_1(%arg0: i32, %arg1: i32) -> (i32, i32, i32) {
    %c0_i32 = arith.constant 0 : i32
    %c0_i32_0 = arith.constant 0 : i32
    %c0_i32_1 = arith.constant 0 : i32
    return %arg0, %c0_i32, %c0_i32_0 : i32, i32, i32
  }
  func.func @transform_2(%arg0: i32, %arg1: i32) -> (i32, i32, i32) {
    %c1_i32 = arith.constant 1 : i32
    %0 = arith.subi %c1_i32, %arg0 : i32
    %1 = arith.muli %0, %arg1 : i32
    %c7_i32 = arith.constant 7 : i32
    %2 = arith.subi %c7_i32, %arg1 : i32
    %3 = arith.muli %arg0, %2 : i32
    %4 = arith.addi %1, %3 : i32
    %c0_i32 = arith.constant 0 : i32
    %c0_i32_0 = arith.constant 0 : i32
    return %4, %c0_i32, %arg0 : i32, i32, i32
  }
}

module attributes {stable_mosaic.version = 11 : i64} {
  func.func @mlp_head_kernel(%arg0: i32, %arg1: memref<16x1280xbf16, #tpu.memory_space<vmem>>, %arg2: memref<1280x640xbf16, #tpu.memory_space<vmem>>, %arg3: memref<1x640xf32, #tpu.memory_space<vmem>>, %arg4: memref<640x640xbf16, #tpu.memory_space<vmem>>, %arg5: memref<1x640xf32, #tpu.memory_space<vmem>>, %arg6: memref<640x128xbf16, #tpu.memory_space<vmem>>, %arg7: memref<1x128xf32, #tpu.memory_space<vmem>>, %arg8: memref<16x128xf32, #tpu.memory_space<vmem>>) attributes {dimension_semantics = [#tpu.dimension_semantics<parallel>], iteration_bounds = array<i64: 1>, scalar_prefetch = 0 : i64, scratch_operands = 0 : i64, tpu.core_type = #tpu.core_type<tc>, window_params = [{transform_indices = @transform_0, window_bounds = array<i64: 16, 1280>}, {pipeline_mode = #tpu.pipeline_mode<synchronous>, transform_indices = @transform_1, window_bounds = array<i64: 1280, 640>}, {pipeline_mode = #tpu.pipeline_mode<synchronous>, transform_indices = @transform_2, window_bounds = array<i64: 1, 640>}, {pipeline_mode = #tpu.pipeline_mode<synchronous>, transform_indices = @transform_3, window_bounds = array<i64: 640, 640>}, {pipeline_mode = #tpu.pipeline_mode<synchronous>, transform_indices = @transform_4, window_bounds = array<i64: 1, 640>}, {pipeline_mode = #tpu.pipeline_mode<synchronous>, transform_indices = @transform_5, window_bounds = array<i64: 640, 128>}, {pipeline_mode = #tpu.pipeline_mode<synchronous>, transform_indices = @transform_6, window_bounds = array<i64: 1, 128>}, {transform_indices = @transform_7, window_bounds = array<i64: 16, 128>}]} {
    %c0 = arith.constant 0 : index
    %c0_0 = arith.constant 0 : index
    %0 = vector.load %arg1[%c0, %c0_0] : memref<16x1280xbf16, #tpu.memory_space<vmem>>, vector<16x1280xbf16>
    %c0_1 = arith.constant 0 : index
    %c0_2 = arith.constant 0 : index
    %1 = vector.load %arg2[%c0_1, %c0_2] : memref<1280x640xbf16, #tpu.memory_space<vmem>>, vector<1280x640xbf16>
    %cst = arith.constant dense<0.000000e+00> : vector<16x640xf32>
    %2 = tpu.matmul %0, %1, %cst {dimension_numbers = #tpu.dot_dimension_numbers<[1], [0], [0], [1], [0, 0, 1, 1], [], []>} : vector<16x1280xbf16>, vector<1280x640xbf16>, vector<16x640xf32> -> vector<16x640xf32>
    %c0_3 = arith.constant 0 : index
    %c0_4 = arith.constant 0 : index
    %3 = vector.load %arg3[%c0_3, %c0_4] : memref<1x640xf32, #tpu.memory_space<vmem>>, vector<1x640xf32>
    %4 = vector.broadcast %3 : vector<1x640xf32> to vector<16x640xf32>
    %5 = arith.addf %2, %4 : vector<16x640xf32>
    %cst_5 = arith.constant 0.000000e+00 : f32
    %6 = vector.broadcast %cst_5 : f32 to vector<16x640xf32>
    %7 = arith.maximumf %5, %6 : vector<16x640xf32>
    %8 = arith.truncf %7 : vector<16x640xf32> to vector<16x640xbf16>
    %c0_6 = arith.constant 0 : index
    %c0_7 = arith.constant 0 : index
    %9 = vector.load %arg4[%c0_6, %c0_7] : memref<640x640xbf16, #tpu.memory_space<vmem>>, vector<640x640xbf16>
    %cst_8 = arith.constant dense<0.000000e+00> : vector<16x640xf32>
    %10 = tpu.matmul %8, %9, %cst_8 {dimension_numbers = #tpu.dot_dimension_numbers<[1], [0], [0], [1], [0, 0, 1, 1], [], []>} : vector<16x640xbf16>, vector<640x640xbf16>, vector<16x640xf32> -> vector<16x640xf32>
    %c0_9 = arith.constant 0 : index
    %c0_10 = arith.constant 0 : index
    %11 = vector.load %arg5[%c0_9, %c0_10] : memref<1x640xf32, #tpu.memory_space<vmem>>, vector<1x640xf32>
    %12 = vector.broadcast %11 : vector<1x640xf32> to vector<16x640xf32>
    %13 = arith.addf %10, %12 : vector<16x640xf32>
    %cst_11 = arith.constant 0.000000e+00 : f32
    %14 = vector.broadcast %cst_11 : f32 to vector<16x640xf32>
    %15 = arith.maximumf %13, %14 : vector<16x640xf32>
    %16 = arith.truncf %15 : vector<16x640xf32> to vector<16x640xbf16>
    %c0_12 = arith.constant 0 : index
    %c0_13 = arith.constant 0 : index
    %17 = vector.load %arg6[%c0_12, %c0_13] : memref<640x128xbf16, #tpu.memory_space<vmem>>, vector<640x128xbf16>
    %cst_14 = arith.constant dense<0.000000e+00> : vector<16x128xf32>
    %18 = tpu.matmul %16, %17, %cst_14 {dimension_numbers = #tpu.dot_dimension_numbers<[1], [0], [0], [1], [0, 0, 1, 1], [], []>} : vector<16x640xbf16>, vector<640x128xbf16>, vector<16x128xf32> -> vector<16x128xf32>
    %c0_15 = arith.constant 0 : index
    %c0_16 = arith.constant 0 : index
    %19 = vector.load %arg7[%c0_15, %c0_16] : memref<1x128xf32, #tpu.memory_space<vmem>>, vector<1x128xf32>
    %20 = vector.broadcast %19 : vector<1x128xf32> to vector<16x128xf32>
    %21 = arith.addf %18, %20 : vector<16x128xf32>
    %22 = arith.negf %21 : vector<16x128xf32>
    %23 = math.exp %22 : vector<16x128xf32>
    %cst_17 = arith.constant 1.000000e+00 : f32
    %24 = vector.broadcast %cst_17 : f32 to vector<16x128xf32>
    %25 = arith.addf %24, %23 : vector<16x128xf32>
    %26 = arith.divf %24, %25 : vector<16x128xf32>
    %c0_18 = arith.constant 0 : index
    %c0_19 = arith.constant 0 : index
    %27 = vector.load %arg8[%c0_18, %c0_19] : memref<16x128xf32, #tpu.memory_space<vmem>>, vector<16x128xf32>
    tpu.vector_store %arg8[%c0_18, %c0_19], %26 {strides = array<i32>} : memref<16x128xf32, #tpu.memory_space<vmem>>, vector<16x128xf32>,
    return
  }
  func.func @transform_0(%arg0: i32) -> (i32, i32) {
    %c0_i32 = arith.constant 0 : i32
    %c0_i32_0 = arith.constant 0 : i32
    return %arg0, %c0_i32 : i32, i32
  }
  func.func @transform_1(%arg0: i32) -> (i32, i32) {
    %c0_i32 = arith.constant 0 : i32
    %c0_i32_0 = arith.constant 0 : i32
    %c0_i32_1 = arith.constant 0 : i32
    return %c0_i32, %c0_i32_0 : i32, i32
  }
  func.func @transform_2(%arg0: i32) -> (i32, i32) {
    %c0_i32 = arith.constant 0 : i32
    %c0_i32_0 = arith.constant 0 : i32
    %c0_i32_1 = arith.constant 0 : i32
    return %c0_i32, %c0_i32_0 : i32, i32
  }
  func.func @transform_3(%arg0: i32) -> (i32, i32) {
    %c0_i32 = arith.constant 0 : i32
    %c0_i32_0 = arith.constant 0 : i32
    %c0_i32_1 = arith.constant 0 : i32
    return %c0_i32, %c0_i32_0 : i32, i32
  }
  func.func @transform_4(%arg0: i32) -> (i32, i32) {
    %c0_i32 = arith.constant 0 : i32
    %c0_i32_0 = arith.constant 0 : i32
    %c0_i32_1 = arith.constant 0 : i32
    return %c0_i32, %c0_i32_0 : i32, i32
  }
  func.func @transform_5(%arg0: i32) -> (i32, i32) {
    %c0_i32 = arith.constant 0 : i32
    %c0_i32_0 = arith.constant 0 : i32
    %c0_i32_1 = arith.constant 0 : i32
    return %c0_i32, %c0_i32_0 : i32, i32
  }
  func.func @transform_6(%arg0: i32) -> (i32, i32) {
    %c0_i32 = arith.constant 0 : i32
    %c0_i32_0 = arith.constant 0 : i32
    %c0_i32_1 = arith.constant 0 : i32
    return %c0_i32, %c0_i32_0 : i32, i32
  }
  func.func @transform_7(%arg0: i32) -> (i32, i32) {
    %c0_i32 = arith.constant 0 : i32
    %c0_i32_0 = arith.constant 0 : i32
    return %arg0, %c0_i32 : i32, i32
  }
}

</mosaic_0001>

<bundles_post_ra>
// kernel: stream_amplitude_postnet.3
= control target key start
LH: loop header
LB: loop body
LE: loop exit
PB: predicated region body
PF: predicated region fallthrough
CT: control target
= control target key end

     0   :  { %10 = vsyncpa [#allocation3], 0  ;;  %s4341_s0 = inlined_call_operand.vmem [shape: f32[16,64], index: 0, kind: input, shape index: {}]   ;;  %s4342_s1 = inlined_call_operand.hbm [shape: bf16[64,128], index: 1, kind: input, shape index: {}]   ;;  %s4343_s2 = inlined_call_operand.hbm [shape: f32[1,128], index: 2, kind: input, shape index: {}]   ;;  %s4344_s3 = inlined_call_operand.hbm [shape: bf16[128,5120], index: 3, kind: input, shape index: {}]   ;;  %s4345_s4 = inlined_call_operand.hbm [shape: f32[1,5120], index: 4, kind: input, shape index: {}]   ;;  %s4346_s5 = inlined_call_operand.vmem [shape: bf16[16,5120], index: 5, kind: output, shape index: {}]  }
   0x1   :  { %11 = vsyncpa [#allocation5], 0 }
   0x2   :  { %12 = vsyncpa [#allocation8], 0  ;;  %s3991_s18 = smov [#allocation4]   ;;  %s3992_s20 = smov [#allocation2]  }
   0x3   :  { %s33_s19 = sshll.u32 %s3991_s18, 4  ;;  %s20_s21 = sshll.u32 %s3992_s20, 4  ;;  %s34_s19 = int_to_ptr.vmem [resolvable:$true] %s33_s19  ;;  %s4032_s21 = int_to_ptr.vmem [resolvable:$true] %s20_s21 }
   0x4   :  { %s3897_s24 = scalar_lea.hbm %s4343_s2, 16 }
   0x5   :  { %p3898_p0 = scmp.ne.s32.totalorder %s4343_s2, %s3897_s24  ;;  %p3901_p1 = scmp.lt.u32.totalorder %s3897_s24, %s4343_s2 }
   0x7   :  { %p3903_p2 = pnand %p3901_p1, %p3898_p0 }
   0x9   :  { %3906 = shalt.err (!%p3903_p2)
}
   0xa   :  { %s3907_s29 = scalar_lea.vmem %s34_s19, 16  ;;  %s3911_s30 = scalar_lea.vmem %s34_s19, 32 }
   0xb   :  { %p3908_p3 = scmp.ne.s32.totalorder %s34_s19, %s3907_s29  ;;  %p3912_p4 = scmp.lt.s32.totalorder %s34_s19, %s34_s19 }
   0xc   :  { %p3913_p5 = scmp.lt.s32.totalorder %s3911_s30, %s3907_s29 }
   0xe   :  { %p3914_p6 = por %p3913_p5, %p3912_p4 }
  0x10   :  { %p3915_p7 = pnand %p3914_p6, %p3908_p3 }
  0x12   :  { %3918 = shalt.err (!%p3915_p7)
}
  0x13   :  { %36 = dma.hbm_to_vmem [thread:$0]  %s4343_s2, 16, %s34_s19, [#allocation5]  }
  0x14   :  { %s3919_s10 = scalar_lea.hbm %s4342_s1, 512 }
  0x15   :  { %p3920_p8 = scmp.ne.s32.totalorder %s4342_s1, %s3919_s10  ;;  %p3923_p9 = scmp.lt.u32.totalorder %s3919_s10, %s4342_s1 }
  0x17   :  { %p3925_p10 = pnand %p3923_p9, %p3920_p8 }
  0x19   :  { %3928 = shalt.err (!%p3925_p10)
}
  0x1a   :  { %s3929_s15 = scalar_lea.vmem %s4032_s21, 512  ;;  %p3934_p12 = scmp.lt.s32.totalorder %s4032_s21, %s4032_s21 }
  0x1b   :  { %p3930_p11 = scmp.ne.s32.totalorder %s4032_s21, %s3929_s15  ;;  %p3935_p13 = scmp.lt.s32.totalorder %s3929_s15, %s3929_s15 }
  0x1d   :  { %p3936_p0 = por %p3935_p13, %p3934_p12 }
  0x1f   :  { %p3937_p1 = pnand %p3936_p0, %p3930_p11 }
  0x21   :  { %3940 = shalt.err (!%p3937_p1)
}
  0x22   :  { %s3993_s2 = smov 64   ;;  %s3994_s16 = smov 4  }
  0x23   :  { %26 = dma.hbm_to_vmem [thread:$0]  %s4342_s1, 512, %s4032_s21, [#allocation3], %s3993_s2, %s3993_s2, %s3994_s16  }
  0x24   :  { %s3995_s19 = smov [#allocation6]   ;;  %s3941_s24 = scalar_lea.hbm %s4344_s3, 40960 }
  0x25   :  { %s42_s20 = sshll.u32 %s3995_s19, 4  ;;  %p3942_p2 = scmp.ne.s32.totalorder %s4344_s3, %s3941_s24  ;;  %s43_s20 = int_to_ptr.vmem [resolvable:$true] %s42_s20 }
  0x26   :  { %p3945_p3 = scmp.lt.u32.totalorder %s3941_s24, %s4344_s3 }
  0x28   :  { %p3947_p4 = pnand %p3945_p3, %p3942_p2 }
  0x2a   :  { %3950 = shalt.err (!%p3947_p4)
}
  0x2b   :  { %s3951_s29 = scalar_lea.vmem %s43_s20, 40960  ;;  %p3956_p6 = scmp.lt.s32.totalorder %s43_s20, %s43_s20 }
  0x2c   :  { %p3952_p5 = scmp.ne.s32.totalorder %s43_s20, %s3951_s29  ;;  %p3957_p7 = scmp.lt.s32.totalorder %s3951_s29, %s3951_s29 }
  0x2e   :  { %p3958_p8 = por %p3957_p7, %p3956_p6 }
  0x30   :  { %p3959_p9 = pnand %p3958_p8, %p3952_p5 }
  0x32   :  { %3962 = shalt.err (!%p3959_p9)
}
  0x33   :  { %s3996_s1 = smov 2560   ;;  %s3997_s21 = smov 160  }
  0x34   :  { %48 = dma.hbm_to_vmem [thread:$0]  %s4344_s3, 40960, %s43_s20, [#allocation5], %s3996_s1, %s3996_s1, %s3997_s21  }
  0x35   :  { %s3998_s7 = smov [#allocation7]   ;;  %s3963_s11 = scalar_lea.hbm %s4345_s4, 640 }
  0x36   :  { %s55_s8 = sshll.u32 %s3998_s7, 4  ;;  %p3964_p10 = scmp.ne.s32.totalorder %s4345_s4, %s3963_s11  ;;  %s56_s8 = int_to_ptr.vmem [resolvable:$true] %s55_s8 }
  0x37   :  { %p3967_p11 = scmp.lt.u32.totalorder %s3963_s11, %s4345_s4 }
  0x39   :  { %p3969_p12 = pnand %p3967_p11, %p3964_p10 }
  0x3b   :  { %3972 = shalt.err (!%p3969_p12)
}
  0x3c   :  { %s3973_s2 = scalar_lea.vmem %s56_s8, 640  ;;  %p3978_p0 = scmp.lt.s32.totalorder %s56_s8, %s56_s8 }
  0x3d   :  { %p3974_p13 = scmp.ne.s32.totalorder %s56_s8, %s3973_s2  ;;  %p3979_p1 = scmp.lt.s32.totalorder %s3973_s2, %s3973_s2 }
  0x3f   :  { %p3980_p2 = por %p3979_p1, %p3978_p0 }
  0x41   :  { %p3981_p3 = pnand %p3980_p2, %p3974_p13 }
  0x43   :  { %3984 = shalt.err (!%p3981_p3)
}
  0x44   :  { %58 = dma.hbm_to_vmem [thread:$0]  %s4345_s4, 640, %s56_s8, [#allocation8]  }
  0x45   :  { %3985 = dma.done.wait [#allocation3], 512  }
  0x46   :  { %3986 = vsyncadd [#allocation3], 4294966784 }
  0x47   :  { %3987 = dma.done.wait [#allocation5], 40976  }
  0x48   :  { %3988 = vsyncadd [#allocation5], 4294926320 }
  0x49   :  { %3989 = dma.done.wait [#allocation8], 640  }
  0x4a   :  { %3990 = vsyncadd [#allocation8], 4294966656  ;;  %v3999_v0 = vmov 0.0   ;;  %vm4000_vm0 = vmmov 0   ;;  %v3885_v1 = vld [vmem:[#allocation2] sm:$0xff]   ;;  %v3886_v2 = vld [vmem:[#allocation2 + $0x8] sm:$0xff]  }
  0x4b   :  { %3862 = vmatprep.subr.bf16.mxu0 %v3999_v0  ;;  %3870 = vmatprep.mubr.msk.bf16.mxu0 %vm4000_vm0, %v3999_v0  ;;  %v3887_v3 = vld [vmem:[#allocation2 + $0x10] sm:$0xff]   ;;  %v3888_v4 = vld [vmem:[#allocation2 + $0x18] sm:$0xff]   ;;  %v72_v5 = vld [vmem:[%s4341_s0] sm:$0xff]  ;;  %vm114_vm1 = vcmask 523264  }
  0x4c   :  { %3863 = vmatpush3.bf16.msra.mxu0 %v3885_v1  ;;  %v73_v6 = vld [vmem:[%s4341_s0 + $0x8] sm:$0xff] }
  0x4d   :  { %3864 = vmatprep.subr.bf16.mxu0 %v3999_v0  ;;  %v74_v7 = vpack.c.bf16 %v73_v6, %v72_v5  ;;  %v172_v8 = vld [vmem:[#allocation6] sm:$0xff]  ;;  %v173_v10 = vld [vmem:[#allocation6 + $0x8] sm:$0xff] }
  0x4e   :  { %v192_v9 = vld [vmem:[#allocation6 + $0xa0] sm:$0xff]  ;;  %v193_v12 = vld [vmem:[#allocation6 + $0xa8] sm:$0xff] }
  0x4f   :  { %v3458_v11 = vcombine.high %v172_v8, %v192_v9  ;;  %v3459_v13 = vcombine.low %v173_v10, %v193_v12  ;;  %v3460_v14 = vcombine.high %v173_v10, %v193_v12  ;;  %v3457_v15 = vcombine.low %v172_v8, %v192_v9  ;;  %v212_v16 = vld [vmem:[#allocation6 + $0x140] sm:$0xff]  ;;  %v213_v18 = vld [vmem:[#allocation6 + $0x148] sm:$0xff]  ;;  %v174_v8 = vld [vmem:[#allocation6 + $0x10] sm:$0xff] }
  0x50   :  { %3865 = vmatpush3.bf16.msra.mxu0 %v3886_v2  ;;  %v232_v17 = vld [vmem:[#allocation6 + $0x1e0] sm:$0xff]  ;;  %v233_v20 = vld [vmem:[#allocation6 + $0x1e8] sm:$0xff]  ;;  %v194_v9 = vld [vmem:[#allocation6 + $0xb0] sm:$0xff] }
  0x51   :  { %3866 = vmatprep.subr.bf16.mxu0 %v3999_v0  ;;  %2302 = vmatprep.subr.bf16.mxu1 %v3458_v11  ;;  %v3498_v19 = vcombine.high %v212_v16, %v232_v17  ;;  %v3499_v21 = vcombine.low %v213_v18, %v233_v20  ;;  %v3500_v22 = vcombine.high %v213_v18, %v233_v20  ;;  %v252_v24 = vld [vmem:[#allocation6 + $0x280] sm:$0xff]  ;;  %v253_v26 = vld [vmem:[#allocation6 + $0x288] sm:$0xff]  ;;  %v175_v10 = vld [vmem:[#allocation6 + $0x18] sm:$0xff] }
  0x52   :  { %2303 = vmatpush1.bf16.msra.mxu1 %v3457_v15  ;;  %v3497_v23 = vcombine.low %v212_v16, %v232_v17  ;;  %v272_v25 = vld [vmem:[#allocation6 + $0x320] sm:$0xff]  ;;  %v273_v28 = vld [vmem:[#allocation6 + $0x328] sm:$0xff]  ;;  %v3462_v11 = vcombine.high %v174_v8, %v194_v9  ;;  %v195_v12 = vld [vmem:[#allocation6 + $0xb8] sm:$0xff]  ;;  %v4001_v16 = vmov 0  }
  0x53   :  { %2304 = vmatprep.subr.bf16.mxu1 %v3498_v19  ;;  %v3538_v27 = vcombine.high %v252_v24, %v272_v25  ;;  %v3539_v29 = vcombine.low %v253_v26, %v273_v28  ;;  %v3540_v30 = vcombine.high %v253_v26, %v273_v28  ;;  %v3537_v31 = vcombine.low %v252_v24, %v272_v25  ;;  %v292_v32 = vld [vmem:[#allocation6 + $0x3c0] sm:$0xff]  ;;  %v293_v34 = vld [vmem:[#allocation6 + $0x3c8] sm:$0xff]  ;;  %v3449_v17 = vld [vmem:[#allocation4] ss:$0 sm:$0xff] }
  0x54   :  { %3867 = vmatpush3.bf16.msra.mxu0 %v3887_v3  ;;  %v312_v33 = vld [vmem:[#allocation6 + $0x460] sm:$0xff]  ;;  %v313_v36 = vld [vmem:[#allocation6 + $0x468] sm:$0xff]  ;;  %v3464_v15 = vcombine.high %v175_v10, %v195_v12  ;;  %2334 = vmatprep.mubr.bf16.mxu1 %v4001_v16 }
  0x55   :  { %3868 = vmatprep.subr.bf16.mxu0 %v3999_v0  ;;  %v3578_v35 = vcombine.high %v292_v32, %v312_v33  ;;  %v3579_v37 = vcombine.low %v293_v34, %v313_v36  ;;  %v3580_v38 = vcombine.high %v293_v34, %v313_v36  ;;  %v3577_v39 = vcombine.low %v292_v32, %v312_v33  ;;  %v332_v40 = vld [vmem:[#allocation6 + $0x500] sm:$0xff]  ;;  %v333_v42 = vld [vmem:[#allocation6 + $0x508] sm:$0xff]  ;;  %v215_v32 = vld [vmem:[#allocation6 + $0x158] sm:$0xff] }
  0x56   :  { %2305 = vmatpush1.bf16.msra.mxu1 %v3497_v23  ;;  %v352_v41 = vld [vmem:[#allocation6 + $0x5a0] sm:$0xff]  ;;  %v353_v44 = vld [vmem:[#allocation6 + $0x5a8] sm:$0xff]  ;;  %v235_v33 = vld [vmem:[#allocation6 + $0x1f8] sm:$0xff] }
  0x57   :  { %2306 = vmatprep.subr.bf16.mxu1 %v3538_v27  ;;  %v3618_v43 = vcombine.high %v332_v40, %v352_v41  ;;  %v3619_v45 = vcombine.low %v333_v42, %v353_v44  ;;  %v3620_v46 = vcombine.high %v333_v42, %v353_v44  ;;  %v3617_v47 = vcombine.low %v332_v40, %v352_v41  ;;  %v372_v48 = vld [vmem:[#allocation6 + $0x640] sm:$0xff]  ;;  %v373_v50 = vld [vmem:[#allocation6 + $0x648] sm:$0xff]  ;;  %v274_v40 = vld [vmem:[#allocation6 + $0x330] sm:$0xff] }
  0x58   :  { %3869 = vmatpush3.bf16.msra.mxu0 %v3888_v4  ;;  %v392_v49 = vld [vmem:[#allocation6 + $0x6e0] sm:$0xff]  ;;  %v393_v52 = vld [vmem:[#allocation6 + $0x6e8] sm:$0xff]  ;;  %v255_v41 = vld [vmem:[#allocation6 + $0x298] sm:$0xff]  ;;  %v3503_v44 = vcombine.low %v215_v32, %v235_v33 }
  0x59   :  { %2345 = vmatprep.subr.bf16.mxu0 %v3460_v14  ;;  %v3658_v51 = vcombine.high %v372_v48, %v392_v49  ;;  %v3659_v53 = vcombine.low %v373_v50, %v393_v52  ;;  %v3660_v54 = vcombine.high %v373_v50, %v393_v52  ;;  %v3657_v55 = vcombine.low %v372_v48, %v392_v49  ;;  %v412_v56 = vld [vmem:[#allocation6 + $0x780] sm:$0xff]  ;;  %v413_v58 = vld [vmem:[#allocation6 + $0x788] sm:$0xff]  ;;  %v275_v42 = vld [vmem:[#allocation6 + $0x338] sm:$0xff] }
  0x5a   :  { %2307 = vmatpush1.bf16.msra.mxu1 %v3537_v31  ;;  %v432_v57 = vld [vmem:[#allocation6 + $0x820] sm:$0xff]  ;;  %v433_v60 = vld [vmem:[#allocation6 + $0x828] sm:$0xff]  ;;  %v3463_v14 = vcombine.low %v175_v10, %v195_v12  ;;  %v234_v31 = vld [vmem:[#allocation6 + $0x1f0] sm:$0xff]  ;;  %v3543_v52 = vcombine.low %v255_v41, %v275_v42 }
  0x5b   :  { %3871 = vmatmul.mubr.msk.bf16.vlgmr.msra.gmra.mrb[0].mxu0 %vm114_vm1, %v74_v7  ;;  %2308 = vmatprep.subr.bf16.mxu1 %v3578_v35  ;;  %v3698_v59 = vcombine.high %v412_v56, %v432_v57  ;;  %v3699_v61 = vcombine.low %v413_v58, %v433_v60  ;;  %v3700_v62 = vcombine.high %v413_v58, %v433_v60  ;;  %v452_v0 = vld [vmem:[#allocation6 + $0x8c0] sm:$0xff]  ;;  %v453_v2 = vld [vmem:[#allocation6 + $0x8c8] sm:$0xff]  ;;  %v314_v48 = vld [vmem:[#allocation6 + $0x470] sm:$0xff] }
  0x5c   :  { %2346 = vmatpush1.bf16.msra.mxu0 %v3459_v13  ;;  %v3697_v63 = vcombine.low %v412_v56, %v432_v57  ;;  %v472_v1 = vld [vmem:[#allocation6 + $0x960] sm:$0xff]  ;;  %v473_v4 = vld [vmem:[#allocation6 + $0x968] sm:$0xff]  ;;  %v3461_v13 = vcombine.low %v174_v8, %v194_v9  ;;  %2377 = vmatprep.mubr.bf16.mxu0 %v4001_v16  ;;  %v295_v49 = vld [vmem:[#allocation6 + $0x3d8] sm:$0xff] }
  0x5d   :  { %2347 = vmatprep.subr.bf16.mxu0 %v3500_v22  ;;  %v3738_v3 = vcombine.high %v452_v0, %v472_v1  ;;  %v3739_v5 = vcombine.low %v453_v2, %v473_v4  ;;  %v3740_v6 = vcombine.high %v453_v2, %v473_v4  ;;  %v3737_v7 = vcombine.low %v452_v0, %v472_v1  ;;  %v315_v50 = vld [vmem:[#allocation6 + $0x478] sm:$0xff]  ;;  %v354_v56 = vld [vmem:[#allocation6 + $0x5b0] sm:$0xff] }
  0x5e   :  { %2309 = vmatpush1.bf16.msra.mxu1 %v3577_v39  ;;  %v254_v39 = vld [vmem:[#allocation6 + $0x290] sm:$0xff]  ;;  %v335_v57 = vld [vmem:[#allocation6 + $0x518] sm:$0xff]  ;;  %v3583_v60 = vcombine.low %v295_v49, %v315_v50 }
  0x5f   :  { %2310 = vmatprep.subr.bf16.mxu1 %v3618_v43  ;;  %v355_v58 = vld [vmem:[#allocation6 + $0x5b8] sm:$0xff]  ;;  %v394_v0 = vld [vmem:[#allocation6 + $0x6f0] sm:$0xff] }
  0x60   :  { %2348 = vmatpush1.bf16.msra.mxu0 %v3499_v21  ;;  %v375_v1 = vld [vmem:[#allocation6 + $0x658] sm:$0xff]  ;;  %v3623_v4 = vcombine.low %v335_v57, %v355_v58  ;;  %v434_v8 = vld [vmem:[#allocation6 + $0x830] sm:$0xff] }
  0x61   :  { %2349 = vmatprep.subr.bf16.mxu0 %v3540_v30  ;;  %v214_v30 = vld [vmem:[#allocation6 + $0x150] sm:$0xff]  ;;  %v395_v2 = vld [vmem:[#allocation6 + $0x6f8] sm:$0xff] }
  0x62   :  { %2311 = vmatpush1.bf16.msra.mxu1 %v3617_v47  ;;  %v3501_v43 = vcombine.low %v214_v30, %v234_v31  ;;  %v294_v47 = vld [vmem:[#allocation6 + $0x3d0] sm:$0xff]  ;;  %v415_v9 = vld [vmem:[#allocation6 + $0x798] sm:$0xff]  ;;  %v3663_v12 = vcombine.low %v375_v1, %v395_v2 }
  0x63   :  { %2312 = vmatprep.subr.bf16.mxu1 %v3658_v51  ;;  %v3541_v51 = vcombine.low %v254_v39, %v274_v40  ;;  %v435_v10 = vld [vmem:[#allocation6 + $0x838] sm:$0xff] }
  0x64   :  { %2350 = vmatpush1.bf16.msra.mxu0 %v3539_v29 }
  0x65   :  { %2351 = vmatprep.subr.bf16.mxu0 %v3580_v38  ;;  %v3504_v38 = vcombine.high %v215_v32, %v235_v33  ;;  %v216_v32 = vld [vmem:[#allocation6 + $0x160] sm:$0xff] }
  0x66   :  { %2313 = vmatpush1.bf16.msra.mxu1 %v3657_v55  ;;  %v334_v55 = vld [vmem:[#allocation6 + $0x510] sm:$0xff]  ;;  %v236_v33 = vld [vmem:[#allocation6 + $0x200] sm:$0xff] }
  0x67   :  { %2314 = vmatprep.subr.bf16.mxu1 %v3698_v59  ;;  %v3581_v59 = vcombine.low %v294_v47, %v314_v48 }
  0x68   :  { %2352 = vmatpush1.bf16.msra.mxu0 %v3579_v37  ;;  %v3502_v37 = vcombine.high %v214_v30, %v234_v31 }
  0x69   :  { %2353 = vmatprep.subr.bf16.mxu0 %v3620_v46  ;;  %v3544_v46 = vcombine.high %v255_v41, %v275_v42  ;;  %v256_v41 = vld [vmem:[#allocation6 + $0x2a0] sm:$0xff] }
  0x6a   :  { %2315 = vmatpush1.bf16.msra.mxu1 %v3697_v63  ;;  %v374_v63 = vld [vmem:[#allocation6 + $0x650] sm:$0xff]  ;;  %v276_v42 = vld [vmem:[#allocation6 + $0x340] sm:$0xff] }
  0x6b   :  { %2316 = vmatprep.subr.bf16.mxu1 %v3738_v3  ;;  %v3621_v3 = vcombine.low %v334_v55, %v354_v56 }
  0x6c   :  { %2354 = vmatpush1.bf16.msra.mxu0 %v3619_v45  ;;  %v3542_v45 = vcombine.high %v254_v39, %v274_v40  ;;  %v3506_v39 = vcombine.high %v216_v32, %v236_v33 }
  0x6d   :  { %2355 = vmatprep.subr.bf16.mxu0 %v3660_v54  ;;  %v3584_v54 = vcombine.high %v295_v49, %v315_v50  ;;  %v296_v49 = vld [vmem:[#allocation6 + $0x3e0] sm:$0xff] }
  0x6e   :  { %2317 = vmatpush1.bf16.msra.mxu1 %v3737_v7  ;;  %v414_v7 = vld [vmem:[#allocation6 + $0x790] sm:$0xff]  ;;  %v316_v50 = vld [vmem:[#allocation6 + $0x480] sm:$0xff] }
  0x6f   :  { %2388 = vmatprep.subr.bf16.mxu1 %v3462_v11  ;;  %v3661_v11 = vcombine.low %v374_v63, %v394_v0 }
  0x70   :  { %2356 = vmatpush1.bf16.msra.mxu0 %v3659_v53  ;;  %v3582_v53 = vcombine.high %v294_v47, %v314_v48  ;;  %v3546_v47 = vcombine.high %v256_v41, %v276_v42 }
  0x71   :  { %2357 = vmatprep.subr.bf16.mxu0 %v3700_v62  ;;  %v3624_v62 = vcombine.high %v335_v57, %v355_v58  ;;  %v336_v57 = vld [vmem:[#allocation6 + $0x520] sm:$0xff] }
  0x72   :  { %v356_v58 = vld [vmem:[#allocation6 + $0x5c0] sm:$0xff] }
  0x74   :  { %2358 = vmatpush1.bf16.msra.mxu0 %v3699_v61  ;;  %v3622_v61 = vcombine.high %v334_v55, %v354_v56  ;;  %v3586_v55 = vcombine.high %v296_v49, %v316_v50 }
  0x75   :  { %2359 = vmatprep.subr.bf16.mxu0 %v3740_v6  ;;  %v3664_v6 = vcombine.high %v375_v1, %v395_v2  ;;  %v376_v1 = vld [vmem:[#allocation6 + $0x660] sm:$0xff] }
  0x76   :  { %v396_v2 = vld [vmem:[#allocation6 + $0x700] sm:$0xff] }
  0x78   :  { %2360 = vmatpush1.bf16.msra.mxu0 %v3739_v5  ;;  %v3662_v5 = vcombine.high %v374_v63, %v394_v0  ;;  %v3626_v63 = vcombine.high %v336_v57, %v356_v58 }
  0x79   :  { %2431 = vmatprep.subr.bf16.mxu0 %v3464_v15  ;;  %v454_v15 = vld [vmem:[#allocation6 + $0x8d0] sm:$0xff] }
 0x12e   :  { %v152_v18 = vpop.f32.mrb[0].mxu0 }
 0x12f   :  { %v153_v19 = vadd.f32 %v3449_v17, %v152_v18  ;;  %v3872_v20 = vpop.f32.mrb[1].mxu0  ;;  %v455_v18 = vld [vmem:[#allocation6 + $0x8d8] sm:$0xff] }
 0x130   :  { %v155_v21 = vpop.f32.mrb[2].mxu0  ;;  %v3701_v20 = vcombine.low %v414_v7, %v434_v8 }
 0x131   :  { %v3455_v22 = vmul.f32 -1.442695, %v153_v19  ;;  %v156_v23 = vadd.f32 %v3449_v17, %v155_v21  ;;  %v3873_v24 = vpop.f32.mrb[3].mxu0  ;;  %v474_v17 = vld [vmem:[#allocation6 + $0x970] sm:$0xff]  ;;  %v475_v19 = vld [vmem:[#allocation6 + $0x978] sm:$0xff]  ;;  %v3703_v21 = vcombine.low %v415_v9, %v435_v10 }
 0x132   :  { %v176_v24 = vld [vmem:[#allocation6 + $0x20] sm:$0xff] }
 0x133   :  { %3889 = vpow2.f32 %v3455_v22  ;;  %v3456_v25 = vmul.f32 -1.442695, %v156_v23  ;;  %v3742_v22 = vcombine.high %v454_v15, %v474_v17  ;;  %v3744_v23 = vcombine.high %v455_v18, %v475_v19 }
 0x135   :  { %3891 = vpow2.f32 %v3456_v25  ;;  %v196_v25 = vld [vmem:[#allocation6 + $0xc0] sm:$0xff] }
 0x136   :  { %v3466_v30 = vcombine.high %v176_v24, %v196_v25 }
 0x13d   :  { %v3890_v26 = vpop.eup %3889 }
 0x13e   :  { %v165_v27 = vadd.f32 1.0, %v3890_v26  ;;  %v177_v26 = vld [vmem:[#allocation6 + $0x28] sm:$0xff] }
 0x13f   :  { %v3892_v28 = vpop.eup %3891 }
 0x140   :  { %v166_v29 = vadd.f32 1.0, %v3892_v28  ;;  %3893 = vrcp.f32 %v165_v27  ;;  %v197_v27 = vld [vmem:[#allocation6 + $0xc8] sm:$0xff]  ;;  %v3741_v28 = vcombine.low %v454_v15, %v474_v17 }
 0x141   :  { %v3468_v31 = vcombine.high %v177_v26, %v197_v27 }
 0x142   :  { %3895 = vrcp.f32 %v166_v29  ;;  %v3743_v29 = vcombine.low %v455_v18, %v475_v19  ;;  %v456_v18 = vld [vmem:[#allocation6 + $0x8e0] sm:$0xff] }
 0x143   :  { %v476_v19 = vld [vmem:[#allocation6 + $0x980] sm:$0xff] }
 0x14a   :  { %v3894_v34 = vpop.eup %3893 }
 0x14c   :  { %v3896_v35 = vpop.eup %3895 }
 0x14d   :  { %v4095_v36 = vpack.c.bf16 %v3896_v35, %v3894_v34  ;;  %v217_v34 = vld [vmem:[#allocation6 + $0x168] sm:$0xff] }
 0x14e   :  { %v237_v35 = vld [vmem:[#allocation6 + $0x208] sm:$0xff] }
 0x14f   :  { %2335 = vmatmul.mubr.bf16.vlgmr.msra.gmra.mrb[0].mxu1 %v4095_v36  ;;  %2378 = vmatmul.mubr.bf16.vlgmr.msra.gmra.mrb[4].mxu0 %v4095_v36  ;;  %v3508_v40 = vcombine.high %v217_v34, %v237_v35 }
 0x150   :  { %2389 = vmatpush1.bf16.msra.mxu1 %v3461_v13  ;;  %2432 = vmatpush1.bf16.msra.mxu0 %v3463_v14  ;;  %v3702_v13 = vcombine.high %v414_v7, %v434_v8  ;;  %v3704_v14 = vcombine.high %v415_v9, %v435_v10  ;;  %v3666_v7 = vcombine.high %v376_v1, %v396_v2  ;;  %v416_v9 = vld [vmem:[#allocation6 + $0x7a0] sm:$0xff] }
 0x151   :  { %2390 = vmatprep.subr.bf16.mxu1 %v3502_v37  ;;  %2433 = vmatprep.subr.bf16.mxu0 %v3504_v38  ;;  %v3465_v37 = vcombine.low %v176_v24, %v196_v25  ;;  %v3467_v38 = vcombine.low %v177_v26, %v197_v27  ;;  %v436_v10 = vld [vmem:[#allocation6 + $0x840] sm:$0xff]  ;;  %v3746_v24 = vcombine.high %v456_v18, %v476_v19  ;;  %v178_v26 = vld [vmem:[#allocation6 + $0x30] sm:$0xff] }
 0x152   :  { %2420 = vmatprep.mubr.bf16.mxu1 %v4001_v16  ;;  %2463 = vmatprep.mubr.bf16.mxu0 %v4001_v16  ;;  %v3706_v15 = vcombine.high %v416_v9, %v436_v10  ;;  %v198_v27 = vld [vmem:[#allocation6 + $0xd0] sm:$0xff] }
 0x154   :  { %2391 = vmatpush1.bf16.msra.mxu1 %v3501_v43  ;;  %2434 = vmatpush1.bf16.msra.mxu0 %v3503_v44  ;;  %v257_v43 = vld [vmem:[#allocation6 + $0x2a8] sm:$0xff] }
 0x155   :  { %2392 = vmatprep.subr.bf16.mxu1 %v3542_v45  ;;  %2435 = vmatprep.subr.bf16.mxu0 %v3544_v46  ;;  %v277_v44 = vld [vmem:[#allocation6 + $0x348] sm:$0xff]  ;;  %v3505_v45 = vcombine.low %v216_v32, %v236_v33  ;;  %v3507_v46 = vcombine.low %v217_v34, %v237_v35  ;;  %v3470_v32 = vcombine.high %v178_v26, %v198_v27  ;;  %v218_v34 = vld [vmem:[#allocation6 + $0x170] sm:$0xff] }
 0x156   :  { %v3548_v48 = vcombine.high %v257_v43, %v277_v44  ;;  %v238_v35 = vld [vmem:[#allocation6 + $0x210] sm:$0xff] }
 0x158   :  { %2393 = vmatpush1.bf16.msra.mxu1 %v3541_v51  ;;  %2436 = vmatpush1.bf16.msra.mxu0 %v3543_v52  ;;  %v297_v51 = vld [vmem:[#allocation6 + $0x3e8] sm:$0xff] }
 0x159   :  { %2394 = vmatprep.subr.bf16.mxu1 %v3582_v53  ;;  %2437 = vmatprep.subr.bf16.mxu0 %v3584_v54  ;;  %v317_v52 = vld [vmem:[#allocation6 + $0x488] sm:$0xff]  ;;  %v3545_v53 = vcombine.low %v256_v41, %v276_v42  ;;  %v3547_v54 = vcombine.low %v257_v43, %v277_v44  ;;  %v3510_v41 = vcombine.high %v218_v34, %v238_v35  ;;  %v258_v43 = vld [vmem:[#allocation6 + $0x2b0] sm:$0xff] }
 0x15a   :  { %v3588_v56 = vcombine.high %v297_v51, %v317_v52  ;;  %v278_v44 = vld [vmem:[#allocation6 + $0x350] sm:$0xff] }
 0x15c   :  { %2395 = vmatpush1.bf16.msra.mxu1 %v3581_v59  ;;  %2438 = vmatpush1.bf16.msra.mxu0 %v3583_v60  ;;  %v337_v59 = vld [vmem:[#allocation6 + $0x528] sm:$0xff] }
 0x15d   :  { %2396 = vmatprep.subr.bf16.mxu1 %v3622_v61  ;;  %2439 = vmatprep.subr.bf16.mxu0 %v3624_v62  ;;  %v357_v60 = vld [vmem:[#allocation6 + $0x5c8] sm:$0xff]  ;;  %v3585_v61 = vcombine.low %v296_v49, %v316_v50  ;;  %v3587_v62 = vcombine.low %v297_v51, %v317_v52  ;;  %v3550_v49 = vcombine.high %v258_v43, %v278_v44  ;;  %v298_v51 = vld [vmem:[#allocation6 + $0x3f0] sm:$0xff] }
 0x15e   :  { %v3628_v0 = vcombine.high %v337_v59, %v357_v60  ;;  %v318_v52 = vld [vmem:[#allocation6 + $0x490] sm:$0xff] }
 0x160   :  { %2397 = vmatpush1.bf16.msra.mxu1 %v3621_v3  ;;  %2440 = vmatpush1.bf16.msra.mxu0 %v3623_v4  ;;  %v377_v3 = vld [vmem:[#allocation6 + $0x668] sm:$0xff] }
 0x161   :  { %2398 = vmatprep.subr.bf16.mxu1 %v3662_v5  ;;  %2441 = vmatprep.subr.bf16.mxu0 %v3664_v6  ;;  %v397_v4 = vld [vmem:[#allocation6 + $0x708] sm:$0xff]  ;;  %v3625_v5 = vcombine.low %v336_v57, %v356_v58  ;;  %v3627_v6 = vcombine.low %v337_v59, %v357_v60  ;;  %v3590_v57 = vcombine.high %v298_v51, %v318_v52  ;;  %v338_v59 = vld [vmem:[#allocation6 + $0x530] sm:$0xff] }
 0x162   :  { %v3668_v8 = vcombine.high %v377_v3, %v397_v4  ;;  %v358_v60 = vld [vmem:[#allocation6 + $0x5d0] sm:$0xff] }
 0x164   :  { %2399 = vmatpush1.bf16.msra.mxu1 %v3661_v11  ;;  %2442 = vmatpush1.bf16.msra.mxu0 %v3663_v12  ;;  %v417_v11 = vld [vmem:[#allocation6 + $0x7a8] sm:$0xff] }
 0x165   :  { %2400 = vmatprep.subr.bf16.mxu1 %v3702_v13  ;;  %2443 = vmatprep.subr.bf16.mxu0 %v3704_v14  ;;  %v437_v12 = vld [vmem:[#allocation6 + $0x848] sm:$0xff]  ;;  %v3665_v13 = vcombine.low %v376_v1, %v396_v2  ;;  %v3667_v14 = vcombine.low %v377_v3, %v397_v4  ;;  %v3630_v1 = vcombine.high %v338_v59, %v358_v60  ;;  %v378_v3 = vld [vmem:[#allocation6 + $0x670] sm:$0xff] }
 0x166   :  { %v3708_v17 = vcombine.high %v417_v11, %v437_v12  ;;  %v398_v4 = vld [vmem:[#allocation6 + $0x710] sm:$0xff] }
 0x168   :  { %2401 = vmatpush1.bf16.msra.mxu1 %v3701_v20  ;;  %2444 = vmatpush1.bf16.msra.mxu0 %v3703_v21  ;;  %v457_v20 = vld [vmem:[#allocation6 + $0x8e8] sm:$0xff] }
 0x169   :  { %2402 = vmatprep.subr.bf16.mxu1 %v3742_v22  ;;  %2445 = vmatprep.subr.bf16.mxu0 %v3744_v23  ;;  %v477_v21 = vld [vmem:[#allocation6 + $0x988] sm:$0xff]  ;;  %v3705_v22 = vcombine.low %v416_v9, %v436_v10  ;;  %v3707_v23 = vcombine.low %v417_v11, %v437_v12  ;;  %v3670_v9 = vcombine.high %v378_v3, %v398_v4  ;;  %v418_v11 = vld [vmem:[#allocation6 + $0x7b0] sm:$0xff] }
 0x16a   :  { %v3748_v25 = vcombine.high %v457_v20, %v477_v21  ;;  %v438_v12 = vld [vmem:[#allocation6 + $0x850] sm:$0xff] }
 0x16c   :  { %2403 = vmatpush1.bf16.msra.mxu1 %v3741_v28  ;;  %2446 = vmatpush1.bf16.msra.mxu0 %v3743_v29  ;;  %v179_v28 = vld [vmem:[#allocation6 + $0x38] sm:$0xff] }
 0x16d   :  { %2474 = vmatprep.subr.bf16.mxu1 %v3466_v30  ;;  %2517 = vmatprep.subr.bf16.mxu0 %v3468_v31  ;;  %v199_v29 = vld [vmem:[#allocation6 + $0xd8] sm:$0xff]  ;;  %v3745_v30 = vcombine.low %v456_v18, %v476_v19  ;;  %v3747_v31 = vcombine.low %v457_v20, %v477_v21  ;;  %v3710_v18 = vcombine.high %v418_v11, %v438_v12  ;;  %v458_v20 = vld [vmem:[#allocation6 + $0x8f0] sm:$0xff] }
 0x16e   :  { %v3472_v33 = vcombine.high %v179_v28, %v199_v29  ;;  %v478_v21 = vld [vmem:[#allocation6 + $0x990] sm:$0xff] }
 0x16f   :  { %2421 = vmatmul.mubr.bf16.vlgmr.msra.gmra.mrb[4].mxu1 %v4095_v36  ;;  %2464 = vmatmul.mubr.bf16.vlgmr.msra.gmra.mrb[8].mxu0 %v4095_v36 }
 0x170   :  { %2475 = vmatpush1.bf16.msra.mxu1 %v3465_v37  ;;  %2518 = vmatpush1.bf16.msra.mxu0 %v3467_v38  ;;  %v219_v37 = vld [vmem:[#allocation6 + $0x178] sm:$0xff] }
 0x171   :  { %2476 = vmatprep.subr.bf16.mxu1 %v3506_v39  ;;  %2519 = vmatprep.subr.bf16.mxu0 %v3508_v40  ;;  %v239_v38 = vld [vmem:[#allocation6 + $0x218] sm:$0xff]  ;;  %v3469_v39 = vcombine.low %v178_v26, %v198_v27  ;;  %v3471_v40 = vcombine.low %v179_v28, %v199_v29  ;;  %v3750_v26 = vcombine.high %v458_v20, %v478_v21  ;;  %v180_v28 = vld [vmem:[#allocation6 + $0x40] sm:$0xff] }
 0x172   :  { %2506 = vmatprep.mubr.bf16.mxu1 %v4001_v16  ;;  %2549 = vmatprep.mubr.bf16.mxu0 %v4001_v16  ;;  %v3512_v42 = vcombine.high %v219_v37, %v239_v38  ;;  %v200_v29 = vld [vmem:[#allocation6 + $0xe0] sm:$0xff] }
 0x174   :  { %2477 = vmatpush1.bf16.msra.mxu1 %v3505_v45  ;;  %2520 = vmatpush1.bf16.msra.mxu0 %v3507_v46  ;;  %v259_v45 = vld [vmem:[#allocation6 + $0x2b8] sm:$0xff] }
 0x175   :  { %2478 = vmatprep.subr.bf16.mxu1 %v3546_v47  ;;  %2521 = vmatprep.subr.bf16.mxu0 %v3548_v48  ;;  %v279_v46 = vld [vmem:[#allocation6 + $0x358] sm:$0xff]  ;;  %v3509_v47 = vcombine.low %v218_v34, %v238_v35  ;;  %v3511_v48 = vcombine.low %v219_v37, %v239_v38  ;;  %v3474_v34 = vcombine.high %v180_v28, %v200_v29  ;;  %v220_v37 = vld [vmem:[#allocation6 + $0x180] sm:$0xff] }
 0x176   :  { %v3552_v50 = vcombine.high %v259_v45, %v279_v46  ;;  %v240_v38 = vld [vmem:[#allocation6 + $0x220] sm:$0xff] }
 0x178   :  { %2479 = vmatpush1.bf16.msra.mxu1 %v3545_v53  ;;  %2522 = vmatpush1.bf16.msra.mxu0 %v3547_v54  ;;  %v299_v53 = vld [vmem:[#allocation6 + $0x3f8] sm:$0xff] }
 0x179   :  { %2480 = vmatprep.subr.bf16.mxu1 %v3586_v55  ;;  %2523 = vmatprep.subr.bf16.mxu0 %v3588_v56  ;;  %v319_v54 = vld [vmem:[#allocation6 + $0x498] sm:$0xff]  ;;  %v3549_v55 = vcombine.low %v258_v43, %v278_v44  ;;  %v3551_v56 = vcombine.low %v259_v45, %v279_v46  ;;  %v3514_v43 = vcombine.high %v220_v37, %v240_v38  ;;  %v260_v45 = vld [vmem:[#allocation6 + $0x2c0] sm:$0xff] }
 0x17a   :  { %v3592_v58 = vcombine.high %v299_v53, %v319_v54  ;;  %v280_v46 = vld [vmem:[#allocation6 + $0x360] sm:$0xff] }
 0x17c   :  { %2481 = vmatpush1.bf16.msra.mxu1 %v3585_v61  ;;  %2524 = vmatpush1.bf16.msra.mxu0 %v3587_v62  ;;  %v339_v61 = vld [vmem:[#allocation6 + $0x538] sm:$0xff] }
 0x17d   :  { %2482 = vmatprep.subr.bf16.mxu1 %v3626_v63  ;;  %2525 = vmatprep.subr.bf16.mxu0 %v3628_v0  ;;  %v359_v62 = vld [vmem:[#allocation6 + $0x5d8] sm:$0xff]  ;;  %v3589_v63 = vcombine.low %v298_v51, %v318_v52  ;;  %v3591_v0 = vcombine.low %v299_v53, %v319_v54  ;;  %v3554_v51 = vcombine.high %v260_v45, %v280_v46  ;;  %v300_v53 = vld [vmem:[#allocation6 + $0x400] sm:$0xff] }
 0x17e   :  { %v3632_v2 = vcombine.high %v339_v61, %v359_v62  ;;  %v320_v54 = vld [vmem:[#allocation6 + $0x4a0] sm:$0xff] }
 0x180   :  { %2483 = vmatpush1.bf16.msra.mxu1 %v3625_v5  ;;  %2526 = vmatpush1.bf16.msra.mxu0 %v3627_v6  ;;  %v379_v5 = vld [vmem:[#allocation6 + $0x678] sm:$0xff] }
 0x181   :  { %2484 = vmatprep.subr.bf16.mxu1 %v3666_v7  ;;  %2527 = vmatprep.subr.bf16.mxu0 %v3668_v8  ;;  %v399_v6 = vld [vmem:[#allocation6 + $0x718] sm:$0xff]  ;;  %v3629_v7 = vcombine.low %v338_v59, %v358_v60  ;;  %v3631_v8 = vcombine.low %v339_v61, %v359_v62  ;;  %v3594_v59 = vcombine.high %v300_v53, %v320_v54  ;;  %v340_v61 = vld [vmem:[#allocation6 + $0x540] sm:$0xff] }
 0x182   :  { %v3672_v10 = vcombine.high %v379_v5, %v399_v6  ;;  %v360_v62 = vld [vmem:[#allocation6 + $0x5e0] sm:$0xff] }
 0x184   :  { %2485 = vmatpush1.bf16.msra.mxu1 %v3665_v13  ;;  %2528 = vmatpush1.bf16.msra.mxu0 %v3667_v14  ;;  %v419_v13 = vld [vmem:[#allocation6 + $0x7b8] sm:$0xff] }
 0x185   :  { %2486 = vmatprep.subr.bf16.mxu1 %v3706_v15  ;;  %2529 = vmatprep.subr.bf16.mxu0 %v3708_v17  ;;  %v439_v14 = vld [vmem:[#allocation6 + $0x858] sm:$0xff]  ;;  %v3669_v15 = vcombine.low %v378_v3, %v398_v4  ;;  %v3671_v17 = vcombine.low %v379_v5, %v399_v6  ;;  %v3634_v3 = vcombine.high %v340_v61, %v360_v62  ;;  %v380_v5 = vld [vmem:[#allocation6 + $0x680] sm:$0xff] }
 0x186   :  { %v3712_v19 = vcombine.high %v419_v13, %v439_v14  ;;  %v400_v6 = vld [vmem:[#allocation6 + $0x720] sm:$0xff] }
 0x188   :  { %2487 = vmatpush1.bf16.msra.mxu1 %v3705_v22  ;;  %2530 = vmatpush1.bf16.msra.mxu0 %v3707_v23  ;;  %v459_v22 = vld [vmem:[#allocation6 + $0x8f8] sm:$0xff] }
 0x189   :  { %2488 = vmatprep.subr.bf16.mxu1 %v3746_v24  ;;  %2531 = vmatprep.subr.bf16.mxu0 %v3748_v25  ;;  %v479_v23 = vld [vmem:[#allocation6 + $0x998] sm:$0xff]  ;;  %v3709_v24 = vcombine.low %v418_v11, %v438_v12  ;;  %v3711_v25 = vcombine.low %v419_v13, %v439_v14  ;;  %v3674_v11 = vcombine.high %v380_v5, %v400_v6  ;;  %v420_v13 = vld [vmem:[#allocation6 + $0x7c0] sm:$0xff] }
 0x18a   :  { %v3752_v27 = vcombine.high %v459_v22, %v479_v23  ;;  %v440_v14 = vld [vmem:[#allocation6 + $0x860] sm:$0xff] }
 0x18c   :  { %2489 = vmatpush1.bf16.msra.mxu1 %v3745_v30  ;;  %2532 = vmatpush1.bf16.msra.mxu0 %v3747_v31  ;;  %v181_v30 = vld [vmem:[#allocation6 + $0x48] sm:$0xff] }
 0x18d   :  { %2560 = vmatprep.subr.bf16.mxu1 %v3470_v32  ;;  %2603 = vmatprep.subr.bf16.mxu0 %v3472_v33  ;;  %v201_v31 = vld [vmem:[#allocation6 + $0xe8] sm:$0xff]  ;;  %v3749_v32 = vcombine.low %v458_v20, %v478_v21  ;;  %v3751_v33 = vcombine.low %v459_v22, %v479_v23  ;;  %v3714_v20 = vcombine.high %v420_v13, %v440_v14  ;;  %v460_v22 = vld [vmem:[#allocation6 + $0x900] sm:$0xff] }
 0x18e   :  { %v3476_v35 = vcombine.high %v181_v30, %v201_v31  ;;  %v480_v23 = vld [vmem:[#allocation6 + $0x9a0] sm:$0xff] }
 0x18f   :  { %2507 = vmatmul.mubr.bf16.vlgmr.msra.gmra.mrb[8].mxu1 %v4095_v36  ;;  %2550 = vmatmul.mubr.bf16.vlgmr.msra.gmra.mrb[12].mxu0 %v4095_v36 }
 0x190   :  { %2561 = vmatpush1.bf16.msra.mxu1 %v3469_v39  ;;  %2604 = vmatpush1.bf16.msra.mxu0 %v3471_v40  ;;  %v221_v39 = vld [vmem:[#allocation6 + $0x188] sm:$0xff] }
 0x191   :  { %2562 = vmatprep.subr.bf16.mxu1 %v3510_v41  ;;  %2605 = vmatprep.subr.bf16.mxu0 %v3512_v42  ;;  %v241_v40 = vld [vmem:[#allocation6 + $0x228] sm:$0xff]  ;;  %v3473_v41 = vcombine.low %v180_v28, %v200_v29  ;;  %v3475_v42 = vcombine.low %v181_v30, %v201_v31  ;;  %v3754_v28 = vcombine.high %v460_v22, %v480_v23  ;;  %v182_v30 = vld [vmem:[#allocation6 + $0x50] sm:$0xff] }
 0x192   :  { %2592 = vmatprep.mubr.bf16.mxu1 %v4001_v16  ;;  %2635 = vmatprep.mubr.bf16.mxu0 %v4001_v16  ;;  %v3516_v44 = vcombine.high %v221_v39, %v241_v40  ;;  %v202_v31 = vld [vmem:[#allocation6 + $0xf0] sm:$0xff] }
 0x194   :  { %2563 = vmatpush1.bf16.msra.mxu1 %v3509_v47  ;;  %2606 = vmatpush1.bf16.msra.mxu0 %v3511_v48  ;;  %v261_v47 = vld [vmem:[#allocation6 + $0x2c8] sm:$0xff] }
 0x195   :  { %2564 = vmatprep.subr.bf16.mxu1 %v3550_v49  ;;  %2607 = vmatprep.subr.bf16.mxu0 %v3552_v50  ;;  %v281_v48 = vld [vmem:[#allocation6 + $0x368] sm:$0xff]  ;;  %v3513_v49 = vcombine.low %v220_v37, %v240_v38  ;;  %v3515_v50 = vcombine.low %v221_v39, %v241_v40  ;;  %v3478_v37 = vcombine.high %v182_v30, %v202_v31  ;;  %v222_v39 = vld [vmem:[#allocation6 + $0x190] sm:$0xff] }
 0x196   :  { %v3556_v52 = vcombine.high %v261_v47, %v281_v48  ;;  %v242_v40 = vld [vmem:[#allocation6 + $0x230] sm:$0xff] }
 0x198   :  { %2565 = vmatpush1.bf16.msra.mxu1 %v3549_v55  ;;  %2608 = vmatpush1.bf16.msra.mxu0 %v3551_v56  ;;  %v301_v55 = vld [vmem:[#allocation6 + $0x408] sm:$0xff] }
 0x199   :  { %2566 = vmatprep.subr.bf16.mxu1 %v3590_v57  ;;  %2609 = vmatprep.subr.bf16.mxu0 %v3592_v58  ;;  %v321_v56 = vld [vmem:[#allocation6 + $0x4a8] sm:$0xff]  ;;  %v3553_v57 = vcombine.low %v260_v45, %v280_v46  ;;  %v3555_v58 = vcombine.low %v261_v47, %v281_v48  ;;  %v3518_v45 = vcombine.high %v222_v39, %v242_v40  ;;  %v262_v47 = vld [vmem:[#allocation6 + $0x2d0] sm:$0xff] }
 0x19a   :  { %v3596_v60 = vcombine.high %v301_v55, %v321_v56  ;;  %v282_v48 = vld [vmem:[#allocation6 + $0x370] sm:$0xff] }
 0x19c   :  { %2567 = vmatpush1.bf16.msra.mxu1 %v3589_v63  ;;  %2610 = vmatpush1.bf16.msra.mxu0 %v3591_v0  ;;  %v341_v63 = vld [vmem:[#allocation6 + $0x548] sm:$0xff] }
 0x19d   :  { %2568 = vmatprep.subr.bf16.mxu1 %v3630_v1  ;;  %2611 = vmatprep.subr.bf16.mxu0 %v3632_v2  ;;  %v361_v0 = vld [vmem:[#allocation6 + $0x5e8] sm:$0xff]  ;;  %v3593_v1 = vcombine.low %v300_v53, %v320_v54  ;;  %v3595_v2 = vcombine.low %v301_v55, %v321_v56  ;;  %v3558_v53 = vcombine.high %v262_v47, %v282_v48  ;;  %v302_v55 = vld [vmem:[#allocation6 + $0x410] sm:$0xff] }
 0x19e   :  { %v3636_v4 = vcombine.high %v341_v63, %v361_v0  ;;  %v322_v56 = vld [vmem:[#allocation6 + $0x4b0] sm:$0xff] }
 0x1a0   :  { %2569 = vmatpush1.bf16.msra.mxu1 %v3629_v7  ;;  %2612 = vmatpush1.bf16.msra.mxu0 %v3631_v8  ;;  %v381_v7 = vld [vmem:[#allocation6 + $0x688] sm:$0xff] }
 0x1a1   :  { %2570 = vmatprep.subr.bf16.mxu1 %v3670_v9  ;;  %2613 = vmatprep.subr.bf16.mxu0 %v3672_v10  ;;  %v401_v8 = vld [vmem:[#allocation6 + $0x728] sm:$0xff]  ;;  %v3633_v9 = vcombine.low %v340_v61, %v360_v62  ;;  %v3635_v10 = vcombine.low %v341_v63, %v361_v0  ;;  %v3598_v61 = vcombine.high %v302_v55, %v322_v56  ;;  %v342_v63 = vld [vmem:[#allocation6 + $0x550] sm:$0xff] }
 0x1a2   :  { %v3676_v12 = vcombine.high %v381_v7, %v401_v8  ;;  %v362_v0 = vld [vmem:[#allocation6 + $0x5f0] sm:$0xff] }
 0x1a4   :  { %2571 = vmatpush1.bf16.msra.mxu1 %v3669_v15  ;;  %2614 = vmatpush1.bf16.msra.mxu0 %v3671_v17  ;;  %v421_v15 = vld [vmem:[#allocation6 + $0x7c8] sm:$0xff] }
 0x1a5   :  { %2572 = vmatprep.subr.bf16.mxu1 %v3710_v18  ;;  %2615 = vmatprep.subr.bf16.mxu0 %v3712_v19  ;;  %v441_v17 = vld [vmem:[#allocation6 + $0x868] sm:$0xff]  ;;  %v3673_v18 = vcombine.low %v380_v5, %v400_v6  ;;  %v3675_v19 = vcombine.low %v381_v7, %v401_v8  ;;  %v3638_v5 = vcombine.high %v342_v63, %v362_v0  ;;  %v382_v7 = vld [vmem:[#allocation6 + $0x690] sm:$0xff] }
 0x1a6   :  { %v3716_v21 = vcombine.high %v421_v15, %v441_v17  ;;  %v402_v8 = vld [vmem:[#allocation6 + $0x730] sm:$0xff] }
 0x1a8   :  { %2573 = vmatpush1.bf16.msra.mxu1 %v3709_v24  ;;  %2616 = vmatpush1.bf16.msra.mxu0 %v3711_v25  ;;  %v461_v24 = vld [vmem:[#allocation6 + $0x908] sm:$0xff] }
 0x1a9   :  { %2574 = vmatprep.subr.bf16.mxu1 %v3750_v26  ;;  %2617 = vmatprep.subr.bf16.mxu0 %v3752_v27  ;;  %v481_v25 = vld [vmem:[#allocation6 + $0x9a8] sm:$0xff]  ;;  %v3713_v26 = vcombine.low %v420_v13, %v440_v14  ;;  %v3715_v27 = vcombine.low %v421_v15, %v441_v17  ;;  %v3678_v13 = vcombine.high %v382_v7, %v402_v8  ;;  %v422_v15 = vld [vmem:[#allocation6 + $0x7d0] sm:$0xff] }
 0x1aa   :  { %v3756_v29 = vcombine.high %v461_v24, %v481_v25  ;;  %v442_v17 = vld [vmem:[#allocation6 + $0x870] sm:$0xff] }
 0x1ac   :  { %2575 = vmatpush1.bf16.msra.mxu1 %v3749_v32  ;;  %2618 = vmatpush1.bf16.msra.mxu0 %v3751_v33  ;;  %v183_v32 = vld [vmem:[#allocation6 + $0x58] sm:$0xff] }
 0x1ad   :  { %2646 = vmatprep.subr.bf16.mxu1 %v3474_v34  ;;  %2689 = vmatprep.subr.bf16.mxu0 %v3476_v35  ;;  %v203_v33 = vld [vmem:[#allocation6 + $0xf8] sm:$0xff]  ;;  %v3753_v34 = vcombine.low %v460_v22, %v480_v23  ;;  %v3755_v35 = vcombine.low %v461_v24, %v481_v25  ;;  %v3718_v22 = vcombine.high %v422_v15, %v442_v17  ;;  %v462_v24 = vld [vmem:[#allocation6 + $0x910] sm:$0xff] }
 0x1ae   :  { %v3480_v38 = vcombine.high %v183_v32, %v203_v33  ;;  %v482_v25 = vld [vmem:[#allocation6 + $0x9b0] sm:$0xff] }
 0x1af   :  { %2593 = vmatmul.mubr.bf16.vlgmr.msra.gmra.mrb[12].mxu1 %v4095_v36  ;;  %2636 = vmatmul.mubr.bf16.vlgmr.msra.gmra.mrb[16].mxu0 %v4095_v36 }
 0x1b0   :  { %2647 = vmatpush1.bf16.msra.mxu1 %v3473_v41  ;;  %2690 = vmatpush1.bf16.msra.mxu0 %v3475_v42  ;;  %v223_v41 = vld [vmem:[#allocation6 + $0x198] sm:$0xff] }
 0x1b1   :  { %2648 = vmatprep.subr.bf16.mxu1 %v3514_v43  ;;  %2691 = vmatprep.subr.bf16.mxu0 %v3516_v44  ;;  %v243_v42 = vld [vmem:[#allocation6 + $0x238] sm:$0xff]  ;;  %v3477_v43 = vcombine.low %v182_v30, %v202_v31  ;;  %v3479_v44 = vcombine.low %v183_v32, %v203_v33  ;;  %v3758_v30 = vcombine.high %v462_v24, %v482_v25  ;;  %v184_v32 = vld [vmem:[#allocation6 + $0x60] sm:$0xff] }
 0x1b2   :  { %2678 = vmatprep.mubr.bf16.mxu1 %v4001_v16  ;;  %2721 = vmatprep.mubr.bf16.mxu0 %v4001_v16  ;;  %v3520_v46 = vcombine.high %v223_v41, %v243_v42  ;;  %v204_v33 = vld [vmem:[#allocation6 + $0x100] sm:$0xff] }
 0x1b4   :  { %2649 = vmatpush1.bf16.msra.mxu1 %v3513_v49  ;;  %2692 = vmatpush1.bf16.msra.mxu0 %v3515_v50  ;;  %v263_v49 = vld [vmem:[#allocation6 + $0x2d8] sm:$0xff] }
 0x1b5   :  { %2650 = vmatprep.subr.bf16.mxu1 %v3554_v51  ;;  %2693 = vmatprep.subr.bf16.mxu0 %v3556_v52  ;;  %v283_v50 = vld [vmem:[#allocation6 + $0x378] sm:$0xff]  ;;  %v3517_v51 = vcombine.low %v222_v39, %v242_v40  ;;  %v3519_v52 = vcombine.low %v223_v41, %v243_v42  ;;  %v3482_v39 = vcombine.high %v184_v32, %v204_v33  ;;  %v224_v41 = vld [vmem:[#allocation6 + $0x1a0] sm:$0xff] }
 0x1b6   :  { %v3560_v54 = vcombine.high %v263_v49, %v283_v50  ;;  %v244_v42 = vld [vmem:[#allocation6 + $0x240] sm:$0xff] }
 0x1b8   :  { %2651 = vmatpush1.bf16.msra.mxu1 %v3553_v57  ;;  %2694 = vmatpush1.bf16.msra.mxu0 %v3555_v58  ;;  %v303_v57 = vld [vmem:[#allocation6 + $0x418] sm:$0xff] }
 0x1b9   :  { %2652 = vmatprep.subr.bf16.mxu1 %v3594_v59  ;;  %2695 = vmatprep.subr.bf16.mxu0 %v3596_v60  ;;  %v323_v58 = vld [vmem:[#allocation6 + $0x4b8] sm:$0xff]  ;;  %v3557_v59 = vcombine.low %v262_v47, %v282_v48  ;;  %v3559_v60 = vcombine.low %v263_v49, %v283_v50  ;;  %v3522_v47 = vcombine.high %v224_v41, %v244_v42  ;;  %v264_v49 = vld [vmem:[#allocation6 + $0x2e0] sm:$0xff] }
 0x1ba   :  { %v3600_v62 = vcombine.high %v303_v57, %v323_v58  ;;  %v284_v50 = vld [vmem:[#allocation6 + $0x380] sm:$0xff] }
 0x1bc   :  { %2653 = vmatpush1.bf16.msra.mxu1 %v3593_v1  ;;  %2696 = vmatpush1.bf16.msra.mxu0 %v3595_v2  ;;  %v343_v1 = vld [vmem:[#allocation6 + $0x558] sm:$0xff] }
 0x1bd   :  { %2654 = vmatprep.subr.bf16.mxu1 %v3634_v3  ;;  %2697 = vmatprep.subr.bf16.mxu0 %v3636_v4  ;;  %v363_v2 = vld [vmem:[#allocation6 + $0x5f8] sm:$0xff]  ;;  %v3597_v3 = vcombine.low %v302_v55, %v322_v56  ;;  %v3599_v4 = vcombine.low %v303_v57, %v323_v58  ;;  %v3562_v55 = vcombine.high %v264_v49, %v284_v50  ;;  %v304_v57 = vld [vmem:[#allocation6 + $0x420] sm:$0xff] }
 0x1be   :  { %v3640_v6 = vcombine.high %v343_v1, %v363_v2  ;;  %v324_v58 = vld [vmem:[#allocation6 + $0x4c0] sm:$0xff] }
 0x1c0   :  { %2655 = vmatpush1.bf16.msra.mxu1 %v3633_v9  ;;  %2698 = vmatpush1.bf16.msra.mxu0 %v3635_v10  ;;  %v383_v9 = vld [vmem:[#allocation6 + $0x698] sm:$0xff] }
 0x1c1   :  { %2656 = vmatprep.subr.bf16.mxu1 %v3674_v11  ;;  %2699 = vmatprep.subr.bf16.mxu0 %v3676_v12  ;;  %v403_v10 = vld [vmem:[#allocation6 + $0x738] sm:$0xff]  ;;  %v3637_v11 = vcombine.low %v342_v63, %v362_v0  ;;  %v3639_v12 = vcombine.low %v343_v1, %v363_v2  ;;  %v3602_v63 = vcombine.high %v304_v57, %v324_v58  ;;  %v344_v1 = vld [vmem:[#allocation6 + $0x560] sm:$0xff] }
 0x1c2   :  { %v3680_v14 = vcombine.high %v383_v9, %v403_v10  ;;  %v364_v2 = vld [vmem:[#allocation6 + $0x600] sm:$0xff] }
 0x1c4   :  { %2657 = vmatpush1.bf16.msra.mxu1 %v3673_v18  ;;  %2700 = vmatpush1.bf16.msra.mxu0 %v3675_v19  ;;  %v423_v18 = vld [vmem:[#allocation6 + $0x7d8] sm:$0xff] }
 0x1c5   :  { %2658 = vmatprep.subr.bf16.mxu1 %v3714_v20  ;;  %2701 = vmatprep.subr.bf16.mxu0 %v3716_v21  ;;  %v443_v19 = vld [vmem:[#allocation6 + $0x878] sm:$0xff]  ;;  %v3677_v20 = vcombine.low %v382_v7, %v402_v8  ;;  %v3679_v21 = vcombine.low %v383_v9, %v403_v10  ;;  %v3642_v7 = vcombine.high %v344_v1, %v364_v2  ;;  %v384_v9 = vld [vmem:[#allocation6 + $0x6a0] sm:$0xff] }
 0x1c6   :  { %v3720_v23 = vcombine.high %v423_v18, %v443_v19  ;;  %v404_v10 = vld [vmem:[#allocation6 + $0x740] sm:$0xff] }
 0x1c8   :  { %2659 = vmatpush1.bf16.msra.mxu1 %v3713_v26  ;;  %2702 = vmatpush1.bf16.msra.mxu0 %v3715_v27  ;;  %v463_v26 = vld [vmem:[#allocation6 + $0x918] sm:$0xff] }
 0x1c9   :  { %2660 = vmatprep.subr.bf16.mxu1 %v3754_v28  ;;  %2703 = vmatprep.subr.bf16.mxu0 %v3756_v29  ;;  %v483_v27 = vld [vmem:[#allocation6 + $0x9b8] sm:$0xff]  ;;  %v3717_v28 = vcombine.low %v422_v15, %v442_v17  ;;  %v3719_v29 = vcombine.low %v423_v18, %v443_v19  ;;  %v3682_v15 = vcombine.high %v384_v9, %v404_v10  ;;  %v424_v18 = vld [vmem:[#allocation6 + $0x7e0] sm:$0xff] }
 0x1ca   :  { %v3760_v31 = vcombine.high %v463_v26, %v483_v27  ;;  %v444_v19 = vld [vmem:[#allocation6 + $0x880] sm:$0xff] }
 0x1cc   :  { %2661 = vmatpush1.bf16.msra.mxu1 %v3753_v34  ;;  %2704 = vmatpush1.bf16.msra.mxu0 %v3755_v35  ;;  %v185_v34 = vld [vmem:[#allocation6 + $0x68] sm:$0xff] }
 0x1cd   :  { %2732 = vmatprep.subr.bf16.mxu1 %v3478_v37  ;;  %2775 = vmatprep.subr.bf16.mxu0 %v3480_v38  ;;  %v205_v35 = vld [vmem:[#allocation6 + $0x108] sm:$0xff]  ;;  %v3757_v37 = vcombine.low %v462_v24, %v482_v25  ;;  %v3759_v38 = vcombine.low %v463_v26, %v483_v27  ;;  %v3722_v24 = vcombine.high %v424_v18, %v444_v19  ;;  %v464_v26 = vld [vmem:[#allocation6 + $0x920] sm:$0xff] }
 0x1ce   :  { %v3484_v40 = vcombine.high %v185_v34, %v205_v35  ;;  %v484_v27 = vld [vmem:[#allocation6 + $0x9c0] sm:$0xff] }
 0x1cf   :  { %2679 = vmatmul.mubr.bf16.vlgmr.msra.gmra.mrb[16].mxu1 %v4095_v36  ;;  %2722 = vmatmul.mubr.bf16.vlgmr.msra.gmra.mrb[20].mxu0 %v4095_v36 }
 0x1d0   :  { %2733 = vmatpush1.bf16.msra.mxu1 %v3477_v43  ;;  %2776 = vmatpush1.bf16.msra.mxu0 %v3479_v44  ;;  %v225_v43 = vld [vmem:[#allocation6 + $0x1a8] sm:$0xff] }
 0x1d1   :  { %2734 = vmatprep.subr.bf16.mxu1 %v3518_v45  ;;  %2777 = vmatprep.subr.bf16.mxu0 %v3520_v46  ;;  %v245_v44 = vld [vmem:[#allocation6 + $0x248] sm:$0xff]  ;;  %v3481_v45 = vcombine.low %v184_v32, %v204_v33  ;;  %v3483_v46 = vcombine.low %v185_v34, %v205_v35  ;;  %v3762_v32 = vcombine.high %v464_v26, %v484_v27  ;;  %v186_v34 = vld [vmem:[#allocation6 + $0x70] sm:$0xff] }
 0x1d2   :  { %2764 = vmatprep.mubr.bf16.mxu1 %v4001_v16  ;;  %2807 = vmatprep.mubr.bf16.mxu0 %v4001_v16  ;;  %v3524_v48 = vcombine.high %v225_v43, %v245_v44  ;;  %v206_v35 = vld [vmem:[#allocation6 + $0x110] sm:$0xff] }
 0x1d4   :  { %2735 = vmatpush1.bf16.msra.mxu1 %v3517_v51  ;;  %2778 = vmatpush1.bf16.msra.mxu0 %v3519_v52  ;;  %v265_v51 = vld [vmem:[#allocation6 + $0x2e8] sm:$0xff] }
 0x1d5   :  { %2736 = vmatprep.subr.bf16.mxu1 %v3558_v53  ;;  %2779 = vmatprep.subr.bf16.mxu0 %v3560_v54  ;;  %v285_v52 = vld [vmem:[#allocation6 + $0x388] sm:$0xff]  ;;  %v3521_v53 = vcombine.low %v224_v41, %v244_v42  ;;  %v3523_v54 = vcombine.low %v225_v43, %v245_v44  ;;  %v3486_v41 = vcombine.high %v186_v34, %v206_v35  ;;  %v226_v43 = vld [vmem:[#allocation6 + $0x1b0] sm:$0xff] }
 0x1d6   :  { %v3564_v56 = vcombine.high %v265_v51, %v285_v52  ;;  %v246_v44 = vld [vmem:[#allocation6 + $0x250] sm:$0xff] }
 0x1d8   :  { %2737 = vmatpush1.bf16.msra.mxu1 %v3557_v59  ;;  %2780 = vmatpush1.bf16.msra.mxu0 %v3559_v60  ;;  %v305_v59 = vld [vmem:[#allocation6 + $0x428] sm:$0xff] }
 0x1d9   :  { %2738 = vmatprep.subr.bf16.mxu1 %v3598_v61  ;;  %2781 = vmatprep.subr.bf16.mxu0 %v3600_v62  ;;  %v325_v60 = vld [vmem:[#allocation6 + $0x4c8] sm:$0xff]  ;;  %v3561_v61 = vcombine.low %v264_v49, %v284_v50  ;;  %v3563_v62 = vcombine.low %v265_v51, %v285_v52  ;;  %v3526_v49 = vcombine.high %v226_v43, %v246_v44  ;;  %v266_v51 = vld [vmem:[#allocation6 + $0x2f0] sm:$0xff] }
 0x1da   :  { %v3604_v0 = vcombine.high %v305_v59, %v325_v60  ;;  %v286_v52 = vld [vmem:[#allocation6 + $0x390] sm:$0xff] }
 0x1dc   :  { %2739 = vmatpush1.bf16.msra.mxu1 %v3597_v3  ;;  %2782 = vmatpush1.bf16.msra.mxu0 %v3599_v4  ;;  %v345_v3 = vld [vmem:[#allocation6 + $0x568] sm:$0xff] }
 0x1dd   :  { %2740 = vmatprep.subr.bf16.mxu1 %v3638_v5  ;;  %2783 = vmatprep.subr.bf16.mxu0 %v3640_v6  ;;  %v365_v4 = vld [vmem:[#allocation6 + $0x608] sm:$0xff]  ;;  %v3601_v5 = vcombine.low %v304_v57, %v324_v58  ;;  %v3603_v6 = vcombine.low %v305_v59, %v325_v60  ;;  %v3566_v57 = vcombine.high %v266_v51, %v286_v52  ;;  %v306_v59 = vld [vmem:[#allocation6 + $0x430] sm:$0xff] }
 0x1de   :  { %v3644_v8 = vcombine.high %v345_v3, %v365_v4  ;;  %v326_v60 = vld [vmem:[#allocation6 + $0x4d0] sm:$0xff] }
 0x1e0   :  { %2741 = vmatpush1.bf16.msra.mxu1 %v3637_v11  ;;  %2784 = vmatpush1.bf16.msra.mxu0 %v3639_v12  ;;  %v385_v11 = vld [vmem:[#allocation6 + $0x6a8] sm:$0xff] }
 0x1e1   :  { %2742 = vmatprep.subr.bf16.mxu1 %v3678_v13  ;;  %2785 = vmatprep.subr.bf16.mxu0 %v3680_v14  ;;  %v405_v12 = vld [vmem:[#allocation6 + $0x748] sm:$0xff]  ;;  %v3641_v13 = vcombine.low %v344_v1, %v364_v2  ;;  %v3643_v14 = vcombine.low %v345_v3, %v365_v4  ;;  %v3606_v2 = vcombine.high %v306_v59, %v326_v60  ;;  %v346_v4 = vld [vmem:[#allocation6 + $0x570] sm:$0xff] }
 0x1e2   :  { %v3684_v17 = vcombine.high %v385_v11, %v405_v12 }
 0x1e4   :  { %2743 = vmatpush1.bf16.msra.mxu1 %v3677_v20  ;;  %2786 = vmatpush1.bf16.msra.mxu0 %v3679_v21  ;;  %v425_v20 = vld [vmem:[#allocation6 + $0x7e8] sm:$0xff] }
 0x1e5   :  { %2744 = vmatprep.subr.bf16.mxu1 %v3718_v22  ;;  %2787 = vmatprep.subr.bf16.mxu0 %v3720_v23  ;;  %v445_v21 = vld [vmem:[#allocation6 + $0x888] sm:$0xff]  ;;  %v3681_v22 = vcombine.low %v384_v9, %v404_v10  ;;  %v3683_v23 = vcombine.low %v385_v11, %v405_v12  ;;  %v3605_v9 = vcombine.low %v306_v59, %v326_v60 }
 0x1e6   :  { %v3724_v25 = vcombine.high %v425_v20, %v445_v21 }
 0x1e8   :  { %2745 = vmatpush1.bf16.msra.mxu1 %v3717_v28  ;;  %2788 = vmatpush1.bf16.msra.mxu0 %v3719_v29  ;;  %v465_v28 = vld [vmem:[#allocation6 + $0x928] sm:$0xff] }
 0x1e9   :  { %2746 = vmatprep.subr.bf16.mxu1 %v3758_v30  ;;  %2789 = vmatprep.subr.bf16.mxu0 %v3760_v31  ;;  %v485_v29 = vld [vmem:[#allocation6 + $0x9c8] sm:$0xff]  ;;  %v3721_v30 = vcombine.low %v424_v18, %v444_v19  ;;  %v3723_v31 = vcombine.low %v425_v20, %v445_v21 }
 0x1ea   :  { %v3764_v33 = vcombine.high %v465_v28, %v485_v29 }
 0x1ec   :  { %2747 = vmatpush1.bf16.msra.mxu1 %v3757_v37  ;;  %2790 = vmatpush1.bf16.msra.mxu0 %v3759_v38  ;;  %v187_v37 = vld [vmem:[#allocation6 + $0x78] sm:$0xff] }
 0x1ed   :  { %2818 = vmatprep.subr.bf16.mxu1 %v3482_v39  ;;  %2861 = vmatprep.subr.bf16.mxu0 %v3484_v40  ;;  %v207_v38 = vld [vmem:[#allocation6 + $0x118] sm:$0xff]  ;;  %v3761_v39 = vcombine.low %v464_v26, %v484_v27  ;;  %v3763_v40 = vcombine.low %v465_v28, %v485_v29  ;;  %v426_v27 = vld [vmem:[#allocation6 + $0x7f0] sm:$0xff] }
 0x1ee   :  { %v3488_v42 = vcombine.high %v187_v37, %v207_v38  ;;  %v446_v28 = vld [vmem:[#allocation6 + $0x890] sm:$0xff]  ;;  %v427_v29 = vld [vmem:[#allocation6 + $0x7f8] sm:$0xff] }
 0x1ef   :  { %2765 = vmatmul.mubr.bf16.vlgmr.msra.gmra.mrb[20].mxu1 %v4095_v36  ;;  %2808 = vmatmul.mubr.bf16.vlgmr.msra.gmra.mrb[24].mxu0 %v4095_v36 }
 0x1f0   :  { %2819 = vmatpush1.bf16.msra.mxu1 %v3481_v45  ;;  %2862 = vmatpush1.bf16.msra.mxu0 %v3483_v46  ;;  %v227_v45 = vld [vmem:[#allocation6 + $0x1b8] sm:$0xff] }
 0x1f1   :  { %2820 = vmatprep.subr.bf16.mxu1 %v3522_v47  ;;  %2863 = vmatprep.subr.bf16.mxu0 %v3524_v48  ;;  %v247_v46 = vld [vmem:[#allocation6 + $0x258] sm:$0xff]  ;;  %v3485_v47 = vcombine.low %v186_v34, %v206_v35  ;;  %v3487_v48 = vcombine.low %v187_v37, %v207_v38  ;;  %v3726_v38 = vcombine.high %v426_v27, %v446_v28 }
 0x1f2   :  { %2850 = vmatprep.mubr.bf16.mxu1 %v4001_v16  ;;  %2893 = vmatprep.mubr.bf16.mxu0 %v4001_v16  ;;  %v3528_v50 = vcombine.high %v227_v45, %v247_v46 }
 0x1f4   :  { %2821 = vmatpush1.bf16.msra.mxu1 %v3521_v53  ;;  %2864 = vmatpush1.bf16.msra.mxu0 %v3523_v54  ;;  %v267_v53 = vld [vmem:[#allocation6 + $0x2f8] sm:$0xff] }
 0x1f5   :  { %2822 = vmatprep.subr.bf16.mxu1 %v3562_v55  ;;  %2865 = vmatprep.subr.bf16.mxu0 %v3564_v56  ;;  %v287_v54 = vld [vmem:[#allocation6 + $0x398] sm:$0xff]  ;;  %v3525_v55 = vcombine.low %v226_v43, %v246_v44  ;;  %v3527_v56 = vcombine.low %v227_v45, %v247_v46 }
 0x1f6   :  { %v3568_v58 = vcombine.high %v267_v53, %v287_v54  ;;  %v3567_v1 = vcombine.low %v267_v53, %v287_v54  ;;  %v467_v44 = vld [vmem:[#allocation6 + $0x938] sm:$0xff] }
 0x1f7   :  { %v487_v45 = vld [vmem:[#allocation6 + $0x9d8] sm:$0xff] }
 0x1f8   :  { %2823 = vmatpush1.bf16.msra.mxu1 %v3561_v61  ;;  %2866 = vmatpush1.bf16.msra.mxu0 %v3563_v62  ;;  %v307_v61 = vld [vmem:[#allocation6 + $0x438] sm:$0xff] }
 0x1f9   :  { %2824 = vmatprep.subr.bf16.mxu1 %v3602_v63  ;;  %2867 = vmatprep.subr.bf16.mxu0 %v3604_v0  ;;  %v327_v62 = vld [vmem:[#allocation6 + $0x4d8] sm:$0xff]  ;;  %v502_v63 = vlaneseq  ;;  %v3565_v0 = vcombine.low %v266_v51, %v286_v52 }
 0x1fa   :  { %v3608_v3 = vcombine.high %v307_v61, %v327_v62  ;;  %v3607_v10 = vcombine.low %v307_v61, %v327_v62  ;;  %v3768_v61 = vcombine.high %v467_v44, %v487_v45  ;;  %v188_v62 = vld [vmem:[#allocation6 + $0x80] sm:$0xff] }
 0x1fc   :  { %2825 = vmatpush1.bf16.msra.mxu1 %v3601_v5  ;;  %2868 = vmatpush1.bf16.msra.mxu0 %v3603_v6  ;;  %v366_v5 = vld [vmem:[#allocation6 + $0x610] sm:$0xff]  ;;  %v347_v6 = vld [vmem:[#allocation6 + $0x578] sm:$0xff] }
 0x1fd   :  { %2826 = vmatprep.subr.bf16.mxu1 %v3642_v7  ;;  %2869 = vmatprep.subr.bf16.mxu0 %v3644_v8  ;;  %v367_v7 = vld [vmem:[#allocation6 + $0x618] sm:$0xff]  ;;  %v4125_v8 = vshrl.u32 %v502_v63, 7  ;;  %v3646_v11 = vcombine.high %v346_v4, %v366_v5  ;;  %v3645_v20 = vcombine.low %v346_v4, %v366_v5  ;;  %v189_v4 = vld [vmem:[#allocation6 + $0x88] sm:$0xff] }
 0x1fe   :  { %v3648_v12 = vcombine.high %v347_v6, %v367_v7  ;;  %v3647_v21 = vcombine.low %v347_v6, %v367_v7  ;;  %v209_v5 = vld [vmem:[#allocation6 + $0x128] sm:$0xff] }
 0x1ff   :  { %v4128_v18 = vsub.s32 0, %v4125_v8  ;;  %v4131_v19 = vsub.s32 2, %v4125_v8 }
 0x200   :  { %2827 = vmatpush1.bf16.msra.mxu1 %v3641_v13  ;;  %2870 = vmatpush1.bf16.msra.mxu0 %v3643_v14  ;;  %v386_v13 = vld [vmem:[#allocation6 + $0x6b0] sm:$0xff] }
 0x201   :  { %2828 = vmatprep.subr.bf16.mxu1 %v3682_v15  ;;  %2871 = vmatprep.subr.bf16.mxu0 %v3684_v17  ;;  %v406_v14 = vld [vmem:[#allocation6 + $0x750] sm:$0xff]  ;;  %v387_v15 = vld [vmem:[#allocation6 + $0x6b8] sm:$0xff] }
 0x202   :  { %v407_v17 = vld [vmem:[#allocation6 + $0x758] sm:$0xff] }
 0x203   :  { %v3688_v26 = vcombine.high %v387_v15, %v407_v17  ;;  %v3687_v34 = vcombine.low %v387_v15, %v407_v17  ;;  %v229_v15 = vld [vmem:[#allocation6 + $0x1c8] sm:$0xff] }
 0x204   :  { %2829 = vmatpush1.bf16.msra.mxu1 %v3681_v22  ;;  %2872 = vmatpush1.bf16.msra.mxu0 %v3683_v23  ;;  %v4133_v22 = vld [vmem:[#allocation7] sm:$0xff]  ;;  %v4136_v23 = vsub.s32 1, %v4125_v8  ;;  %v249_v17 = vld [vmem:[#allocation6 + $0x268] sm:$0xff] }
 0x205   :  { %2830 = vmatprep.subr.bf16.mxu1 %v3722_v24  ;;  %2873 = vmatprep.subr.bf16.mxu0 %v3724_v25  ;;  %v4139_v24 = vsub.s32 3, %v4125_v8  ;;  %v3686_v25 = vcombine.high %v386_v13, %v406_v14 }
 0x206   :  { %v509_v35 = vrot.slane %v4133_v22, %v4136_v23 }
 0x207   :  { %v517_v37 = vrot.slane %v4133_v22, %v4139_v24 }
 0x208   :  { %2831 = vmatpush1.bf16.msra.mxu1 %v3721_v30  ;;  %2874 = vmatpush1.bf16.msra.mxu0 %v3723_v31  ;;  %v447_v30 = vld [vmem:[#allocation6 + $0x898] sm:$0xff]  ;;  %v505_v31 = vrot.slane %v4133_v22, %v4128_v18 }
 0x209   :  { %2832 = vmatprep.subr.bf16.mxu1 %v3762_v32  ;;  %2875 = vmatprep.subr.bf16.mxu0 %v3764_v33  ;;  %v513_v32 = vrot.slane %v4133_v22, %v4131_v19  ;;  %v3685_v33 = vcombine.low %v386_v13, %v406_v14  ;;  %v3727_v51 = vcombine.low %v427_v29, %v447_v30  ;;  %v228_v13 = vld [vmem:[#allocation6 + $0x1c0] sm:$0xff] }
 0x20a   :  { %v248_v14 = vld [vmem:[#allocation6 + $0x260] sm:$0xff] }
 0x20c   :  { %2833 = vmatpush1.bf16.msra.mxu1 %v3761_v39  ;;  %2876 = vmatpush1.bf16.msra.mxu0 %v3763_v40  ;;  %v3728_v39 = vcombine.high %v427_v29, %v447_v30  ;;  %v466_v40 = vld [vmem:[#allocation6 + $0x930] sm:$0xff]  ;;  %v269_v29 = vld [vmem:[#allocation6 + $0x308] sm:$0xff] }
 0x20d   :  { %2904 = vmatprep.subr.bf16.mxu1 %v3486_v41  ;;  %2947 = vmatprep.subr.bf16.mxu0 %v3488_v42  ;;  %v486_v41 = vld [vmem:[#allocation6 + $0x9d0] sm:$0xff]  ;;  %v289_v30 = vld [vmem:[#allocation6 + $0x3a8] sm:$0xff] }
 0x20e   :  { %v3765_v6 = vcombine.low %v466_v40, %v486_v41 }
 0x20f   :  { %2851 = vmatmul.mubr.bf16.vlgmr.msra.gmra.mrb[24].mxu1 %v4095_v36  ;;  %2894 = vmatmul.mubr.bf16.vlgmr.msra.gmra.mrb[28].mxu0 %v4095_v36 }
 0x210   :  { %2905 = vmatpush1.bf16.msra.mxu1 %v3485_v47  ;;  %2948 = vmatpush1.bf16.msra.mxu0 %v3487_v48 }
 0x211   :  { %2906 = vmatprep.subr.bf16.mxu1 %v3526_v49  ;;  %2949 = vmatprep.subr.bf16.mxu0 %v3528_v50  ;;  %v3725_v50 = vcombine.low %v426_v27, %v446_v28  ;;  %v268_v27 = vld [vmem:[#allocation6 + $0x300] sm:$0xff] }
 0x212   :  { %2936 = vmatprep.mubr.bf16.mxu1 %v4001_v16  ;;  %2979 = vmatprep.mubr.bf16.mxu0 %v4001_v16  ;;  %v288_v28 = vld [vmem:[#allocation6 + $0x3a0] sm:$0xff] }
 0x214   :  { %2907 = vmatpush1.bf16.msra.mxu1 %v3525_v55  ;;  %2950 = vmatpush1.bf16.msra.mxu0 %v3527_v56  ;;  %v3766_v56 = vcombine.high %v466_v40, %v486_v41  ;;  %v3569_v40 = vcombine.low %v268_v27, %v288_v28  ;;  %v3571_v41 = vcombine.low %v269_v29, %v289_v30 }
 0x215   :  { %2908 = vmatprep.subr.bf16.mxu1 %v3566_v57  ;;  %2951 = vmatprep.subr.bf16.mxu0 %v3568_v58 }
 0x218   :  { %2909 = vmatpush1.bf16.msra.mxu1 %v3565_v0  ;;  %2952 = vmatpush1.bf16.msra.mxu0 %v3567_v1 }
 0x219   :  { %2910 = vmatprep.subr.bf16.mxu1 %v3606_v2  ;;  %2953 = vmatprep.subr.bf16.mxu0 %v3608_v3  ;;  %v208_v3 = vld [vmem:[#allocation6 + $0x120] sm:$0xff] }
 0x21c   :  { %2911 = vmatpush1.bf16.msra.mxu1 %v3605_v9  ;;  %2954 = vmatpush1.bf16.msra.mxu0 %v3607_v10  ;;  %v3767_v10 = vcombine.low %v467_v44, %v487_v45  ;;  %v348_v44 = vld [vmem:[#allocation6 + $0x580] sm:$0xff] }
 0x21d   :  { %2912 = vmatprep.subr.bf16.mxu1 %v3646_v11  ;;  %2955 = vmatprep.subr.bf16.mxu0 %v3648_v12  ;;  %v3490_v11 = vcombine.high %v188_v62, %v208_v3  ;;  %v3492_v12 = vcombine.high %v189_v4, %v209_v5  ;;  %v368_v45 = vld [vmem:[#allocation6 + $0x620] sm:$0xff] }
 0x220   :  { %2913 = vmatpush1.bf16.msra.mxu1 %v3645_v20  ;;  %2956 = vmatpush1.bf16.msra.mxu0 %v3647_v21  ;;  %v3489_v20 = vcombine.low %v188_v62, %v208_v3  ;;  %v3491_v21 = vcombine.low %v189_v4, %v209_v5  ;;  %v449_v3 = vld [vmem:[#allocation6 + $0x8a8] sm:$0xff] }
 0x221   :  { %2914 = vmatprep.subr.bf16.mxu1 %v3686_v25  ;;  %2957 = vmatprep.subr.bf16.mxu0 %v3688_v26  ;;  %v3530_v25 = vcombine.high %v228_v13, %v248_v14  ;;  %v3532_v26 = vcombine.high %v229_v15, %v249_v17 }
 0x222   :  { %v2336_v42 = vpop.f32.mrb[0].mxu1  ;;  %v2379_v43 = vpop.f32.mrb[4].mxu0 }
 0x223   :  { %v2337_v46 = vadd.f32 %v2336_v42, %v505_v31  ;;  %v2380_v47 = vadd.f32 %v2379_v43, %v513_v32  ;;  %v2338_v48 = vpop.f32.mrb[1].mxu1  ;;  %v2381_v49 = vpop.f32.mrb[5].mxu0 }
 0x224   :  { %v2339_v52 = vadd.f32 %v2338_v48, %v509_v35  ;;  %v2382_v53 = vadd.f32 %v2381_v49, %v517_v37  ;;  %2915 = vmatpush1.bf16.msra.mxu1 %v3685_v33  ;;  %2958 = vmatpush1.bf16.msra.mxu0 %v3687_v34  ;;  %v2340_v54 = vpop.f32.mrb[2].mxu1  ;;  %v2383_v55 = vpop.f32.mrb[6].mxu0  ;;  %v3570_v33 = vcombine.high %v268_v27, %v288_v28 }
 0x225   :  { %v2341_v57 = vadd.f32 %v2340_v54, %v505_v31  ;;  %v2384_v58 = vadd.f32 %v2383_v55, %v513_v32  ;;  %v2342_v59 = vpop.f32.mrb[3].mxu1  ;;  %v2385_v60 = vpop.f32.mrb[7].mxu0  ;;  %2916 = vmatprep.subr.bf16.mxu1 %v3726_v38  ;;  %2959 = vmatprep.subr.bf16.mxu0 %v3728_v39  ;;  %v3529_v31 = vcombine.low %v228_v13, %v248_v14  ;;  %v309_v38 = vld [vmem:[#allocation6 + $0x448] sm:$0xff]  ;;  %v488_v13 = vld [vmem:[#allocation6 + $0x9e0] sm:$0xff] }
 0x226   :  { %v3817_v63 = vpack.c.bf16 %v2339_v52, %v2337_v46  ;;  %v3818_v0 = vpack.c.bf16 %v2382_v53, %v2380_v47  ;;  %v2343_v1 = vadd.f32 %v2342_v59, %v509_v35  ;;  %v2386_v2 = vadd.f32 %v2385_v60, %v517_v37  ;;  %v308_v35 = vld [vmem:[#allocation6 + $0x440] sm:$0xff]  ;;  %v329_v39 = vld [vmem:[#allocation6 + $0x4e8] sm:$0xff] }
 0x227   :  { %v3531_v32 = vcombine.low %v229_v15, %v249_v17  ;;  %v3572_v34 = vcombine.high %v269_v29, %v289_v30  ;;  %v328_v37 = vld [vmem:[#allocation6 + $0x4e0] sm:$0xff]  ;;  %v3612_v43 = vcombine.high %v309_v38, %v329_v39  ;;  %v349_v46 = vld [vmem:[#allocation6 + $0x588] sm:$0xff]  ;;  %v3611_v49 = vcombine.low %v309_v38, %v329_v39 }
 0x228   :  { %3402 = vst [vmem:[%s4346_s5] sm:$0xff] %v3817_v63  ;;  %3403 = vst [vmem:[%s4346_s5 + $0x8] sm:$0xff] %v3818_v0  ;;  %v3837_v7 = vpack.c.bf16 %v2343_v1, %v2341_v57  ;;  %v3838_v9 = vpack.c.bf16 %v2386_v2, %v2384_v58  ;;  %2917 = vmatpush1.bf16.msra.mxu1 %v3725_v50  ;;  %2960 = vmatpush1.bf16.msra.mxu0 %v3727_v51  ;;  %v369_v47 = vld [vmem:[#allocation6 + $0x628] sm:$0xff]  ;;  %v388_v52 = vld [vmem:[#allocation6 + $0x6c0] sm:$0xff]  ;;  %v4169_v57 = vsub.s32 6, %v4125_v8 }
 0x229   :  { %2918 = vmatprep.subr.bf16.mxu1 %v3766_v56  ;;  %2961 = vmatprep.subr.bf16.mxu0 %v3768_v61  ;;  %v3610_v42 = vcombine.high %v308_v35, %v328_v37  ;;  %v3609_v48 = vcombine.low %v308_v35, %v328_v37  ;;  %v3650_v50 = vcombine.high %v348_v44, %v368_v45  ;;  %v408_v53 = vld [vmem:[#allocation6 + $0x760] sm:$0xff]  ;;  %v389_v54 = vld [vmem:[#allocation6 + $0x6c8] sm:$0xff]  ;;  %v4166_v56 = vsub.s32 4, %v4125_v8 }
 0x22a   :  { %3422 = vst [vmem:[%s4346_s5 + $0xa0] sm:$0xff] %v3837_v7  ;;  %3423 = vst [vmem:[%s4346_s5 + $0xa8] sm:$0xff] %v3838_v9  ;;  %v3652_v51 = vcombine.high %v349_v46, %v369_v47  ;;  %v409_v55 = vld [vmem:[#allocation6 + $0x768] sm:$0xff]  ;;  %v4172_v58 = vsub.s32 5, %v4125_v8  ;;  %v3649_v59 = vcombine.low %v348_v44, %v368_v45  ;;  %v3651_v60 = vcombine.low %v349_v46, %v369_v47  ;;  %v428_v0 = vld [vmem:[#allocation6 + $0x800] sm:$0xff] }
 0x22b   :  { %v4175_v61 = vsub.s32 7, %v4125_v8  ;;  %v3690_v62 = vcombine.high %v388_v52, %v408_v53  ;;  %v3692_v63 = vcombine.high %v389_v54, %v409_v55  ;;  %v448_v1 = vld [vmem:[#allocation6 + $0x8a0] sm:$0xff]  ;;  %v429_v2 = vld [vmem:[#allocation6 + $0x808] sm:$0xff]  ;;  %v521_v4 = vrot.slane %v4133_v22, %v4166_v56  ;;  %v210_v45 = vld [vmem:[#allocation6 + $0x130] sm:$0xff] }
 0x22c   :  { %2919 = vmatpush1.bf16.msra.mxu1 %v3765_v6  ;;  %2962 = vmatpush1.bf16.msra.mxu0 %v3767_v10  ;;  %v529_v5 = vrot.slane %v4133_v22, %v4169_v57  ;;  %v525_v6 = vrot.slane %v4133_v22, %v4172_v58  ;;  %v3689_v7 = vcombine.low %v388_v52, %v408_v53  ;;  %v469_v17 = vld [vmem:[#allocation6 + $0x948] sm:$0xff]  ;;  %v191_v46 = vld [vmem:[#allocation6 + $0x98] sm:$0xff] }
 0x22d   :  { %2990 = vmatprep.subr.bf16.mxu1 %v3490_v11  ;;  %3033 = vmatprep.subr.bf16.mxu0 %v3492_v12  ;;  %v533_v8 = vrot.slane %v4133_v22, %v4175_v61  ;;  %v3691_v9 = vcombine.low %v389_v54, %v409_v55  ;;  %v3730_v10 = vcombine.high %v428_v0, %v448_v1  ;;  %v468_v12 = vld [vmem:[#allocation6 + $0x940] sm:$0xff]  ;;  %v211_v47 = vld [vmem:[#allocation6 + $0x138] sm:$0xff]  ;;  %v230_v54 = vld [vmem:[#allocation6 + $0x1d0] sm:$0xff] }
 0x22e   :  { %v3732_v11 = vcombine.high %v429_v2, %v449_v3  ;;  %v3729_v28 = vcombine.low %v428_v0, %v448_v1  ;;  %v3731_v29 = vcombine.low %v429_v2, %v449_v3  ;;  %v3496_v53 = vcombine.high %v191_v46, %v211_v47  ;;  %v250_v55 = vld [vmem:[#allocation6 + $0x270] sm:$0xff] }
 0x22f   :  { %2937 = vmatmul.mubr.bf16.vlgmr.msra.gmra.mrb[28].mxu1 %v4095_v36  ;;  %2980 = vmatmul.mubr.bf16.vlgmr.msra.gmra.mrb[32].mxu0 %v4095_v36  ;;  %v3534_v0 = vcombine.high %v230_v54, %v250_v55  ;;  %v270_v2 = vld [vmem:[#allocation6 + $0x310] sm:$0xff] }
 0x230   :  { %2991 = vmatpush1.bf16.msra.mxu1 %v3489_v20  ;;  %3034 = vmatpush1.bf16.msra.mxu0 %v3491_v21  ;;  %v489_v20 = vld [vmem:[#allocation6 + $0x9e8] sm:$0xff]  ;;  %v290_v3 = vld [vmem:[#allocation6 + $0x3b0] sm:$0xff] }
 0x231   :  { %2992 = vmatprep.subr.bf16.mxu1 %v3530_v25  ;;  %3035 = vmatprep.subr.bf16.mxu0 %v3532_v26  ;;  %v3772_v39 = vcombine.high %v469_v17, %v489_v20 }
 0x232   :  { %3022 = vmatprep.mubr.bf16.mxu1 %v4001_v16  ;;  %3065 = vmatprep.mubr.bf16.mxu0 %v4001_v16 }
 0x234   :  { %2993 = vmatpush1.bf16.msra.mxu1 %v3529_v31  ;;  %3036 = vmatpush1.bf16.msra.mxu0 %v3531_v32 }
 0x235   :  { %2994 = vmatprep.subr.bf16.mxu1 %v3570_v33  ;;  %3037 = vmatprep.subr.bf16.mxu0 %v3572_v34  ;;  %v3770_v33 = vcombine.high %v468_v12, %v488_v13 }
 0x238   :  { %2995 = vmatpush1.bf16.msra.mxu1 %v3569_v40  ;;  %3038 = vmatpush1.bf16.msra.mxu0 %v3571_v41  ;;  %v190_v40 = vld [vmem:[#allocation6 + $0x90] sm:$0xff] }
 0x239   :  { %2996 = vmatprep.subr.bf16.mxu1 %v3610_v42  ;;  %3039 = vmatprep.subr.bf16.mxu0 %v3612_v43  ;;  %v3494_v52 = vcombine.high %v190_v40, %v210_v45 }
 0x23c   :  { %2997 = vmatpush1.bf16.msra.mxu1 %v3609_v48  ;;  %3040 = vmatpush1.bf16.msra.mxu0 %v3611_v49  ;;  %v3769_v48 = vcombine.low %v468_v12, %v488_v13  ;;  %v311_v12 = vld [vmem:[#allocation6 + $0x458] sm:$0xff] }
 0x23d   :  { %2998 = vmatprep.subr.bf16.mxu1 %v3650_v50  ;;  %3041 = vmatprep.subr.bf16.mxu0 %v3652_v51  ;;  %v3771_v51 = vcombine.low %v469_v17, %v489_v20  ;;  %v331_v13 = vld [vmem:[#allocation6 + $0x4f8] sm:$0xff] }
 0x23e   :  { %v3616_v20 = vcombine.high %v311_v12, %v331_v13 }
 0x240   :  { %2999 = vmatpush1.bf16.msra.mxu1 %v3649_v59  ;;  %3042 = vmatpush1.bf16.msra.mxu0 %v3651_v60  ;;  %v231_v59 = vld [vmem:[#allocation6 + $0x1d8] sm:$0xff] }
 0x241   :  { %3000 = vmatprep.subr.bf16.mxu1 %v3690_v62  ;;  %3043 = vmatprep.subr.bf16.mxu0 %v3692_v63  ;;  %v251_v60 = vld [vmem:[#allocation6 + $0x278] sm:$0xff]  ;;  %v3493_v62 = vcombine.low %v190_v40, %v210_v45  ;;  %v3495_v63 = vcombine.low %v191_v46, %v211_v47  ;;  %v430_v40 = vld [vmem:[#allocation6 + $0x810] sm:$0xff] }
 0x242   :  { %v2422_v14 = vpop.f32.mrb[4].mxu1  ;;  %v2465_v15 = vpop.f32.mrb[8].mxu0  ;;  %v3536_v1 = vcombine.high %v231_v59, %v251_v60 }
 0x243   :  { %v2423_v21 = vadd.f32 %v2422_v14, %v521_v4  ;;  %v2466_v25 = vadd.f32 %v2465_v15, %v529_v5  ;;  %v2424_v26 = vpop.f32.mrb[5].mxu1  ;;  %v2467_v27 = vpop.f32.mrb[9].mxu0  ;;  %v3573_v14 = vcombine.low %v270_v2, %v290_v3 }
 0x244   :  { %v2425_v30 = vadd.f32 %v2424_v26, %v525_v6  ;;  %v2468_v22 = vadd.f32 %v2467_v27, %v533_v8  ;;  %v2426_v31 = vpop.f32.mrb[6].mxu1  ;;  %v2469_v32 = vpop.f32.mrb[10].mxu0  ;;  %3001 = vmatpush1.bf16.msra.mxu1 %v3689_v7  ;;  %3044 = vmatpush1.bf16.msra.mxu0 %v3691_v9  ;;  %v3574_v7 = vcombine.high %v270_v2, %v290_v3  ;;  %v351_v26 = vld [vmem:[#allocation6 + $0x598] sm:$0xff] }
 0x245   :  { %v2427_v34 = vadd.f32 %v2426_v31, %v521_v4  ;;  %v2470_v35 = vadd.f32 %v2469_v32, %v529_v5  ;;  %v2428_v37 = vpop.f32.mrb[7].mxu1  ;;  %v2471_v38 = vpop.f32.mrb[11].mxu0  ;;  %3002 = vmatprep.subr.bf16.mxu1 %v3730_v10  ;;  %3045 = vmatprep.subr.bf16.mxu0 %v3732_v11  ;;  %v271_v4 = vld [vmem:[#allocation6 + $0x318] sm:$0xff]  ;;  %v310_v10 = vld [vmem:[#allocation6 + $0x450] sm:$0xff] }
 0x246   :  { %v3819_v41 = vpack.c.bf16 %v2425_v30, %v2423_v21  ;;  %v3820_v42 = vpack.c.bf16 %v2468_v22, %v2466_v25  ;;  %v2429_v43 = vadd.f32 %v2428_v37, %v525_v6  ;;  %v2472_v44 = vadd.f32 %v2471_v38, %v533_v8  ;;  %v291_v5 = vld [vmem:[#allocation6 + $0x3b8] sm:$0xff]  ;;  %v330_v11 = vld [vmem:[#allocation6 + $0x4f0] sm:$0xff]  ;;  %v4201_v37 = vld [vmem:[#allocation7 + $0x8] sm:$0xff] }
 0x247   :  { %v3533_v6 = vcombine.low %v230_v54, %v250_v55  ;;  %v3535_v8 = vcombine.low %v231_v59, %v251_v60  ;;  %v3576_v9 = vcombine.high %v271_v4, %v291_v5  ;;  %v3575_v15 = vcombine.low %v271_v4, %v291_v5  ;;  %v350_v21 = vld [vmem:[#allocation6 + $0x590] sm:$0xff]  ;;  %v371_v27 = vld [vmem:[#allocation6 + $0x638] sm:$0xff] }
 0x248   :  { %3404 = vst [vmem:[%s4346_s5 + $0x10] sm:$0xff] %v3819_v41  ;;  %3405 = vst [vmem:[%s4346_s5 + $0x18] sm:$0xff] %v3820_v42  ;;  %v3839_v49 = vpack.c.bf16 %v2429_v43, %v2427_v34  ;;  %v3840_v50 = vpack.c.bf16 %v2472_v44, %v2470_v35  ;;  %3003 = vmatpush1.bf16.msra.mxu1 %v3729_v28  ;;  %3046 = vmatpush1.bf16.msra.mxu0 %v3731_v29  ;;  %v370_v25 = vld [vmem:[#allocation6 + $0x630] sm:$0xff]  ;;  %v391_v32 = vld [vmem:[#allocation6 + $0x6d8] sm:$0xff] }
 0x249   :  { %3004 = vmatprep.subr.bf16.mxu1 %v3770_v33  ;;  %3047 = vmatprep.subr.bf16.mxu0 %v3772_v39  ;;  %v3614_v17 = vcombine.high %v310_v10, %v330_v11  ;;  %v3613_v28 = vcombine.low %v310_v10, %v330_v11  ;;  %v3615_v29 = vcombine.low %v311_v12, %v331_v13  ;;  %v390_v22 = vld [vmem:[#allocation6 + $0x6d0] sm:$0xff]  ;;  %v411_v33 = vld [vmem:[#allocation6 + $0x778] sm:$0xff] }
 0x24a   :  { %3424 = vst [vmem:[%s4346_s5 + $0xb0] sm:$0xff] %v3839_v49  ;;  %3425 = vst [vmem:[%s4346_s5 + $0xb8] sm:$0xff] %v3840_v50  ;;  %v3654_v30 = vcombine.high %v350_v21, %v370_v25  ;;  %v410_v31 = vld [vmem:[#allocation6 + $0x770] sm:$0xff]  ;;  %v3653_v34 = vcombine.low %v350_v21, %v370_v25  ;;  %v3655_v35 = vcombine.low %v351_v26, %v371_v27  ;;  %v431_v42 = vld [vmem:[#allocation6 + $0x818] sm:$0xff] }
 0x24b   :  { %v3694_v38 = vcombine.high %v390_v22, %v410_v31  ;;  %v3696_v39 = vcombine.high %v391_v32, %v411_v33  ;;  %v450_v41 = vld [vmem:[#allocation6 + $0x8b0] sm:$0xff]  ;;  %v451_v43 = vld [vmem:[#allocation6 + $0x8b8] sm:$0xff]  ;;  %v537_v44 = vrot.slane %v4201_v37, %v4128_v18  ;;  %v545_v45 = vrot.slane %v4201_v37, %v4131_v19 }
 0x24c   :  { %3005 = vmatpush1.bf16.msra.mxu1 %v3769_v48  ;;  %3048 = vmatpush1.bf16.msra.mxu0 %v3771_v51  ;;  %v541_v46 = vrot.slane %v4201_v37, %v4136_v23  ;;  %v549_v47 = vrot.slane %v4201_v37, %v4139_v24  ;;  %v3693_v48 = vcombine.low %v390_v22, %v410_v31  ;;  %v471_v59 = vld [vmem:[#allocation6 + $0x958] sm:$0xff] }
 0x24d   :  { %3076 = vmatprep.subr.bf16.mxu1 %v3494_v52  ;;  %3119 = vmatprep.subr.bf16.mxu0 %v3496_v53  ;;  %v3695_v49 = vcombine.low %v391_v32, %v411_v33  ;;  %v3734_v50 = vcombine.high %v430_v40, %v450_v41  ;;  %v3736_v51 = vcombine.high %v431_v42, %v451_v43  ;;  %v470_v52 = vld [vmem:[#allocation6 + $0x950] sm:$0xff]  ;;  %v491_v60 = vld [vmem:[#allocation6 + $0x9f8] sm:$0xff] }
 0x24e   :  { %v490_v53 = vld [vmem:[#allocation6 + $0x9f0] sm:$0xff]  ;;  %v3733_v2 = vcombine.low %v430_v40, %v450_v41  ;;  %v3735_v3 = vcombine.low %v431_v42, %v451_v43  ;;  %v3776_v13 = vcombine.high %v471_v59, %v491_v60 }
 0x24f   :  { %3023 = vmatmul.mubr.bf16.vlgmr.msra.gmra.mrb[32].mxu1 %v4095_v36  ;;  %3066 = vmatmul.mubr.bf16.vlgmr.msra.gmra.mrb[36].mxu0 %v4095_v36  ;;  %v3773_v21 = vcombine.low %v470_v52, %v490_v53 }
 0x250   :  { %3077 = vmatpush1.bf16.msra.mxu1 %v3493_v62  ;;  %3120 = vmatpush1.bf16.msra.mxu0 %v3495_v63 }
 0x251   :  { %3078 = vmatprep.subr.bf16.mxu1 %v3534_v0  ;;  %3121 = vmatprep.subr.bf16.mxu0 %v3536_v1 }
 0x252   :  { %3108 = vmatprep.mubr.bf16.mxu1 %v4001_v16  ;;  %3151 = vmatprep.mubr.bf16.mxu0 %v4001_v16  ;;  %v3656_v16 = vcombine.high %v351_v26, %v371_v27  ;;  %v3775_v27 = vcombine.low %v471_v59, %v491_v60 }
 0x254   :  { %3079 = vmatpush1.bf16.msra.mxu1 %v3533_v6  ;;  %3122 = vmatpush1.bf16.msra.mxu0 %v3535_v8 }
 0x255   :  { %3080 = vmatprep.subr.bf16.mxu1 %v3574_v7  ;;  %3123 = vmatprep.subr.bf16.mxu0 %v3576_v9  ;;  %v3774_v7 = vcombine.high %v470_v52, %v490_v53 }
 0x258   :  { %3081 = vmatpush1.bf16.msra.mxu1 %v3573_v14  ;;  %3124 = vmatpush1.bf16.msra.mxu0 %v3575_v15 }
 0x259   :  { %3082 = vmatprep.subr.bf16.mxu1 %v3614_v17  ;;  %3125 = vmatprep.subr.bf16.mxu0 %v3616_v20 }
 0x25c   :  { %3083 = vmatpush1.bf16.msra.mxu1 %v3613_v28  ;;  %3126 = vmatpush1.bf16.msra.mxu0 %v3615_v29  ;;  %v553_v28 = vrot.slane %v4201_v37, %v4166_v56  ;;  %v561_v29 = vrot.slane %v4201_v37, %v4169_v57 }
 0x25d   :  { %3084 = vmatprep.subr.bf16.mxu1 %v3654_v30  ;;  %3127 = vmatprep.subr.bf16.mxu0 %v3656_v16  ;;  %v557_v30 = vrot.slane %v4201_v37, %v4172_v58  ;;  %v565_v16 = vrot.slane %v4201_v37, %v4175_v61 }
 0x260   :  { %3085 = vmatpush1.bf16.msra.mxu1 %v3653_v34  ;;  %3128 = vmatpush1.bf16.msra.mxu0 %v3655_v35 }
 0x261   :  { %3086 = vmatprep.subr.bf16.mxu1 %v3694_v38  ;;  %3129 = vmatprep.subr.bf16.mxu0 %v3696_v39 }
 0x262   :  { %v2508_v54 = vpop.f32.mrb[8].mxu1  ;;  %v2551_v55 = vpop.f32.mrb[12].mxu0 }
 0x263   :  { %v2509_v62 = vadd.f32 %v2508_v54, %v537_v44  ;;  %v2552_v63 = vadd.f32 %v2551_v55, %v545_v45  ;;  %v2510_v0 = vpop.f32.mrb[9].mxu1  ;;  %v2553_v1 = vpop.f32.mrb[13].mxu0 }
 0x264   :  { %v2511_v4 = vadd.f32 %v2510_v0, %v541_v46  ;;  %v2554_v5 = vadd.f32 %v2553_v1, %v549_v47  ;;  %v2512_v6 = vpop.f32.mrb[10].mxu1  ;;  %v2555_v8 = vpop.f32.mrb[14].mxu0  ;;  %3087 = vmatpush1.bf16.msra.mxu1 %v3693_v48  ;;  %3130 = vmatpush1.bf16.msra.mxu0 %v3695_v49 }
 0x265   :  { %v2513_v9 = vadd.f32 %v2512_v6, %v537_v44  ;;  %v2556_v10 = vadd.f32 %v2555_v8, %v545_v45  ;;  %v2514_v11 = vpop.f32.mrb[11].mxu1  ;;  %v2557_v12 = vpop.f32.mrb[15].mxu0  ;;  %3088 = vmatprep.subr.bf16.mxu1 %v3734_v50  ;;  %3131 = vmatprep.subr.bf16.mxu0 %v3736_v51  ;;  %v494_v50 = vld [vmem:[#allocation7 + $0x10] sm:$0xff] }
 0x266   :  { %v3821_v14 = vpack.c.bf16 %v2511_v4, %v2509_v62  ;;  %v3822_v15 = vpack.c.bf16 %v2554_v5, %v2552_v63  ;;  %v2515_v17 = vadd.f32 %v2514_v11, %v541_v46  ;;  %v2558_v20 = vadd.f32 %v2557_v12, %v549_v47 }
 0x267   :  { %v569_v51 = vrot.slane %v494_v50, %v4128_v18  ;;  %v577_v52 = vrot.slane %v494_v50, %v4131_v19  ;;  %v573_v53 = vrot.slane %v494_v50, %v4136_v23  ;;  %v581_v54 = vrot.slane %v494_v50, %v4139_v24 }
 0x268   :  { %3406 = vst [vmem:[%s4346_s5 + $0x20] sm:$0xff] %v3821_v14  ;;  %3407 = vst [vmem:[%s4346_s5 + $0x28] sm:$0xff] %v3822_v15  ;;  %v3841_v25 = vpack.c.bf16 %v2515_v17, %v2513_v9  ;;  %v3842_v26 = vpack.c.bf16 %v2558_v20, %v2556_v10  ;;  %3089 = vmatpush1.bf16.msra.mxu1 %v3733_v2  ;;  %3132 = vmatpush1.bf16.msra.mxu0 %v3735_v3 }
 0x269   :  { %3090 = vmatprep.subr.bf16.mxu1 %v3774_v7  ;;  %3133 = vmatprep.subr.bf16.mxu0 %v3776_v13  ;;  %v585_v15 = vrot.slane %v494_v50, %v4166_v56  ;;  %v593_v17 = vrot.slane %v494_v50, %v4169_v57  ;;  %v589_v20 = vrot.slane %v494_v50, %v4172_v58 }
 0x26a   :  { %3426 = vst [vmem:[%s4346_s5 + $0xc0] sm:$0xff] %v3841_v25  ;;  %3427 = vst [vmem:[%s4346_s5 + $0xc8] sm:$0xff] %v3842_v26 }
 0x26c   :  { %3091 = vmatpush1.bf16.msra.mxu1 %v3773_v21  ;;  %3134 = vmatpush1.bf16.msra.mxu0 %v3775_v27  ;;  %v597_v21 = vrot.slane %v494_v50, %v4175_v61 }
 0x26f   :  { %3109 = vmatmul.mubr.bf16.vlgmr.msra.gmra.mrb[36].mxu1 %v4095_v36  ;;  %3152 = vmatmul.mubr.bf16.vlgmr.msra.gmra.mrb[40].mxu0 %v4095_v36 }
 0x282   :  { %v2594_v22 = vpop.f32.mrb[12].mxu1  ;;  %v2637_v31 = vpop.f32.mrb[16].mxu0 }
 0x283   :  { %v2595_v32 = vadd.f32 %v2594_v22, %v553_v28  ;;  %v2638_v33 = vadd.f32 %v2637_v31, %v561_v29  ;;  %v2596_v34 = vpop.f32.mrb[13].mxu1  ;;  %v2639_v35 = vpop.f32.mrb[17].mxu0 }
 0x284   :  { %v2597_v38 = vadd.f32 %v2596_v34, %v557_v30  ;;  %v2640_v36 = vadd.f32 %v2639_v35, %v565_v16  ;;  %v2598_v39 = vpop.f32.mrb[14].mxu1  ;;  %v2641_v40 = vpop.f32.mrb[18].mxu0 }
 0x285   :  { %v2599_v41 = vadd.f32 %v2598_v39, %v553_v28  ;;  %v2642_v42 = vadd.f32 %v2641_v40, %v561_v29  ;;  %v2600_v43 = vpop.f32.mrb[15].mxu1  ;;  %v2643_v44 = vpop.f32.mrb[19].mxu0 }
 0x286   :  { %v3823_v45 = vpack.c.bf16 %v2597_v38, %v2595_v32  ;;  %v3824_v46 = vpack.c.bf16 %v2640_v36, %v2638_v33  ;;  %v2601_v47 = vadd.f32 %v2600_v43, %v557_v30  ;;  %v2644_v48 = vadd.f32 %v2643_v44, %v565_v16  ;;  %v495_v44 = vld [vmem:[#allocation7 + $0x18] sm:$0xff] }
 0x288   :  { %3408 = vst [vmem:[%s4346_s5 + $0x30] sm:$0xff] %v3823_v45  ;;  %3409 = vst [vmem:[%s4346_s5 + $0x38] sm:$0xff] %v3824_v46  ;;  %v3843_v37 = vpack.c.bf16 %v2601_v47, %v2599_v41  ;;  %v3844_v49 = vpack.c.bf16 %v2644_v48, %v2642_v42  ;;  %v601_v45 = vrot.slane %v495_v44, %v4128_v18 }
 0x289   :  { %v609_v46 = vrot.slane %v495_v44, %v4131_v19  ;;  %v605_v47 = vrot.slane %v495_v44, %v4136_v23  ;;  %v613_v48 = vrot.slane %v495_v44, %v4139_v24 }
 0x28a   :  { %3428 = vst [vmem:[%s4346_s5 + $0xd0] sm:$0xff] %v3843_v37  ;;  %3429 = vst [vmem:[%s4346_s5 + $0xd8] sm:$0xff] %v3844_v49 }
 0x2a2   :  { %v2680_v55 = vpop.f32.mrb[16].mxu1  ;;  %v2723_v59 = vpop.f32.mrb[20].mxu0 }
 0x2a3   :  { %v2681_v60 = vadd.f32 %v2680_v55, %v569_v51  ;;  %v2724_v62 = vadd.f32 %v2723_v59, %v577_v52  ;;  %v2682_v63 = vpop.f32.mrb[17].mxu1  ;;  %v2725_v0 = vpop.f32.mrb[21].mxu0 }
 0x2a4   :  { %v2683_v1 = vadd.f32 %v2682_v63, %v573_v53  ;;  %v2726_v2 = vadd.f32 %v2725_v0, %v581_v54  ;;  %v2684_v3 = vpop.f32.mrb[18].mxu1  ;;  %v2727_v4 = vpop.f32.mrb[22].mxu0 }
 0x2a5   :  { %v2685_v5 = vadd.f32 %v2684_v3, %v569_v51  ;;  %v2728_v6 = vadd.f32 %v2727_v4, %v577_v52  ;;  %v2686_v8 = vpop.f32.mrb[19].mxu1  ;;  %v2729_v7 = vpop.f32.mrb[23].mxu0 }
 0x2a6   :  { %v3825_v9 = vpack.c.bf16 %v2683_v1, %v2681_v60  ;;  %v3826_v10 = vpack.c.bf16 %v2726_v2, %v2724_v62  ;;  %v2687_v11 = vadd.f32 %v2686_v8, %v573_v53  ;;  %v2730_v12 = vadd.f32 %v2729_v7, %v581_v54 }
 0x2a7   :  { %v617_v7 = vrot.slane %v495_v44, %v4166_v56 }
 0x2a8   :  { %3410 = vst [vmem:[%s4346_s5 + $0x40] sm:$0xff] %v3825_v9  ;;  %3411 = vst [vmem:[%s4346_s5 + $0x48] sm:$0xff] %v3826_v10  ;;  %v3845_v13 = vpack.c.bf16 %v2687_v11, %v2685_v5  ;;  %v3846_v14 = vpack.c.bf16 %v2730_v12, %v2728_v6  ;;  %v625_v9 = vrot.slane %v495_v44, %v4169_v57 }
 0x2a9   :  { %v621_v10 = vrot.slane %v495_v44, %v4172_v58  ;;  %v629_v11 = vrot.slane %v495_v44, %v4175_v61 }
 0x2aa   :  { %3430 = vst [vmem:[%s4346_s5 + $0xe0] sm:$0xff] %v3845_v13  ;;  %3431 = vst [vmem:[%s4346_s5 + $0xe8] sm:$0xff] %v3846_v14 }
 0x2c2   :  { %v2766_v25 = vpop.f32.mrb[20].mxu1  ;;  %v2809_v26 = vpop.f32.mrb[24].mxu0 }
 0x2c3   :  { %v2767_v27 = vadd.f32 %v2766_v25, %v585_v15  ;;  %v2810_v28 = vadd.f32 %v2809_v26, %v593_v17  ;;  %v2768_v29 = vpop.f32.mrb[21].mxu1  ;;  %v2811_v30 = vpop.f32.mrb[25].mxu0 }
 0x2c4   :  { %v2769_v16 = vadd.f32 %v2768_v29, %v589_v20  ;;  %v2812_v22 = vadd.f32 %v2811_v30, %v597_v21  ;;  %v2770_v31 = vpop.f32.mrb[22].mxu1  ;;  %v2813_v32 = vpop.f32.mrb[26].mxu0 }
 0x2c5   :  { %v2771_v33 = vadd.f32 %v2770_v31, %v585_v15  ;;  %v2814_v34 = vadd.f32 %v2813_v32, %v593_v17  ;;  %v2772_v35 = vpop.f32.mrb[23].mxu1  ;;  %v2815_v38 = vpop.f32.mrb[27].mxu0 }
 0x2c6   :  { %v3827_v36 = vpack.c.bf16 %v2769_v16, %v2767_v27  ;;  %v3828_v39 = vpack.c.bf16 %v2812_v22, %v2810_v28  ;;  %v2773_v40 = vadd.f32 %v2772_v35, %v589_v20  ;;  %v2816_v41 = vadd.f32 %v2815_v38, %v597_v21  ;;  %v496_v38 = vld [vmem:[#allocation7 + $0x20] sm:$0xff] }
 0x2c8   :  { %3412 = vst [vmem:[%s4346_s5 + $0x50] sm:$0xff] %v3827_v36  ;;  %3413 = vst [vmem:[%s4346_s5 + $0x58] sm:$0xff] %v3828_v39  ;;  %v3847_v42 = vpack.c.bf16 %v2773_v40, %v2771_v33  ;;  %v3848_v43 = vpack.c.bf16 %v2816_v41, %v2814_v34  ;;  %v633_v36 = vrot.slane %v496_v38, %v4128_v18 }
 0x2c9   :  { %v641_v39 = vrot.slane %v496_v38, %v4131_v19  ;;  %v637_v40 = vrot.slane %v496_v38, %v4136_v23  ;;  %v645_v41 = vrot.slane %v496_v38, %v4139_v24 }
 0x2ca   :  { %3432 = vst [vmem:[%s4346_s5 + $0xf0] sm:$0xff] %v3847_v42  ;;  %3433 = vst [vmem:[%s4346_s5 + $0xf8] sm:$0xff] %v3848_v43 }
 0x2e2   :  { %v2852_v37 = vpop.f32.mrb[24].mxu1  ;;  %v2895_v49 = vpop.f32.mrb[28].mxu0 }
 0x2e3   :  { %v2853_v50 = vadd.f32 %v2852_v37, %v601_v45  ;;  %v2896_v51 = vadd.f32 %v2895_v49, %v609_v46  ;;  %v2854_v52 = vpop.f32.mrb[25].mxu1  ;;  %v2897_v53 = vpop.f32.mrb[29].mxu0 }
 0x2e4   :  { %v2855_v54 = vadd.f32 %v2854_v52, %v605_v47  ;;  %v2898_v55 = vadd.f32 %v2897_v53, %v613_v48  ;;  %v2856_v59 = vpop.f32.mrb[26].mxu1  ;;  %v2899_v60 = vpop.f32.mrb[30].mxu0 }
 0x2e5   :  { %v2857_v62 = vadd.f32 %v2856_v59, %v601_v45  ;;  %v2900_v63 = vadd.f32 %v2899_v60, %v609_v46  ;;  %v2858_v0 = vpop.f32.mrb[27].mxu1  ;;  %v2901_v1 = vpop.f32.mrb[31].mxu0  ;;  %v649_v60 = vrot.slane %v496_v38, %v4166_v56 }
 0x2e6   :  { %v3829_v2 = vpack.c.bf16 %v2855_v54, %v2853_v50  ;;  %v3830_v3 = vpack.c.bf16 %v2898_v55, %v2896_v51  ;;  %v2859_v4 = vadd.f32 %v2858_v0, %v605_v47  ;;  %v2902_v5 = vadd.f32 %v2901_v1, %v613_v48 }
 0x2e7   :  { %v661_v0 = vrot.slane %v496_v38, %v4175_v61 }
 0x2e8   :  { %3414 = vst [vmem:[%s4346_s5 + $0x60] sm:$0xff] %v3829_v2  ;;  %3415 = vst [vmem:[%s4346_s5 + $0x68] sm:$0xff] %v3830_v3  ;;  %v3849_v6 = vpack.c.bf16 %v2859_v4, %v2857_v62  ;;  %v3850_v8 = vpack.c.bf16 %v2902_v5, %v2900_v63  ;;  %v657_v62 = vrot.slane %v496_v38, %v4169_v57 }
 0x2e9   :  { %v653_v63 = vrot.slane %v496_v38, %v4172_v58 }
 0x2ea   :  { %3434 = vst [vmem:[%s4346_s5 + $0x100] sm:$0xff] %v3849_v6  ;;  %3435 = vst [vmem:[%s4346_s5 + $0x108] sm:$0xff] %v3850_v8 }
 0x302   :  { %v2938_v12 = vpop.f32.mrb[28].mxu1  ;;  %v2981_v13 = vpop.f32.mrb[32].mxu0 }
 0x303   :  { %v2939_v14 = vadd.f32 %v2938_v12, %v617_v7  ;;  %v2982_v15 = vadd.f32 %v2981_v13, %v625_v9  ;;  %v2940_v17 = vpop.f32.mrb[29].mxu1  ;;  %v2983_v20 = vpop.f32.mrb[33].mxu0 }
 0x304   :  { %v2941_v21 = vadd.f32 %v2940_v17, %v621_v10  ;;  %v2984_v25 = vadd.f32 %v2983_v20, %v629_v11  ;;  %v2942_v26 = vpop.f32.mrb[30].mxu1  ;;  %v2985_v27 = vpop.f32.mrb[34].mxu0 }
 0x305   :  { %v2943_v28 = vadd.f32 %v2942_v26, %v617_v7  ;;  %v2986_v29 = vadd.f32 %v2985_v27, %v625_v9  ;;  %v2944_v30 = vpop.f32.mrb[31].mxu1  ;;  %v2987_v16 = vpop.f32.mrb[35].mxu0 }
 0x306   :  { %v3831_v22 = vpack.c.bf16 %v2941_v21, %v2939_v14  ;;  %v3832_v31 = vpack.c.bf16 %v2984_v25, %v2982_v15  ;;  %v2945_v32 = vadd.f32 %v2944_v30, %v621_v10  ;;  %v2988_v33 = vadd.f32 %v2987_v16, %v629_v11 }
 0x308   :  { %3416 = vst [vmem:[%s4346_s5 + $0x70] sm:$0xff] %v3831_v22  ;;  %3417 = vst [vmem:[%s4346_s5 + $0x78] sm:$0xff] %v3832_v31  ;;  %v3851_v34 = vpack.c.bf16 %v2945_v32, %v2943_v28  ;;  %v3852_v35 = vpack.c.bf16 %v2988_v33, %v2986_v29 }
 0x30a   :  { %3436 = vst [vmem:[%s4346_s5 + $0x110] sm:$0xff] %v3851_v34  ;;  %3437 = vst [vmem:[%s4346_s5 + $0x118] sm:$0xff] %v3852_v35 }
 0x322   :  { %v3024_v42 = vpop.f32.mrb[32].mxu1  ;;  %v3067_v43 = vpop.f32.mrb[36].mxu0 }
 0x323   :  { %v3025_v44 = vadd.f32 %v3024_v42, %v633_v36  ;;  %v3068_v45 = vadd.f32 %v3067_v43, %v641_v39  ;;  %v3026_v46 = vpop.f32.mrb[33].mxu1  ;;  %v3069_v47 = vpop.f32.mrb[37].mxu0 }
 0x324   :  { %v3027_v48 = vadd.f32 %v3026_v46, %v637_v40  ;;  %v3070_v37 = vadd.f32 %v3069_v47, %v645_v41  ;;  %v3028_v49 = vpop.f32.mrb[34].mxu1  ;;  %v3071_v50 = vpop.f32.mrb[38].mxu0 }
 0x325   :  { %v3029_v51 = vadd.f32 %v3028_v49, %v633_v36  ;;  %v3072_v52 = vadd.f32 %v3071_v50, %v641_v39  ;;  %v3030_v53 = vpop.f32.mrb[35].mxu1  ;;  %v3073_v18 = vpop.f32.mrb[39].mxu0 }
 0x326   :  { %v3833_v54 = vpack.c.bf16 %v3027_v48, %v3025_v44  ;;  %v3834_v19 = vpack.c.bf16 %v3070_v37, %v3068_v45  ;;  %v3031_v55 = vadd.f32 %v3030_v53, %v637_v40  ;;  %v3074_v23 = vadd.f32 %v3073_v18, %v645_v41 }
 0x328   :  { %3418 = vst [vmem:[%s4346_s5 + $0x80] sm:$0xff] %v3833_v54  ;;  %3419 = vst [vmem:[%s4346_s5 + $0x88] sm:$0xff] %v3834_v19  ;;  %v3853_v24 = vpack.c.bf16 %v3031_v55, %v3029_v51  ;;  %v3854_v59 = vpack.c.bf16 %v3074_v23, %v3072_v52 }
 0x32a   :  { %3438 = vst [vmem:[%s4346_s5 + $0x120] sm:$0xff] %v3853_v24  ;;  %3439 = vst [vmem:[%s4346_s5 + $0x128] sm:$0xff] %v3854_v59 }
 0x342   :  { %v3110_v1 = vpop.f32.mrb[36].mxu1  ;;  %v3153_v2 = vpop.f32.mrb[40].mxu0 }
 0x343   :  { %v3111_v3 = vadd.f32 %v3110_v1, %v649_v60  ;;  %v3154_v4 = vadd.f32 %v3153_v2, %v657_v62  ;;  %v3112_v5 = vpop.f32.mrb[37].mxu1  ;;  %v3155_v6 = vpop.f32.mrb[41].mxu0 }
 0x344   :  { %v3113_v8 = vadd.f32 %v3112_v5, %v653_v63  ;;  %v3156_v7 = vadd.f32 %v3155_v6, %v661_v0  ;;  %v3114_v9 = vpop.f32.mrb[38].mxu1  ;;  %v3157_v10 = vpop.f32.mrb[42].mxu0 }
 0x345   :  { %v3115_v11 = vadd.f32 %v3114_v9, %v649_v60  ;;  %v3158_v12 = vadd.f32 %v3157_v10, %v657_v62  ;;  %v3116_v13 = vpop.f32.mrb[39].mxu1  ;;  %v3159_v56 = vpop.f32.mrb[43].mxu0 }
 0x346   :  { %v3835_v14 = vpack.c.bf16 %v3113_v8, %v3111_v3  ;;  %v3836_v57 = vpack.c.bf16 %v3156_v7, %v3154_v4  ;;  %v3117_v15 = vadd.f32 %v3116_v13, %v653_v63  ;;  %v3160_v58 = vadd.f32 %v3159_v56, %v661_v0 }
 0x348   :  { %3420 = vst [vmem:[%s4346_s5 + $0x90] sm:$0xff] %v3835_v14  ;;  %3421 = vst [vmem:[%s4346_s5 + $0x98] sm:$0xff] %v3836_v57  ;;  %v3855_v61 = vpack.c.bf16 %v3117_v15, %v3115_v11  ;;  %v3856_v17 = vpack.c.bf16 %v3160_v58, %v3158_v12 }
 0x34a   :  { %3440 = vst [vmem:[%s4346_s5 + $0x130] sm:$0xff] %v3855_v61  ;;  %3441 = vst [vmem:[%s4346_s5 + $0x138] sm:$0xff] %v3856_v17 }
 0x34b   :  { %3446 = vsyncpa [#allocation3], 1 }
 0x34c   :  { %3447 = vsyncpa [#allocation5], 1 }
 0x34d   :  { %3448 = vsyncpa [#allocation8], 1 }

// kernel: stream_amplitude_postnet.4
= control target key start
LH: loop header
LB: loop body
LE: loop exit
PB: predicated region body
PF: predicated region fallthrough
CT: control target
= control target key end

     0   :  { %7 = vsyncpa [#allocation5], 0  ;;  %s10207_s0 = inlined_call_operand.vmem [shape: bf16[8,2,5120], index: 0, kind: input, shape index: {}]   ;;  %s10208_s1 = inlined_call_operand.hbm [shape: bf16[2,640,2560], index: 1, kind: input, shape index: {}]   ;;  %s10209_s2 = inlined_call_operand.vmem [shape: bf16[8,2,1280], index: 2, kind: output, shape index: {}]  }
   0x1   :  { %9 = vsyncpa [#allocation5 + $0x1], 0  ;;  %s9095_s9 = smov 0   ;;  %s9097_s10 = smov 0  }
   0x2   :  { %s9099_s11 = smov 0   ;;  %s9101_s12 = smov 0  }
   0x3   :  { %s9103_s13 = smov 0   ;;  %s9105_s14 = smov 0  }
   0x4   :  { %s9107_s15 = smov 0   ;;  %s9109_s16 = smov 0  }
   0x5 LB: > { %s6761_s17 = sadd.s32 4294967295, %s9070_s16   ;;  %s24_s18 = sadd.s32 1, %s9062_s14  ;;  %s9070_s16 = sphi %s9109_s16, %s15_s16   ;;  %s9066_s15 = sphi %s9107_s15, %s10218_s15   ;;  %s9062_s14 = sphi %s9105_s14, %s10217_s14   ;;  %s9058_s13 = sphi %s9103_s13, %s10216_s13   ;;  %s9054_s12 = sphi %s9101_s12, %s10215_s12   ;;  %s9050_s11 = sphi %s9099_s11, %s10214_s11   ;;  %s9046_s10 = sphi %s9097_s10, %s10213_s10   ;;  %s9042_s9 = sphi %s9095_s9, %s10212_s9  }
   0x6   : > { %p25_p0 = scmp.ge.s32.totalorder %s24_s18, 8  ;;  %s27_s19 = sadd.s32 1, %s9066_s15 }
   0x7   : > { %s72_s20 = sadd.s32 1, %s9050_s11  ;;  %p79_p1 = scmp.ne.s32.totalorder %s9050_s11, %s9046_s10 }
   0x8   : > { %s10220_s18 = smov (%p25_p0, %s24_s18), 0  ;;  %s10222_s19 = smov (!%p25_p0, %s27_s19), %s9066_s15 }
   0x9   : > { %p80_p2 = scmp.eq.s32.totalorder %s9070_s16, 0  ;;  %p85_p3 = scmp.ne.s32.totalorder %s9046_s10, %s9042_s9 }
   0xa   : > { %p29_p4 = scmp.ge.s32.totalorder %s10222_s19, 2  ;;  %p86_p5 = scmp.eq.s32.totalorder %s6761_s17, 0 }
   0xb   : > { %p81_p6 = por %p80_p2, %p79_p1  ;;  %p7669_p8 = scmp.lt.s32.totalorder %s9070_s16, 16 }
   0xc   : > { %s10224_s19 = smov (%p29_p4, %s10222_s19), 0  ;;  %p9146_p7 = por %p86_p5, %p85_p3 }
   0xd   : > { %s69_s22 = ssub.s32 %s9066_s15, %s10224_s19  ;;  %s169_s23 = sand.u32 1, %s9050_s11  }
   0xe   : > { %p70_p9 = scmp.eq.s32.totalorder %s69_s22, 0  ;;  %s7658_s24 = smul.u32 6400, %s169_s23 }
   0xf   : > { %p9154_p10 = pnand %p7669_p8, %p81_p6  ;;  %s7659_s27 = smul.u32 102400, %s9066_s15 }
  0x10   : > { %s9159_s26 = scalar_select %p70_p9, %s9050_s11, %s72_s20  }
  0x11   : > { %s173_s28 = scalar_lea.vmem [#allocation4], %s7658_s24  ;;  %s9165_s4 = scalar_lea.hbm %s10208_s1, %s7659_s27 }
  0x12   : > { %s180_s29 = sshll.u32 %s173_s28, 4  ;;  %s9169_s5 = scalar_lea.sflag [#allocation5], %s169_s23  ;;  %s9167_s29 = int_to_ptr.vmem [resolvable:$true] %s180_s29 }
  0x13   : > { %s8974_s6 = scalar_lea.hbm %s9165_s4, 102400  ;;  %p8976_p12 = pneg %p9154_p10 }
  0x14   : > { %p8975_p11 = scmp.ne.s32.totalorder %s9165_s4, %s8974_s6  ;;  %s8979_s9 = scalar_lea.hbm %s10208_s1, 204800 }
  0x15   : > { %p8980_p1 = scmp.lt.u32.totalorder %s9165_s4, %s10208_s1  ;;  %p8981_p2 = scmp.lt.u32.totalorder %s8979_s9, %s8974_s6 }
  0x16   : > { %p8977_p13 = pnand %p8976_p12, %p8975_p11  ;;  %p8983_p4 = scmp.lt.u32.totalorder %s8974_s6, %s9165_s4 }
  0x17   : > { %p8982_p3 = por %p8981_p2, %p8980_p1 }
  0x18   : > { %p8978_p0 = pneg %p8977_p13 }
  0x19   : > { %p8984_p5 = por %p8983_p4, %p8982_p3 }
  0x1b   : > { %p8985_p6 = pnand %p8984_p5, %p8978_p0 }
  0x1d   : > { %8988 = shalt.err (!%p8985_p6)
}
  0x1e   : > { %s8989_s22 = scalar_lea.vmem %s9167_s29, 102400  ;;  %s9072_s23 = smov [#allocation4]  }
  0x1f   : > { %p8990_p8 = scmp.ne.s32.totalorder %s9167_s29, %s8989_s22  ;;  %s8994_s24 = sshll.u32 %s9072_s23, 4  ;;  %s8995_s24 = int_to_ptr.vmem [resolvable:$false] %s8994_s24 }
  0x20   : > { %s8996_s27 = scalar_lea.vmem %s8995_s24, 204800  ;;  %p8997_p13 = scmp.lt.s32.totalorder %s9167_s29, %s8995_s24 }
  0x21   : > { %p8992_p9 = pnand %p8990_p8, %p8976_p12  ;;  %p8998_p1 = scmp.lt.s32.totalorder %s8996_s27, %s8989_s22 }
  0x23   : > { %p8993_p11 = pneg %p8992_p9  ;;  %p8999_p2 = por %p8998_p1, %p8997_p13 }
  0x25   : > { %p9000_p3 = pnand %p8999_p2, %p8993_p11 }
  0x27   : > { %9003 = shalt.err (!%p9000_p3)
}
  0x28   : > { %s9073_s28 = smov 1280   ;;  %s9074_s30 = smov 80  }
  0x29   : > { %7668 = dma.hbm_to_vmem [thread:$0]  (!%p9154_p10), %s9165_s4, 102400, %s9167_s29, %s9169_s5, %s9073_s28, %s9073_s28, %s9074_s30  }
  0x2a   : > { %p6766_p12 = scmp.ge.s32.totalorder %s9070_s16, 1  ;;  %p188_p0 = scmp.lt.s32.totalorder %s9070_s16, 17 }
  0x2c   : > { %p189_p4 = pnand %p6766_p12, %p188_p0 }
  0x2d   : > { %s194_s3 = sand.u32 (!%p189_p4), 1, %s9046_s10  }
  0x2e   : > { %192 = sbr.rel (%p189_p4) target bundleno = 1137 (0x471), region = 28  ;;  %s195_s7 = scalar_lea.sflag (!%p189_p4), [#allocation5], %s194_s3 }
  0x2f   : > { %s7660_s6 = smul.u32 (!%p189_p4), 6400, %s194_s3 }
  0x31   : > { %s9200_s8 = scalar_lea.vmem (!%p189_p4), [#allocation4], %s7660_s6 }
  0x35   : > { %9037 = dma.done.wait (%p9146_p7), %s195_s7, 102400  }
  0x36   : > { %9039 = vsyncadd (%p9146_p7), %s195_s7, 4294864896  ;;  %s240_s25 = ssub.s32 1, %s9058_s13  ;;  %s242_s29 = ssub.s32 7, %s9054_s12 }
  0x37   : > { %s241_s4 = smul.u32 %s9054_s12, %s240_s25  ;;  %p6767_p7 = scmp.ne.s32.totalorder %s9054_s12, 0 }
  0x38   : > { %s243_s5 = smul.u32 %s9058_s13, %s242_s29  ;;  %v9075_v0 = vmov (!%p6767_p7), 0   ;;  %v9076_v1 = vmov (!%p6767_p7), 0.0  }
  0x39   : > { %s245_s9 = smul.u32 20, %s9058_s13  ;;  %283 = vst [vmem:[#allocation2] sm:$0x1f] (!%p6767_p7), %v9075_v0  ;;  %284 = vst [vmem:[#allocation3] sm:$0xff] (!%p6767_p7), %v9076_v1 }
  0x3a   : > { %s244_s17 = sadd.s32 %s243_s5, %s241_s4  ;;  %s264_s20 = smul.u32 5, %s9058_s13  ;;  %285 = vst [vmem:[#allocation3 + $0x8] sm:$0x3] (!%p6767_p7), %v9076_v1 }
  0x3b   : > { %p246_p10 = scmp.lt.s32.totalorder %s244_s17, 7  ;;  %p248_p5 = scmp.lt.s32.totalorder %s245_s9, 39 }
  0x3c   : > { %p267_p6 = scmp.lt.s32.totalorder %s264_s20, 9  ;;  %282 = sbr.rel (%p6767_p7) target bundleno = 67 (0x43), region = 36 }
  0x3d   : > { %s10226_s17 = smov (!%p246_p10, %s244_s17), 7  ;;  %s10228_s9 = smov (!%p248_p5, %s245_s9), 39 }
  0x3e   : > { %s7661_s21 = smul.u32 40, %s10226_s17  ;;  %s10230_s20 = smov (!%p267_p6, %s264_s20), 9 }
  0x3f   : > { %s7662_s23 = smul.u32 10, %s10226_s17 }
  0x40   : > { %s251_s22 = sadd.s32 %s7661_s21, %s10228_s9 }
  0x41   : > { %s9215_s28 = scalar_lea.vmem %s10207_s0, %s251_s22  ;;  %s9217_s30 = sadd.s32 %s7662_s23, %s10230_s20 }
  0x42   : > { %s271_s13 = scalar_lea.vmem %s10209_s2, %s9217_s30 }
  0x43 PF: > { %v7741_v2 = vld [vmem:[%s9200_s8 + $0x4] ss:$80 sps:$4 sm:$0xff]   ;;  %v7743_v3 = vld [vmem:[%s9200_s8 + $0xc] ss:$80 sps:$4 sm:$0xff]   ;;  %v7745_v4 = vld [vmem:[%s9200_s8] ss:$80 sps:$4 sm:$0xff]   ;;  %v1100_v40 = vlaneseq }
  0x44   : > { %5140 = vmatprep.subr.bf16.mxu0 %v7741_v2  ;;  %v7746_v5 = vld [vmem:[%s9200_s8 + $0x8] ss:$80 sps:$4 sm:$0xff]   ;;  %5263 = vmatprep.subr.bf16.mxu1 %v7743_v3  ;;  %v7747_v6 = vld [vmem:[%s9200_s8 + $0xa4] ss:$80 sps:$4 sm:$0xff]   ;;  %v7749_v7 = vld [vmem:[%s9200_s8 + $0xac] ss:$80 sps:$4 sm:$0xff]  }
  0x45   : > { %5141 = vmatpush1.bf16.msra.mxu0 %v7745_v4  ;;  %5264 = vmatpush1.bf16.msra.mxu1 %v7746_v5  ;;  %v7751_v8 = vld [vmem:[%s9200_s8 + $0xa0] ss:$80 sps:$4 sm:$0xff]   ;;  %v7752_v9 = vld [vmem:[%s9200_s8 + $0xa8] ss:$80 sps:$4 sm:$0xff]   ;;  %v7753_v10 = vld [vmem:[%s9200_s8 + $0x144] ss:$80 sps:$4 sm:$0xff]  }
  0x46   : > { %5142 = vmatprep.subr.bf16.mxu0 %v7747_v6  ;;  %5265 = vmatprep.subr.bf16.mxu1 %v7749_v7  ;;  %v7755_v11 = vld [vmem:[%s9200_s8 + $0x14c] ss:$80 sps:$4 sm:$0xff]   ;;  %v7757_v12 = vld [vmem:[%s9200_s8 + $0x140] ss:$80 sps:$4 sm:$0xff]   ;;  %v7758_v13 = vld [vmem:[%s9200_s8 + $0x148] ss:$80 sps:$4 sm:$0xff]  }
  0x47   : > { %v7759_v14 = vld [vmem:[%s9200_s8 + $0x1e4] ss:$80 sps:$4 sm:$0xff]   ;;  %v7761_v15 = vld [vmem:[%s9200_s8 + $0x1ec] ss:$80 sps:$4 sm:$0xff]   ;;  %v7763_v16 = vld [vmem:[%s9200_s8 + $0x1e0] ss:$80 sps:$4 sm:$0xff]  }
  0x48   : > { %v7764_v17 = vld [vmem:[%s9200_s8 + $0x1e8] ss:$80 sps:$4 sm:$0xff]   ;;  %v7765_v18 = vld [vmem:[%s9200_s8 + $0x284] ss:$80 sps:$4 sm:$0xff]   ;;  %v7767_v19 = vld [vmem:[%s9200_s8 + $0x28c] ss:$80 sps:$4 sm:$0xff]  }
  0x49   : > { %5143 = vmatpush1.bf16.msra.mxu0 %v7751_v8  ;;  %5266 = vmatpush1.bf16.msra.mxu1 %v7752_v9  ;;  %v7769_v20 = vld [vmem:[%s9200_s8 + $0x280] ss:$80 sps:$4 sm:$0xff]   ;;  %v7770_v21 = vld [vmem:[%s9200_s8 + $0x288] ss:$80 sps:$4 sm:$0xff]   ;;  %v7771_v22 = vld [vmem:[%s9200_s8 + $0x324] ss:$80 sps:$4 sm:$0xff]  }
  0x4a   : > { %5144 = vmatprep.subr.bf16.mxu0 %v7753_v10  ;;  %5267 = vmatprep.subr.bf16.mxu1 %v7755_v11  ;;  %v7773_v23 = vld [vmem:[%s9200_s8 + $0x32c] ss:$80 sps:$4 sm:$0xff]   ;;  %v7775_v24 = vld [vmem:[%s9200_s8 + $0x320] ss:$80 sps:$4 sm:$0xff]   ;;  %v7776_v25 = vld [vmem:[%s9200_s8 + $0x328] ss:$80 sps:$4 sm:$0xff]  }
  0x4b   : > { %v7777_v26 = vld [vmem:[%s9200_s8 + $0x3c4] ss:$80 sps:$4 sm:$0xff]   ;;  %v7779_v27 = vld [vmem:[%s9200_s8 + $0x3cc] ss:$80 sps:$4 sm:$0xff]   ;;  %v7781_v28 = vld [vmem:[%s9200_s8 + $0x3c0] ss:$80 sps:$4 sm:$0xff]  }
  0x4c   : > { %v7782_v29 = vld [vmem:[%s9200_s8 + $0x3c8] ss:$80 sps:$4 sm:$0xff]   ;;  %v7783_v30 = vld [vmem:[%s9200_s8 + $0x464] ss:$80 sps:$4 sm:$0xff]   ;;  %v7785_v31 = vld [vmem:[%s9200_s8 + $0x46c] ss:$80 sps:$4 sm:$0xff]  }
  0x4d   : > { %5145 = vmatpush1.bf16.msra.mxu0 %v7757_v12  ;;  %5268 = vmatpush1.bf16.msra.mxu1 %v7758_v13  ;;  %v7787_v32 = vld [vmem:[%s9200_s8 + $0x460] ss:$80 sps:$4 sm:$0xff]   ;;  %v7788_v33 = vld [vmem:[%s9200_s8 + $0x468] ss:$80 sps:$4 sm:$0xff]   ;;  %v7789_v34 = vld [vmem:[%s9200_s8 + $0x504] ss:$80 sps:$4 sm:$0xff]  }
  0x4e   : > { %5146 = vmatprep.subr.bf16.mxu0 %v7759_v14  ;;  %5269 = vmatprep.subr.bf16.mxu1 %v7761_v15  ;;  %v7791_v35 = vld [vmem:[%s9200_s8 + $0x50c] ss:$80 sps:$4 sm:$0xff]   ;;  %v7793_v36 = vld [vmem:[%s9200_s8 + $0x500] ss:$80 sps:$4 sm:$0xff]   ;;  %v7794_v37 = vld [vmem:[%s9200_s8 + $0x508] ss:$80 sps:$4 sm:$0xff]  }
  0x4f   : > { %v9077_v38 = vmov 1966171168   ;;  %v7795_v41 = vld [vmem:[%s9200_s8 + $0x5a4] ss:$80 sps:$4 sm:$0xff]   ;;  %v7797_v42 = vld [vmem:[%s9200_s8 + $0x5ac] ss:$80 sps:$4 sm:$0xff]  }
  0x50   : > { %v1098_v39 = vunpack.c.l.s4 %v9077_v38  ;;  %v7799_v43 = vld [vmem:[%s9200_s8 + $0x5a0] ss:$80 sps:$4 sm:$0xff]   ;;  %v9263_v45 = vshrl.u32 %v1100_v40, 7  ;;  %v7800_v46 = vld [vmem:[%s9200_s8 + $0x5a8] ss:$80 sps:$4 sm:$0xff]   ;;  %vm6501_vm0 = vcmask 1045504  }
  0x51   : > { %5147 = vmatpush1.bf16.msra.mxu0 %v7763_v16  ;;  %5270 = vmatpush1.bf16.msra.mxu1 %v7764_v17  ;;  %v7801_v47 = vld [vmem:[%s9200_s8 + $0x644] ss:$80 sps:$4 sm:$0xff]   ;;  %v7803_v48 = vld [vmem:[%s9200_s8 + $0x64c] ss:$80 sps:$4 sm:$0xff]   ;;  %v7805_v49 = vld [vmem:[%s9200_s8 + $0x640] ss:$80 sps:$4 sm:$0xff]  }
  0x52   : > { %5148 = vmatprep.subr.bf16.mxu0 %v7765_v18  ;;  %5271 = vmatprep.subr.bf16.mxu1 %v7767_v19  ;;  %v1099_v44 = vunpack.c.0.s8 %v1098_v39  ;;  %v7806_v50 = vld [vmem:[%s9200_s8 + $0x648] ss:$80 sps:$4 sm:$0xff]   ;;  %v7807_v52 = vld [vmem:[%s9200_s8 + $0x6e4] ss:$80 sps:$4 sm:$0xff]   ;;  %v7809_v53 = vld [vmem:[%s9200_s8 + $0x6ec] ss:$80 sps:$4 sm:$0xff]  }
  0x53   : > { %v9275_v54 = vld [vmem:[#allocation2] sm:$0x1f]  ;;  %v7812_v57 = vld [vmem:[%s9200_s8 + $0x6e8] ss:$80 sps:$4 sm:$0xff]   ;;  %v7815_v59 = vld [vmem:[%s9200_s8 + $0x78c] ss:$80 sps:$4 sm:$0xff]  }
  0x54   : > { %v9271_v51 = vsub.s32 %v1099_v44, %v9263_v45  ;;  %v7811_v55 = vld [vmem:[%s9200_s8 + $0x6e0] ss:$80 sps:$4 sm:$0xff]   ;;  %v7813_v58 = vld [vmem:[%s9200_s8 + $0x784] ss:$80 sps:$4 sm:$0xff]   ;;  %v7818_v63 = vld [vmem:[%s9200_s8 + $0x788] ss:$80 sps:$4 sm:$0xff]  }
  0x55   : > { %5149 = vmatpush1.bf16.msra.mxu0 %v7769_v20  ;;  %5272 = vmatpush1.bf16.msra.mxu1 %v7770_v21  ;;  %v7817_v61 = vld [vmem:[%s9200_s8 + $0x780] ss:$80 sps:$4 sm:$0xff]   ;;  %v7819_v0 = vld [vmem:[%s9200_s8 + $0x824] ss:$80 sps:$4 sm:$0xff]   ;;  %v7821_v1 = vld [vmem:[%s9200_s8 + $0x82c] ss:$80 sps:$4 sm:$0xff]  }
  0x56   : > { %5150 = vmatprep.subr.bf16.mxu0 %v7771_v22  ;;  %5273 = vmatprep.subr.bf16.mxu1 %v7773_v23  ;;  %v1103_v56 = vrot.slane %v9275_v54, %v9271_v51  ;;  %v7823_v2 = vld [vmem:[%s9200_s8 + $0x820] ss:$80 sps:$4 sm:$0xff]   ;;  %v7824_v3 = vld [vmem:[%s9200_s8 + $0x828] ss:$80 sps:$4 sm:$0xff]   ;;  %v7825_v4 = vld [vmem:[%s9200_s8 + $0x8c4] ss:$80 sps:$4 sm:$0xff]  }
  0x57   : > { %v7827_v5 = vld [vmem:[%s9200_s8 + $0x8cc] ss:$80 sps:$4 sm:$0xff]   ;;  %v7829_v6 = vld [vmem:[%s9200_s8 + $0x8c0] ss:$80 sps:$4 sm:$0xff]   ;;  %v7830_v7 = vld [vmem:[%s9200_s8 + $0x8c8] ss:$80 sps:$4 sm:$0xff]  }
  0x58   : > { %v1111_v60 = vcombine.high %v1103_v56, %v1103_v56  ;;  %v7831_v8 = vld [vmem:[%s9200_s8 + $0x964] ss:$80 sps:$4 sm:$0xff]   ;;  %v7833_v9 = vld [vmem:[%s9200_s8 + $0x96c] ss:$80 sps:$4 sm:$0xff]   ;;  %v7835_v10 = vld [vmem:[%s9200_s8 + $0x960] ss:$80 sps:$4 sm:$0xff]   ;;  %v9306_v15 = vrot.slane %v1103_v56, %v9271_v51 }
  0x59   : > { %5151 = vmatpush1.bf16.msra.mxu0 %v7775_v24  ;;  %5274 = vmatpush1.bf16.msra.mxu1 %v7776_v25  ;;  %v7836_v11 = vld [vmem:[%s9200_s8 + $0x968] ss:$80 sps:$4 sm:$0xff]   ;;  %v7839_v12 = vld [vmem:[%s9200_s8 + $0xa04] ss:$80 sps:$4 sm:$0xff]   ;;  %v7842_v13 = vld [vmem:[%s9200_s8 + $0xa0c] ss:$80 sps:$4 sm:$0xff]  }
  0x5a   : > { %5152 = vmatprep.subr.bf16.mxu0 %v7777_v26  ;;  %5275 = vmatprep.subr.bf16.mxu1 %v7779_v27  ;;  %v9285_v62 = vrot.slane %v1111_v60, %v9271_v51  ;;  %v7837_v14 = vld [vmem:[%s9200_s8 + $0xa00] ss:$80 sps:$4 sm:$0xff]   ;;  %v7840_v16 = vld [vmem:[%s9200_s8 + $0xa08] ss:$80 sps:$4 sm:$0xff]   ;;  %v7845_v17 = vld [vmem:[%s9200_s8 + $0xaa4] ss:$80 sps:$4 sm:$0xff]  }
  0x5b   : > { %v7848_v18 = vld [vmem:[%s9200_s8 + $0xaac] ss:$80 sps:$4 sm:$0xff]   ;;  %v7843_v20 = vld [vmem:[%s9200_s8 + $0xaa0] ss:$80 sps:$4 sm:$0xff]   ;;  %v7846_v21 = vld [vmem:[%s9200_s8 + $0xaa8] ss:$80 sps:$4 sm:$0xff]  }
  0x5c   : > { %5172 = vmatprep.mubr.bf16.mxu0 %v9285_v62  ;;  %5295 = vmatprep.mubr.bf16.mxu1 %v9285_v62  ;;  %v9313_v19 = vcombine.high %v9285_v62, %v9285_v62  ;;  %v7851_v22 = vld [vmem:[%s9200_s8 + $0xb44] ss:$80 sps:$4 sm:$0xff]   ;;  %v7854_v23 = vld [vmem:[%s9200_s8 + $0xb4c] ss:$80 sps:$4 sm:$0xff]   ;;  %v7849_v24 = vld [vmem:[%s9200_s8 + $0xb40] ss:$80 sps:$4 sm:$0xff]  }
  0x5d   : > { %5153 = vmatpush1.bf16.msra.mxu0 %v7781_v28  ;;  %5276 = vmatpush1.bf16.msra.mxu1 %v7782_v29  ;;  %v7852_v25 = vld [vmem:[%s9200_s8 + $0xb48] ss:$80 sps:$4 sm:$0xff]   ;;  %v7857_v26 = vld [vmem:[%s9200_s8 + $0xbe4] ss:$80 sps:$4 sm:$0xff]   ;;  %v7860_v27 = vld [vmem:[%s9200_s8 + $0xbec] ss:$80 sps:$4 sm:$0xff]  }
  0x5e   : > { %5154 = vmatprep.subr.bf16.mxu0 %v7783_v30  ;;  %5277 = vmatprep.subr.bf16.mxu1 %v7785_v31  ;;  %v7855_v28 = vld [vmem:[%s9200_s8 + $0xbe0] ss:$80 sps:$4 sm:$0xff]   ;;  %v7858_v29 = vld [vmem:[%s9200_s8 + $0xbe8] ss:$80 sps:$4 sm:$0xff]   ;;  %v7863_v30 = vld [vmem:[%s9200_s8 + $0xc84] ss:$80 sps:$4 sm:$0xff]  }
  0x5f   : > { %v7866_v31 = vld [vmem:[%s9200_s8 + $0xc8c] ss:$80 sps:$4 sm:$0xff]   ;;  %v7875_v38 = vld [vmem:[%s9200_s8 + $0xdc4] ss:$80 sps:$4 sm:$0xff]   ;;  %v7873_v40 = vld [vmem:[%s9200_s8 + $0xdc0] ss:$80 sps:$4 sm:$0xff]  }
  0x60   : > { %v7878_v39 = vld [vmem:[%s9200_s8 + $0xdcc] ss:$80 sps:$4 sm:$0xff]   ;;  %v7879_v44 = vld [vmem:[%s9200_s8 + $0xe60] ss:$80 sps:$4 sm:$0xff]   ;;  %v7894_v56 = vld [vmem:[%s9200_s8 + $0xfa8] ss:$80 sps:$4 sm:$0xff]  }
  0x61   : > { %5155 = vmatpush1.bf16.msra.mxu0 %v7787_v32  ;;  %5278 = vmatpush1.bf16.msra.mxu1 %v7788_v33  ;;  %v7861_v32 = vld [vmem:[%s9200_s8 + $0xc80] ss:$80 sps:$4 sm:$0xff]   ;;  %v7864_v33 = vld [vmem:[%s9200_s8 + $0xc88] ss:$80 sps:$4 sm:$0xff]   ;;  %vm6520_vm1 = vcmask 1043456   ;;  %vm6529_vm2 = vcmask 1041408  }
  0x62   : > { %5156 = vmatprep.subr.bf16.mxu0 %v7789_v34  ;;  %5279 = vmatprep.subr.bf16.mxu1 %v7791_v35  ;;  %v7869_v34 = vld [vmem:[%s9200_s8 + $0xd24] ss:$80 sps:$4 sm:$0xff]   ;;  %v7872_v35 = vld [vmem:[%s9200_s8 + $0xd2c] ss:$80 sps:$4 sm:$0xff]   ;;  %v7900_v60 = vld [vmem:[%s9200_s8 + $0x1048] ss:$80 sps:$4 sm:$0xff]  }
  0x65   : > { %5157 = vmatpush1.bf16.msra.mxu0 %v7793_v36  ;;  %5280 = vmatpush1.bf16.msra.mxu1 %v7794_v37  ;;  %v7867_v36 = vld [vmem:[%s9200_s8 + $0xd20] ss:$80 sps:$4 sm:$0xff]   ;;  %v7870_v37 = vld [vmem:[%s9200_s8 + $0xd28] ss:$80 sps:$4 sm:$0xff]  }
  0x66   : > { %5158 = vmatprep.subr.bf16.mxu0 %v7795_v41  ;;  %5281 = vmatprep.subr.bf16.mxu1 %v7797_v42  ;;  %v7876_v41 = vld [vmem:[%s9200_s8 + $0xdc8] ss:$80 sps:$4 sm:$0xff]   ;;  %v7881_v42 = vld [vmem:[%s9200_s8 + $0xe64] ss:$80 sps:$4 sm:$0xff]  }
  0x69   : > { %5159 = vmatpush1.bf16.msra.mxu0 %v7799_v43  ;;  %5282 = vmatpush1.bf16.msra.mxu1 %v7800_v46  ;;  %v7884_v43 = vld [vmem:[%s9200_s8 + $0xe6c] ss:$80 sps:$4 sm:$0xff]   ;;  %v7882_v46 = vld [vmem:[%s9200_s8 + $0xe68] ss:$80 sps:$4 sm:$0xff]  }
  0x6a   : > { %5160 = vmatprep.subr.bf16.mxu0 %v7801_v47  ;;  %5283 = vmatprep.subr.bf16.mxu1 %v7803_v48  ;;  %v7887_v47 = vld [vmem:[%s9200_s8 + $0xf04] ss:$80 sps:$4 sm:$0xff]   ;;  %v7890_v48 = vld [vmem:[%s9200_s8 + $0xf0c] ss:$80 sps:$4 sm:$0xff]  }
  0x6d   : > { %5161 = vmatpush1.bf16.msra.mxu0 %v7805_v49  ;;  %5284 = vmatpush1.bf16.msra.mxu1 %v7806_v50  ;;  %v7885_v49 = vld [vmem:[%s9200_s8 + $0xf00] ss:$80 sps:$4 sm:$0xff]   ;;  %v7888_v50 = vld [vmem:[%s9200_s8 + $0xf08] ss:$80 sps:$4 sm:$0xff]  }
  0x6e   : > { %5162 = vmatprep.subr.bf16.mxu0 %v7807_v52  ;;  %5285 = vmatprep.subr.bf16.mxu1 %v7809_v53  ;;  %v7893_v52 = vld [vmem:[%s9200_s8 + $0xfa4] ss:$80 sps:$4 sm:$0xff]   ;;  %v7896_v53 = vld [vmem:[%s9200_s8 + $0xfac] ss:$80 sps:$4 sm:$0xff]  }
  0x71   : > { %5163 = vmatpush1.bf16.msra.mxu0 %v7811_v55  ;;  %5286 = vmatpush1.bf16.msra.mxu1 %v7812_v57  ;;  %v7891_v55 = vld [vmem:[%s9200_s8 + $0xfa0] ss:$80 sps:$4 sm:$0xff]   ;;  %v7899_v57 = vld [vmem:[%s9200_s8 + $0x1044] ss:$80 sps:$4 sm:$0xff]  }
  0x72   : > { %5164 = vmatprep.subr.bf16.mxu0 %v7813_v58  ;;  %5287 = vmatprep.subr.bf16.mxu1 %v7815_v59  ;;  %v7902_v58 = vld [vmem:[%s9200_s8 + $0x104c] ss:$80 sps:$4 sm:$0xff]   ;;  %v7897_v59 = vld [vmem:[%s9200_s8 + $0x1040] ss:$80 sps:$4 sm:$0xff]  }
  0x75   : > { %5165 = vmatpush1.bf16.msra.mxu0 %v7817_v61  ;;  %5288 = vmatpush1.bf16.msra.mxu1 %v7818_v63  ;;  %v7905_v61 = vld [vmem:[%s9200_s8 + $0x10e4] ss:$80 sps:$4 sm:$0xff]   ;;  %v7908_v63 = vld [vmem:[%s9200_s8 + $0x10ec] ss:$80 sps:$4 sm:$0xff]  }
  0x76   : > { %5166 = vmatprep.subr.bf16.mxu0 %v7819_v0  ;;  %5289 = vmatprep.subr.bf16.mxu1 %v7821_v1  ;;  %v7903_v0 = vld [vmem:[%s9200_s8 + $0x10e0] ss:$80 sps:$4 sm:$0xff]   ;;  %v7906_v1 = vld [vmem:[%s9200_s8 + $0x10e8] ss:$80 sps:$4 sm:$0xff]  }
  0x79   : > { %5167 = vmatpush1.bf16.msra.mxu0 %v7823_v2  ;;  %5290 = vmatpush1.bf16.msra.mxu1 %v7824_v3  ;;  %v7911_v2 = vld [vmem:[%s9200_s8 + $0x1184] ss:$80 sps:$4 sm:$0xff]   ;;  %v7914_v3 = vld [vmem:[%s9200_s8 + $0x118c] ss:$80 sps:$4 sm:$0xff]  }
  0x7a   : > { %5168 = vmatprep.subr.bf16.mxu0 %v7825_v4  ;;  %5291 = vmatprep.subr.bf16.mxu1 %v7827_v5  ;;  %v7909_v4 = vld [vmem:[%s9200_s8 + $0x1180] ss:$80 sps:$4 sm:$0xff]   ;;  %v7912_v5 = vld [vmem:[%s9200_s8 + $0x1188] ss:$80 sps:$4 sm:$0xff]  }
  0x7d   : > { %5169 = vmatpush1.bf16.msra.mxu0 %v7829_v6  ;;  %5292 = vmatpush1.bf16.msra.mxu1 %v7830_v7  ;;  %v7917_v6 = vld [vmem:[%s9200_s8 + $0x1224] ss:$80 sps:$4 sm:$0xff]   ;;  %v7920_v7 = vld [vmem:[%s9200_s8 + $0x122c] ss:$80 sps:$4 sm:$0xff]  }
  0x7e   : > { %5170 = vmatprep.subr.bf16.mxu0 %v7831_v8  ;;  %5293 = vmatprep.subr.bf16.mxu1 %v7833_v9  ;;  %v7915_v8 = vld [vmem:[%s9200_s8 + $0x1220] ss:$80 sps:$4 sm:$0xff]   ;;  %v7918_v9 = vld [vmem:[%s9200_s8 + $0x1228] ss:$80 sps:$4 sm:$0xff]  }
  0x81   : > { %5171 = vmatpush1.bf16.msra.mxu0 %v7835_v10  ;;  %5294 = vmatpush1.bf16.msra.mxu1 %v7836_v11  ;;  %v7923_v10 = vld [vmem:[%s9200_s8 + $0x12c4] ss:$80 sps:$4 sm:$0xff]   ;;  %v7926_v11 = vld [vmem:[%s9200_s8 + $0x12cc] ss:$80 sps:$4 sm:$0xff]  }
  0x82   : > { %5181 = vmatprep.subr.bf16.mxu0 %v7839_v12  ;;  %5304 = vmatprep.subr.bf16.mxu1 %v7842_v13  ;;  %v7921_v12 = vld [vmem:[%s9200_s8 + $0x12c0] ss:$80 sps:$4 sm:$0xff]   ;;  %v7924_v13 = vld [vmem:[%s9200_s8 + $0x12c8] ss:$80 sps:$4 sm:$0xff]  }
  0x84   : > { %5173 = vmatmul.mubr.bf16.vlgmr.msra.gmra.mrb[0].mxu0 %v9306_v15  ;;  %5296 = vmatmul.mubr.bf16.vlgmr.msra.gmra.mrb[0].mxu1 %v9306_v15 }
  0x85   : > { %5182 = vmatpush1.bf16.msra.mxu0 %v7837_v14  ;;  %5305 = vmatpush1.bf16.msra.mxu1 %v7840_v16  ;;  %v7929_v14 = vld [vmem:[%s9200_s8 + $0x1364] ss:$80 sps:$4 sm:$0xff]   ;;  %v7932_v16 = vld [vmem:[%s9200_s8 + $0x136c] ss:$80 sps:$4 sm:$0xff]  }
  0x86   : > { %5183 = vmatprep.subr.bf16.mxu0 %v7845_v17  ;;  %5306 = vmatprep.subr.bf16.mxu1 %v7848_v18  ;;  %v7927_v17 = vld [vmem:[%s9200_s8 + $0x1360] ss:$80 sps:$4 sm:$0xff]   ;;  %v7930_v18 = vld [vmem:[%s9200_s8 + $0x1368] ss:$80 sps:$4 sm:$0xff]  }
  0x87   : > { %5213 = vmatprep.mubr.bf16.mxu0 %v9313_v19  ;;  %5336 = vmatprep.mubr.bf16.mxu1 %v9313_v19 }
  0x89   : > { %5184 = vmatpush1.bf16.msra.mxu0 %v7843_v20  ;;  %5307 = vmatpush1.bf16.msra.mxu1 %v7846_v21  ;;  %v7935_v20 = vld [vmem:[%s9200_s8 + $0x1404] ss:$80 sps:$4 sm:$0xff]   ;;  %v7938_v21 = vld [vmem:[%s9200_s8 + $0x140c] ss:$80 sps:$4 sm:$0xff]  }
  0x8a   : > { %5185 = vmatprep.subr.bf16.mxu0 %v7851_v22  ;;  %5308 = vmatprep.subr.bf16.mxu1 %v7854_v23  ;;  %v7933_v22 = vld [vmem:[%s9200_s8 + $0x1400] ss:$80 sps:$4 sm:$0xff]   ;;  %v9382_v23 = vcombine.high %v9306_v15, %v9306_v15 }
  0x8d   : > { %5186 = vmatpush1.bf16.msra.mxu0 %v7849_v24  ;;  %5309 = vmatpush1.bf16.msra.mxu1 %v7852_v25  ;;  %v7936_v24 = vld [vmem:[%s9200_s8 + $0x1408] ss:$80 sps:$4 sm:$0xff]   ;;  %v7941_v25 = vld [vmem:[%s9200_s8 + $0x14a4] ss:$80 sps:$4 sm:$0xff]  }
  0x8e   : > { %5187 = vmatprep.subr.bf16.mxu0 %v7857_v26  ;;  %5310 = vmatprep.subr.bf16.mxu1 %v7860_v27  ;;  %v7944_v26 = vld [vmem:[%s9200_s8 + $0x14ac] ss:$80 sps:$4 sm:$0xff]   ;;  %v7939_v27 = vld [vmem:[%s9200_s8 + $0x14a0] ss:$80 sps:$4 sm:$0xff]  }
  0x91   : > { %5188 = vmatpush1.bf16.msra.mxu0 %v7855_v28  ;;  %5311 = vmatpush1.bf16.msra.mxu1 %v7858_v29  ;;  %v7942_v28 = vld [vmem:[%s9200_s8 + $0x14a8] ss:$80 sps:$4 sm:$0xff]   ;;  %v7947_v29 = vld [vmem:[%s9200_s8 + $0x1544] ss:$80 sps:$4 sm:$0xff]  }
  0x92   : > { %5189 = vmatprep.subr.bf16.mxu0 %v7863_v30  ;;  %5312 = vmatprep.subr.bf16.mxu1 %v7866_v31  ;;  %v7950_v30 = vld [vmem:[%s9200_s8 + $0x154c] ss:$80 sps:$4 sm:$0xff]   ;;  %v9078_v31 = vmov 0  }
  0x95   : > { %5190 = vmatpush1.bf16.msra.mxu0 %v7861_v32  ;;  %5313 = vmatpush1.bf16.msra.mxu1 %v7864_v33  ;;  %v7945_v32 = vld [vmem:[%s9200_s8 + $0x1540] ss:$80 sps:$4 sm:$0xff]   ;;  %v7948_v33 = vld [vmem:[%s9200_s8 + $0x1548] ss:$80 sps:$4 sm:$0xff]  }
  0x96   : > { %5191 = vmatprep.subr.bf16.mxu0 %v7869_v34  ;;  %5314 = vmatprep.subr.bf16.mxu1 %v7872_v35  ;;  %v7953_v34 = vld [vmem:[%s9200_s8 + $0x15e4] ss:$80 sps:$4 sm:$0xff]   ;;  %v7956_v35 = vld [vmem:[%s9200_s8 + $0x15ec] ss:$80 sps:$4 sm:$0xff]  }
  0x99   : > { %5192 = vmatpush1.bf16.msra.mxu0 %v7867_v36  ;;  %5315 = vmatpush1.bf16.msra.mxu1 %v7870_v37  ;;  %v7951_v36 = vld [vmem:[%s9200_s8 + $0x15e0] ss:$80 sps:$4 sm:$0xff]   ;;  %v7954_v37 = vld [vmem:[%s9200_s8 + $0x15e8] ss:$80 sps:$4 sm:$0xff]  }
  0x9a   : > { %5193 = vmatprep.subr.bf16.mxu0 %v7875_v38  ;;  %5316 = vmatprep.subr.bf16.mxu1 %v7878_v39  ;;  %v7959_v38 = vld [vmem:[%s9200_s8 + $0x1684] ss:$80 sps:$4 sm:$0xff]   ;;  %v7962_v39 = vld [vmem:[%s9200_s8 + $0x168c] ss:$80 sps:$4 sm:$0xff]  }
  0x9d   : > { %5194 = vmatpush1.bf16.msra.mxu0 %v7873_v40  ;;  %5317 = vmatpush1.bf16.msra.mxu1 %v7876_v41  ;;  %v7957_v40 = vld [vmem:[%s9200_s8 + $0x1680] ss:$80 sps:$4 sm:$0xff]   ;;  %v7960_v41 = vld [vmem:[%s9200_s8 + $0x1688] ss:$80 sps:$4 sm:$0xff]  }
  0x9e   : > { %5195 = vmatprep.subr.bf16.mxu0 %v7881_v42  ;;  %5318 = vmatprep.subr.bf16.mxu1 %v7884_v43  ;;  %v7965_v42 = vld [vmem:[%s9200_s8 + $0x1724] ss:$80 sps:$4 sm:$0xff]   ;;  %v7968_v43 = vld [vmem:[%s9200_s8 + $0x172c] ss:$80 sps:$4 sm:$0xff]  }
  0xa1   : > { %5196 = vmatpush1.bf16.msra.mxu0 %v7879_v44  ;;  %5319 = vmatpush1.bf16.msra.mxu1 %v7882_v46  ;;  %v7963_v44 = vld [vmem:[%s9200_s8 + $0x1720] ss:$80 sps:$4 sm:$0xff]   ;;  %v7966_v46 = vld [vmem:[%s9200_s8 + $0x1728] ss:$80 sps:$4 sm:$0xff]  }
  0xa2   : > { %5197 = vmatprep.subr.bf16.mxu0 %v7887_v47  ;;  %5320 = vmatprep.subr.bf16.mxu1 %v7890_v48  ;;  %v7971_v47 = vld [vmem:[%s9200_s8 + $0x17c4] ss:$80 sps:$4 sm:$0xff]   ;;  %v7974_v48 = vld [vmem:[%s9200_s8 + $0x17cc] ss:$80 sps:$4 sm:$0xff]  }
  0xa5   : > { %5198 = vmatpush1.bf16.msra.mxu0 %v7885_v49  ;;  %5321 = vmatpush1.bf16.msra.mxu1 %v7888_v50  ;;  %v7969_v49 = vld [vmem:[%s9200_s8 + $0x17c0] ss:$80 sps:$4 sm:$0xff]   ;;  %v1096_v50 = vcombine.high %v9275_v54, %v9275_v54  ;;  %v7984_v54 = vld [vmem:[%s9200_s8 + $0x14] ss:$80 sps:$4 sm:$0xff]  }
  0xa6   : > { %5199 = vmatprep.subr.bf16.mxu0 %v7893_v52  ;;  %5322 = vmatprep.subr.bf16.mxu1 %v7896_v53  ;;  %v7972_v52 = vld [vmem:[%s9200_s8 + $0x17c8] ss:$80 sps:$4 sm:$0xff]   ;;  %v7977_v53 = vld [vmem:[%s9200_s8 + $0x1864] ss:$80 sps:$4 sm:$0xff]  }
  0xa9   : > { %5200 = vmatpush1.bf16.msra.mxu0 %v7891_v55  ;;  %5323 = vmatpush1.bf16.msra.mxu1 %v7894_v56  ;;  %v7980_v55 = vld [vmem:[%s9200_s8 + $0x186c] ss:$80 sps:$4 sm:$0xff]   ;;  %v7975_v56 = vld [vmem:[%s9200_s8 + $0x1860] ss:$80 sps:$4 sm:$0xff]  }
  0xaa   : > { %5201 = vmatprep.subr.bf16.mxu0 %v7899_v57  ;;  %5324 = vmatprep.subr.bf16.mxu1 %v7902_v58  ;;  %v1110_v57 = vrot.slane %v1096_v50, %v9271_v51  ;;  %v7978_v58 = vld [vmem:[%s9200_s8 + $0x1868] ss:$80 sps:$4 sm:$0xff]   ;;  %v8059_v50 = vld [vmem:[%s9200_s8 + $0x79c] ss:$80 sps:$4 sm:$0xff]  }
  0xad   : > { %5202 = vmatpush1.bf16.msra.mxu0 %v7897_v59  ;;  %5325 = vmatpush1.bf16.msra.mxu1 %v7900_v60  ;;  %v7987_v59 = vld [vmem:[%s9200_s8 + $0x1c] ss:$80 sps:$4 sm:$0xff]   ;;  %v9423_v60 = vrot.slane %v1110_v57, %v9271_v51  ;;  %v8060_v57 = vld [vmem:[%s9200_s8 + $0x830] ss:$80 sps:$4 sm:$0xff]  }
  0xae   : > { %5203 = vmatprep.subr.bf16.mxu0 %v7905_v61  ;;  %5326 = vmatprep.subr.bf16.mxu1 %v7908_v63  ;;  %v7982_v61 = vld [vmem:[%s9200_s8 + $0x10] ss:$80 sps:$4 sm:$0xff]   ;;  %v7985_v63 = vld [vmem:[%s9200_s8 + $0x18] ss:$80 sps:$4 sm:$0xff]  }
  0xb1   : > { %5204 = vmatpush1.bf16.msra.mxu0 %v7903_v0  ;;  %5327 = vmatpush1.bf16.msra.mxu1 %v7906_v1  ;;  %v7990_v0 = vld [vmem:[%s9200_s8 + $0xb4] ss:$80 sps:$4 sm:$0xff]   ;;  %v7993_v1 = vld [vmem:[%s9200_s8 + $0xbc] ss:$80 sps:$4 sm:$0xff]  }
  0xb2   : > { %5205 = vmatprep.subr.bf16.mxu0 %v7911_v2  ;;  %5328 = vmatprep.subr.bf16.mxu1 %v7914_v3  ;;  %v7988_v2 = vld [vmem:[%s9200_s8 + $0xb0] ss:$80 sps:$4 sm:$0xff]   ;;  %v7991_v3 = vld [vmem:[%s9200_s8 + $0xb8] ss:$80 sps:$4 sm:$0xff]  }
  0xb5   : > { %5206 = vmatpush1.bf16.msra.mxu0 %v7909_v4  ;;  %5329 = vmatpush1.bf16.msra.mxu1 %v7912_v5  ;;  %v7996_v4 = vld [vmem:[%s9200_s8 + $0x154] ss:$80 sps:$4 sm:$0xff]   ;;  %v7999_v5 = vld [vmem:[%s9200_s8 + $0x15c] ss:$80 sps:$4 sm:$0xff]  }
  0xb6   : > { %5207 = vmatprep.subr.bf16.mxu0 %v7917_v6  ;;  %5330 = vmatprep.subr.bf16.mxu1 %v7920_v7  ;;  %v7994_v6 = vld [vmem:[%s9200_s8 + $0x150] ss:$80 sps:$4 sm:$0xff]   ;;  %v7997_v7 = vld [vmem:[%s9200_s8 + $0x158] ss:$80 sps:$4 sm:$0xff]  }
  0xb9   : > { %5208 = vmatpush1.bf16.msra.mxu0 %v7915_v8  ;;  %5331 = vmatpush1.bf16.msra.mxu1 %v7918_v9  ;;  %v8002_v8 = vld [vmem:[%s9200_s8 + $0x1f4] ss:$80 sps:$4 sm:$0xff]   ;;  %v8005_v9 = vld [vmem:[%s9200_s8 + $0x1fc] ss:$80 sps:$4 sm:$0xff]  }
  0xba   : > { %5209 = vmatprep.subr.bf16.mxu0 %v7923_v10  ;;  %5332 = vmatprep.subr.bf16.mxu1 %v7926_v11  ;;  %v8000_v10 = vld [vmem:[%s9200_s8 + $0x1f0] ss:$80 sps:$4 sm:$0xff]   ;;  %v8003_v11 = vld [vmem:[%s9200_s8 + $0x1f8] ss:$80 sps:$4 sm:$0xff]  }
  0xbd   : > { %5210 = vmatpush1.bf16.msra.mxu0 %v7921_v12  ;;  %5333 = vmatpush1.bf16.msra.mxu1 %v7924_v13  ;;  %v8008_v12 = vld [vmem:[%s9200_s8 + $0x294] ss:$80 sps:$4 sm:$0xff]   ;;  %v8011_v13 = vld [vmem:[%s9200_s8 + $0x29c] ss:$80 sps:$4 sm:$0xff]  }
  0xbe   : > { %5211 = vmatprep.subr.bf16.mxu0 %v7929_v14  ;;  %5334 = vmatprep.subr.bf16.mxu1 %v7932_v16  ;;  %v8006_v14 = vld [vmem:[%s9200_s8 + $0x290] ss:$80 sps:$4 sm:$0xff]   ;;  %v8009_v16 = vld [vmem:[%s9200_s8 + $0x298] ss:$80 sps:$4 sm:$0xff]  }
  0xc1   : > { %5212 = vmatpush1.bf16.msra.mxu0 %v7927_v17  ;;  %5335 = vmatpush1.bf16.msra.mxu1 %v7930_v18  ;;  %v8014_v17 = vld [vmem:[%s9200_s8 + $0x334] ss:$80 sps:$4 sm:$0xff]   ;;  %v8017_v18 = vld [vmem:[%s9200_s8 + $0x33c] ss:$80 sps:$4 sm:$0xff]  }
  0xc2   : > { %5222 = vmatprep.subr.bf16.mxu0 %v7935_v20  ;;  %5345 = vmatprep.subr.bf16.mxu1 %v7938_v21  ;;  %v8012_v20 = vld [vmem:[%s9200_s8 + $0x330] ss:$80 sps:$4 sm:$0xff]   ;;  %v8015_v21 = vld [vmem:[%s9200_s8 + $0x338] ss:$80 sps:$4 sm:$0xff]  }
  0xc4   : > { %5214 = vmatmul.mubr.bf16.vlgmr.msra.gmra.mrb[0].mxu0 %v9382_v23  ;;  %5337 = vmatmul.mubr.bf16.vlgmr.msra.gmra.mrb[0].mxu1 %v9382_v23 }
  0xc5   : > { %5223 = vmatpush1.bf16.msra.mxu0 %v7933_v22  ;;  %5346 = vmatpush1.bf16.msra.mxu1 %v7936_v24  ;;  %v8020_v22 = vld [vmem:[%s9200_s8 + $0x3d4] ss:$80 sps:$4 sm:$0xff]   ;;  %v8023_v24 = vld [vmem:[%s9200_s8 + $0x3dc] ss:$80 sps:$4 sm:$0xff]  }
  0xc6   : > { %5224 = vmatprep.subr.bf16.mxu0 %v7941_v25  ;;  %5347 = vmatprep.subr.bf16.mxu1 %v7944_v26  ;;  %v8018_v25 = vld [vmem:[%s9200_s8 + $0x3d0] ss:$80 sps:$4 sm:$0xff]   ;;  %v8021_v26 = vld [vmem:[%s9200_s8 + $0x3d8] ss:$80 sps:$4 sm:$0xff]  }
  0xc7   : > { %5254 = vmatprep.mubr.bf16.mxu0 %v9078_v31  ;;  %5377 = vmatprep.mubr.bf16.mxu1 %v9078_v31 }
  0xc9   : > { %5225 = vmatpush1.bf16.msra.mxu0 %v7939_v27  ;;  %5348 = vmatpush1.bf16.msra.mxu1 %v7942_v28  ;;  %v8026_v27 = vld [vmem:[%s9200_s8 + $0x474] ss:$80 sps:$4 sm:$0xff]   ;;  %v8029_v28 = vld [vmem:[%s9200_s8 + $0x47c] ss:$80 sps:$4 sm:$0xff]  }
  0xca   : > { %5226 = vmatprep.subr.bf16.mxu0 %v7947_v29  ;;  %5349 = vmatprep.subr.bf16.mxu1 %v7950_v30  ;;  %v8024_v29 = vld [vmem:[%s9200_s8 + $0x470] ss:$80 sps:$4 sm:$0xff]   ;;  %v8027_v30 = vld [vmem:[%s9200_s8 + $0x478] ss:$80 sps:$4 sm:$0xff]  }
  0xcd   : > { %5227 = vmatpush1.bf16.msra.mxu0 %v7945_v32  ;;  %5350 = vmatpush1.bf16.msra.mxu1 %v7948_v33  ;;  %v8032_v32 = vld [vmem:[%s9200_s8 + $0x514] ss:$80 sps:$4 sm:$0xff]   ;;  %v8035_v33 = vld [vmem:[%s9200_s8 + $0x51c] ss:$80 sps:$4 sm:$0xff]  }
  0xce   : > { %5228 = vmatprep.subr.bf16.mxu0 %v7953_v34  ;;  %5351 = vmatprep.subr.bf16.mxu1 %v7956_v35  ;;  %v8030_v34 = vld [vmem:[%s9200_s8 + $0x510] ss:$80 sps:$4 sm:$0xff]   ;;  %v8033_v35 = vld [vmem:[%s9200_s8 + $0x518] ss:$80 sps:$4 sm:$0xff]  }
  0xd1   : > { %5229 = vmatpush1.bf16.msra.mxu0 %v7951_v36  ;;  %5352 = vmatpush1.bf16.msra.mxu1 %v7954_v37  ;;  %v8038_v36 = vld [vmem:[%s9200_s8 + $0x5b4] ss:$80 sps:$4 sm:$0xff]   ;;  %v8041_v37 = vld [vmem:[%s9200_s8 + $0x5bc] ss:$80 sps:$4 sm:$0xff]  }
  0xd2   : > { %5230 = vmatprep.subr.bf16.mxu0 %v7959_v38  ;;  %5353 = vmatprep.subr.bf16.mxu1 %v7962_v39  ;;  %v8036_v38 = vld [vmem:[%s9200_s8 + $0x5b0] ss:$80 sps:$4 sm:$0xff]   ;;  %v8039_v39 = vld [vmem:[%s9200_s8 + $0x5b8] ss:$80 sps:$4 sm:$0xff]  }
  0xd5   : > { %5231 = vmatpush1.bf16.msra.mxu0 %v7957_v40  ;;  %5354 = vmatpush1.bf16.msra.mxu1 %v7960_v41  ;;  %v8044_v40 = vld [vmem:[%s9200_s8 + $0x654] ss:$80 sps:$4 sm:$0xff]   ;;  %v8047_v41 = vld [vmem:[%s9200_s8 + $0x65c] ss:$80 sps:$4 sm:$0xff]  }
  0xd6   : > { %5232 = vmatprep.subr.bf16.mxu0 %v7965_v42  ;;  %5355 = vmatprep.subr.bf16.mxu1 %v7968_v43  ;;  %v8042_v42 = vld [vmem:[%s9200_s8 + $0x650] ss:$80 sps:$4 sm:$0xff]   ;;  %v8045_v43 = vld [vmem:[%s9200_s8 + $0x658] ss:$80 sps:$4 sm:$0xff]  }
  0xd9   : > { %5233 = vmatpush1.bf16.msra.mxu0 %v7963_v44  ;;  %5356 = vmatpush1.bf16.msra.mxu1 %v7966_v46  ;;  %v8050_v44 = vld [vmem:[%s9200_s8 + $0x6f4] ss:$80 sps:$4 sm:$0xff]   ;;  %v8053_v46 = vld [vmem:[%s9200_s8 + $0x6fc] ss:$80 sps:$4 sm:$0xff]  }
  0xda   : > { %5234 = vmatprep.subr.bf16.mxu0 %v7971_v47  ;;  %5357 = vmatprep.subr.bf16.mxu1 %v7974_v48  ;;  %v8048_v47 = vld [vmem:[%s9200_s8 + $0x6f0] ss:$80 sps:$4 sm:$0xff]   ;;  %v8051_v48 = vld [vmem:[%s9200_s8 + $0x6f8] ss:$80 sps:$4 sm:$0xff]  }
  0xdd   : > { %5235 = vmatpush1.bf16.msra.mxu0 %v7969_v49  ;;  %5358 = vmatpush1.bf16.msra.mxu1 %v7972_v52  ;;  %v8056_v49 = vld [vmem:[%s9200_s8 + $0x794] ss:$80 sps:$4 sm:$0xff]   ;;  %v8054_v52 = vld [vmem:[%s9200_s8 + $0x790] ss:$80 sps:$4 sm:$0xff]  }
  0xde   : > { %5236 = vmatprep.subr.bf16.mxu0 %v7977_v53  ;;  %5359 = vmatprep.subr.bf16.mxu1 %v7980_v55  ;;  %v8057_v53 = vld [vmem:[%s9200_s8 + $0x798] ss:$80 sps:$4 sm:$0xff]   ;;  %v8062_v55 = vld [vmem:[%s9200_s8 + $0x834] ss:$80 sps:$4 sm:$0xff]  }
  0xe1   : > { %5237 = vmatpush1.bf16.msra.mxu0 %v7975_v56  ;;  %5360 = vmatpush1.bf16.msra.mxu1 %v7978_v58  ;;  %v8065_v56 = vld [vmem:[%s9200_s8 + $0x83c] ss:$80 sps:$4 sm:$0xff]   ;;  %v8063_v58 = vld [vmem:[%s9200_s8 + $0x838] ss:$80 sps:$4 sm:$0xff]  }
  0xe2   : > { %5386 = vmatprep.subr.bf16.mxu0 %v7984_v54  ;;  %5509 = vmatprep.subr.bf16.mxu1 %v7987_v59  ;;  %v8068_v54 = vld [vmem:[%s9200_s8 + $0x8d4] ss:$80 sps:$4 sm:$0xff]   ;;  %v8071_v59 = vld [vmem:[%s9200_s8 + $0x8dc] ss:$80 sps:$4 sm:$0xff]  }
  0xe4   : > { %5255 = vmatmul.mubr.bf16.vlgmr.msra.gmra.mrb[0].mxu0 %v9423_v60  ;;  %5378 = vmatmul.mubr.bf16.vlgmr.msra.gmra.mrb[0].mxu1 %v9423_v60 }
  0xe5   : > { %5387 = vmatpush1.bf16.msra.mxu0 %v7982_v61  ;;  %5510 = vmatpush1.bf16.msra.mxu1 %v7985_v63  ;;  %v8066_v61 = vld [vmem:[%s9200_s8 + $0x8d0] ss:$80 sps:$4 sm:$0xff]   ;;  %v8069_v63 = vld [vmem:[%s9200_s8 + $0x8d8] ss:$80 sps:$4 sm:$0xff]  }
  0xe6   : > { %5388 = vmatprep.subr.bf16.mxu0 %v7990_v0  ;;  %5511 = vmatprep.subr.bf16.mxu1 %v7993_v1  ;;  %v8074_v0 = vld [vmem:[%s9200_s8 + $0x974] ss:$80 sps:$4 sm:$0xff]   ;;  %v8077_v1 = vld [vmem:[%s9200_s8 + $0x97c] ss:$80 sps:$4 sm:$0xff]  }
  0xe7   : > { %5418 = vmatprep.mubr.bf16.mxu0 %v9285_v62  ;;  %5541 = vmatprep.mubr.bf16.mxu1 %v9285_v62 }
  0xe9   : > { %5389 = vmatpush1.bf16.msra.mxu0 %v7988_v2  ;;  %5512 = vmatpush1.bf16.msra.mxu1 %v7991_v3  ;;  %v8072_v2 = vld [vmem:[%s9200_s8 + $0x970] ss:$80 sps:$4 sm:$0xff]   ;;  %v8075_v3 = vld [vmem:[%s9200_s8 + $0x978] ss:$80 sps:$4 sm:$0xff]  }
  0xea   : > { %5390 = vmatprep.subr.bf16.mxu0 %v7996_v4  ;;  %5513 = vmatprep.subr.bf16.mxu1 %v7999_v5  ;;  %v8080_v4 = vld [vmem:[%s9200_s8 + $0xa14] ss:$80 sps:$4 sm:$0xff]   ;;  %v8083_v5 = vld [vmem:[%s9200_s8 + $0xa1c] ss:$80 sps:$4 sm:$0xff]  }
  0xed   : > { %5391 = vmatpush1.bf16.msra.mxu0 %v7994_v6  ;;  %5514 = vmatpush1.bf16.msra.mxu1 %v7997_v7  ;;  %v8078_v6 = vld [vmem:[%s9200_s8 + $0xa10] ss:$80 sps:$4 sm:$0xff]   ;;  %v8081_v7 = vld [vmem:[%s9200_s8 + $0xa18] ss:$80 sps:$4 sm:$0xff]  }
  0xee   : > { %5392 = vmatprep.subr.bf16.mxu0 %v8002_v8  ;;  %5515 = vmatprep.subr.bf16.mxu1 %v8005_v9  ;;  %v8086_v8 = vld [vmem:[%s9200_s8 + $0xab4] ss:$80 sps:$4 sm:$0xff]   ;;  %v8089_v9 = vld [vmem:[%s9200_s8 + $0xabc] ss:$80 sps:$4 sm:$0xff]  }
  0xf1   : > { %5393 = vmatpush1.bf16.msra.mxu0 %v8000_v10  ;;  %5516 = vmatpush1.bf16.msra.mxu1 %v8003_v11  ;;  %v8084_v10 = vld [vmem:[%s9200_s8 + $0xab0] ss:$80 sps:$4 sm:$0xff]   ;;  %v8087_v11 = vld [vmem:[%s9200_s8 + $0xab8] ss:$80 sps:$4 sm:$0xff]  }
  0xf2   : > { %5394 = vmatprep.subr.bf16.mxu0 %v8008_v12  ;;  %5517 = vmatprep.subr.bf16.mxu1 %v8011_v13  ;;  %v8092_v12 = vld [vmem:[%s9200_s8 + $0xb54] ss:$80 sps:$4 sm:$0xff]   ;;  %v8095_v13 = vld [vmem:[%s9200_s8 + $0xb5c] ss:$80 sps:$4 sm:$0xff]  }
  0xf5   : > { %5395 = vmatpush1.bf16.msra.mxu0 %v8006_v14  ;;  %5518 = vmatpush1.bf16.msra.mxu1 %v8009_v16  ;;  %v8090_v14 = vld [vmem:[%s9200_s8 + $0xb50] ss:$80 sps:$4 sm:$0xff]   ;;  %v8093_v16 = vld [vmem:[%s9200_s8 + $0xb58] ss:$80 sps:$4 sm:$0xff]  }
  0xf6   : > { %5396 = vmatprep.subr.bf16.mxu0 %v8014_v17  ;;  %5519 = vmatprep.subr.bf16.mxu1 %v8017_v18  ;;  %v8098_v17 = vld [vmem:[%s9200_s8 + $0xbf4] ss:$80 sps:$4 sm:$0xff]   ;;  %v8101_v18 = vld [vmem:[%s9200_s8 + $0xbfc] ss:$80 sps:$4 sm:$0xff]  }
  0xf9   : > { %5397 = vmatpush1.bf16.msra.mxu0 %v8012_v20  ;;  %5520 = vmatpush1.bf16.msra.mxu1 %v8015_v21  ;;  %v8096_v20 = vld [vmem:[%s9200_s8 + $0xbf0] ss:$80 sps:$4 sm:$0xff]   ;;  %v8099_v21 = vld [vmem:[%s9200_s8 + $0xbf8] ss:$80 sps:$4 sm:$0xff]  }
  0xfa   : > { %5398 = vmatprep.subr.bf16.mxu0 %v8020_v22  ;;  %5521 = vmatprep.subr.bf16.mxu1 %v8023_v24  ;;  %v8104_v22 = vld [vmem:[%s9200_s8 + $0xc94] ss:$80 sps:$4 sm:$0xff]   ;;  %v8107_v24 = vld [vmem:[%s9200_s8 + $0xc9c] ss:$80 sps:$4 sm:$0xff]  }
  0xfd   : > { %5399 = vmatpush1.bf16.msra.mxu0 %v8018_v25  ;;  %5522 = vmatpush1.bf16.msra.mxu1 %v8021_v26  ;;  %v8102_v25 = vld [vmem:[%s9200_s8 + $0xc90] ss:$80 sps:$4 sm:$0xff]   ;;  %v8105_v26 = vld [vmem:[%s9200_s8 + $0xc98] ss:$80 sps:$4 sm:$0xff]  }
  0xfe   : > { %5400 = vmatprep.subr.bf16.mxu0 %v8026_v27  ;;  %5523 = vmatprep.subr.bf16.mxu1 %v8029_v28  ;;  %v8110_v27 = vld [vmem:[%s9200_s8 + $0xd34] ss:$80 sps:$4 sm:$0xff]   ;;  %v8113_v28 = vld [vmem:[%s9200_s8 + $0xd3c] ss:$80 sps:$4 sm:$0xff]  }
 0x101   : > { %5401 = vmatpush1.bf16.msra.mxu0 %v8024_v29  ;;  %5524 = vmatpush1.bf16.msra.mxu1 %v8027_v30  ;;  %v8108_v29 = vld [vmem:[%s9200_s8 + $0xd30] ss:$80 sps:$4 sm:$0xff]   ;;  %v8111_v30 = vld [vmem:[%s9200_s8 + $0xd38] ss:$80 sps:$4 sm:$0xff]  }
 0x102   : > { %5402 = vmatprep.subr.bf16.mxu0 %v8032_v32  ;;  %5525 = vmatprep.subr.bf16.mxu1 %v8035_v33  ;;  %v8116_v32 = vld [vmem:[%s9200_s8 + $0xdd4] ss:$80 sps:$4 sm:$0xff]   ;;  %v8119_v33 = vld [vmem:[%s9200_s8 + $0xddc] ss:$80 sps:$4 sm:$0xff]  }
 0x105   : > { %5403 = vmatpush1.bf16.msra.mxu0 %v8030_v34  ;;  %5526 = vmatpush1.bf16.msra.mxu1 %v8033_v35  ;;  %v8114_v34 = vld [vmem:[%s9200_s8 + $0xdd0] ss:$80 sps:$4 sm:$0xff]   ;;  %v8117_v35 = vld [vmem:[%s9200_s8 + $0xdd8] ss:$80 sps:$4 sm:$0xff]  }
 0x106   : > { %5404 = vmatprep.subr.bf16.mxu0 %v8038_v36  ;;  %5527 = vmatprep.subr.bf16.mxu1 %v8041_v37  ;;  %v8122_v36 = vld [vmem:[%s9200_s8 + $0xe74] ss:$80 sps:$4 sm:$0xff]   ;;  %v8125_v37 = vld [vmem:[%s9200_s8 + $0xe7c] ss:$80 sps:$4 sm:$0xff]  }
 0x109   : > { %5405 = vmatpush1.bf16.msra.mxu0 %v8036_v38  ;;  %5528 = vmatpush1.bf16.msra.mxu1 %v8039_v39  ;;  %v8120_v38 = vld [vmem:[%s9200_s8 + $0xe70] ss:$80 sps:$4 sm:$0xff]   ;;  %v8123_v39 = vld [vmem:[%s9200_s8 + $0xe78] ss:$80 sps:$4 sm:$0xff]  }
 0x10a   : > { %5406 = vmatprep.subr.bf16.mxu0 %v8044_v40  ;;  %5529 = vmatprep.subr.bf16.mxu1 %v8047_v41  ;;  %v8128_v40 = vld [vmem:[%s9200_s8 + $0xf14] ss:$80 sps:$4 sm:$0xff]   ;;  %v8131_v41 = vld [vmem:[%s9200_s8 + $0xf1c] ss:$80 sps:$4 sm:$0xff]  }
 0x10d   : > { %5407 = vmatpush1.bf16.msra.mxu0 %v8042_v42  ;;  %5530 = vmatpush1.bf16.msra.mxu1 %v8045_v43  ;;  %v8126_v42 = vld [vmem:[%s9200_s8 + $0xf10] ss:$80 sps:$4 sm:$0xff]   ;;  %v8129_v43 = vld [vmem:[%s9200_s8 + $0xf18] ss:$80 sps:$4 sm:$0xff]  }
 0x10e   : > { %5408 = vmatprep.subr.bf16.mxu0 %v8050_v44  ;;  %5531 = vmatprep.subr.bf16.mxu1 %v8053_v46  ;;  %v8134_v44 = vld [vmem:[%s9200_s8 + $0xfb4] ss:$80 sps:$4 sm:$0xff]   ;;  %v8137_v46 = vld [vmem:[%s9200_s8 + $0xfbc] ss:$80 sps:$4 sm:$0xff]  }
 0x111   : > { %5409 = vmatpush1.bf16.msra.mxu0 %v8048_v47  ;;  %5532 = vmatpush1.bf16.msra.mxu1 %v8051_v48  ;;  %v8132_v47 = vld [vmem:[%s9200_s8 + $0xfb0] ss:$80 sps:$4 sm:$0xff]   ;;  %v8135_v48 = vld [vmem:[%s9200_s8 + $0xfb8] ss:$80 sps:$4 sm:$0xff]  }
 0x112   : > { %5410 = vmatprep.subr.bf16.mxu0 %v8056_v49  ;;  %5533 = vmatprep.subr.bf16.mxu1 %v8059_v50  ;;  %v8140_v49 = vld [vmem:[%s9200_s8 + $0x1054] ss:$80 sps:$4 sm:$0xff]   ;;  %v8143_v50 = vld [vmem:[%s9200_s8 + $0x105c] ss:$80 sps:$4 sm:$0xff]  }
 0x115   : > { %5411 = vmatpush1.bf16.msra.mxu0 %v8054_v52  ;;  %5534 = vmatpush1.bf16.msra.mxu1 %v8057_v53  ;;  %v8138_v52 = vld [vmem:[%s9200_s8 + $0x1050] ss:$80 sps:$4 sm:$0xff]   ;;  %v8141_v53 = vld [vmem:[%s9200_s8 + $0x1058] ss:$80 sps:$4 sm:$0xff]  }
 0x116   : > { %5412 = vmatprep.subr.bf16.mxu0 %v8062_v55  ;;  %5535 = vmatprep.subr.bf16.mxu1 %v8065_v56  ;;  %v8146_v55 = vld [vmem:[%s9200_s8 + $0x10f4] ss:$80 sps:$4 sm:$0xff]   ;;  %v8149_v56 = vld [vmem:[%s9200_s8 + $0x10fc] ss:$80 sps:$4 sm:$0xff]  }
 0x119   : > { %5413 = vmatpush1.bf16.msra.mxu0 %v8060_v57  ;;  %5536 = vmatpush1.bf16.msra.mxu1 %v8063_v58  ;;  %v8144_v57 = vld [vmem:[%s9200_s8 + $0x10f0] ss:$80 sps:$4 sm:$0xff]   ;;  %v8147_v58 = vld [vmem:[%s9200_s8 + $0x10f8] ss:$80 sps:$4 sm:$0xff]  }
 0x11a   : > { %5414 = vmatprep.subr.bf16.mxu0 %v8068_v54  ;;  %5537 = vmatprep.subr.bf16.mxu1 %v8071_v59  ;;  %v8152_v54 = vld [vmem:[%s9200_s8 + $0x1194] ss:$80 sps:$4 sm:$0xff]   ;;  %v8155_v59 = vld [vmem:[%s9200_s8 + $0x119c] ss:$80 sps:$4 sm:$0xff]  }
 0x11d   : > { %5415 = vmatpush1.bf16.msra.mxu0 %v8066_v61  ;;  %5538 = vmatpush1.bf16.msra.mxu1 %v8069_v63  ;;  %v8150_v61 = vld [vmem:[%s9200_s8 + $0x1190] ss:$80 sps:$4 sm:$0xff]   ;;  %v8153_v63 = vld [vmem:[%s9200_s8 + $0x1198] ss:$80 sps:$4 sm:$0xff]  }
 0x11e   : > { %5416 = vmatprep.subr.bf16.mxu0 %v8074_v0  ;;  %5539 = vmatprep.subr.bf16.mxu1 %v8077_v1  ;;  %v8158_v0 = vld [vmem:[%s9200_s8 + $0x1234] ss:$80 sps:$4 sm:$0xff]   ;;  %v8161_v1 = vld [vmem:[%s9200_s8 + $0x123c] ss:$80 sps:$4 sm:$0xff]  }
 0x121   : > { %5417 = vmatpush1.bf16.msra.mxu0 %v8072_v2  ;;  %5540 = vmatpush1.bf16.msra.mxu1 %v8075_v3  ;;  %v8156_v2 = vld [vmem:[%s9200_s8 + $0x1230] ss:$80 sps:$4 sm:$0xff]   ;;  %v8159_v3 = vld [vmem:[%s9200_s8 + $0x1238] ss:$80 sps:$4 sm:$0xff]  }
 0x122   : > { %5427 = vmatprep.subr.bf16.mxu0 %v8080_v4  ;;  %5550 = vmatprep.subr.bf16.mxu1 %v8083_v5  ;;  %v8164_v4 = vld [vmem:[%s9200_s8 + $0x12d4] ss:$80 sps:$4 sm:$0xff]   ;;  %v8167_v5 = vld [vmem:[%s9200_s8 + $0x12dc] ss:$80 sps:$4 sm:$0xff]  }
 0x124   : > { %5419 = vmatmul.mubr.bf16.vlgmr.msra.gmra.mrb[4].mxu0 %v9306_v15  ;;  %5542 = vmatmul.mubr.bf16.vlgmr.msra.gmra.mrb[4].mxu1 %v9306_v15 }
 0x125   : > { %5428 = vmatpush1.bf16.msra.mxu0 %v8078_v6  ;;  %5551 = vmatpush1.bf16.msra.mxu1 %v8081_v7  ;;  %v8162_v6 = vld [vmem:[%s9200_s8 + $0x12d0] ss:$80 sps:$4 sm:$0xff]   ;;  %v8165_v7 = vld [vmem:[%s9200_s8 + $0x12d8] ss:$80 sps:$4 sm:$0xff]  }
 0x126   : > { %5429 = vmatprep.subr.bf16.mxu0 %v8086_v8  ;;  %5552 = vmatprep.subr.bf16.mxu1 %v8089_v9  ;;  %v8170_v8 = vld [vmem:[%s9200_s8 + $0x1374] ss:$80 sps:$4 sm:$0xff]   ;;  %v8173_v9 = vld [vmem:[%s9200_s8 + $0x137c] ss:$80 sps:$4 sm:$0xff]  }
 0x127   : > { %5459 = vmatprep.mubr.bf16.mxu0 %v9313_v19  ;;  %5582 = vmatprep.mubr.bf16.mxu1 %v9313_v19 }
 0x129   : > { %5430 = vmatpush1.bf16.msra.mxu0 %v8084_v10  ;;  %5553 = vmatpush1.bf16.msra.mxu1 %v8087_v11  ;;  %v8168_v10 = vld [vmem:[%s9200_s8 + $0x1370] ss:$80 sps:$4 sm:$0xff]   ;;  %v8171_v11 = vld [vmem:[%s9200_s8 + $0x1378] ss:$80 sps:$4 sm:$0xff]  }
 0x12a   : > { %5431 = vmatprep.subr.bf16.mxu0 %v8092_v12  ;;  %5554 = vmatprep.subr.bf16.mxu1 %v8095_v13  ;;  %v8176_v12 = vld [vmem:[%s9200_s8 + $0x1414] ss:$80 sps:$4 sm:$0xff]   ;;  %v8179_v13 = vld [vmem:[%s9200_s8 + $0x141c] ss:$80 sps:$4 sm:$0xff]  }
 0x12d   : > { %5432 = vmatpush1.bf16.msra.mxu0 %v8090_v14  ;;  %5555 = vmatpush1.bf16.msra.mxu1 %v8093_v16  ;;  %v8174_v14 = vld [vmem:[%s9200_s8 + $0x1410] ss:$80 sps:$4 sm:$0xff]   ;;  %v8177_v16 = vld [vmem:[%s9200_s8 + $0x1418] ss:$80 sps:$4 sm:$0xff]  }
 0x12e   : > { %5433 = vmatprep.subr.bf16.mxu0 %v8098_v17  ;;  %5556 = vmatprep.subr.bf16.mxu1 %v8101_v18  ;;  %v8182_v17 = vld [vmem:[%s9200_s8 + $0x14b4] ss:$80 sps:$4 sm:$0xff]   ;;  %v8185_v18 = vld [vmem:[%s9200_s8 + $0x14bc] ss:$80 sps:$4 sm:$0xff]  }
 0x131   : > { %5434 = vmatpush1.bf16.msra.mxu0 %v8096_v20  ;;  %5557 = vmatpush1.bf16.msra.mxu1 %v8099_v21  ;;  %v8180_v20 = vld [vmem:[%s9200_s8 + $0x14b0] ss:$80 sps:$4 sm:$0xff]   ;;  %v8183_v21 = vld [vmem:[%s9200_s8 + $0x14b8] ss:$80 sps:$4 sm:$0xff]  }
 0x132   : > { %5435 = vmatprep.subr.bf16.mxu0 %v8104_v22  ;;  %5558 = vmatprep.subr.bf16.mxu1 %v8107_v24  ;;  %v8188_v22 = vld [vmem:[%s9200_s8 + $0x1554] ss:$80 sps:$4 sm:$0xff]   ;;  %v8191_v24 = vld [vmem:[%s9200_s8 + $0x155c] ss:$80 sps:$4 sm:$0xff]  }
 0x135   : > { %5436 = vmatpush1.bf16.msra.mxu0 %v8102_v25  ;;  %5559 = vmatpush1.bf16.msra.mxu1 %v8105_v26  ;;  %v8186_v25 = vld [vmem:[%s9200_s8 + $0x1550] ss:$80 sps:$4 sm:$0xff]   ;;  %v8189_v26 = vld [vmem:[%s9200_s8 + $0x1558] ss:$80 sps:$4 sm:$0xff]  }
 0x136   : > { %5437 = vmatprep.subr.bf16.mxu0 %v8110_v27  ;;  %5560 = vmatprep.subr.bf16.mxu1 %v8113_v28  ;;  %v8194_v27 = vld [vmem:[%s9200_s8 + $0x15f4] ss:$80 sps:$4 sm:$0xff]   ;;  %v8197_v28 = vld [vmem:[%s9200_s8 + $0x15fc] ss:$80 sps:$4 sm:$0xff]  }
 0x139   : > { %5438 = vmatpush1.bf16.msra.mxu0 %v8108_v29  ;;  %5561 = vmatpush1.bf16.msra.mxu1 %v8111_v30  ;;  %v8192_v29 = vld [vmem:[%s9200_s8 + $0x15f0] ss:$80 sps:$4 sm:$0xff]   ;;  %v8195_v30 = vld [vmem:[%s9200_s8 + $0x15f8] ss:$80 sps:$4 sm:$0xff]  }
 0x13a   : > { %5439 = vmatprep.subr.bf16.mxu0 %v8116_v32  ;;  %5562 = vmatprep.subr.bf16.mxu1 %v8119_v33  ;;  %v8200_v32 = vld [vmem:[%s9200_s8 + $0x1694] ss:$80 sps:$4 sm:$0xff]   ;;  %v8203_v33 = vld [vmem:[%s9200_s8 + $0x169c] ss:$80 sps:$4 sm:$0xff]  }
 0x13d   : > { %5440 = vmatpush1.bf16.msra.mxu0 %v8114_v34  ;;  %5563 = vmatpush1.bf16.msra.mxu1 %v8117_v35  ;;  %v8198_v34 = vld [vmem:[%s9200_s8 + $0x1690] ss:$80 sps:$4 sm:$0xff]   ;;  %v8201_v35 = vld [vmem:[%s9200_s8 + $0x1698] ss:$80 sps:$4 sm:$0xff]  }
 0x13e   : > { %5441 = vmatprep.subr.bf16.mxu0 %v8122_v36  ;;  %5564 = vmatprep.subr.bf16.mxu1 %v8125_v37  ;;  %v8206_v36 = vld [vmem:[%s9200_s8 + $0x1734] ss:$80 sps:$4 sm:$0xff]   ;;  %v8209_v37 = vld [vmem:[%s9200_s8 + $0x173c] ss:$80 sps:$4 sm:$0xff]  }
 0x141   : > { %5442 = vmatpush1.bf16.msra.mxu0 %v8120_v38  ;;  %5565 = vmatpush1.bf16.msra.mxu1 %v8123_v39  ;;  %v8204_v38 = vld [vmem:[%s9200_s8 + $0x1730] ss:$80 sps:$4 sm:$0xff]   ;;  %v8207_v39 = vld [vmem:[%s9200_s8 + $0x1738] ss:$80 sps:$4 sm:$0xff]  }
 0x142   : > { %5443 = vmatprep.subr.bf16.mxu0 %v8128_v40  ;;  %5566 = vmatprep.subr.bf16.mxu1 %v8131_v41  ;;  %v8212_v40 = vld [vmem:[%s9200_s8 + $0x17d4] ss:$80 sps:$4 sm:$0xff]   ;;  %v8215_v41 = vld [vmem:[%s9200_s8 + $0x17dc] ss:$80 sps:$4 sm:$0xff]  }
 0x145   : > { %5444 = vmatpush1.bf16.msra.mxu0 %v8126_v42  ;;  %5567 = vmatpush1.bf16.msra.mxu1 %v8129_v43  ;;  %v8210_v42 = vld [vmem:[%s9200_s8 + $0x17d0] ss:$80 sps:$4 sm:$0xff]   ;;  %v8213_v43 = vld [vmem:[%s9200_s8 + $0x17d8] ss:$80 sps:$4 sm:$0xff]  }
 0x146   : > { %5445 = vmatprep.subr.bf16.mxu0 %v8134_v44  ;;  %5568 = vmatprep.subr.bf16.mxu1 %v8137_v46  ;;  %v8218_v44 = vld [vmem:[%s9200_s8 + $0x1874] ss:$80 sps:$4 sm:$0xff]   ;;  %v8221_v46 = vld [vmem:[%s9200_s8 + $0x187c] ss:$80 sps:$4 sm:$0xff]  }
 0x149   : > { %5446 = vmatpush1.bf16.msra.mxu0 %v8132_v47  ;;  %5569 = vmatpush1.bf16.msra.mxu1 %v8135_v48  ;;  %v8216_v47 = vld [vmem:[%s9200_s8 + $0x1870] ss:$80 sps:$4 sm:$0xff]   ;;  %v8219_v48 = vld [vmem:[%s9200_s8 + $0x1878] ss:$80 sps:$4 sm:$0xff]  }
 0x14a   : > { %5447 = vmatprep.subr.bf16.mxu0 %v8140_v49  ;;  %5570 = vmatprep.subr.bf16.mxu1 %v8143_v50  ;;  %v8224_v49 = vld [vmem:[%s9200_s8 + $0x24] ss:$80 sps:$4 sm:$0xff]   ;;  %v8227_v50 = vld [vmem:[%s9200_s8 + $0x2c] ss:$80 sps:$4 sm:$0xff]  }
 0x14d   : > { %5448 = vmatpush1.bf16.msra.mxu0 %v8138_v52  ;;  %5571 = vmatpush1.bf16.msra.mxu1 %v8141_v53  ;;  %v8222_v52 = vld [vmem:[%s9200_s8 + $0x20] ss:$80 sps:$4 sm:$0xff]   ;;  %v8225_v53 = vld [vmem:[%s9200_s8 + $0x28] ss:$80 sps:$4 sm:$0xff]  }
 0x14e   : > { %5449 = vmatprep.subr.bf16.mxu0 %v8146_v55  ;;  %5572 = vmatprep.subr.bf16.mxu1 %v8149_v56  ;;  %v8230_v55 = vld [vmem:[%s9200_s8 + $0xc4] ss:$80 sps:$4 sm:$0xff]   ;;  %v8233_v56 = vld [vmem:[%s9200_s8 + $0xcc] ss:$80 sps:$4 sm:$0xff]  }
 0x151   : > { %5450 = vmatpush1.bf16.msra.mxu0 %v8144_v57  ;;  %5573 = vmatpush1.bf16.msra.mxu1 %v8147_v58  ;;  %v8228_v57 = vld [vmem:[%s9200_s8 + $0xc0] ss:$80 sps:$4 sm:$0xff]   ;;  %v8231_v58 = vld [vmem:[%s9200_s8 + $0xc8] ss:$80 sps:$4 sm:$0xff]  }
 0x152   : > { %5451 = vmatprep.subr.bf16.mxu0 %v8152_v54  ;;  %5574 = vmatprep.subr.bf16.mxu1 %v8155_v59  ;;  %v8236_v54 = vld [vmem:[%s9200_s8 + $0x164] ss:$80 sps:$4 sm:$0xff]   ;;  %v8239_v59 = vld [vmem:[%s9200_s8 + $0x16c] ss:$80 sps:$4 sm:$0xff]  }
 0x155   : > { %5452 = vmatpush1.bf16.msra.mxu0 %v8150_v61  ;;  %5575 = vmatpush1.bf16.msra.mxu1 %v8153_v63  ;;  %v8234_v61 = vld [vmem:[%s9200_s8 + $0x160] ss:$80 sps:$4 sm:$0xff]   ;;  %v8237_v63 = vld [vmem:[%s9200_s8 + $0x168] ss:$80 sps:$4 sm:$0xff]  }
 0x156   : > { %5453 = vmatprep.subr.bf16.mxu0 %v8158_v0  ;;  %5576 = vmatprep.subr.bf16.mxu1 %v8161_v1  ;;  %v8242_v0 = vld [vmem:[%s9200_s8 + $0x204] ss:$80 sps:$4 sm:$0xff]   ;;  %v8245_v1 = vld [vmem:[%s9200_s8 + $0x20c] ss:$80 sps:$4 sm:$0xff]  }
 0x159   : > { %5454 = vmatpush1.bf16.msra.mxu0 %v8156_v2  ;;  %5577 = vmatpush1.bf16.msra.mxu1 %v8159_v3  ;;  %v8240_v2 = vld [vmem:[%s9200_s8 + $0x200] ss:$80 sps:$4 sm:$0xff]   ;;  %v8243_v3 = vld [vmem:[%s9200_s8 + $0x208] ss:$80 sps:$4 sm:$0xff]  }
 0x15a   : > { %5455 = vmatprep.subr.bf16.mxu0 %v8164_v4  ;;  %5578 = vmatprep.subr.bf16.mxu1 %v8167_v5  ;;  %v8248_v4 = vld [vmem:[%s9200_s8 + $0x2a4] ss:$80 sps:$4 sm:$0xff]   ;;  %v8251_v5 = vld [vmem:[%s9200_s8 + $0x2ac] ss:$80 sps:$4 sm:$0xff]  }
 0x15d   : > { %5456 = vmatpush1.bf16.msra.mxu0 %v8162_v6  ;;  %5579 = vmatpush1.bf16.msra.mxu1 %v8165_v7  ;;  %v8246_v6 = vld [vmem:[%s9200_s8 + $0x2a0] ss:$80 sps:$4 sm:$0xff]   ;;  %v8249_v7 = vld [vmem:[%s9200_s8 + $0x2a8] ss:$80 sps:$4 sm:$0xff]  }
 0x15e   : > { %5457 = vmatprep.subr.bf16.mxu0 %v8170_v8  ;;  %5580 = vmatprep.subr.bf16.mxu1 %v8173_v9  ;;  %v8254_v8 = vld [vmem:[%s9200_s8 + $0x344] ss:$80 sps:$4 sm:$0xff]   ;;  %v8257_v9 = vld [vmem:[%s9200_s8 + $0x34c] ss:$80 sps:$4 sm:$0xff]  }
 0x161   : > { %5458 = vmatpush1.bf16.msra.mxu0 %v8168_v10  ;;  %5581 = vmatpush1.bf16.msra.mxu1 %v8171_v11  ;;  %v8252_v10 = vld [vmem:[%s9200_s8 + $0x340] ss:$80 sps:$4 sm:$0xff]   ;;  %v8255_v11 = vld [vmem:[%s9200_s8 + $0x348] ss:$80 sps:$4 sm:$0xff]  }
 0x162   : > { %5468 = vmatprep.subr.bf16.mxu0 %v8176_v12  ;;  %5591 = vmatprep.subr.bf16.mxu1 %v8179_v13  ;;  %v8260_v12 = vld [vmem:[%s9200_s8 + $0x3e4] ss:$80 sps:$4 sm:$0xff]   ;;  %v8263_v13 = vld [vmem:[%s9200_s8 + $0x3ec] ss:$80 sps:$4 sm:$0xff]  }
 0x164   : > { %5460 = vmatmul.mubr.bf16.vlgmr.msra.gmra.mrb[4].mxu0 %v9382_v23  ;;  %5583 = vmatmul.mubr.bf16.vlgmr.msra.gmra.mrb[4].mxu1 %v9382_v23 }
 0x165   : > { %5469 = vmatpush1.bf16.msra.mxu0 %v8174_v14  ;;  %5592 = vmatpush1.bf16.msra.mxu1 %v8177_v16  ;;  %v8258_v14 = vld [vmem:[%s9200_s8 + $0x3e0] ss:$80 sps:$4 sm:$0xff]   ;;  %v8261_v16 = vld [vmem:[%s9200_s8 + $0x3e8] ss:$80 sps:$4 sm:$0xff]  }
 0x166   : > { %5470 = vmatprep.subr.bf16.mxu0 %v8182_v17  ;;  %5593 = vmatprep.subr.bf16.mxu1 %v8185_v18  ;;  %v8266_v17 = vld [vmem:[%s9200_s8 + $0x484] ss:$80 sps:$4 sm:$0xff]   ;;  %v8269_v18 = vld [vmem:[%s9200_s8 + $0x48c] ss:$80 sps:$4 sm:$0xff]  }
 0x167   : > { %5500 = vmatprep.mubr.bf16.mxu0 %v9078_v31  ;;  %5623 = vmatprep.mubr.bf16.mxu1 %v9078_v31 }
 0x169   : > { %5471 = vmatpush1.bf16.msra.mxu0 %v8180_v20  ;;  %5594 = vmatpush1.bf16.msra.mxu1 %v8183_v21  ;;  %v8264_v20 = vld [vmem:[%s9200_s8 + $0x480] ss:$80 sps:$4 sm:$0xff]   ;;  %v8267_v21 = vld [vmem:[%s9200_s8 + $0x488] ss:$80 sps:$4 sm:$0xff]  }
 0x16a   : > { %5472 = vmatprep.subr.bf16.mxu0 %v8188_v22  ;;  %5595 = vmatprep.subr.bf16.mxu1 %v8191_v24  ;;  %v8272_v22 = vld [vmem:[%s9200_s8 + $0x524] ss:$80 sps:$4 sm:$0xff]   ;;  %v8275_v24 = vld [vmem:[%s9200_s8 + $0x52c] ss:$80 sps:$4 sm:$0xff]  }
 0x16d   : > { %5473 = vmatpush1.bf16.msra.mxu0 %v8186_v25  ;;  %5596 = vmatpush1.bf16.msra.mxu1 %v8189_v26  ;;  %v8270_v25 = vld [vmem:[%s9200_s8 + $0x520] ss:$80 sps:$4 sm:$0xff]   ;;  %v8273_v26 = vld [vmem:[%s9200_s8 + $0x528] ss:$80 sps:$4 sm:$0xff]  }
 0x16e   : > { %5474 = vmatprep.subr.bf16.mxu0 %v8194_v27  ;;  %5597 = vmatprep.subr.bf16.mxu1 %v8197_v28  ;;  %v8278_v27 = vld [vmem:[%s9200_s8 + $0x5c4] ss:$80 sps:$4 sm:$0xff]   ;;  %v8281_v28 = vld [vmem:[%s9200_s8 + $0x5cc] ss:$80 sps:$4 sm:$0xff]  }
 0x171   : > { %5475 = vmatpush1.bf16.msra.mxu0 %v8192_v29  ;;  %5598 = vmatpush1.bf16.msra.mxu1 %v8195_v30  ;;  %v8276_v29 = vld [vmem:[%s9200_s8 + $0x5c0] ss:$80 sps:$4 sm:$0xff]   ;;  %v8279_v30 = vld [vmem:[%s9200_s8 + $0x5c8] ss:$80 sps:$4 sm:$0xff]  }
 0x172   : > { %5476 = vmatprep.subr.bf16.mxu0 %v8200_v32  ;;  %5599 = vmatprep.subr.bf16.mxu1 %v8203_v33  ;;  %v8284_v32 = vld [vmem:[%s9200_s8 + $0x664] ss:$80 sps:$4 sm:$0xff]   ;;  %v8287_v33 = vld [vmem:[%s9200_s8 + $0x66c] ss:$80 sps:$4 sm:$0xff]  }
 0x175   : > { %5477 = vmatpush1.bf16.msra.mxu0 %v8198_v34  ;;  %5600 = vmatpush1.bf16.msra.mxu1 %v8201_v35  ;;  %v8282_v34 = vld [vmem:[%s9200_s8 + $0x660] ss:$80 sps:$4 sm:$0xff]   ;;  %v8285_v35 = vld [vmem:[%s9200_s8 + $0x668] ss:$80 sps:$4 sm:$0xff]  }
 0x176   : > { %5478 = vmatprep.subr.bf16.mxu0 %v8206_v36  ;;  %5601 = vmatprep.subr.bf16.mxu1 %v8209_v37  ;;  %v8290_v36 = vld [vmem:[%s9200_s8 + $0x704] ss:$80 sps:$4 sm:$0xff]   ;;  %v8293_v37 = vld [vmem:[%s9200_s8 + $0x70c] ss:$80 sps:$4 sm:$0xff]  }
 0x179   : > { %5479 = vmatpush1.bf16.msra.mxu0 %v8204_v38  ;;  %5602 = vmatpush1.bf16.msra.mxu1 %v8207_v39  ;;  %v8288_v38 = vld [vmem:[%s9200_s8 + $0x700] ss:$80 sps:$4 sm:$0xff]   ;;  %v8291_v39 = vld [vmem:[%s9200_s8 + $0x708] ss:$80 sps:$4 sm:$0xff]  }
 0x17a   : > { %5480 = vmatprep.subr.bf16.mxu0 %v8212_v40  ;;  %5603 = vmatprep.subr.bf16.mxu1 %v8215_v41  ;;  %v8296_v40 = vld [vmem:[%s9200_s8 + $0x7a4] ss:$80 sps:$4 sm:$0xff]   ;;  %v8299_v41 = vld [vmem:[%s9200_s8 + $0x7ac] ss:$80 sps:$4 sm:$0xff]  }
 0x17d   : > { %5481 = vmatpush1.bf16.msra.mxu0 %v8210_v42  ;;  %5604 = vmatpush1.bf16.msra.mxu1 %v8213_v43  ;;  %v9079_v42 = vmov 1983009808  }
 0x17e   : > { %5482 = vmatprep.subr.bf16.mxu0 %v8218_v44  ;;  %5605 = vmatprep.subr.bf16.mxu1 %v8221_v46  ;;  %v6393_v43 = vunpack.c.l.s4 %v9079_v42  ;;  %v8294_v44 = vld [vmem:[%s9200_s8 + $0x7a0] ss:$80 sps:$4 sm:$0xff]   ;;  %v8297_v46 = vld [vmem:[%s9200_s8 + $0x7a8] ss:$80 sps:$4 sm:$0xff]  }
 0x17f   : > { %v8354_v42 = vld [vmem:[%s9200_s8 + $0xde0] ss:$80 sps:$4 sm:$0xff]  }
 0x181   : > { %5483 = vmatpush1.bf16.msra.mxu0 %v8216_v47  ;;  %5606 = vmatpush1.bf16.msra.mxu1 %v8219_v48  ;;  %v8302_v47 = vld [vmem:[%s9200_s8 + $0x844] ss:$80 sps:$4 sm:$0xff]   ;;  %v8305_v48 = vld [vmem:[%s9200_s8 + $0x84c] ss:$80 sps:$4 sm:$0xff]  }
 0x182   : > { %5632 = vmatprep.subr.bf16.mxu0 %v8224_v49  ;;  %5755 = vmatprep.subr.bf16.mxu1 %v8227_v50  ;;  %v6394_v49 = vunpack.c.0.s8 %v6393_v43  ;;  %v8300_v50 = vld [vmem:[%s9200_s8 + $0x840] ss:$80 sps:$4 sm:$0xff]   ;;  %v8357_v43 = vld [vmem:[%s9200_s8 + $0xde8] ss:$80 sps:$4 sm:$0xff]  }
 0x184   : > { %5501 = vmatmul.mubr.bf16.vlgmr.msra.gmra.mrb[4].mxu0 %v9423_v60  ;;  %5624 = vmatmul.mubr.bf16.vlgmr.msra.gmra.mrb[4].mxu1 %v9423_v60 }
 0x185   : > { %5633 = vmatpush1.bf16.msra.mxu0 %v8222_v52  ;;  %5756 = vmatpush1.bf16.msra.mxu1 %v8225_v53  ;;  %v8303_v52 = vld [vmem:[%s9200_s8 + $0x848] ss:$80 sps:$4 sm:$0xff]   ;;  %v8308_v53 = vld [vmem:[%s9200_s8 + $0x8e4] ss:$80 sps:$4 sm:$0xff]  }
 0x186   : > { %5634 = vmatprep.subr.bf16.mxu0 %v8230_v55  ;;  %5757 = vmatprep.subr.bf16.mxu1 %v8233_v56  ;;  %v8311_v55 = vld [vmem:[%s9200_s8 + $0x8ec] ss:$80 sps:$4 sm:$0xff]  }
 0x187   : > { %5664 = vmatprep.mubr.bf16.mxu0 %v9285_v62  ;;  %5787 = vmatprep.mubr.bf16.mxu1 %v9285_v62 }
 0x189   : > { %5635 = vmatpush1.bf16.msra.mxu0 %v8228_v57  ;;  %5758 = vmatpush1.bf16.msra.mxu1 %v8231_v58  ;;  %v9658_v58 = vsub.s32 %v6394_v49, %v9263_v45  ;;  %v8314_v45 = vld [vmem:[%s9200_s8 + $0x984] ss:$80 sps:$4 sm:$0xff]  }
 0x18a   : > { %5636 = vmatprep.subr.bf16.mxu0 %v8236_v54  ;;  %5759 = vmatprep.subr.bf16.mxu1 %v8239_v59  ;;  %v8368_v49 = vld [vmem:[%s9200_s8 + $0xf24] ss:$80 sps:$4 sm:$0xff]  }
 0x18d   : > { %5637 = vmatpush1.bf16.msra.mxu0 %v8234_v61  ;;  %5760 = vmatpush1.bf16.msra.mxu1 %v8237_v63 }
 0x18e   : > { %5638 = vmatprep.subr.bf16.mxu0 %v8242_v0  ;;  %5761 = vmatprep.subr.bf16.mxu1 %v8245_v1 }
 0x191   : > { %5639 = vmatpush1.bf16.msra.mxu0 %v8240_v2  ;;  %5762 = vmatpush1.bf16.msra.mxu1 %v8243_v3  ;;  %v8306_v2 = vld [vmem:[%s9200_s8 + $0x8e0] ss:$80 sps:$4 sm:$0xff]   ;;  %v8309_v3 = vld [vmem:[%s9200_s8 + $0x8e8] ss:$80 sps:$4 sm:$0xff]  }
 0x192   : > { %5640 = vmatprep.subr.bf16.mxu0 %v8248_v4  ;;  %5763 = vmatprep.subr.bf16.mxu1 %v8251_v5 }
 0x195   : > { %5641 = vmatpush1.bf16.msra.mxu0 %v8246_v6  ;;  %5764 = vmatpush1.bf16.msra.mxu1 %v8249_v7  ;;  %v8317_v6 = vld [vmem:[%s9200_s8 + $0x98c] ss:$80 sps:$4 sm:$0xff]  }
 0x196   : > { %5642 = vmatprep.subr.bf16.mxu0 %v8254_v8  ;;  %5765 = vmatprep.subr.bf16.mxu1 %v8257_v9 }
 0x199   : > { %5643 = vmatpush1.bf16.msra.mxu0 %v8252_v10  ;;  %5766 = vmatpush1.bf16.msra.mxu1 %v8255_v11  ;;  %v8312_v10 = vld [vmem:[%s9200_s8 + $0x980] ss:$80 sps:$4 sm:$0xff]   ;;  %v8315_v11 = vld [vmem:[%s9200_s8 + $0x988] ss:$80 sps:$4 sm:$0xff]  }
 0x19a   : > { %5644 = vmatprep.subr.bf16.mxu0 %v8260_v12  ;;  %5767 = vmatprep.subr.bf16.mxu1 %v8263_v13  ;;  %v8320_v12 = vld [vmem:[%s9200_s8 + $0xa24] ss:$80 sps:$4 sm:$0xff]   ;;  %v8323_v13 = vld [vmem:[%s9200_s8 + $0xa2c] ss:$80 sps:$4 sm:$0xff]  }
 0x19d   : > { %5645 = vmatpush1.bf16.msra.mxu0 %v8258_v14  ;;  %5768 = vmatpush1.bf16.msra.mxu1 %v8261_v16  ;;  %v8318_v14 = vld [vmem:[%s9200_s8 + $0xa20] ss:$80 sps:$4 sm:$0xff]   ;;  %v8321_v16 = vld [vmem:[%s9200_s8 + $0xa28] ss:$80 sps:$4 sm:$0xff]  }
 0x19e   : > { %5646 = vmatprep.subr.bf16.mxu0 %v8266_v17  ;;  %5769 = vmatprep.subr.bf16.mxu1 %v8269_v18  ;;  %v8326_v17 = vld [vmem:[%s9200_s8 + $0xac4] ss:$80 sps:$4 sm:$0xff]   ;;  %v8329_v18 = vld [vmem:[%s9200_s8 + $0xacc] ss:$80 sps:$4 sm:$0xff]  }
 0x1a1   : > { %5647 = vmatpush1.bf16.msra.mxu0 %v8264_v20  ;;  %5770 = vmatpush1.bf16.msra.mxu1 %v8267_v21  ;;  %v8324_v20 = vld [vmem:[%s9200_s8 + $0xac0] ss:$80 sps:$4 sm:$0xff]   ;;  %v8327_v21 = vld [vmem:[%s9200_s8 + $0xac8] ss:$80 sps:$4 sm:$0xff]  }
 0x1a2   : > { %5648 = vmatprep.subr.bf16.mxu0 %v8272_v22  ;;  %5771 = vmatprep.subr.bf16.mxu1 %v8275_v24  ;;  %v8332_v22 = vld [vmem:[%s9200_s8 + $0xb64] ss:$80 sps:$4 sm:$0xff]   ;;  %v8335_v24 = vld [vmem:[%s9200_s8 + $0xb6c] ss:$80 sps:$4 sm:$0xff]  }
 0x1a5   : > { %5649 = vmatpush1.bf16.msra.mxu0 %v8270_v25  ;;  %5772 = vmatpush1.bf16.msra.mxu1 %v8273_v26  ;;  %v8330_v25 = vld [vmem:[%s9200_s8 + $0xb60] ss:$80 sps:$4 sm:$0xff]   ;;  %v8333_v26 = vld [vmem:[%s9200_s8 + $0xb68] ss:$80 sps:$4 sm:$0xff]  }
 0x1a6   : > { %5650 = vmatprep.subr.bf16.mxu0 %v8278_v27  ;;  %5773 = vmatprep.subr.bf16.mxu1 %v8281_v28  ;;  %v8338_v27 = vld [vmem:[%s9200_s8 + $0xc04] ss:$80 sps:$4 sm:$0xff]   ;;  %v8341_v28 = vld [vmem:[%s9200_s8 + $0xc0c] ss:$80 sps:$4 sm:$0xff]  }
 0x1a9   : > { %5651 = vmatpush1.bf16.msra.mxu0 %v8276_v29  ;;  %5774 = vmatpush1.bf16.msra.mxu1 %v8279_v30  ;;  %v8336_v29 = vld [vmem:[%s9200_s8 + $0xc00] ss:$80 sps:$4 sm:$0xff]   ;;  %v8339_v30 = vld [vmem:[%s9200_s8 + $0xc08] ss:$80 sps:$4 sm:$0xff]  }
 0x1aa   : > { %5652 = vmatprep.subr.bf16.mxu0 %v8284_v32  ;;  %5775 = vmatprep.subr.bf16.mxu1 %v8287_v33  ;;  %v8344_v32 = vld [vmem:[%s9200_s8 + $0xca4] ss:$80 sps:$4 sm:$0xff]   ;;  %v8347_v33 = vld [vmem:[%s9200_s8 + $0xcac] ss:$80 sps:$4 sm:$0xff]  }
 0x1ad   : > { %5653 = vmatpush1.bf16.msra.mxu0 %v8282_v34  ;;  %5776 = vmatpush1.bf16.msra.mxu1 %v8285_v35  ;;  %v8342_v34 = vld [vmem:[%s9200_s8 + $0xca0] ss:$80 sps:$4 sm:$0xff]   ;;  %v8345_v35 = vld [vmem:[%s9200_s8 + $0xca8] ss:$80 sps:$4 sm:$0xff]  }
 0x1ae   : > { %5654 = vmatprep.subr.bf16.mxu0 %v8290_v36  ;;  %5777 = vmatprep.subr.bf16.mxu1 %v8293_v37  ;;  %v8350_v36 = vld [vmem:[%s9200_s8 + $0xd44] ss:$80 sps:$4 sm:$0xff]   ;;  %v8353_v37 = vld [vmem:[%s9200_s8 + $0xd4c] ss:$80 sps:$4 sm:$0xff]  }
 0x1b1   : > { %5655 = vmatpush1.bf16.msra.mxu0 %v8288_v38  ;;  %5778 = vmatpush1.bf16.msra.mxu1 %v8291_v39  ;;  %v8348_v38 = vld [vmem:[%s9200_s8 + $0xd40] ss:$80 sps:$4 sm:$0xff]   ;;  %v8351_v39 = vld [vmem:[%s9200_s8 + $0xd48] ss:$80 sps:$4 sm:$0xff]  }
 0x1b2   : > { %5656 = vmatprep.subr.bf16.mxu0 %v8296_v40  ;;  %5779 = vmatprep.subr.bf16.mxu1 %v8299_v41  ;;  %v8356_v40 = vld [vmem:[%s9200_s8 + $0xde4] ss:$80 sps:$4 sm:$0xff]   ;;  %v8359_v41 = vld [vmem:[%s9200_s8 + $0xdec] ss:$80 sps:$4 sm:$0xff]  }
 0x1b5   : > { %5657 = vmatpush1.bf16.msra.mxu0 %v8294_v44  ;;  %5780 = vmatpush1.bf16.msra.mxu1 %v8297_v46  ;;  %v8362_v44 = vld [vmem:[%s9200_s8 + $0xe84] ss:$80 sps:$4 sm:$0xff]   ;;  %v8365_v46 = vld [vmem:[%s9200_s8 + $0xe8c] ss:$80 sps:$4 sm:$0xff]  }
 0x1b6   : > { %5658 = vmatprep.subr.bf16.mxu0 %v8302_v47  ;;  %5781 = vmatprep.subr.bf16.mxu1 %v8305_v48  ;;  %v8360_v47 = vld [vmem:[%s9200_s8 + $0xe80] ss:$80 sps:$4 sm:$0xff]   ;;  %v8363_v48 = vld [vmem:[%s9200_s8 + $0xe88] ss:$80 sps:$4 sm:$0xff]  }
 0x1b7   : > { %v5256_v56 = vpop.f32.mrb[0].mxu0  ;;  %v5379_v57 = vpop.f32.mrb[0].mxu1 }
 0x1b8   : > { %v5258_v54 = vpop.f32.mrb[1].mxu0  ;;  %v5381_v59 = vpop.f32.mrb[1].mxu1 }
 0x1b9   : > { %v6390_v61 = vcombine.low %v5256_v56, %v5258_v54  ;;  %v6391_v63 = vcombine.low %v5379_v57, %v5381_v59  ;;  %v5260_v0 = vpop.f32.mrb[2].mxu0  ;;  %v5383_v1 = vpop.f32.mrb[2].mxu1  ;;  %5659 = vmatpush1.bf16.msra.mxu0 %v8300_v50  ;;  %5782 = vmatpush1.bf16.msra.mxu1 %v8303_v52  ;;  %v8371_v50 = vld [vmem:[%s9200_s8 + $0xf2c] ss:$80 sps:$4 sm:$0xff]   ;;  %v8366_v52 = vld [vmem:[%s9200_s8 + $0xf20] ss:$80 sps:$4 sm:$0xff]  }
 0x1ba   : > { %v5261_v4 = vpop.f32.mrb[3].mxu0  ;;  %v5384_v5 = vpop.f32.mrb[3].mxu1  ;;  %5660 = vmatprep.subr.bf16.mxu0 %v8308_v53  ;;  %5783 = vmatprep.subr.bf16.mxu1 %v8311_v55  ;;  %v8369_v53 = vld [vmem:[%s9200_s8 + $0xf28] ss:$80 sps:$4 sm:$0xff]   ;;  %v8374_v55 = vld [vmem:[%s9200_s8 + $0xfc4] ss:$80 sps:$4 sm:$0xff]  }
 0x1bb   : > { %v9665_v7 = vrot.slane %v6390_v61, %v9658_v58  ;;  %v9668_v8 = vrot.slane %v6391_v63, %v9658_v58  ;;  %v8377_v56 = vld [vmem:[%s9200_s8 + $0xfcc] ss:$80 sps:$4 sm:$0xff]   ;;  %v8372_v57 = vld [vmem:[%s9200_s8 + $0xfc0] ss:$80 sps:$4 sm:$0xff]   ;;  %v8375_v54 = vld [vmem:[%s9200_s8 + $0xfc8] ss:$80 sps:$4 sm:$0xff]  }
 0x1bc   : > { %v8380_v59 = vld [vmem:[%s9200_s8 + $0x1064] ss:$80 sps:$4 sm:$0xff]   ;;  %v8383_v61 = vld [vmem:[%s9200_s8 + $0x106c] ss:$80 sps:$4 sm:$0xff]   ;;  %v8378_v63 = vld [vmem:[%s9200_s8 + $0x1060] ss:$80 sps:$4 sm:$0xff]  }
 0x1bd   : > { %v6406_v9 = vcombine.low %v9665_v7, %v9668_v8  ;;  %5661 = vmatpush1.bf16.msra.mxu0 %v8306_v2  ;;  %5784 = vmatpush1.bf16.msra.mxu1 %v8309_v3  ;;  %v8381_v0 = vld [vmem:[%s9200_s8 + $0x1068] ss:$80 sps:$4 sm:$0xff]   ;;  %v8386_v1 = vld [vmem:[%s9200_s8 + $0x1104] ss:$80 sps:$4 sm:$0xff]   ;;  %v8389_v2 = vld [vmem:[%s9200_s8 + $0x110c] ss:$80 sps:$4 sm:$0xff]  }
 0x1be   : > { %5662 = vmatprep.subr.bf16.mxu0 %v8314_v45  ;;  %5785 = vmatprep.subr.bf16.mxu1 %v8317_v6  ;;  %v8384_v3 = vld [vmem:[%s9200_s8 + $0x1100] ss:$80 sps:$4 sm:$0xff]   ;;  %v8387_v4 = vld [vmem:[%s9200_s8 + $0x1108] ss:$80 sps:$4 sm:$0xff]   ;;  %v8392_v5 = vld [vmem:[%s9200_s8 + $0x11a4] ss:$80 sps:$4 sm:$0xff]  }
 0x1bf   : > { %v8395_v45 = vld [vmem:[%s9200_s8 + $0x11ac] ss:$80 sps:$4 sm:$0xff]   ;;  %v8390_v6 = vld [vmem:[%s9200_s8 + $0x11a0] ss:$80 sps:$4 sm:$0xff]  }
 0x1c1   : > { %5663 = vmatpush1.bf16.msra.mxu0 %v8312_v10  ;;  %5786 = vmatpush1.bf16.msra.mxu1 %v8315_v11  ;;  %v8393_v10 = vld [vmem:[%s9200_s8 + $0x11a8] ss:$80 sps:$4 sm:$0xff]   ;;  %v8398_v11 = vld [vmem:[%s9200_s8 + $0x1244] ss:$80 sps:$4 sm:$0xff]  }
 0x1c2   : > { %5673 = vmatprep.subr.bf16.mxu0 %v8320_v12  ;;  %5796 = vmatprep.subr.bf16.mxu1 %v8323_v13  ;;  %v8401_v12 = vld [vmem:[%s9200_s8 + $0x124c] ss:$80 sps:$4 sm:$0xff]   ;;  %v8396_v13 = vld [vmem:[%s9200_s8 + $0x1240] ss:$80 sps:$4 sm:$0xff]  }
 0x1c4   : > { %5665 = vmatmul.mubr.bf16.vlgmr.msra.gmra.mrb[8].mxu0 %v9306_v15  ;;  %5788 = vmatmul.mubr.bf16.vlgmr.msra.gmra.mrb[8].mxu1 %v9306_v15 }
 0x1c5   : > { %5674 = vmatpush1.bf16.msra.mxu0 %v8318_v14  ;;  %5797 = vmatpush1.bf16.msra.mxu1 %v8321_v16  ;;  %v8399_v14 = vld [vmem:[%s9200_s8 + $0x1248] ss:$80 sps:$4 sm:$0xff]   ;;  %v8404_v16 = vld [vmem:[%s9200_s8 + $0x12e4] ss:$80 sps:$4 sm:$0xff]  }
 0x1c6   : > { %5675 = vmatprep.subr.bf16.mxu0 %v8326_v17  ;;  %5798 = vmatprep.subr.bf16.mxu1 %v8329_v18  ;;  %v8407_v17 = vld [vmem:[%s9200_s8 + $0x12ec] ss:$80 sps:$4 sm:$0xff]   ;;  %v8402_v18 = vld [vmem:[%s9200_s8 + $0x12e0] ss:$80 sps:$4 sm:$0xff]  }
 0x1c7   : > { %5705 = vmatprep.mubr.bf16.mxu0 %v9313_v19  ;;  %5828 = vmatprep.mubr.bf16.mxu1 %v9313_v19 }
 0x1c9   : > { %5676 = vmatpush1.bf16.msra.mxu0 %v8324_v20  ;;  %5799 = vmatpush1.bf16.msra.mxu1 %v8327_v21  ;;  %v8405_v20 = vld [vmem:[%s9200_s8 + $0x12e8] ss:$80 sps:$4 sm:$0xff]   ;;  %v8410_v21 = vld [vmem:[%s9200_s8 + $0x1384] ss:$80 sps:$4 sm:$0xff]  }
 0x1ca   : > { %5677 = vmatprep.subr.bf16.mxu0 %v8332_v22  ;;  %5800 = vmatprep.subr.bf16.mxu1 %v8335_v24  ;;  %v8413_v22 = vld [vmem:[%s9200_s8 + $0x138c] ss:$80 sps:$4 sm:$0xff]   ;;  %v8408_v24 = vld [vmem:[%s9200_s8 + $0x1380] ss:$80 sps:$4 sm:$0xff]  }
 0x1cd   : > { %5678 = vmatpush1.bf16.msra.mxu0 %v8330_v25  ;;  %5801 = vmatpush1.bf16.msra.mxu1 %v8333_v26  ;;  %v8411_v25 = vld [vmem:[%s9200_s8 + $0x1388] ss:$80 sps:$4 sm:$0xff]   ;;  %v8416_v26 = vld [vmem:[%s9200_s8 + $0x1424] ss:$80 sps:$4 sm:$0xff]  }
 0x1ce   : > { %5679 = vmatprep.subr.bf16.mxu0 %v8338_v27  ;;  %5802 = vmatprep.subr.bf16.mxu1 %v8341_v28  ;;  %v8419_v27 = vld [vmem:[%s9200_s8 + $0x142c] ss:$80 sps:$4 sm:$0xff]   ;;  %v8414_v28 = vld [vmem:[%s9200_s8 + $0x1420] ss:$80 sps:$4 sm:$0xff]  }
 0x1d1   : > { %5680 = vmatpush1.bf16.msra.mxu0 %v8336_v29  ;;  %5803 = vmatpush1.bf16.msra.mxu1 %v8339_v30  ;;  %v8417_v29 = vld [vmem:[%s9200_s8 + $0x1428] ss:$80 sps:$4 sm:$0xff]   ;;  %v8422_v30 = vld [vmem:[%s9200_s8 + $0x14c4] ss:$80 sps:$4 sm:$0xff]  }
 0x1d2   : > { %5681 = vmatprep.subr.bf16.mxu0 %v8344_v32  ;;  %5804 = vmatprep.subr.bf16.mxu1 %v8347_v33  ;;  %v8425_v32 = vld [vmem:[%s9200_s8 + $0x14cc] ss:$80 sps:$4 sm:$0xff]   ;;  %v8420_v33 = vld [vmem:[%s9200_s8 + $0x14c0] ss:$80 sps:$4 sm:$0xff]  }
 0x1d5   : > { %5682 = vmatpush1.bf16.msra.mxu0 %v8342_v34  ;;  %5805 = vmatpush1.bf16.msra.mxu1 %v8345_v35  ;;  %v8423_v34 = vld [vmem:[%s9200_s8 + $0x14c8] ss:$80 sps:$4 sm:$0xff]   ;;  %v8428_v35 = vld [vmem:[%s9200_s8 + $0x1564] ss:$80 sps:$4 sm:$0xff]  }
 0x1d6   : > { %5683 = vmatprep.subr.bf16.mxu0 %v8350_v36  ;;  %5806 = vmatprep.subr.bf16.mxu1 %v8353_v37  ;;  %v8431_v36 = vld [vmem:[%s9200_s8 + $0x156c] ss:$80 sps:$4 sm:$0xff]   ;;  %v8426_v37 = vld [vmem:[%s9200_s8 + $0x1560] ss:$80 sps:$4 sm:$0xff]  }
 0x1d9   : > { %5684 = vmatpush1.bf16.msra.mxu0 %v8348_v38  ;;  %5807 = vmatpush1.bf16.msra.mxu1 %v8351_v39  ;;  %v8429_v38 = vld [vmem:[%s9200_s8 + $0x1568] ss:$80 sps:$4 sm:$0xff]   ;;  %v8434_v39 = vld [vmem:[%s9200_s8 + $0x1604] ss:$80 sps:$4 sm:$0xff]  }
 0x1da   : > { %5685 = vmatprep.subr.bf16.mxu0 %v8356_v40  ;;  %5808 = vmatprep.subr.bf16.mxu1 %v8359_v41  ;;  %v8437_v40 = vld [vmem:[%s9200_s8 + $0x160c] ss:$80 sps:$4 sm:$0xff]   ;;  %v8432_v41 = vld [vmem:[%s9200_s8 + $0x1600] ss:$80 sps:$4 sm:$0xff]  }
 0x1dd   : > { %5686 = vmatpush1.bf16.msra.mxu0 %v8354_v42  ;;  %5809 = vmatpush1.bf16.msra.mxu1 %v8357_v43  ;;  %v8435_v42 = vld [vmem:[%s9200_s8 + $0x1608] ss:$80 sps:$4 sm:$0xff]   ;;  %v8440_v43 = vld [vmem:[%s9200_s8 + $0x16a4] ss:$80 sps:$4 sm:$0xff]  }
 0x1de   : > { %5687 = vmatprep.subr.bf16.mxu0 %v8362_v44  ;;  %5810 = vmatprep.subr.bf16.mxu1 %v8365_v46  ;;  %v8443_v44 = vld [vmem:[%s9200_s8 + $0x16ac] ss:$80 sps:$4 sm:$0xff]   ;;  %v8438_v46 = vld [vmem:[%s9200_s8 + $0x16a0] ss:$80 sps:$4 sm:$0xff]  }
 0x1e1   : > { %5688 = vmatpush1.bf16.msra.mxu0 %v8360_v47  ;;  %5811 = vmatpush1.bf16.msra.mxu1 %v8363_v48  ;;  %v8441_v47 = vld [vmem:[%s9200_s8 + $0x16a8] ss:$80 sps:$4 sm:$0xff]   ;;  %v8446_v48 = vld [vmem:[%s9200_s8 + $0x1744] ss:$80 sps:$4 sm:$0xff]  }
 0x1e2   : > { %5689 = vmatprep.subr.bf16.mxu0 %v8368_v49  ;;  %5812 = vmatprep.subr.bf16.mxu1 %v8371_v50  ;;  %v8449_v49 = vld [vmem:[%s9200_s8 + $0x174c] ss:$80 sps:$4 sm:$0xff]   ;;  %v8444_v50 = vld [vmem:[%s9200_s8 + $0x1740] ss:$80 sps:$4 sm:$0xff]  }
 0x1e5   : > { %5690 = vmatpush1.bf16.msra.mxu0 %v8366_v52  ;;  %5813 = vmatpush1.bf16.msra.mxu1 %v8369_v53  ;;  %v8447_v52 = vld [vmem:[%s9200_s8 + $0x1748] ss:$80 sps:$4 sm:$0xff]   ;;  %v8452_v53 = vld [vmem:[%s9200_s8 + $0x17e4] ss:$80 sps:$4 sm:$0xff]  }
 0x1e6   : > { %5691 = vmatprep.subr.bf16.mxu0 %v8374_v55  ;;  %5814 = vmatprep.subr.bf16.mxu1 %v8377_v56  ;;  %v8455_v55 = vld [vmem:[%s9200_s8 + $0x17ec] ss:$80 sps:$4 sm:$0xff]   ;;  %v8450_v56 = vld [vmem:[%s9200_s8 + $0x17e0] ss:$80 sps:$4 sm:$0xff]  }
 0x1e9   : > { %5692 = vmatpush1.bf16.msra.mxu0 %v8372_v57  ;;  %5815 = vmatpush1.bf16.msra.mxu1 %v8375_v54  ;;  %v8453_v57 = vld [vmem:[%s9200_s8 + $0x17e8] ss:$80 sps:$4 sm:$0xff]   ;;  %v8458_v54 = vld [vmem:[%s9200_s8 + $0x1884] ss:$80 sps:$4 sm:$0xff]  }
 0x1ea   : > { %5693 = vmatprep.subr.bf16.mxu0 %v8380_v59  ;;  %5816 = vmatprep.subr.bf16.mxu1 %v8383_v61  ;;  %v8461_v59 = vld [vmem:[%s9200_s8 + $0x188c] ss:$80 sps:$4 sm:$0xff]   ;;  %v8456_v61 = vld [vmem:[%s9200_s8 + $0x1880] ss:$80 sps:$4 sm:$0xff]  }
 0x1ed   : > { %5694 = vmatpush1.bf16.msra.mxu0 %v8378_v63  ;;  %5817 = vmatpush1.bf16.msra.mxu1 %v8381_v0  ;;  %v8459_v63 = vld [vmem:[%s9200_s8 + $0x1888] ss:$80 sps:$4 sm:$0xff]   ;;  %v8464_v0 = vld [vmem:[%s9200_s8 + $0x34] ss:$80 sps:$4 sm:$0xff]  }
 0x1ee   : > { %5695 = vmatprep.subr.bf16.mxu0 %v8386_v1  ;;  %5818 = vmatprep.subr.bf16.mxu1 %v8389_v2  ;;  %v8467_v1 = vld [vmem:[%s9200_s8 + $0x3c] ss:$80 sps:$4 sm:$0xff]   ;;  %v8462_v2 = vld [vmem:[%s9200_s8 + $0x30] ss:$80 sps:$4 sm:$0xff]  }
 0x1f1   : > { %5696 = vmatpush1.bf16.msra.mxu0 %v8384_v3  ;;  %5819 = vmatpush1.bf16.msra.mxu1 %v8387_v4  ;;  %v8465_v3 = vld [vmem:[%s9200_s8 + $0x38] ss:$80 sps:$4 sm:$0xff]   ;;  %v8470_v4 = vld [vmem:[%s9200_s8 + $0xd4] ss:$80 sps:$4 sm:$0xff]  }
 0x1f2   : > { %5697 = vmatprep.subr.bf16.mxu0 %v8392_v5  ;;  %5820 = vmatprep.subr.bf16.mxu1 %v8395_v45  ;;  %v8473_v5 = vld [vmem:[%s9200_s8 + $0xdc] ss:$80 sps:$4 sm:$0xff]   ;;  %v8468_v45 = vld [vmem:[%s9200_s8 + $0xd0] ss:$80 sps:$4 sm:$0xff]  }
 0x1f5   : > { %5698 = vmatpush1.bf16.msra.mxu0 %v8390_v6  ;;  %5821 = vmatpush1.bf16.msra.mxu1 %v8393_v10  ;;  %v8471_v6 = vld [vmem:[%s9200_s8 + $0xd8] ss:$80 sps:$4 sm:$0xff]   ;;  %v8476_v10 = vld [vmem:[%s9200_s8 + $0x174] ss:$80 sps:$4 sm:$0xff]  }
 0x1f6   : > { %5699 = vmatprep.subr.bf16.mxu0 %v8398_v11  ;;  %5822 = vmatprep.subr.bf16.mxu1 %v8401_v12  ;;  %v8479_v11 = vld [vmem:[%s9200_s8 + $0x17c] ss:$80 sps:$4 sm:$0xff]   ;;  %v8474_v12 = vld [vmem:[%s9200_s8 + $0x170] ss:$80 sps:$4 sm:$0xff]  }
 0x1f9   : > { %5700 = vmatpush1.bf16.msra.mxu0 %v8396_v13  ;;  %5823 = vmatpush1.bf16.msra.mxu1 %v8399_v14  ;;  %v8477_v13 = vld [vmem:[%s9200_s8 + $0x178] ss:$80 sps:$4 sm:$0xff]   ;;  %v8482_v14 = vld [vmem:[%s9200_s8 + $0x214] ss:$80 sps:$4 sm:$0xff]  }
 0x1fa   : > { %5701 = vmatprep.subr.bf16.mxu0 %v8404_v16  ;;  %5824 = vmatprep.subr.bf16.mxu1 %v8407_v17  ;;  %v8485_v16 = vld [vmem:[%s9200_s8 + $0x21c] ss:$80 sps:$4 sm:$0xff]   ;;  %v8480_v17 = vld [vmem:[%s9200_s8 + $0x210] ss:$80 sps:$4 sm:$0xff]  }
 0x1fd   : > { %5702 = vmatpush1.bf16.msra.mxu0 %v8402_v18  ;;  %5825 = vmatpush1.bf16.msra.mxu1 %v8405_v20  ;;  %v8483_v18 = vld [vmem:[%s9200_s8 + $0x218] ss:$80 sps:$4 sm:$0xff]   ;;  %v8488_v20 = vld [vmem:[%s9200_s8 + $0x2b4] ss:$80 sps:$4 sm:$0xff]  }
 0x1fe   : > { %5703 = vmatprep.subr.bf16.mxu0 %v8410_v21  ;;  %5826 = vmatprep.subr.bf16.mxu1 %v8413_v22  ;;  %v8491_v21 = vld [vmem:[%s9200_s8 + $0x2bc] ss:$80 sps:$4 sm:$0xff]   ;;  %v8486_v22 = vld [vmem:[%s9200_s8 + $0x2b0] ss:$80 sps:$4 sm:$0xff]  }
 0x201   : > { %5704 = vmatpush1.bf16.msra.mxu0 %v8408_v24  ;;  %5827 = vmatpush1.bf16.msra.mxu1 %v8411_v25  ;;  %v8489_v24 = vld [vmem:[%s9200_s8 + $0x2b8] ss:$80 sps:$4 sm:$0xff]   ;;  %v8494_v25 = vld [vmem:[%s9200_s8 + $0x354] ss:$80 sps:$4 sm:$0xff]  }
 0x202   : > { %5714 = vmatprep.subr.bf16.mxu0 %v8416_v26  ;;  %5837 = vmatprep.subr.bf16.mxu1 %v8419_v27  ;;  %v8497_v26 = vld [vmem:[%s9200_s8 + $0x35c] ss:$80 sps:$4 sm:$0xff]   ;;  %v8492_v27 = vld [vmem:[%s9200_s8 + $0x350] ss:$80 sps:$4 sm:$0xff]  }
 0x204   : > { %5706 = vmatmul.mubr.bf16.vlgmr.msra.gmra.mrb[8].mxu0 %v9382_v23  ;;  %5829 = vmatmul.mubr.bf16.vlgmr.msra.gmra.mrb[8].mxu1 %v9382_v23 }
 0x205   : > { %5715 = vmatpush1.bf16.msra.mxu0 %v8414_v28  ;;  %5838 = vmatpush1.bf16.msra.mxu1 %v8417_v29  ;;  %v8495_v28 = vld [vmem:[%s9200_s8 + $0x358] ss:$80 sps:$4 sm:$0xff]   ;;  %v8500_v29 = vld [vmem:[%s9200_s8 + $0x3f4] ss:$80 sps:$4 sm:$0xff]  }
 0x206   : > { %5716 = vmatprep.subr.bf16.mxu0 %v8422_v30  ;;  %5839 = vmatprep.subr.bf16.mxu1 %v8425_v32  ;;  %v8503_v30 = vld [vmem:[%s9200_s8 + $0x3fc] ss:$80 sps:$4 sm:$0xff]   ;;  %v8498_v32 = vld [vmem:[%s9200_s8 + $0x3f0] ss:$80 sps:$4 sm:$0xff]  }
 0x207   : > { %5746 = vmatprep.mubr.bf16.mxu0 %v9078_v31  ;;  %5869 = vmatprep.mubr.bf16.mxu1 %v9078_v31 }
 0x209   : > { %5717 = vmatpush1.bf16.msra.mxu0 %v8420_v33  ;;  %5840 = vmatpush1.bf16.msra.mxu1 %v8423_v34  ;;  %v8501_v33 = vld [vmem:[%s9200_s8 + $0x3f8] ss:$80 sps:$4 sm:$0xff]   ;;  %v8506_v34 = vld [vmem:[%s9200_s8 + $0x494] ss:$80 sps:$4 sm:$0xff]  }
 0x20a   : > { %5718 = vmatprep.subr.bf16.mxu0 %v8428_v35  ;;  %5841 = vmatprep.subr.bf16.mxu1 %v8431_v36  ;;  %v8509_v35 = vld [vmem:[%s9200_s8 + $0x49c] ss:$80 sps:$4 sm:$0xff]   ;;  %v8504_v36 = vld [vmem:[%s9200_s8 + $0x490] ss:$80 sps:$4 sm:$0xff]  }
 0x20d   : > { %5719 = vmatpush1.bf16.msra.mxu0 %v8426_v37  ;;  %5842 = vmatpush1.bf16.msra.mxu1 %v8429_v38  ;;  %v8507_v37 = vld [vmem:[%s9200_s8 + $0x498] ss:$80 sps:$4 sm:$0xff]   ;;  %v8512_v38 = vld [vmem:[%s9200_s8 + $0x534] ss:$80 sps:$4 sm:$0xff]  }
 0x20e   : > { %5720 = vmatprep.subr.bf16.mxu0 %v8434_v39  ;;  %5843 = vmatprep.subr.bf16.mxu1 %v8437_v40  ;;  %v8515_v39 = vld [vmem:[%s9200_s8 + $0x53c] ss:$80 sps:$4 sm:$0xff]   ;;  %v8510_v40 = vld [vmem:[%s9200_s8 + $0x530] ss:$80 sps:$4 sm:$0xff]  }
 0x211   : > { %5721 = vmatpush1.bf16.msra.mxu0 %v8432_v41  ;;  %5844 = vmatpush1.bf16.msra.mxu1 %v8435_v42  ;;  %v8513_v41 = vld [vmem:[%s9200_s8 + $0x538] ss:$80 sps:$4 sm:$0xff]   ;;  %v8518_v42 = vld [vmem:[%s9200_s8 + $0x5d4] ss:$80 sps:$4 sm:$0xff]  }
 0x212   : > { %5722 = vmatprep.subr.bf16.mxu0 %v8440_v43  ;;  %5845 = vmatprep.subr.bf16.mxu1 %v8443_v44  ;;  %v8521_v43 = vld [vmem:[%s9200_s8 + $0x5dc] ss:$80 sps:$4 sm:$0xff]   ;;  %v8516_v44 = vld [vmem:[%s9200_s8 + $0x5d0] ss:$80 sps:$4 sm:$0xff]  }
 0x215   : > { %5723 = vmatpush1.bf16.msra.mxu0 %v8438_v46  ;;  %5846 = vmatpush1.bf16.msra.mxu1 %v8441_v47  ;;  %v8519_v46 = vld [vmem:[%s9200_s8 + $0x5d8] ss:$80 sps:$4 sm:$0xff]   ;;  %v8524_v47 = vld [vmem:[%s9200_s8 + $0x674] ss:$80 sps:$4 sm:$0xff]  }
 0x216   : > { %5724 = vmatprep.subr.bf16.mxu0 %v8446_v48  ;;  %5847 = vmatprep.subr.bf16.mxu1 %v8449_v49  ;;  %v8527_v48 = vld [vmem:[%s9200_s8 + $0x67c] ss:$80 sps:$4 sm:$0xff]   ;;  %v8522_v49 = vld [vmem:[%s9200_s8 + $0x670] ss:$80 sps:$4 sm:$0xff]  }
 0x219   : > { %5725 = vmatpush1.bf16.msra.mxu0 %v8444_v50  ;;  %5848 = vmatpush1.bf16.msra.mxu1 %v8447_v52  ;;  %v8525_v50 = vld [vmem:[%s9200_s8 + $0x678] ss:$80 sps:$4 sm:$0xff]   ;;  %v8530_v52 = vld [vmem:[%s9200_s8 + $0x714] ss:$80 sps:$4 sm:$0xff]  }
 0x21a   : > { %5726 = vmatprep.subr.bf16.mxu0 %v8452_v53  ;;  %5849 = vmatprep.subr.bf16.mxu1 %v8455_v55  ;;  %v8533_v53 = vld [vmem:[%s9200_s8 + $0x71c] ss:$80 sps:$4 sm:$0xff]   ;;  %v8528_v55 = vld [vmem:[%s9200_s8 + $0x710] ss:$80 sps:$4 sm:$0xff]  }
 0x21d   : > { %5727 = vmatpush1.bf16.msra.mxu0 %v8450_v56  ;;  %5850 = vmatpush1.bf16.msra.mxu1 %v8453_v57  ;;  %v8531_v56 = vld [vmem:[%s9200_s8 + $0x718] ss:$80 sps:$4 sm:$0xff]   ;;  %v8536_v57 = vld [vmem:[%s9200_s8 + $0x7b4] ss:$80 sps:$4 sm:$0xff]  }
 0x21e   : > { %5728 = vmatprep.subr.bf16.mxu0 %v8458_v54  ;;  %5851 = vmatprep.subr.bf16.mxu1 %v8461_v59  ;;  %v8539_v54 = vld [vmem:[%s9200_s8 + $0x7bc] ss:$80 sps:$4 sm:$0xff]   ;;  %v8534_v59 = vld [vmem:[%s9200_s8 + $0x7b0] ss:$80 sps:$4 sm:$0xff]  }
 0x221   : > { %5729 = vmatpush1.bf16.msra.mxu0 %v8456_v61  ;;  %5852 = vmatpush1.bf16.msra.mxu1 %v8459_v63  ;;  %v8537_v61 = vld [vmem:[%s9200_s8 + $0x7b8] ss:$80 sps:$4 sm:$0xff]   ;;  %v8542_v63 = vld [vmem:[%s9200_s8 + $0x854] ss:$80 sps:$4 sm:$0xff]  }
 0x222   : > { %5878 = vmatprep.subr.bf16.mxu0 %v8464_v0  ;;  %6001 = vmatprep.subr.bf16.mxu1 %v8467_v1  ;;  %v8545_v0 = vld [vmem:[%s9200_s8 + $0x85c] ss:$80 sps:$4 sm:$0xff]   ;;  %v8540_v1 = vld [vmem:[%s9200_s8 + $0x850] ss:$80 sps:$4 sm:$0xff]  }
 0x224   : > { %5747 = vmatmul.mubr.bf16.vlgmr.msra.gmra.mrb[8].mxu0 %v9423_v60  ;;  %5870 = vmatmul.mubr.bf16.vlgmr.msra.gmra.mrb[8].mxu1 %v9423_v60 }
 0x225   : > { %5879 = vmatpush1.bf16.msra.mxu0 %v8462_v2  ;;  %6002 = vmatpush1.bf16.msra.mxu1 %v8465_v3  ;;  %v8543_v2 = vld [vmem:[%s9200_s8 + $0x858] ss:$80 sps:$4 sm:$0xff]   ;;  %v8548_v3 = vld [vmem:[%s9200_s8 + $0x8f4] ss:$80 sps:$4 sm:$0xff]  }
 0x226   : > { %5880 = vmatprep.subr.bf16.mxu0 %v8470_v4  ;;  %6003 = vmatprep.subr.bf16.mxu1 %v8473_v5  ;;  %v8551_v4 = vld [vmem:[%s9200_s8 + $0x8fc] ss:$80 sps:$4 sm:$0xff]  }
 0x227   : > { %5910 = vmatprep.mubr.bf16.mxu0 %v9285_v62  ;;  %6033 = vmatprep.mubr.bf16.mxu1 %v9285_v62 }
 0x229   : > { %5881 = vmatpush1.bf16.msra.mxu0 %v8468_v45  ;;  %6004 = vmatpush1.bf16.msra.mxu1 %v8471_v6 }
 0x22a   : > { %5882 = vmatprep.subr.bf16.mxu0 %v8476_v10  ;;  %6005 = vmatprep.subr.bf16.mxu1 %v8479_v11 }
 0x22d   : > { %5883 = vmatpush1.bf16.msra.mxu0 %v8474_v12  ;;  %6006 = vmatpush1.bf16.msra.mxu1 %v8477_v13 }
 0x22e   : > { %5884 = vmatprep.subr.bf16.mxu0 %v8482_v14  ;;  %6007 = vmatprep.subr.bf16.mxu1 %v8485_v16  ;;  %v8546_v16 = vld [vmem:[%s9200_s8 + $0x8f0] ss:$80 sps:$4 sm:$0xff]  }
 0x231   : > { %5885 = vmatpush1.bf16.msra.mxu0 %v8480_v17  ;;  %6008 = vmatpush1.bf16.msra.mxu1 %v8483_v18  ;;  %v8549_v17 = vld [vmem:[%s9200_s8 + $0x8f8] ss:$80 sps:$4 sm:$0xff]  }
 0x232   : > { %5886 = vmatprep.subr.bf16.mxu0 %v8488_v20  ;;  %6009 = vmatprep.subr.bf16.mxu1 %v8491_v21  ;;  %v8554_v21 = vld [vmem:[%s9200_s8 + $0x994] ss:$80 sps:$4 sm:$0xff]  }
 0x235   : > { %5887 = vmatpush1.bf16.msra.mxu0 %v8486_v22  ;;  %6010 = vmatpush1.bf16.msra.mxu1 %v8489_v24  ;;  %v8557_v22 = vld [vmem:[%s9200_s8 + $0x99c] ss:$80 sps:$4 sm:$0xff]  }
 0x236   : > { %5888 = vmatprep.subr.bf16.mxu0 %v8494_v25  ;;  %6011 = vmatprep.subr.bf16.mxu1 %v8497_v26 }
 0x239   : > { %5889 = vmatpush1.bf16.msra.mxu0 %v8492_v27  ;;  %6012 = vmatpush1.bf16.msra.mxu1 %v8495_v28  ;;  %v8552_v27 = vld [vmem:[%s9200_s8 + $0x990] ss:$80 sps:$4 sm:$0xff]   ;;  %v8555_v28 = vld [vmem:[%s9200_s8 + $0x998] ss:$80 sps:$4 sm:$0xff]  }
 0x23a   : > { %5890 = vmatprep.subr.bf16.mxu0 %v8500_v29  ;;  %6013 = vmatprep.subr.bf16.mxu1 %v8503_v30  ;;  %v8560_v29 = vld [vmem:[%s9200_s8 + $0xa34] ss:$80 sps:$4 sm:$0xff]   ;;  %v8563_v30 = vld [vmem:[%s9200_s8 + $0xa3c] ss:$80 sps:$4 sm:$0xff]  }
 0x23d   : > { %5891 = vmatpush1.bf16.msra.mxu0 %v8498_v32  ;;  %6014 = vmatpush1.bf16.msra.mxu1 %v8501_v33  ;;  %v8558_v32 = vld [vmem:[%s9200_s8 + $0xa30] ss:$80 sps:$4 sm:$0xff]   ;;  %v8561_v33 = vld [vmem:[%s9200_s8 + $0xa38] ss:$80 sps:$4 sm:$0xff]  }
 0x23e   : > { %5892 = vmatprep.subr.bf16.mxu0 %v8506_v34  ;;  %6015 = vmatprep.subr.bf16.mxu1 %v8509_v35  ;;  %v8566_v34 = vld [vmem:[%s9200_s8 + $0xad4] ss:$80 sps:$4 sm:$0xff]   ;;  %v8569_v35 = vld [vmem:[%s9200_s8 + $0xadc] ss:$80 sps:$4 sm:$0xff]  }
 0x241   : > { %5893 = vmatpush1.bf16.msra.mxu0 %v8504_v36  ;;  %6016 = vmatpush1.bf16.msra.mxu1 %v8507_v37  ;;  %v8564_v36 = vld [vmem:[%s9200_s8 + $0xad0] ss:$80 sps:$4 sm:$0xff]   ;;  %v8567_v37 = vld [vmem:[%s9200_s8 + $0xad8] ss:$80 sps:$4 sm:$0xff]  }
 0x242   : > { %5894 = vmatprep.subr.bf16.mxu0 %v8512_v38  ;;  %6017 = vmatprep.subr.bf16.mxu1 %v8515_v39  ;;  %v8572_v38 = vld [vmem:[%s9200_s8 + $0xb74] ss:$80 sps:$4 sm:$0xff]   ;;  %v8575_v39 = vld [vmem:[%s9200_s8 + $0xb7c] ss:$80 sps:$4 sm:$0xff]  }
 0x245   : > { %5895 = vmatpush1.bf16.msra.mxu0 %v8510_v40  ;;  %6018 = vmatpush1.bf16.msra.mxu1 %v8513_v41  ;;  %v8570_v40 = vld [vmem:[%s9200_s8 + $0xb70] ss:$80 sps:$4 sm:$0xff]   ;;  %v8573_v41 = vld [vmem:[%s9200_s8 + $0xb78] ss:$80 sps:$4 sm:$0xff]  }
 0x246   : > { %5896 = vmatprep.subr.bf16.mxu0 %v8518_v42  ;;  %6019 = vmatprep.subr.bf16.mxu1 %v8521_v43  ;;  %v8578_v42 = vld [vmem:[%s9200_s8 + $0xc14] ss:$80 sps:$4 sm:$0xff]   ;;  %v8581_v43 = vld [vmem:[%s9200_s8 + $0xc1c] ss:$80 sps:$4 sm:$0xff]  }
 0x249   : > { %5897 = vmatpush1.bf16.msra.mxu0 %v8516_v44  ;;  %6020 = vmatpush1.bf16.msra.mxu1 %v8519_v46  ;;  %v8576_v44 = vld [vmem:[%s9200_s8 + $0xc10] ss:$80 sps:$4 sm:$0xff]   ;;  %v8579_v46 = vld [vmem:[%s9200_s8 + $0xc18] ss:$80 sps:$4 sm:$0xff]  }
 0x24a   : > { %5898 = vmatprep.subr.bf16.mxu0 %v8524_v47  ;;  %6021 = vmatprep.subr.bf16.mxu1 %v8527_v48  ;;  %v8584_v47 = vld [vmem:[%s9200_s8 + $0xcb4] ss:$80 sps:$4 sm:$0xff]   ;;  %v8587_v48 = vld [vmem:[%s9200_s8 + $0xcbc] ss:$80 sps:$4 sm:$0xff]  }
 0x24d   : > { %5899 = vmatpush1.bf16.msra.mxu0 %v8522_v49  ;;  %6022 = vmatpush1.bf16.msra.mxu1 %v8525_v50  ;;  %v8582_v49 = vld [vmem:[%s9200_s8 + $0xcb0] ss:$80 sps:$4 sm:$0xff]   ;;  %v8585_v50 = vld [vmem:[%s9200_s8 + $0xcb8] ss:$80 sps:$4 sm:$0xff]  }
 0x24e   : > { %5900 = vmatprep.subr.bf16.mxu0 %v8530_v52  ;;  %6023 = vmatprep.subr.bf16.mxu1 %v8533_v53  ;;  %v8590_v52 = vld [vmem:[%s9200_s8 + $0xd54] ss:$80 sps:$4 sm:$0xff]   ;;  %v8593_v53 = vld [vmem:[%s9200_s8 + $0xd5c] ss:$80 sps:$4 sm:$0xff]  }
 0x251   : > { %5901 = vmatpush1.bf16.msra.mxu0 %v8528_v55  ;;  %6024 = vmatpush1.bf16.msra.mxu1 %v8531_v56  ;;  %v8588_v55 = vld [vmem:[%s9200_s8 + $0xd50] ss:$80 sps:$4 sm:$0xff]   ;;  %v8591_v56 = vld [vmem:[%s9200_s8 + $0xd58] ss:$80 sps:$4 sm:$0xff]  }
 0x252   : > { %5902 = vmatprep.subr.bf16.mxu0 %v8536_v57  ;;  %6025 = vmatprep.subr.bf16.mxu1 %v8539_v54  ;;  %v8596_v57 = vld [vmem:[%s9200_s8 + $0xdf4] ss:$80 sps:$4 sm:$0xff]   ;;  %v8599_v54 = vld [vmem:[%s9200_s8 + $0xdfc] ss:$80 sps:$4 sm:$0xff]  }
 0x255   : > { %5903 = vmatpush1.bf16.msra.mxu0 %v8534_v59  ;;  %6026 = vmatpush1.bf16.msra.mxu1 %v8537_v61  ;;  %v8594_v59 = vld [vmem:[%s9200_s8 + $0xdf0] ss:$80 sps:$4 sm:$0xff]   ;;  %v8597_v61 = vld [vmem:[%s9200_s8 + $0xdf8] ss:$80 sps:$4 sm:$0xff]  }
 0x256   : > { %5904 = vmatprep.subr.bf16.mxu0 %v8542_v63  ;;  %6027 = vmatprep.subr.bf16.mxu1 %v8545_v0  ;;  %v8602_v63 = vld [vmem:[%s9200_s8 + $0xe94] ss:$80 sps:$4 sm:$0xff]   ;;  %v8605_v0 = vld [vmem:[%s9200_s8 + $0xe9c] ss:$80 sps:$4 sm:$0xff]  }
 0x257   : > { %v5502_v5 = vpop.f32.mrb[4].mxu0  ;;  %v5625_v45 = vpop.f32.mrb[4].mxu1 }
 0x258   : > { %v5504_v6 = vpop.f32.mrb[5].mxu0  ;;  %v5627_v10 = vpop.f32.mrb[5].mxu1 }
 0x259   : > { %v6407_v11 = vcombine.low %v5502_v5, %v5504_v6  ;;  %v6408_v12 = vcombine.low %v5625_v45, %v5627_v10  ;;  %v5506_v13 = vpop.f32.mrb[6].mxu0  ;;  %v5629_v14 = vpop.f32.mrb[6].mxu1  ;;  %5905 = vmatpush1.bf16.msra.mxu0 %v8540_v1  ;;  %6028 = vmatpush1.bf16.msra.mxu1 %v8543_v2  ;;  %v8600_v1 = vld [vmem:[%s9200_s8 + $0xe90] ss:$80 sps:$4 sm:$0xff]   ;;  %v8603_v2 = vld [vmem:[%s9200_s8 + $0xe98] ss:$80 sps:$4 sm:$0xff]  }
 0x25a   : > { %v5507_v18 = vpop.f32.mrb[7].mxu0  ;;  %v5630_v20 = vpop.f32.mrb[7].mxu1  ;;  %5906 = vmatprep.subr.bf16.mxu0 %v8548_v3  ;;  %6029 = vmatprep.subr.bf16.mxu1 %v8551_v4  ;;  %v8608_v3 = vld [vmem:[%s9200_s8 + $0xf34] ss:$80 sps:$4 sm:$0xff]   ;;  %v8611_v4 = vld [vmem:[%s9200_s8 + $0xf3c] ss:$80 sps:$4 sm:$0xff]  }
 0x25b   : > { %v9845_v24 = vrot.slane %v6407_v11, %v9658_v58  ;;  %v9848_v25 = vrot.slane %v6408_v12, %v9658_v58  ;;  %v8606_v5 = vld [vmem:[%s9200_s8 + $0xf30] ss:$80 sps:$4 sm:$0xff]   ;;  %v8609_v45 = vld [vmem:[%s9200_s8 + $0xf38] ss:$80 sps:$4 sm:$0xff]   ;;  %v8614_v6 = vld [vmem:[%s9200_s8 + $0xfd4] ss:$80 sps:$4 sm:$0xff]  }
 0x25c   : > { %v8617_v10 = vld [vmem:[%s9200_s8 + $0xfdc] ss:$80 sps:$4 sm:$0xff]   ;;  %v8612_v11 = vld [vmem:[%s9200_s8 + $0xfd0] ss:$80 sps:$4 sm:$0xff]   ;;  %v8615_v12 = vld [vmem:[%s9200_s8 + $0xfd8] ss:$80 sps:$4 sm:$0xff]  }
 0x25d   : > { %v6423_v26 = vcombine.low %v9845_v24, %v9848_v25  ;;  %5907 = vmatpush1.bf16.msra.mxu0 %v8546_v16  ;;  %6030 = vmatpush1.bf16.msra.mxu1 %v8549_v17  ;;  %v8620_v13 = vld [vmem:[%s9200_s8 + $0x1074] ss:$80 sps:$4 sm:$0xff]   ;;  %v8623_v14 = vld [vmem:[%s9200_s8 + $0x107c] ss:$80 sps:$4 sm:$0xff]   ;;  %v8618_v16 = vld [vmem:[%s9200_s8 + $0x1070] ss:$80 sps:$4 sm:$0xff]  }
 0x25e   : > { %5908 = vmatprep.subr.bf16.mxu0 %v8554_v21  ;;  %6031 = vmatprep.subr.bf16.mxu1 %v8557_v22  ;;  %v8621_v17 = vld [vmem:[%s9200_s8 + $0x1078] ss:$80 sps:$4 sm:$0xff]   ;;  %v8626_v18 = vld [vmem:[%s9200_s8 + $0x1114] ss:$80 sps:$4 sm:$0xff]   ;;  %v8629_v20 = vld [vmem:[%s9200_s8 + $0x111c] ss:$80 sps:$4 sm:$0xff]  }
 0x25f   : > { %v8624_v21 = vld [vmem:[%s9200_s8 + $0x1110] ss:$80 sps:$4 sm:$0xff]   ;;  %v8627_v22 = vld [vmem:[%s9200_s8 + $0x1118] ss:$80 sps:$4 sm:$0xff]  }
 0x261   : > { %5909 = vmatpush1.bf16.msra.mxu0 %v8552_v27  ;;  %6032 = vmatpush1.bf16.msra.mxu1 %v8555_v28  ;;  %v8632_v27 = vld [vmem:[%s9200_s8 + $0x11b4] ss:$80 sps:$4 sm:$0xff]   ;;  %v8635_v28 = vld [vmem:[%s9200_s8 + $0x11bc] ss:$80 sps:$4 sm:$0xff]  }
 0x262   : > { %5919 = vmatprep.subr.bf16.mxu0 %v8560_v29  ;;  %6042 = vmatprep.subr.bf16.mxu1 %v8563_v30  ;;  %v8630_v29 = vld [vmem:[%s9200_s8 + $0x11b0] ss:$80 sps:$4 sm:$0xff]   ;;  %v8633_v30 = vld [vmem:[%s9200_s8 + $0x11b8] ss:$80 sps:$4 sm:$0xff]  }
 0x264   : > { %5911 = vmatmul.mubr.bf16.vlgmr.msra.gmra.mrb[12].mxu0 %v9306_v15  ;;  %6034 = vmatmul.mubr.bf16.vlgmr.msra.gmra.mrb[12].mxu1 %v9306_v15 }
 0x265   : > { %5920 = vmatpush1.bf16.msra.mxu0 %v8558_v32  ;;  %6043 = vmatpush1.bf16.msra.mxu1 %v8561_v33  ;;  %v8638_v32 = vld [vmem:[%s9200_s8 + $0x1254] ss:$80 sps:$4 sm:$0xff]   ;;  %v8641_v33 = vld [vmem:[%s9200_s8 + $0x125c] ss:$80 sps:$4 sm:$0xff]  }
 0x266   : > { %5921 = vmatprep.subr.bf16.mxu0 %v8566_v34  ;;  %6044 = vmatprep.subr.bf16.mxu1 %v8569_v35  ;;  %v8636_v34 = vld [vmem:[%s9200_s8 + $0x1250] ss:$80 sps:$4 sm:$0xff]   ;;  %v8639_v35 = vld [vmem:[%s9200_s8 + $0x1258] ss:$80 sps:$4 sm:$0xff]  }
 0x267   : > { %5951 = vmatprep.mubr.bf16.mxu0 %v9313_v19  ;;  %6074 = vmatprep.mubr.bf16.mxu1 %v9313_v19 }
 0x269   : > { %5922 = vmatpush1.bf16.msra.mxu0 %v8564_v36  ;;  %6045 = vmatpush1.bf16.msra.mxu1 %v8567_v37  ;;  %v8644_v36 = vld [vmem:[%s9200_s8 + $0x12f4] ss:$80 sps:$4 sm:$0xff]   ;;  %v8647_v37 = vld [vmem:[%s9200_s8 + $0x12fc] ss:$80 sps:$4 sm:$0xff]  }
 0x26a   : > { %5923 = vmatprep.subr.bf16.mxu0 %v8572_v38  ;;  %6046 = vmatprep.subr.bf16.mxu1 %v8575_v39  ;;  %v8642_v38 = vld [vmem:[%s9200_s8 + $0x12f0] ss:$80 sps:$4 sm:$0xff]   ;;  %v8645_v39 = vld [vmem:[%s9200_s8 + $0x12f8] ss:$80 sps:$4 sm:$0xff]  }
 0x26d   : > { %5924 = vmatpush1.bf16.msra.mxu0 %v8570_v40  ;;  %6047 = vmatpush1.bf16.msra.mxu1 %v8573_v41  ;;  %v8650_v40 = vld [vmem:[%s9200_s8 + $0x1394] ss:$80 sps:$4 sm:$0xff]   ;;  %v8653_v41 = vld [vmem:[%s9200_s8 + $0x139c] ss:$80 sps:$4 sm:$0xff]  }
 0x26e   : > { %5925 = vmatprep.subr.bf16.mxu0 %v8578_v42  ;;  %6048 = vmatprep.subr.bf16.mxu1 %v8581_v43  ;;  %v8648_v42 = vld [vmem:[%s9200_s8 + $0x1390] ss:$80 sps:$4 sm:$0xff]   ;;  %v8651_v43 = vld [vmem:[%s9200_s8 + $0x1398] ss:$80 sps:$4 sm:$0xff]  }
 0x271   : > { %5926 = vmatpush1.bf16.msra.mxu0 %v8576_v44  ;;  %6049 = vmatpush1.bf16.msra.mxu1 %v8579_v46  ;;  %v8656_v44 = vld [vmem:[%s9200_s8 + $0x1434] ss:$80 sps:$4 sm:$0xff]   ;;  %v8659_v46 = vld [vmem:[%s9200_s8 + $0x143c] ss:$80 sps:$4 sm:$0xff]  }
 0x272   : > { %5927 = vmatprep.subr.bf16.mxu0 %v8584_v47  ;;  %6050 = vmatprep.subr.bf16.mxu1 %v8587_v48  ;;  %v8654_v47 = vld [vmem:[%s9200_s8 + $0x1430] ss:$80 sps:$4 sm:$0xff]   ;;  %v8657_v48 = vld [vmem:[%s9200_s8 + $0x1438] ss:$80 sps:$4 sm:$0xff]  }
 0x275   : > { %5928 = vmatpush1.bf16.msra.mxu0 %v8582_v49  ;;  %6051 = vmatpush1.bf16.msra.mxu1 %v8585_v50  ;;  %v8662_v49 = vld [vmem:[%s9200_s8 + $0x14d4] ss:$80 sps:$4 sm:$0xff]   ;;  %v8665_v50 = vld [vmem:[%s9200_s8 + $0x14dc] ss:$80 sps:$4 sm:$0xff]  }
 0x276   : > { %5929 = vmatprep.subr.bf16.mxu0 %v8590_v52  ;;  %6052 = vmatprep.subr.bf16.mxu1 %v8593_v53  ;;  %v8660_v52 = vld [vmem:[%s9200_s8 + $0x14d0] ss:$80 sps:$4 sm:$0xff]   ;;  %v8663_v53 = vld [vmem:[%s9200_s8 + $0x14d8] ss:$80 sps:$4 sm:$0xff]  }
 0x279   : > { %5930 = vmatpush1.bf16.msra.mxu0 %v8588_v55  ;;  %6053 = vmatpush1.bf16.msra.mxu1 %v8591_v56  ;;  %v8668_v55 = vld [vmem:[%s9200_s8 + $0x1574] ss:$80 sps:$4 sm:$0xff]   ;;  %v8671_v56 = vld [vmem:[%s9200_s8 + $0x157c] ss:$80 sps:$4 sm:$0xff]  }
 0x27a   : > { %5931 = vmatprep.subr.bf16.mxu0 %v8596_v57  ;;  %6054 = vmatprep.subr.bf16.mxu1 %v8599_v54  ;;  %v8666_v57 = vld [vmem:[%s9200_s8 + $0x1570] ss:$80 sps:$4 sm:$0xff]   ;;  %v8669_v54 = vld [vmem:[%s9200_s8 + $0x1578] ss:$80 sps:$4 sm:$0xff]  }
 0x27d   : > { %5932 = vmatpush1.bf16.msra.mxu0 %v8594_v59  ;;  %6055 = vmatpush1.bf16.msra.mxu1 %v8597_v61  ;;  %v8674_v59 = vld [vmem:[%s9200_s8 + $0x1614] ss:$80 sps:$4 sm:$0xff]   ;;  %v8677_v61 = vld [vmem:[%s9200_s8 + $0x161c] ss:$80 sps:$4 sm:$0xff]  }
 0x27e   : > { %5933 = vmatprep.subr.bf16.mxu0 %v8602_v63  ;;  %6056 = vmatprep.subr.bf16.mxu1 %v8605_v0  ;;  %v8672_v63 = vld [vmem:[%s9200_s8 + $0x1610] ss:$80 sps:$4 sm:$0xff]   ;;  %v8675_v0 = vld [vmem:[%s9200_s8 + $0x1618] ss:$80 sps:$4 sm:$0xff]  }
 0x281   : > { %5934 = vmatpush1.bf16.msra.mxu0 %v8600_v1  ;;  %6057 = vmatpush1.bf16.msra.mxu1 %v8603_v2  ;;  %v8680_v1 = vld [vmem:[%s9200_s8 + $0x16b4] ss:$80 sps:$4 sm:$0xff]   ;;  %v8683_v2 = vld [vmem:[%s9200_s8 + $0x16bc] ss:$80 sps:$4 sm:$0xff]  }
 0x282   : > { %5935 = vmatprep.subr.bf16.mxu0 %v8608_v3  ;;  %6058 = vmatprep.subr.bf16.mxu1 %v8611_v4  ;;  %v8678_v3 = vld [vmem:[%s9200_s8 + $0x16b0] ss:$80 sps:$4 sm:$0xff]   ;;  %v8681_v4 = vld [vmem:[%s9200_s8 + $0x16b8] ss:$80 sps:$4 sm:$0xff]  }
 0x285   : > { %5936 = vmatpush1.bf16.msra.mxu0 %v8606_v5  ;;  %6059 = vmatpush1.bf16.msra.mxu1 %v8609_v45  ;;  %v8686_v5 = vld [vmem:[%s9200_s8 + $0x1754] ss:$80 sps:$4 sm:$0xff]   ;;  %v8689_v45 = vld [vmem:[%s9200_s8 + $0x175c] ss:$80 sps:$4 sm:$0xff]  }
 0x286   : > { %5937 = vmatprep.subr.bf16.mxu0 %v8614_v6  ;;  %6060 = vmatprep.subr.bf16.mxu1 %v8617_v10  ;;  %v8684_v6 = vld [vmem:[%s9200_s8 + $0x1750] ss:$80 sps:$4 sm:$0xff]   ;;  %v8687_v10 = vld [vmem:[%s9200_s8 + $0x1758] ss:$80 sps:$4 sm:$0xff]  }
 0x289   : > { %5938 = vmatpush1.bf16.msra.mxu0 %v8612_v11  ;;  %6061 = vmatpush1.bf16.msra.mxu1 %v8615_v12  ;;  %v8692_v11 = vld [vmem:[%s9200_s8 + $0x17f4] ss:$80 sps:$4 sm:$0xff]   ;;  %v8695_v12 = vld [vmem:[%s9200_s8 + $0x17fc] ss:$80 sps:$4 sm:$0xff]  }
 0x28a   : > { %5939 = vmatprep.subr.bf16.mxu0 %v8620_v13  ;;  %6062 = vmatprep.subr.bf16.mxu1 %v8623_v14  ;;  %v8690_v13 = vld [vmem:[%s9200_s8 + $0x17f0] ss:$80 sps:$4 sm:$0xff]   ;;  %v8693_v14 = vld [vmem:[%s9200_s8 + $0x17f8] ss:$80 sps:$4 sm:$0xff]  }
 0x28d   : > { %5940 = vmatpush1.bf16.msra.mxu0 %v8618_v16  ;;  %6063 = vmatpush1.bf16.msra.mxu1 %v8621_v17  ;;  %v8698_v16 = vld [vmem:[%s9200_s8 + $0x1894] ss:$80 sps:$4 sm:$0xff]   ;;  %v8701_v17 = vld [vmem:[%s9200_s8 + $0x189c] ss:$80 sps:$4 sm:$0xff]  }
 0x28e   : > { %5941 = vmatprep.subr.bf16.mxu0 %v8626_v18  ;;  %6064 = vmatprep.subr.bf16.mxu1 %v8629_v20  ;;  %v8696_v18 = vld [vmem:[%s9200_s8 + $0x1890] ss:$80 sps:$4 sm:$0xff]   ;;  %v8699_v20 = vld [vmem:[%s9200_s8 + $0x1898] ss:$80 sps:$4 sm:$0xff]  }
 0x291   : > { %5942 = vmatpush1.bf16.msra.mxu0 %v8624_v21  ;;  %6065 = vmatpush1.bf16.msra.mxu1 %v8627_v22  ;;  %v8704_v21 = vld [vmem:[%s9200_s8 + $0x44] ss:$80 sps:$4 sm:$0xff]   ;;  %v8707_v22 = vld [vmem:[%s9200_s8 + $0x4c] ss:$80 sps:$4 sm:$0xff]  }
 0x292   : > { %5943 = vmatprep.subr.bf16.mxu0 %v8632_v27  ;;  %6066 = vmatprep.subr.bf16.mxu1 %v8635_v28  ;;  %v8702_v27 = vld [vmem:[%s9200_s8 + $0x40] ss:$80 sps:$4 sm:$0xff]   ;;  %v8705_v28 = vld [vmem:[%s9200_s8 + $0x48] ss:$80 sps:$4 sm:$0xff]  }
 0x295   : > { %5944 = vmatpush1.bf16.msra.mxu0 %v8630_v29  ;;  %6067 = vmatpush1.bf16.msra.mxu1 %v8633_v30  ;;  %v8710_v29 = vld [vmem:[%s9200_s8 + $0xe4] ss:$80 sps:$4 sm:$0xff]   ;;  %v8713_v30 = vld [vmem:[%s9200_s8 + $0xec] ss:$80 sps:$4 sm:$0xff]  }
 0x296   : > { %5945 = vmatprep.subr.bf16.mxu0 %v8638_v32  ;;  %6068 = vmatprep.subr.bf16.mxu1 %v8641_v33  ;;  %v8708_v32 = vld [vmem:[%s9200_s8 + $0xe0] ss:$80 sps:$4 sm:$0xff]   ;;  %v8711_v33 = vld [vmem:[%s9200_s8 + $0xe8] ss:$80 sps:$4 sm:$0xff]  }
 0x299   : > { %5946 = vmatpush1.bf16.msra.mxu0 %v8636_v34  ;;  %6069 = vmatpush1.bf16.msra.mxu1 %v8639_v35  ;;  %v8716_v34 = vld [vmem:[%s9200_s8 + $0x184] ss:$80 sps:$4 sm:$0xff]   ;;  %v8719_v35 = vld [vmem:[%s9200_s8 + $0x18c] ss:$80 sps:$4 sm:$0xff]  }
 0x29a   : > { %5947 = vmatprep.subr.bf16.mxu0 %v8644_v36  ;;  %6070 = vmatprep.subr.bf16.mxu1 %v8647_v37  ;;  %v8714_v36 = vld [vmem:[%s9200_s8 + $0x180] ss:$80 sps:$4 sm:$0xff]   ;;  %v8717_v37 = vld [vmem:[%s9200_s8 + $0x188] ss:$80 sps:$4 sm:$0xff]  }
 0x29d   : > { %5948 = vmatpush1.bf16.msra.mxu0 %v8642_v38  ;;  %6071 = vmatpush1.bf16.msra.mxu1 %v8645_v39  ;;  %v8722_v38 = vld [vmem:[%s9200_s8 + $0x224] ss:$80 sps:$4 sm:$0xff]   ;;  %v8725_v39 = vld [vmem:[%s9200_s8 + $0x22c] ss:$80 sps:$4 sm:$0xff]  }
 0x29e   : > { %5949 = vmatprep.subr.bf16.mxu0 %v8650_v40  ;;  %6072 = vmatprep.subr.bf16.mxu1 %v8653_v41  ;;  %v8720_v40 = vld [vmem:[%s9200_s8 + $0x220] ss:$80 sps:$4 sm:$0xff]   ;;  %v8723_v41 = vld [vmem:[%s9200_s8 + $0x228] ss:$80 sps:$4 sm:$0xff]  }
 0x2a1   : > { %5950 = vmatpush1.bf16.msra.mxu0 %v8648_v42  ;;  %6073 = vmatpush1.bf16.msra.mxu1 %v8651_v43  ;;  %v8731_v42 = vld [vmem:[%s9200_s8 + $0x2cc] ss:$80 sps:$4 sm:$0xff]   ;;  %v8726_v43 = vld [vmem:[%s9200_s8 + $0x2c0] ss:$80 sps:$4 sm:$0xff]  }
 0x2a2   : > { %5960 = vmatprep.subr.bf16.mxu0 %v8656_v44  ;;  %6083 = vmatprep.subr.bf16.mxu1 %v8659_v46  ;;  %v8729_v44 = vld [vmem:[%s9200_s8 + $0x2c8] ss:$80 sps:$4 sm:$0xff]   ;;  %v8734_v46 = vld [vmem:[%s9200_s8 + $0x364] ss:$80 sps:$4 sm:$0xff]  }
 0x2a4   : > { %5952 = vmatmul.mubr.bf16.vlgmr.msra.gmra.mrb[12].mxu0 %v9382_v23  ;;  %6075 = vmatmul.mubr.bf16.vlgmr.msra.gmra.mrb[12].mxu1 %v9382_v23 }
 0x2a5   : > { %5961 = vmatpush1.bf16.msra.mxu0 %v8654_v47  ;;  %6084 = vmatpush1.bf16.msra.mxu1 %v8657_v48  ;;  %v8737_v47 = vld [vmem:[%s9200_s8 + $0x36c] ss:$80 sps:$4 sm:$0xff]   ;;  %v8732_v48 = vld [vmem:[%s9200_s8 + $0x360] ss:$80 sps:$4 sm:$0xff]  }
 0x2a6   : > { %5962 = vmatprep.subr.bf16.mxu0 %v8662_v49  ;;  %6085 = vmatprep.subr.bf16.mxu1 %v8665_v50  ;;  %v8735_v49 = vld [vmem:[%s9200_s8 + $0x368] ss:$80 sps:$4 sm:$0xff]   ;;  %v8740_v50 = vld [vmem:[%s9200_s8 + $0x404] ss:$80 sps:$4 sm:$0xff]  }
 0x2a7   : > { %5992 = vmatprep.mubr.bf16.mxu0 %v9078_v31  ;;  %6115 = vmatprep.mubr.bf16.mxu1 %v9078_v31 }
 0x2a9   : > { %5963 = vmatpush1.bf16.msra.mxu0 %v8660_v52  ;;  %6086 = vmatpush1.bf16.msra.mxu1 %v8663_v53  ;;  %v8743_v52 = vld [vmem:[%s9200_s8 + $0x40c] ss:$80 sps:$4 sm:$0xff]   ;;  %v8738_v53 = vld [vmem:[%s9200_s8 + $0x400] ss:$80 sps:$4 sm:$0xff]  }
 0x2aa   : > { %5964 = vmatprep.subr.bf16.mxu0 %v8668_v55  ;;  %6087 = vmatprep.subr.bf16.mxu1 %v8671_v56  ;;  %v8741_v55 = vld [vmem:[%s9200_s8 + $0x408] ss:$80 sps:$4 sm:$0xff]   ;;  %v8746_v56 = vld [vmem:[%s9200_s8 + $0x4a4] ss:$80 sps:$4 sm:$0xff]  }
 0x2ad   : > { %5965 = vmatpush1.bf16.msra.mxu0 %v8666_v57  ;;  %6088 = vmatpush1.bf16.msra.mxu1 %v8669_v54  ;;  %v8749_v57 = vld [vmem:[%s9200_s8 + $0x4ac] ss:$80 sps:$4 sm:$0xff]   ;;  %v8744_v54 = vld [vmem:[%s9200_s8 + $0x4a0] ss:$80 sps:$4 sm:$0xff]  }
 0x2ae   : > { %5966 = vmatprep.subr.bf16.mxu0 %v8674_v59  ;;  %6089 = vmatprep.subr.bf16.mxu1 %v8677_v61  ;;  %v8747_v59 = vld [vmem:[%s9200_s8 + $0x4a8] ss:$80 sps:$4 sm:$0xff]   ;;  %v8752_v61 = vld [vmem:[%s9200_s8 + $0x544] ss:$80 sps:$4 sm:$0xff]  }
 0x2b1   : > { %5967 = vmatpush1.bf16.msra.mxu0 %v8672_v63  ;;  %6090 = vmatpush1.bf16.msra.mxu1 %v8675_v0  ;;  %v8755_v63 = vld [vmem:[%s9200_s8 + $0x54c] ss:$80 sps:$4 sm:$0xff]   ;;  %v8750_v0 = vld [vmem:[%s9200_s8 + $0x540] ss:$80 sps:$4 sm:$0xff]  }
 0x2b2   : > { %5968 = vmatprep.subr.bf16.mxu0 %v8680_v1  ;;  %6091 = vmatprep.subr.bf16.mxu1 %v8683_v2  ;;  %v8753_v1 = vld [vmem:[%s9200_s8 + $0x548] ss:$80 sps:$4 sm:$0xff]   ;;  %v8758_v2 = vld [vmem:[%s9200_s8 + $0x5e4] ss:$80 sps:$4 sm:$0xff]  }
 0x2b5   : > { %5969 = vmatpush1.bf16.msra.mxu0 %v8678_v3  ;;  %6092 = vmatpush1.bf16.msra.mxu1 %v8681_v4  ;;  %v8761_v3 = vld [vmem:[%s9200_s8 + $0x5ec] ss:$80 sps:$4 sm:$0xff]   ;;  %v8756_v4 = vld [vmem:[%s9200_s8 + $0x5e0] ss:$80 sps:$4 sm:$0xff]  }
 0x2b6   : > { %5970 = vmatprep.subr.bf16.mxu0 %v8686_v5  ;;  %6093 = vmatprep.subr.bf16.mxu1 %v8689_v45  ;;  %v8759_v5 = vld [vmem:[%s9200_s8 + $0x5e8] ss:$80 sps:$4 sm:$0xff]   ;;  %v8764_v45 = vld [vmem:[%s9200_s8 + $0x684] ss:$80 sps:$4 sm:$0xff]  }
 0x2b9   : > { %5971 = vmatpush1.bf16.msra.mxu0 %v8684_v6  ;;  %6094 = vmatpush1.bf16.msra.mxu1 %v8687_v10  ;;  %v8767_v6 = vld [vmem:[%s9200_s8 + $0x68c] ss:$80 sps:$4 sm:$0xff]   ;;  %v8762_v10 = vld [vmem:[%s9200_s8 + $0x680] ss:$80 sps:$4 sm:$0xff]  }
 0x2ba   : > { %5972 = vmatprep.subr.bf16.mxu0 %v8692_v11  ;;  %6095 = vmatprep.subr.bf16.mxu1 %v8695_v12  ;;  %v8765_v11 = vld [vmem:[%s9200_s8 + $0x688] ss:$80 sps:$4 sm:$0xff]   ;;  %v8770_v12 = vld [vmem:[%s9200_s8 + $0x724] ss:$80 sps:$4 sm:$0xff]  }
 0x2bd   : > { %5973 = vmatpush1.bf16.msra.mxu0 %v8690_v13  ;;  %6096 = vmatpush1.bf16.msra.mxu1 %v8693_v14  ;;  %v8773_v13 = vld [vmem:[%s9200_s8 + $0x72c] ss:$80 sps:$4 sm:$0xff]   ;;  %v8768_v14 = vld [vmem:[%s9200_s8 + $0x720] ss:$80 sps:$4 sm:$0xff]  }
 0x2be   : > { %5974 = vmatprep.subr.bf16.mxu0 %v8698_v16  ;;  %6097 = vmatprep.subr.bf16.mxu1 %v8701_v17  ;;  %v8771_v16 = vld [vmem:[%s9200_s8 + $0x728] ss:$80 sps:$4 sm:$0xff]   ;;  %v8776_v17 = vld [vmem:[%s9200_s8 + $0x7c4] ss:$80 sps:$4 sm:$0xff]  }
 0x2c1   : > { %5975 = vmatpush1.bf16.msra.mxu0 %v8696_v18  ;;  %6098 = vmatpush1.bf16.msra.mxu1 %v8699_v20  ;;  %v8779_v18 = vld [vmem:[%s9200_s8 + $0x7cc] ss:$80 sps:$4 sm:$0xff]   ;;  %v8774_v20 = vld [vmem:[%s9200_s8 + $0x7c0] ss:$80 sps:$4 sm:$0xff]  }
 0x2c2   : > { %6124 = vmatprep.subr.bf16.mxu0 %v8704_v21  ;;  %6247 = vmatprep.subr.bf16.mxu1 %v8707_v22  ;;  %v8777_v21 = vld [vmem:[%s9200_s8 + $0x7c8] ss:$80 sps:$4 sm:$0xff]   ;;  %v8782_v22 = vld [vmem:[%s9200_s8 + $0x864] ss:$80 sps:$4 sm:$0xff]  }
 0x2c4   : > { %5993 = vmatmul.mubr.bf16.vlgmr.msra.gmra.mrb[12].mxu0 %v9423_v60  ;;  %6116 = vmatmul.mubr.bf16.vlgmr.msra.gmra.mrb[12].mxu1 %v9423_v60 }
 0x2c5   : > { %6125 = vmatpush1.bf16.msra.mxu0 %v8702_v27  ;;  %6248 = vmatpush1.bf16.msra.mxu1 %v8705_v28  ;;  %v8785_v27 = vld [vmem:[%s9200_s8 + $0x86c] ss:$80 sps:$4 sm:$0xff]   ;;  %v8780_v28 = vld [vmem:[%s9200_s8 + $0x860] ss:$80 sps:$4 sm:$0xff]  }
 0x2c6   : > { %6126 = vmatprep.subr.bf16.mxu0 %v8710_v29  ;;  %6249 = vmatprep.subr.bf16.mxu1 %v8713_v30  ;;  %v8783_v29 = vld [vmem:[%s9200_s8 + $0x868] ss:$80 sps:$4 sm:$0xff]   ;;  %v8788_v30 = vld [vmem:[%s9200_s8 + $0x904] ss:$80 sps:$4 sm:$0xff]  }
 0x2c7   : > { %6156 = vmatprep.mubr.bf16.mxu0 %v9285_v62  ;;  %6279 = vmatprep.mubr.bf16.mxu1 %v9285_v62  ;;  %v8728_v62 = vld [vmem:[%s9200_s8 + $0x2c4] ss:$80 sps:$4 sm:$0xff]  }
 0x2c9   : > { %6127 = vmatpush1.bf16.msra.mxu0 %v8708_v32  ;;  %6250 = vmatpush1.bf16.msra.mxu1 %v8711_v33  ;;  %v8791_v32 = vld [vmem:[%s9200_s8 + $0x90c] ss:$80 sps:$4 sm:$0xff]  }
 0x2ca   : > { %6128 = vmatprep.subr.bf16.mxu0 %v8716_v34  ;;  %6251 = vmatprep.subr.bf16.mxu1 %v8719_v35  ;;  %v10021_v35 = vld [vmem:[%s9215_s28] sm:$0xff] }
 0x2cd   : > { %6129 = vmatpush1.bf16.msra.mxu0 %v8714_v36  ;;  %6252 = vmatpush1.bf16.msra.mxu1 %v8717_v37  ;;  %v10024_v37 = vld [vmem:[%s9215_s28 + $0x8] sm:$0xff] }
 0x2ce   : > { %6130 = vmatprep.subr.bf16.mxu0 %v8722_v38  ;;  %6253 = vmatprep.subr.bf16.mxu1 %v8725_v39  ;;  %v290_v39 = vunpack.c.h.bf16 %v10021_v35 }
 0x2d1   : > { %6131 = vmatpush1.bf16.msra.mxu0 %v8720_v40  ;;  %6254 = vmatpush1.bf16.msra.mxu1 %v8723_v41 }
 0x2d2   : > { %6132 = vmatprep.subr.bf16.mxu0 %v8728_v62  ;;  %6255 = vmatprep.subr.bf16.mxu1 %v8731_v42 }
 0x2d5   : > { %6133 = vmatpush1.bf16.msra.mxu0 %v8726_v43  ;;  %6256 = vmatpush1.bf16.msra.mxu1 %v8729_v44  ;;  %v8786_v43 = vld [vmem:[%s9200_s8 + $0x900] ss:$80 sps:$4 sm:$0xff]   ;;  %v8789_v44 = vld [vmem:[%s9200_s8 + $0x908] ss:$80 sps:$4 sm:$0xff]  }
 0x2d6   : > { %6134 = vmatprep.subr.bf16.mxu0 %v8734_v46  ;;  %6257 = vmatprep.subr.bf16.mxu1 %v8737_v47 }
 0x2d9   : > { %6135 = vmatpush1.bf16.msra.mxu0 %v8732_v48  ;;  %6258 = vmatpush1.bf16.msra.mxu1 %v8735_v49  ;;  %v8794_v48 = vld [vmem:[%s9200_s8 + $0x9a4] ss:$80 sps:$4 sm:$0xff]   ;;  %v8797_v49 = vld [vmem:[%s9200_s8 + $0x9ac] ss:$80 sps:$4 sm:$0xff]  }
 0x2da   : > { %6136 = vmatprep.subr.bf16.mxu0 %v8740_v50  ;;  %6259 = vmatprep.subr.bf16.mxu1 %v8743_v52  ;;  %v291_v52 = vunpack.c.l.bf16 %v10024_v37 }
 0x2dd   : > { %6137 = vmatpush1.bf16.msra.mxu0 %v8738_v53  ;;  %6260 = vmatpush1.bf16.msra.mxu1 %v8741_v55  ;;  %v10037_v55 = vadd.f32 %v6423_v26, %v290_v39  ;;  %v8798_v26 = vld [vmem:[%s9200_s8 + $0xa40] ss:$80 sps:$4 sm:$0xff]   ;;  %v8848_v39 = vld [vmem:[%s9200_s8 + $0xf44] ss:$80 sps:$4 sm:$0xff]  }
 0x2de   : > { %6138 = vmatprep.subr.bf16.mxu0 %v8746_v56  ;;  %6261 = vmatprep.subr.bf16.mxu1 %v8749_v57  ;;  %v8792_v57 = vld [vmem:[%s9200_s8 + $0x9a0] ss:$80 sps:$4 sm:$0xff]  }
 0x2df   : > { %v6499_v24 = vrot.slane %v10037_v55, 2 }
 0x2e1   : > { %6139 = vmatpush1.bf16.msra.mxu0 %v8744_v54  ;;  %6262 = vmatpush1.bf16.msra.mxu1 %v8747_v59  ;;  %v8795_v54 = vld [vmem:[%s9200_s8 + $0x9a8] ss:$80 sps:$4 sm:$0xff]   ;;  %v8800_v59 = vld [vmem:[%s9200_s8 + $0xa44] ss:$80 sps:$4 sm:$0xff]  }
 0x2e2   : > { %6140 = vmatprep.subr.bf16.mxu0 %v8752_v61  ;;  %6263 = vmatprep.subr.bf16.mxu1 %v8755_v63  ;;  %v8803_v61 = vld [vmem:[%s9200_s8 + $0xa4c] ss:$80 sps:$4 sm:$0xff]  }
 0x2e5   : > { %6141 = vmatpush1.bf16.msra.mxu0 %v8750_v0  ;;  %6264 = vmatpush1.bf16.msra.mxu1 %v8753_v1  ;;  %v8801_v0 = vld [vmem:[%s9200_s8 + $0xa48] ss:$80 sps:$4 sm:$0xff]   ;;  %v8806_v1 = vld [vmem:[%s9200_s8 + $0xae4] ss:$80 sps:$4 sm:$0xff]  }
 0x2e6   : > { %6142 = vmatprep.subr.bf16.mxu0 %v8758_v2  ;;  %6265 = vmatprep.subr.bf16.mxu1 %v8761_v3  ;;  %v8809_v2 = vld [vmem:[%s9200_s8 + $0xaec] ss:$80 sps:$4 sm:$0xff]  }
 0x2e9   : > { %6143 = vmatpush1.bf16.msra.mxu0 %v8756_v4  ;;  %6266 = vmatpush1.bf16.msra.mxu1 %v8759_v5  ;;  %v8804_v4 = vld [vmem:[%s9200_s8 + $0xae0] ss:$80 sps:$4 sm:$0xff]   ;;  %v8807_v5 = vld [vmem:[%s9200_s8 + $0xae8] ss:$80 sps:$4 sm:$0xff]  }
 0x2ea   : > { %6144 = vmatprep.subr.bf16.mxu0 %v8764_v45  ;;  %6267 = vmatprep.subr.bf16.mxu1 %v8767_v6  ;;  %v8812_v45 = vld [vmem:[%s9200_s8 + $0xb84] ss:$80 sps:$4 sm:$0xff]   ;;  %v8815_v6 = vld [vmem:[%s9200_s8 + $0xb8c] ss:$80 sps:$4 sm:$0xff]  }
 0x2ed   : > { %6145 = vmatpush1.bf16.msra.mxu0 %v8762_v10  ;;  %6268 = vmatpush1.bf16.msra.mxu1 %v8765_v11  ;;  %v8813_v10 = vld [vmem:[%s9200_s8 + $0xb88] ss:$80 sps:$4 sm:$0xff]   ;;  %v8818_v11 = vld [vmem:[%s9200_s8 + $0xc24] ss:$80 sps:$4 sm:$0xff]  }
 0x2ee   : > { %6146 = vmatprep.subr.bf16.mxu0 %v8770_v12  ;;  %6269 = vmatprep.subr.bf16.mxu1 %v8773_v13  ;;  %v8821_v12 = vld [vmem:[%s9200_s8 + $0xc2c] ss:$80 sps:$4 sm:$0xff]   ;;  %v8816_v13 = vld [vmem:[%s9200_s8 + $0xc20] ss:$80 sps:$4 sm:$0xff]  }
 0x2f1   : > { %6147 = vmatpush1.bf16.msra.mxu0 %v8768_v14  ;;  %6270 = vmatpush1.bf16.msra.mxu1 %v8771_v16  ;;  %v8819_v14 = vld [vmem:[%s9200_s8 + $0xc28] ss:$80 sps:$4 sm:$0xff]   ;;  %v8827_v16 = vld [vmem:[%s9200_s8 + $0xccc] ss:$80 sps:$4 sm:$0xff]  }
 0x2f2   : > { %6148 = vmatprep.subr.bf16.mxu0 %v8776_v17  ;;  %6271 = vmatprep.subr.bf16.mxu1 %v8779_v18  ;;  %v8822_v17 = vld [vmem:[%s9200_s8 + $0xcc0] ss:$80 sps:$4 sm:$0xff]   ;;  %v8825_v18 = vld [vmem:[%s9200_s8 + $0xcc8] ss:$80 sps:$4 sm:$0xff]  }
 0x2f5   : > { %6149 = vmatpush1.bf16.msra.mxu0 %v8774_v20  ;;  %6272 = vmatpush1.bf16.msra.mxu1 %v8777_v21  ;;  %v8830_v20 = vld [vmem:[%s9200_s8 + $0xd64] ss:$80 sps:$4 sm:$0xff]   ;;  %v8833_v21 = vld [vmem:[%s9200_s8 + $0xd6c] ss:$80 sps:$4 sm:$0xff]  }
 0x2f6   : > { %6150 = vmatprep.subr.bf16.mxu0 %v8782_v22  ;;  %6273 = vmatprep.subr.bf16.mxu1 %v8785_v27  ;;  %v8828_v22 = vld [vmem:[%s9200_s8 + $0xd60] ss:$80 sps:$4 sm:$0xff]   ;;  %v8831_v27 = vld [vmem:[%s9200_s8 + $0xd68] ss:$80 sps:$4 sm:$0xff]  }
 0x2f7   : > { %v5748_v33 = vpop.f32.mrb[8].mxu0  ;;  %v5871_v34 = vpop.f32.mrb[8].mxu1 }
 0x2f8   : > { %v5750_v36 = vpop.f32.mrb[9].mxu0  ;;  %v5873_v38 = vpop.f32.mrb[9].mxu1 }
 0x2f9   : > { %v6424_v40 = vcombine.low %v5748_v33, %v5750_v36  ;;  %v6425_v41 = vcombine.low %v5871_v34, %v5873_v38  ;;  %v5752_v62 = vpop.f32.mrb[10].mxu0  ;;  %v5875_v42 = vpop.f32.mrb[10].mxu1  ;;  %6151 = vmatpush1.bf16.msra.mxu0 %v8780_v28  ;;  %6274 = vmatpush1.bf16.msra.mxu1 %v8783_v29  ;;  %v8836_v28 = vld [vmem:[%s9200_s8 + $0xe04] ss:$80 sps:$4 sm:$0xff]   ;;  %v8839_v29 = vld [vmem:[%s9200_s8 + $0xe0c] ss:$80 sps:$4 sm:$0xff]  }
 0x2fa   : > { %v5753_v46 = vpop.f32.mrb[11].mxu0  ;;  %v5876_v47 = vpop.f32.mrb[11].mxu1  ;;  %6152 = vmatprep.subr.bf16.mxu0 %v8788_v30  ;;  %6275 = vmatprep.subr.bf16.mxu1 %v8791_v32  ;;  %v8834_v30 = vld [vmem:[%s9200_s8 + $0xe00] ss:$80 sps:$4 sm:$0xff]   ;;  %v8837_v32 = vld [vmem:[%s9200_s8 + $0xe08] ss:$80 sps:$4 sm:$0xff]  }
 0x2fb   : > { %v6432_v50 = vrot.slane %v6424_v40, %v9658_v58  ;;  %v6439_v53 = vrot.slane %v6425_v41, %v9658_v58  ;;  %v8842_v33 = vld [vmem:[%s9200_s8 + $0xea4] ss:$80 sps:$4 sm:$0xff]   ;;  %v8845_v34 = vld [vmem:[%s9200_s8 + $0xeac] ss:$80 sps:$4 sm:$0xff]   ;;  %v8840_v36 = vld [vmem:[%s9200_s8 + $0xea0] ss:$80 sps:$4 sm:$0xff]  }
 0x2fc   : > { %v8843_v38 = vld [vmem:[%s9200_s8 + $0xea8] ss:$80 sps:$4 sm:$0xff]   ;;  %v8851_v40 = vld [vmem:[%s9200_s8 + $0xf4c] ss:$80 sps:$4 sm:$0xff]   ;;  %v8846_v41 = vld [vmem:[%s9200_s8 + $0xf40] ss:$80 sps:$4 sm:$0xff]  }
 0x2fd   : > { %v6440_v56 = vcombine.low %v6432_v50, %v6439_v53  ;;  %6153 = vmatpush1.bf16.msra.mxu0 %v8786_v43  ;;  %6276 = vmatpush1.bf16.msra.mxu1 %v8789_v44  ;;  %v8849_v62 = vld [vmem:[%s9200_s8 + $0xf48] ss:$80 sps:$4 sm:$0xff]   ;;  %v8854_v42 = vld [vmem:[%s9200_s8 + $0xfe4] ss:$80 sps:$4 sm:$0xff]   ;;  %v8857_v43 = vld [vmem:[%s9200_s8 + $0xfec] ss:$80 sps:$4 sm:$0xff]  }
 0x2fe   : > { %6154 = vmatprep.subr.bf16.mxu0 %v8794_v48  ;;  %6277 = vmatprep.subr.bf16.mxu1 %v8797_v49  ;;  %v8852_v44 = vld [vmem:[%s9200_s8 + $0xfe0] ss:$80 sps:$4 sm:$0xff]   ;;  %v8855_v46 = vld [vmem:[%s9200_s8 + $0xfe8] ss:$80 sps:$4 sm:$0xff]   ;;  %v8860_v47 = vld [vmem:[%s9200_s8 + $0x1084] ss:$80 sps:$4 sm:$0xff]  }
 0x2ff   : > { %v10043_v63 = vadd.f32 %v6440_v56, %v291_v52  ;;  %v8863_v48 = vld [vmem:[%s9200_s8 + $0x108c] ss:$80 sps:$4 sm:$0xff]   ;;  %v8858_v49 = vld [vmem:[%s9200_s8 + $0x1080] ss:$80 sps:$4 sm:$0xff]   ;;  %v8861_v50 = vld [vmem:[%s9200_s8 + $0x1088] ss:$80 sps:$4 sm:$0xff]  }
 0x300   : > { %v8866_v52 = vld [vmem:[%s9200_s8 + $0x1124] ss:$80 sps:$4 sm:$0xff]   ;;  %v8869_v53 = vld [vmem:[%s9200_s8 + $0x112c] ss:$80 sps:$4 sm:$0xff]   ;;  %v8864_v56 = vld [vmem:[%s9200_s8 + $0x1120] ss:$80 sps:$4 sm:$0xff]  }
 0x301   : > { %v6500_v25 = vrot.slane %v10043_v63, 2  ;;  %6155 = vmatpush1.bf16.msra.mxu0 %v8792_v57  ;;  %6278 = vmatpush1.bf16.msra.mxu1 %v8795_v54  ;;  %v8867_v57 = vld [vmem:[%s9200_s8 + $0x1128] ss:$80 sps:$4 sm:$0xff]   ;;  %v8872_v54 = vld [vmem:[%s9200_s8 + $0x11c4] ss:$80 sps:$4 sm:$0xff]  }
 0x302   : > { %6165 = vmatprep.subr.bf16.mxu0 %v8800_v59  ;;  %6288 = vmatprep.subr.bf16.mxu1 %v8803_v61  ;;  %v8875_v59 = vld [vmem:[%s9200_s8 + $0x11cc] ss:$80 sps:$4 sm:$0xff]   ;;  %v8870_v61 = vld [vmem:[%s9200_s8 + $0x11c0] ss:$80 sps:$4 sm:$0xff]  }
 0x303   : > { %v10053_v3 = vsel %vm6501_vm0, %v6499_v24, %v6500_v25  ;;  %v8873_v24 = vld [vmem:[%s9200_s8 + $0x11c8] ss:$80 sps:$4 sm:$0xff]  }
 0x304   : > { %6157 = vmatmul.mubr.bf16.vlgmr.msra.gmra.mrb[16].mxu0 %v9306_v15  ;;  %6280 = vmatmul.mubr.bf16.vlgmr.msra.gmra.mrb[16].mxu1 %v9306_v15  ;;  %v8810_v15 = vld [vmem:[%s9200_s8 + $0xb80] ss:$80 sps:$4 sm:$0xff]  }
 0x305   : > { %6166 = vmatpush1.bf16.msra.mxu0 %v8798_v26  ;;  %6289 = vmatpush1.bf16.msra.mxu1 %v8801_v0  ;;  %v8878_v26 = vld [vmem:[%s9200_s8 + $0x1264] ss:$80 sps:$4 sm:$0xff]   ;;  %v8881_v0 = vld [vmem:[%s9200_s8 + $0x126c] ss:$80 sps:$4 sm:$0xff]  }
 0x306   : > { %6167 = vmatprep.subr.bf16.mxu0 %v8806_v1  ;;  %6290 = vmatprep.subr.bf16.mxu1 %v8809_v2  ;;  %v8876_v1 = vld [vmem:[%s9200_s8 + $0x1260] ss:$80 sps:$4 sm:$0xff]   ;;  %v8879_v2 = vld [vmem:[%s9200_s8 + $0x1268] ss:$80 sps:$4 sm:$0xff]  }
 0x307   : > { %6197 = vmatprep.mubr.bf16.mxu0 %v9313_v19  ;;  %6320 = vmatprep.mubr.bf16.mxu1 %v9313_v19  ;;  %v8824_v19 = vld [vmem:[%s9200_s8 + $0xcc4] ss:$80 sps:$4 sm:$0xff]  }
 0x309   : > { %6168 = vmatpush1.bf16.msra.mxu0 %v8804_v4  ;;  %6291 = vmatpush1.bf16.msra.mxu1 %v8807_v5  ;;  %v8884_v4 = vld [vmem:[%s9200_s8 + $0x1304] ss:$80 sps:$4 sm:$0xff]   ;;  %v8887_v5 = vld [vmem:[%s9200_s8 + $0x130c] ss:$80 sps:$4 sm:$0xff]  }
 0x30a   : > { %6169 = vmatprep.subr.bf16.mxu0 %v8812_v45  ;;  %6292 = vmatprep.subr.bf16.mxu1 %v8815_v6  ;;  %v8882_v45 = vld [vmem:[%s9200_s8 + $0x1300] ss:$80 sps:$4 sm:$0xff]   ;;  %v8885_v6 = vld [vmem:[%s9200_s8 + $0x1308] ss:$80 sps:$4 sm:$0xff]  }
 0x30d   : > { %6170 = vmatpush1.bf16.msra.mxu0 %v8810_v15  ;;  %6293 = vmatpush1.bf16.msra.mxu1 %v8813_v10  ;;  %v8890_v15 = vld [vmem:[%s9200_s8 + $0x13a4] ss:$80 sps:$4 sm:$0xff]   ;;  %v8893_v10 = vld [vmem:[%s9200_s8 + $0x13ac] ss:$80 sps:$4 sm:$0xff]  }
 0x30e   : > { %6171 = vmatprep.subr.bf16.mxu0 %v8818_v11  ;;  %6294 = vmatprep.subr.bf16.mxu1 %v8821_v12  ;;  %v8888_v11 = vld [vmem:[%s9200_s8 + $0x13a0] ss:$80 sps:$4 sm:$0xff]   ;;  %v8891_v12 = vld [vmem:[%s9200_s8 + $0x13a8] ss:$80 sps:$4 sm:$0xff]  }
 0x311   : > { %6172 = vmatpush1.bf16.msra.mxu0 %v8816_v13  ;;  %6295 = vmatpush1.bf16.msra.mxu1 %v8819_v14  ;;  %v8896_v13 = vld [vmem:[%s9200_s8 + $0x1444] ss:$80 sps:$4 sm:$0xff]   ;;  %v8899_v14 = vld [vmem:[%s9200_s8 + $0x144c] ss:$80 sps:$4 sm:$0xff]  }
 0x312   : > { %6173 = vmatprep.subr.bf16.mxu0 %v8824_v19  ;;  %6296 = vmatprep.subr.bf16.mxu1 %v8827_v16  ;;  %v8894_v19 = vld [vmem:[%s9200_s8 + $0x1440] ss:$80 sps:$4 sm:$0xff]   ;;  %v8897_v16 = vld [vmem:[%s9200_s8 + $0x1448] ss:$80 sps:$4 sm:$0xff]  }
 0x315   : > { %6174 = vmatpush1.bf16.msra.mxu0 %v8822_v17  ;;  %6297 = vmatpush1.bf16.msra.mxu1 %v8825_v18  ;;  %v8902_v17 = vld [vmem:[%s9200_s8 + $0x14e4] ss:$80 sps:$4 sm:$0xff]   ;;  %v8905_v18 = vld [vmem:[%s9200_s8 + $0x14ec] ss:$80 sps:$4 sm:$0xff]  }
 0x316   : > { %6175 = vmatprep.subr.bf16.mxu0 %v8830_v20  ;;  %6298 = vmatprep.subr.bf16.mxu1 %v8833_v21  ;;  %v8900_v20 = vld [vmem:[%s9200_s8 + $0x14e0] ss:$80 sps:$4 sm:$0xff]   ;;  %v8903_v21 = vld [vmem:[%s9200_s8 + $0x14e8] ss:$80 sps:$4 sm:$0xff]  }
 0x319   : > { %6176 = vmatpush1.bf16.msra.mxu0 %v8828_v22  ;;  %6299 = vmatpush1.bf16.msra.mxu1 %v8831_v27  ;;  %v8908_v22 = vld [vmem:[%s9200_s8 + $0x1584] ss:$80 sps:$4 sm:$0xff]   ;;  %v8911_v27 = vld [vmem:[%s9200_s8 + $0x158c] ss:$80 sps:$4 sm:$0xff]  }
 0x31a   : > { %6177 = vmatprep.subr.bf16.mxu0 %v8836_v28  ;;  %6300 = vmatprep.subr.bf16.mxu1 %v8839_v29  ;;  %v8909_v28 = vld [vmem:[%s9200_s8 + $0x1588] ss:$80 sps:$4 sm:$0xff]   ;;  %v8914_v29 = vld [vmem:[%s9200_s8 + $0x1624] ss:$80 sps:$4 sm:$0xff]  }
 0x31d   : > { %6178 = vmatpush1.bf16.msra.mxu0 %v8834_v30  ;;  %6301 = vmatpush1.bf16.msra.mxu1 %v8837_v32  ;;  %v8917_v30 = vld [vmem:[%s9200_s8 + $0x162c] ss:$80 sps:$4 sm:$0xff]   ;;  %v8912_v32 = vld [vmem:[%s9200_s8 + $0x1620] ss:$80 sps:$4 sm:$0xff]  }
 0x31e   : > { %6179 = vmatprep.subr.bf16.mxu0 %v8842_v33  ;;  %6302 = vmatprep.subr.bf16.mxu1 %v8845_v34  ;;  %v8915_v33 = vld [vmem:[%s9200_s8 + $0x1628] ss:$80 sps:$4 sm:$0xff]   ;;  %v8923_v34 = vld [vmem:[%s9200_s8 + $0x16cc] ss:$80 sps:$4 sm:$0xff]  }
 0x321   : > { %6180 = vmatpush1.bf16.msra.mxu0 %v8840_v36  ;;  %6303 = vmatpush1.bf16.msra.mxu1 %v8843_v38  ;;  %v8918_v36 = vld [vmem:[%s9200_s8 + $0x16c0] ss:$80 sps:$4 sm:$0xff]   ;;  %v8921_v38 = vld [vmem:[%s9200_s8 + $0x16c8] ss:$80 sps:$4 sm:$0xff]  }
 0x322   : > { %6181 = vmatprep.subr.bf16.mxu0 %v8848_v39  ;;  %6304 = vmatprep.subr.bf16.mxu1 %v8851_v40  ;;  %v8926_v39 = vld [vmem:[%s9200_s8 + $0x1764] ss:$80 sps:$4 sm:$0xff]   ;;  %v8929_v40 = vld [vmem:[%s9200_s8 + $0x176c] ss:$80 sps:$4 sm:$0xff]  }
 0x325   : > { %6182 = vmatpush1.bf16.msra.mxu0 %v8846_v41  ;;  %6305 = vmatpush1.bf16.msra.mxu1 %v8849_v62  ;;  %v8924_v41 = vld [vmem:[%s9200_s8 + $0x1760] ss:$80 sps:$4 sm:$0xff]   ;;  %v8927_v62 = vld [vmem:[%s9200_s8 + $0x1768] ss:$80 sps:$4 sm:$0xff]  }
 0x326   : > { %6183 = vmatprep.subr.bf16.mxu0 %v8854_v42  ;;  %6306 = vmatprep.subr.bf16.mxu1 %v8857_v43  ;;  %v8932_v42 = vld [vmem:[%s9200_s8 + $0x1804] ss:$80 sps:$4 sm:$0xff]   ;;  %v8935_v43 = vld [vmem:[%s9200_s8 + $0x180c] ss:$80 sps:$4 sm:$0xff]  }
 0x329   : > { %6184 = vmatpush1.bf16.msra.mxu0 %v8852_v44  ;;  %6307 = vmatpush1.bf16.msra.mxu1 %v8855_v46  ;;  %v8930_v44 = vld [vmem:[%s9200_s8 + $0x1800] ss:$80 sps:$4 sm:$0xff]   ;;  %v8933_v46 = vld [vmem:[%s9200_s8 + $0x1808] ss:$80 sps:$4 sm:$0xff]  }
 0x32a   : > { %6185 = vmatprep.subr.bf16.mxu0 %v8860_v47  ;;  %6308 = vmatprep.subr.bf16.mxu1 %v8863_v48  ;;  %v8938_v47 = vld [vmem:[%s9200_s8 + $0x18a4] ss:$80 sps:$4 sm:$0xff]   ;;  %v8941_v48 = vld [vmem:[%s9200_s8 + $0x18ac] ss:$80 sps:$4 sm:$0xff]  }
 0x32d   : > { %6186 = vmatpush1.bf16.msra.mxu0 %v8858_v49  ;;  %6309 = vmatpush1.bf16.msra.mxu1 %v8861_v50  ;;  %v8936_v49 = vld [vmem:[%s9200_s8 + $0x18a0] ss:$80 sps:$4 sm:$0xff]   ;;  %v8939_v50 = vld [vmem:[%s9200_s8 + $0x18a8] ss:$80 sps:$4 sm:$0xff]  }
 0x32e   : > { %6187 = vmatprep.subr.bf16.mxu0 %v8866_v52  ;;  %6310 = vmatprep.subr.bf16.mxu1 %v8869_v53  ;;  %v289_v52 = vunpack.c.l.bf16 %v10021_v35 }
 0x330   : > { %v6480_v53 = vadd.f32 %v6406_v9, %v289_v52 }
 0x331   : > { %6188 = vmatpush1.bf16.msra.mxu0 %v8864_v56  ;;  %6311 = vmatpush1.bf16.msra.mxu1 %v8867_v57  ;;  %v7569_v57 = vmul.f32 -1.442695, %v10037_v55 }
 0x332   : > { %6189 = vmatprep.subr.bf16.mxu0 %v8872_v54  ;;  %6312 = vmatprep.subr.bf16.mxu1 %v8875_v59  ;;  %v7568_v56 = vmul.f32 -1.442695, %v6480_v53  ;;  %v7571_v54 = vmul.f32 -1.442695, %v6500_v25  ;;  %v7570_v59 = vmul.f32 -1.442695, %v10053_v3 }
 0x334   : > { %8942 = vpow2.f32 %v7568_v56 }
 0x335   : > { %6190 = vmatpush1.bf16.msra.mxu0 %v8870_v61  ;;  %6313 = vmatpush1.bf16.msra.mxu1 %v8873_v24  ;;  %8944 = vpow2.f32 %v7569_v57 }
 0x336   : > { %6191 = vmatprep.subr.bf16.mxu0 %v8878_v26  ;;  %6314 = vmatprep.subr.bf16.mxu1 %v8881_v0  ;;  %8946 = vpow2.f32 %v7571_v54 }
 0x337   : > { %8948 = vpow2.f32 %v7570_v59 }
 0x339   : > { %6192 = vmatpush1.bf16.msra.mxu0 %v8876_v1  ;;  %6315 = vmatpush1.bf16.msra.mxu1 %v8879_v2 }
 0x33a   : > { %6193 = vmatprep.subr.bf16.mxu0 %v8884_v4  ;;  %6316 = vmatprep.subr.bf16.mxu1 %v8887_v5 }
 0x33d   : > { %6194 = vmatpush1.bf16.msra.mxu0 %v8882_v45  ;;  %6317 = vmatpush1.bf16.msra.mxu1 %v8885_v6  ;;  %v292_v45 = vunpack.c.h.bf16 %v10024_v37 }
 0x33e   : > { %6195 = vmatprep.subr.bf16.mxu0 %v8890_v15  ;;  %6318 = vmatprep.subr.bf16.mxu1 %v8893_v10  ;;  %v8943_v24 = vpop.eup %8942 }
 0x33f   : > { %v8945_v0 = vpop.eup %8944  ;;  %v6491_v5 = vadd.f32 1.0, %v8943_v24 }
 0x340   : > { %v8947_v55 = vpop.eup %8946  ;;  %v6492_v15 = vadd.f32 1.0, %v8945_v0 }
 0x341   : > { %6196 = vmatpush1.bf16.msra.mxu0 %v8888_v11  ;;  %6319 = vmatpush1.bf16.msra.mxu1 %v8891_v12  ;;  %v8949_v25 = vpop.eup %8948  ;;  %v6512_v10 = vadd.f32 1.0, %v8947_v55  ;;  %8950 = vrcp.f32 %v6491_v5 }
 0x342   : > { %6206 = vmatprep.subr.bf16.mxu0 %v8896_v13  ;;  %6329 = vmatprep.subr.bf16.mxu1 %v8899_v14  ;;  %v6511_v12 = vadd.f32 1.0, %v8949_v25  ;;  %8952 = vrcp.f32 %v6492_v15  ;;  %v6518_v14 = vrot.slane %v10043_v63, 4 }
 0x343   : > { %8954 = vrcp.f32 %v6512_v10 }
 0x344   : > { %6198 = vmatmul.mubr.bf16.vlgmr.msra.gmra.mrb[16].mxu0 %v9382_v23  ;;  %6321 = vmatmul.mubr.bf16.vlgmr.msra.gmra.mrb[16].mxu1 %v9382_v23  ;;  %v8906_v23 = vld [vmem:[%s9200_s8 + $0x1580] ss:$80 sps:$4 sm:$0xff]   ;;  %8956 = vrcp.f32 %v6511_v12 }
 0x345   : > { %6207 = vmatpush1.bf16.msra.mxu0 %v8894_v19  ;;  %6330 = vmatpush1.bf16.msra.mxu1 %v8897_v16 }
 0x346   : > { %6208 = vmatprep.subr.bf16.mxu0 %v8902_v17  ;;  %6331 = vmatprep.subr.bf16.mxu1 %v8905_v18 }
 0x347   : > { %6238 = vmatprep.mubr.bf16.mxu0 %v9078_v31  ;;  %6361 = vmatprep.mubr.bf16.mxu1 %v9078_v31  ;;  %v8920_v31 = vld [vmem:[%s9200_s8 + $0x16c4] ss:$80 sps:$4 sm:$0xff]  }
 0x349   : > { %6209 = vmatpush1.bf16.msra.mxu0 %v8900_v20  ;;  %6332 = vmatpush1.bf16.msra.mxu1 %v8903_v21  ;;  %v6546_v20 = vld [vmem:[#allocation3 + $0x8] sm:$0x3] }
 0x34a   : > { %6210 = vmatprep.subr.bf16.mxu0 %v8908_v22  ;;  %6333 = vmatprep.subr.bf16.mxu1 %v8911_v27  ;;  %v6545_v22 = vld [vmem:[#allocation3] sm:$0xff] }
 0x34b   : > { %v8951_v17 = vpop.eup %8950 }
 0x34c   : > { %v8953_v37 = vpop.eup %8952 }
 0x34d   : > { %6211 = vmatpush1.bf16.msra.mxu0 %v8906_v23  ;;  %6334 = vmatpush1.bf16.msra.mxu1 %v8909_v28  ;;  %v8955_v18 = vpop.eup %8954 }
 0x34e   : > { %6212 = vmatprep.subr.bf16.mxu0 %v8914_v29  ;;  %6335 = vmatprep.subr.bf16.mxu1 %v8917_v30  ;;  %v8957_v21 = vpop.eup %8956  ;;  %v6548_v28 = vmul.f32 %v8955_v18, %v6546_v20 }
 0x34f   : > { %v6547_v30 = vmul.f32 %v8957_v21, %v6545_v22 }
 0x351   : > { %6213 = vmatpush1.bf16.msra.mxu0 %v8912_v32  ;;  %6336 = vmatpush1.bf16.msra.mxu1 %v8915_v33 }
 0x352   : > { %6214 = vmatprep.subr.bf16.mxu0 %v8920_v31  ;;  %6337 = vmatprep.subr.bf16.mxu1 %v8923_v34 }
 0x355   : > { %6215 = vmatpush1.bf16.msra.mxu0 %v8918_v36  ;;  %6338 = vmatpush1.bf16.msra.mxu1 %v8921_v38  ;;  %v288_v38 = vld [vmem:[%s9215_s28 + $0x10] sm:$0xf] }
 0x356   : > { %6216 = vmatprep.subr.bf16.mxu0 %v8926_v39  ;;  %6339 = vmatprep.subr.bf16.mxu1 %v8929_v40 }
 0x359   : > { %6217 = vmatpush1.bf16.msra.mxu0 %v8924_v41  ;;  %6340 = vmatpush1.bf16.msra.mxu1 %v8927_v62 }
 0x35a   : > { %6218 = vmatprep.subr.bf16.mxu0 %v8932_v42  ;;  %6341 = vmatprep.subr.bf16.mxu1 %v8935_v43 }
 0x35d   : > { %6219 = vmatpush1.bf16.msra.mxu0 %v8930_v44  ;;  %6342 = vmatpush1.bf16.msra.mxu1 %v8933_v46 }
 0x35e   : > { %6220 = vmatprep.subr.bf16.mxu0 %v8938_v47  ;;  %6343 = vmatprep.subr.bf16.mxu1 %v8941_v48  ;;  %v293_v47 = vunpack.c.l.bf16 %v288_v38 }
 0x361   : > { %6221 = vmatpush1.bf16.msra.mxu0 %v8936_v49  ;;  %6344 = vmatpush1.bf16.msra.mxu1 %v8939_v50 }
 0x364   : > { %6239 = vmatmul.mubr.bf16.vlgmr.msra.gmra.mrb[16].mxu0 %v9423_v60  ;;  %6362 = vmatmul.mubr.bf16.vlgmr.msra.gmra.mrb[16].mxu1 %v9423_v60 }
 0x397   : > { %v5994_v61 = vpop.f32.mrb[12].mxu0  ;;  %v6117_v60 = vpop.f32.mrb[12].mxu1 }
 0x398   : > { %v5996_v35 = vpop.f32.mrb[13].mxu0  ;;  %v6119_v26 = vpop.f32.mrb[13].mxu1 }
 0x399   : > { %v6441_v7 = vcombine.low %v5994_v61, %v5996_v35  ;;  %v6442_v8 = vcombine.low %v6117_v60, %v6119_v26  ;;  %v5998_v9 = vpop.f32.mrb[14].mxu0  ;;  %v6121_v1 = vpop.f32.mrb[14].mxu1 }
 0x39a   : > { %v5999_v2 = vpop.f32.mrb[15].mxu0  ;;  %v6122_v4 = vpop.f32.mrb[15].mxu1 }
 0x39b   : > { %v6449_v3 = vrot.slane %v6441_v7, %v9658_v58  ;;  %v6456_v6 = vrot.slane %v6442_v8, %v9658_v58 }
 0x39d   : > { %v6457_v11 = vcombine.low %v6449_v3, %v6456_v6 }
 0x39f   : > { %v6483_v13 = vadd.f32 %v6457_v11, %v292_v45 }
 0x3a1   : > { %v6519_v19 = vrot.slane %v6483_v13, 4  ;;  %v6527_v52 = vrot.slane %v6483_v13, 6 }
 0x3a3   : > { %v6521_v16 = vsel %vm6520_vm1, %v6518_v14, %v6519_v19  ;;  %8958 = vtanh.f32 %v6519_v19 }
 0x3a4   : > { %8960 = vtanh.f32 %v6521_v16 }
 0x3ad   : > { %v8959_v27 = vpop.eup %8958 }
 0x3ae   : > { %v8961_v23 = vpop.eup %8960  ;;  %v6550_v29 = vmul.f32 %v8959_v27, %v8953_v37 }
 0x3af   : > { %v6549_v32 = vmul.f32 %v8961_v23, %v8951_v17 }
 0x3b0   : > { %v6552_v33 = vadd.f32 %v6550_v29, %v6548_v28 }
 0x3b1   : > { %v6551_v63 = vadd.f32 %v6549_v32, %v6547_v30 }
 0x3b2   : > { %6558 = vst [vmem:[#allocation3 + $0x8] sm:$0x3] %v6552_v33 }
 0x3b3   : > { %6557 = vst [vmem:[#allocation3] sm:$0xff] %v6551_v63 }
 0x437   : > { %v6240_v31 = vpop.f32.mrb[16].mxu0  ;;  %v6363_v34 = vpop.f32.mrb[16].mxu1 }
 0x438   : > { %v6242_v36 = vpop.f32.mrb[17].mxu0  ;;  %v6365_v39 = vpop.f32.mrb[17].mxu1 }
 0x439   : > { %v6458_v40 = vcombine.low %v6240_v31, %v6242_v36  ;;  %v6459_v41 = vcombine.low %v6363_v34, %v6365_v39  ;;  %v6244_v62 = vpop.f32.mrb[18].mxu0  ;;  %v6367_v42 = vpop.f32.mrb[18].mxu1 }
 0x43a   : > { %v6245_v43 = vpop.f32.mrb[19].mxu0  ;;  %v6368_v44 = vpop.f32.mrb[19].mxu1 }
 0x43b   : > { %v6466_v46 = vrot.slane %v6458_v40, %v9658_v58  ;;  %v6473_v48 = vrot.slane %v6459_v41, %v9658_v58 }
 0x43d   : > { %v6474_v49 = vcombine.low %v6466_v46, %v6473_v48 }
 0x43f   : > { %v6484_v50 = vadd.f32 %v6474_v49, %v293_v47 }
 0x441   : > { %v6528_v53 = vrot.slane %v6484_v50, 6 }
 0x443   : > { %v6530_v56 = vsel %vm6529_vm2, %v6527_v52, %v6528_v53  ;;  %v7573_v57 = vmul.f32 -1.442695, %v6528_v53 }
 0x444   : > { %v7572_v54 = vmul.f32 -1.442695, %v6530_v56 }
 0x445   : > { %8962 = vpow2.f32 %v7573_v57 }
 0x446   : > { %8964 = vpow2.f32 %v7572_v54 }
 0x447   : > { %8966 = vtanh.f32 %v6552_v33 }
 0x448   : > { %8968 = vtanh.f32 %v6551_v63 }
 0x44f   : > { %v8963_v59 = vpop.eup %8962 }
 0x450   : > { %v8965_v61 = vpop.eup %8964  ;;  %v6540_v60 = vadd.f32 1.0, %v8963_v59 }
 0x451   : > { %v6539_v24 = vadd.f32 1.0, %v8965_v61  ;;  %v8967_v35 = vpop.eup %8966 }
 0x452   : > { %8970 = vrcp.f32 %v6540_v60  ;;  %v8969_v26 = vpop.eup %8968 }
 0x453   : > { %8972 = vrcp.f32 %v6539_v24 }
 0x45c   : > { %v8971_v0 = vpop.eup %8970 }
 0x45d   : > { %v8973_v7 = vpop.eup %8972  ;;  %v6556_v8 = vmul.f32 %v8971_v0, %v8967_v35 }
 0x45e   : > { %v6555_v9 = vmul.f32 %v8973_v7, %v8969_v26 }
 0x45f   : > { %v6584_v2 = vrot.slane %v6556_v8, %v9658_v58 }
 0x460   : > { %v6561_v1 = vcombine.high %v6555_v9, %v6555_v9  ;;  %v6568_v55 = vrot.slane %v6555_v9, %v9658_v58 }
 0x461   : > { %v6594_v3 = vpack.c.bf16 %v6584_v2, %v6584_v2 }
 0x462   : > { %v6575_v4 = vrot.slane %v6561_v1, %v9658_v58  ;;  %v6576_v25 = vcombine.high %v6568_v55, %v6568_v55 }
 0x463   : > { %v6622_v11 = vrot.slane %v6594_v3, %v9271_v51 }
 0x464   : > { %v6577_v5 = vcombine.high %v6575_v4, %v6575_v4  ;;  %v7574_v45 = vpack.c.bf16 %v6576_v25, %v6568_v55 }
 0x465   : > { %v6637_v14 = vrot.slane %v6622_v11, %v9271_v51 }
 0x466   : > { %v7575_v6 = vpack.c.bf16 %v6577_v5, %v6575_v4  ;;  %v6608_v15 = vrot.slane %v7574_v45, %v9271_v51 }
 0x468   : > { %v6615_v10 = vrot.slane %v7575_v6, %v9271_v51 }
 0x46a   : > { %v6623_v12 = vcombine.low %v6608_v15, %v6615_v10 }
 0x46c   : > { %v6630_v13 = vrot.slane %v6623_v12, %v9271_v51 }
 0x46e   : > { %v6638_v19 = vcombine.low %v6630_v13, %v6637_v14 }
 0x470   : > { %6640 = vst [vmem:[#allocation2] sm:$0x1f] %v6638_v19  ;;  %6641 = vst [vmem:[%s271_s13] sm:$0x1f] %v6638_v19 }
 0x471 PF: > { %s15_s16 = sadd.s32 1, %s9070_s16   ;;  %s10212_s9 = smov %s9046_s10 }
 0x472   : > { %p12_p8 = scmp.ge.s32.totalorder %s15_s16, 18   ;;  %s10213_s10 = smov %s9050_s11 }
 0x473   : > { %s10214_s11 = smov %s9159_s26  ;;  %s10215_s12 = smov %s9062_s14 }
 0x474   : > { %s10216_s13 = smov %s9066_s15  ;;  %s10217_s14 = smov %s10220_s18 }
 0x475   : > { %s10218_s15 = smov %s10224_s19  ;;  %14 = sbr.rel (!%p12_p8) target bundleno = 5 (0x5), region = 75 }
 0x47c   :  { %6685 = vsyncpa [#allocation5], 1 }
 0x47d   :  { %6687 = vsyncpa [#allocation5 + $0x1], 1 }

// kernel: stream_amplitude_postnet.5
= control target key start
LH: loop header
LB: loop body
LE: loop exit
PB: predicated region body
PF: predicated region fallthrough
CT: control target
= control target key end

     0   :  { %vm7385_vm0 = vmmov 0   ;;  %s9514_s1 = inlined_call_operand.vmem [shape: bf16[1280,640], index: 1, kind: input, shape index: {}]   ;;  %s9515_s0 = inlined_call_operand.vmem [shape: bf16[16,1280], index: 0, kind: input, shape index: {}]   ;;  %s9516_s3 = inlined_call_operand.vmem [shape: bf16[640,640], index: 3, kind: input, shape index: {}]   ;;  %s9517_s2 = inlined_call_operand.vmem [shape: f32[1,640], index: 2, kind: input, shape index: {}]   ;;  %s9518_s5 = inlined_call_operand.vmem [shape: bf16[640,128], index: 5, kind: input, shape index: {}]   ;;  %s9519_s4 = inlined_call_operand.vmem [shape: f32[1,640], index: 4, kind: input, shape index: {}]   ;;  %s9520_s6 = inlined_call_operand.vmem [shape: f32[1,128], index: 6, kind: input, shape index: {}]   ;;  %s9521_s7 = inlined_call_operand.vmem [shape: f32[16,128], index: 7, kind: output, shape index: {}]  }
   0x1   :  { %v6471_v0 = vld [vmem:[%s9514_s1 + $0x4] ss:$20 sps:$4 sm:$0xff]   ;;  %v6473_v1 = vld [vmem:[%s9514_s1 + $0xc] ss:$20 sps:$4 sm:$0xff]   ;;  %v6476_v3 = vld [vmem:[%s9514_s1 + $0x8] ss:$20 sps:$4 sm:$0xff]  }
   0x2   :  { %2674 = vmatprep.subr.bf16.mxu0 %v6471_v0  ;;  %v6475_v2 = vld [vmem:[%s9514_s1] ss:$20 sps:$4 sm:$0xff]   ;;  %2889 = vmatprep.subr.bf16.mxu1 %v6473_v1  ;;  %v6481_v6 = vld [vmem:[%s9514_s1 + $0x28] ss:$20 sps:$4 sm:$0xff]   ;;  %v6482_v7 = vld [vmem:[%s9514_s1 + $0x30] ss:$20 sps:$4 sm:$0xff]  }
   0x3   :  { %v6477_v4 = vld [vmem:[%s9514_s1 + $0x2c] ss:$20 sps:$4 sm:$0xff]   ;;  %2675 = vmatpush1.bf16.msra.mxu0 %v6475_v2  ;;  %2890 = vmatpush1.bf16.msra.mxu1 %v6476_v3  ;;  %v6479_v5 = vld [vmem:[%s9514_s1 + $0x34] ss:$20 sps:$4 sm:$0xff]   ;;  %v6485_v9 = vld [vmem:[%s9514_s1 + $0x5c] ss:$20 sps:$4 sm:$0xff]  }
   0x4   :  { %2676 = vmatprep.subr.bf16.mxu0 %v6477_v4  ;;  %2891 = vmatprep.subr.bf16.mxu1 %v6479_v5  ;;  %v6483_v8 = vld [vmem:[%s9514_s1 + $0x54] ss:$20 sps:$4 sm:$0xff]   ;;  %v6487_v10 = vld [vmem:[%s9514_s1 + $0x50] ss:$20 sps:$4 sm:$0xff]   ;;  %v6488_v11 = vld [vmem:[%s9514_s1 + $0x58] ss:$20 sps:$4 sm:$0xff]  }
   0x5   :  { %v6489_v12 = vld [vmem:[%s9514_s1 + $0x7c] ss:$20 sps:$4 sm:$0xff]   ;;  %v6491_v13 = vld [vmem:[%s9514_s1 + $0x84] ss:$20 sps:$4 sm:$0xff]   ;;  %v6494_v15 = vld [vmem:[%s9514_s1 + $0x80] ss:$20 sps:$4 sm:$0xff]  }
   0x6   :  { %v6493_v14 = vld [vmem:[%s9514_s1 + $0x78] ss:$20 sps:$4 sm:$0xff]   ;;  %v6499_v18 = vld [vmem:[%s9514_s1 + $0xa0] ss:$20 sps:$4 sm:$0xff]   ;;  %v6500_v19 = vld [vmem:[%s9514_s1 + $0xa8] ss:$20 sps:$4 sm:$0xff]  }
   0x7   :  { %2677 = vmatpush1.bf16.msra.mxu0 %v6481_v6  ;;  %2892 = vmatpush1.bf16.msra.mxu1 %v6482_v7  ;;  %v6495_v16 = vld [vmem:[%s9514_s1 + $0xa4] ss:$20 sps:$4 sm:$0xff]   ;;  %v6497_v17 = vld [vmem:[%s9514_s1 + $0xac] ss:$20 sps:$4 sm:$0xff]   ;;  %v6503_v21 = vld [vmem:[%s9514_s1 + $0xd4] ss:$20 sps:$4 sm:$0xff]  }
   0x8   :  { %2678 = vmatprep.subr.bf16.mxu0 %v6483_v8  ;;  %2893 = vmatprep.subr.bf16.mxu1 %v6485_v9  ;;  %v6501_v20 = vld [vmem:[%s9514_s1 + $0xcc] ss:$20 sps:$4 sm:$0xff]   ;;  %v6505_v22 = vld [vmem:[%s9514_s1 + $0xc8] ss:$20 sps:$4 sm:$0xff]   ;;  %v6506_v23 = vld [vmem:[%s9514_s1 + $0xd0] ss:$20 sps:$4 sm:$0xff]  }
   0x9   :  { %v6507_v24 = vld [vmem:[%s9514_s1 + $0xf4] ss:$20 sps:$4 sm:$0xff]   ;;  %v6509_v25 = vld [vmem:[%s9514_s1 + $0xfc] ss:$20 sps:$4 sm:$0xff]   ;;  %v6512_v27 = vld [vmem:[%s9514_s1 + $0xf8] ss:$20 sps:$4 sm:$0xff]  }
   0xa   :  { %v6511_v26 = vld [vmem:[%s9514_s1 + $0xf0] ss:$20 sps:$4 sm:$0xff]   ;;  %v6517_v30 = vld [vmem:[%s9514_s1 + $0x118] ss:$20 sps:$4 sm:$0xff]   ;;  %v6518_v31 = vld [vmem:[%s9514_s1 + $0x120] ss:$20 sps:$4 sm:$0xff]  }
   0xb   :  { %2679 = vmatpush1.bf16.msra.mxu0 %v6487_v10  ;;  %2894 = vmatpush1.bf16.msra.mxu1 %v6488_v11  ;;  %v6513_v28 = vld [vmem:[%s9514_s1 + $0x11c] ss:$20 sps:$4 sm:$0xff]   ;;  %v6515_v29 = vld [vmem:[%s9514_s1 + $0x124] ss:$20 sps:$4 sm:$0xff]   ;;  %v6521_v33 = vld [vmem:[%s9514_s1 + $0x14c] ss:$20 sps:$4 sm:$0xff]  }
   0xc   :  { %2680 = vmatprep.subr.bf16.mxu0 %v6489_v12  ;;  %2895 = vmatprep.subr.bf16.mxu1 %v6491_v13  ;;  %v6519_v32 = vld [vmem:[%s9514_s1 + $0x144] ss:$20 sps:$4 sm:$0xff]   ;;  %v6523_v34 = vld [vmem:[%s9514_s1 + $0x140] ss:$20 sps:$4 sm:$0xff]   ;;  %v6524_v35 = vld [vmem:[%s9514_s1 + $0x148] ss:$20 sps:$4 sm:$0xff]  }
   0xd   :  { %v6525_v36 = vld [vmem:[%s9514_s1 + $0x16c] ss:$20 sps:$4 sm:$0xff]   ;;  %v6527_v37 = vld [vmem:[%s9514_s1 + $0x174] ss:$20 sps:$4 sm:$0xff]   ;;  %v6530_v39 = vld [vmem:[%s9514_s1 + $0x170] ss:$20 sps:$4 sm:$0xff]  }
   0xe   :  { %v6529_v38 = vld [vmem:[%s9514_s1 + $0x168] ss:$20 sps:$4 sm:$0xff]   ;;  %v6535_v42 = vld [vmem:[%s9514_s1 + $0x190] ss:$20 sps:$4 sm:$0xff]   ;;  %v6536_v43 = vld [vmem:[%s9514_s1 + $0x198] ss:$20 sps:$4 sm:$0xff]  }
   0xf   :  { %2681 = vmatpush1.bf16.msra.mxu0 %v6493_v14  ;;  %2896 = vmatpush1.bf16.msra.mxu1 %v6494_v15  ;;  %v6531_v40 = vld [vmem:[%s9514_s1 + $0x194] ss:$20 sps:$4 sm:$0xff]   ;;  %v6533_v41 = vld [vmem:[%s9514_s1 + $0x19c] ss:$20 sps:$4 sm:$0xff]   ;;  %v6539_v45 = vld [vmem:[%s9514_s1 + $0x1c4] ss:$20 sps:$4 sm:$0xff]  }
  0x10   :  { %2682 = vmatprep.subr.bf16.mxu0 %v6495_v16  ;;  %2897 = vmatprep.subr.bf16.mxu1 %v6497_v17  ;;  %v6537_v44 = vld [vmem:[%s9514_s1 + $0x1bc] ss:$20 sps:$4 sm:$0xff]   ;;  %v6541_v46 = vld [vmem:[%s9514_s1 + $0x1b8] ss:$20 sps:$4 sm:$0xff]   ;;  %v6542_v48 = vld [vmem:[%s9514_s1 + $0x1c0] ss:$20 sps:$4 sm:$0xff]  }
  0x11   :  { %v6567_v47 = vld [vmem:[%s9515_s0 + $0x4] ss:$40 sps:$4 sm:$0xff]   ;;  %v6547_v51 = vld [vmem:[%s9514_s1 + $0x1e0] ss:$20 sps:$4 sm:$0xff]   ;;  %v6548_v52 = vld [vmem:[%s9514_s1 + $0x1e8] ss:$20 sps:$4 sm:$0xff]  }
  0x12   :  { %v6543_v49 = vld [vmem:[%s9514_s1 + $0x1e4] ss:$20 sps:$4 sm:$0xff]   ;;  %v6545_v50 = vld [vmem:[%s9514_s1 + $0x1ec] ss:$20 sps:$4 sm:$0xff]   ;;  %2706 = vmatprep.mubr.bf16.mxu0 %v6567_v47  ;;  %2921 = vmatprep.mubr.bf16.mxu1 %v6567_v47  ;;  %v6551_v54 = vld [vmem:[%s9514_s1 + $0x214] ss:$20 sps:$4 sm:$0xff]  }
  0x13   :  { %2683 = vmatpush1.bf16.msra.mxu0 %v6499_v18  ;;  %2898 = vmatpush1.bf16.msra.mxu1 %v6500_v19  ;;  %v6549_v53 = vld [vmem:[%s9514_s1 + $0x20c] ss:$20 sps:$4 sm:$0xff]   ;;  %v6553_v55 = vld [vmem:[%s9514_s1 + $0x208] ss:$20 sps:$4 sm:$0xff]   ;;  %v6554_v56 = vld [vmem:[%s9514_s1 + $0x210] ss:$20 sps:$4 sm:$0xff]  }
  0x14   :  { %2684 = vmatprep.subr.bf16.mxu0 %v6501_v20  ;;  %2899 = vmatprep.subr.bf16.mxu1 %v6503_v21  ;;  %v6555_v57 = vld [vmem:[%s9514_s1 + $0x234] ss:$20 sps:$4 sm:$0xff]   ;;  %v6557_v58 = vld [vmem:[%s9514_s1 + $0x23c] ss:$20 sps:$4 sm:$0xff]   ;;  %v6560_v60 = vld [vmem:[%s9514_s1 + $0x238] ss:$20 sps:$4 sm:$0xff]  }
  0x15   :  { %v6559_v59 = vld [vmem:[%s9514_s1 + $0x230] ss:$20 sps:$4 sm:$0xff]   ;;  %v6565_v63 = vld [vmem:[%s9514_s1 + $0x258] ss:$20 sps:$4 sm:$0xff]   ;;  %v6566_v0 = vld [vmem:[%s9514_s1 + $0x260] ss:$20 sps:$4 sm:$0xff]  }
  0x16   :  { %v6561_v61 = vld [vmem:[%s9514_s1 + $0x25c] ss:$20 sps:$4 sm:$0xff]   ;;  %v6563_v62 = vld [vmem:[%s9514_s1 + $0x264] ss:$20 sps:$4 sm:$0xff]   ;;  %v6574_v2 = vld [vmem:[%s9514_s1 + $0x28c] ss:$20 sps:$4 sm:$0xff]  }
  0x17   :  { %2685 = vmatpush1.bf16.msra.mxu0 %v6505_v22  ;;  %2900 = vmatpush1.bf16.msra.mxu1 %v6506_v23  ;;  %v6571_v1 = vld [vmem:[%s9514_s1 + $0x284] ss:$20 sps:$4 sm:$0xff]   ;;  %v6569_v3 = vld [vmem:[%s9514_s1 + $0x280] ss:$20 sps:$4 sm:$0xff]   ;;  %v6572_v4 = vld [vmem:[%s9514_s1 + $0x288] ss:$20 sps:$4 sm:$0xff]  }
  0x18   :  { %2686 = vmatprep.subr.bf16.mxu0 %v6507_v24  ;;  %2901 = vmatprep.subr.bf16.mxu1 %v6509_v25  ;;  %v6575_v5 = vld [vmem:[%s9515_s0] ss:$40 sps:$4 sm:$0xff]   ;;  %v6579_v9 = vld [vmem:[%s9514_s1 + $0x2b0] ss:$20 sps:$4 sm:$0xff]   ;;  %v6585_v13 = vld [vmem:[%s9514_s1 + $0x2d8] ss:$20 sps:$4 sm:$0xff]  }
  0x19   :  { %v6578_v6 = vld [vmem:[%s9514_s1 + $0x2ac] ss:$20 sps:$4 sm:$0xff]   ;;  %v6581_v7 = vld [vmem:[%s9514_s1 + $0x2b4] ss:$20 sps:$4 sm:$0xff]   ;;  %v6587_v11 = vld [vmem:[%s9514_s1 + $0x2dc] ss:$20 sps:$4 sm:$0xff]  }
  0x1a   :  { %v6576_v8 = vld [vmem:[%s9514_s1 + $0x2a8] ss:$20 sps:$4 sm:$0xff]   ;;  %v6582_v12 = vld [vmem:[%s9514_s1 + $0x2d0] ss:$20 sps:$4 sm:$0xff]   ;;  %v6588_v16 = vld [vmem:[%s9514_s1 + $0x2f8] ss:$20 sps:$4 sm:$0xff]  }
  0x1b   :  { %2687 = vmatpush1.bf16.msra.mxu0 %v6511_v26  ;;  %2902 = vmatpush1.bf16.msra.mxu1 %v6512_v27  ;;  %v6584_v10 = vld [vmem:[%s9514_s1 + $0x2d4] ss:$20 sps:$4 sm:$0xff]   ;;  %v6590_v14 = vld [vmem:[%s9514_s1 + $0x2fc] ss:$20 sps:$4 sm:$0xff]   ;;  %v6593_v15 = vld [vmem:[%s9514_s1 + $0x304] ss:$20 sps:$4 sm:$0xff]  }
  0x1c   :  { %2688 = vmatprep.subr.bf16.mxu0 %v6513_v28  ;;  %2903 = vmatprep.subr.bf16.mxu1 %v6515_v29  ;;  %v6591_v17 = vld [vmem:[%s9514_s1 + $0x300] ss:$20 sps:$4 sm:$0xff]   ;;  %v6596_v18 = vld [vmem:[%s9514_s1 + $0x324] ss:$20 sps:$4 sm:$0xff]   ;;  %v6597_v21 = vld [vmem:[%s9514_s1 + $0x328] ss:$20 sps:$4 sm:$0xff]  }
  0x1d   :  { %v6599_v19 = vld [vmem:[%s9514_s1 + $0x32c] ss:$20 sps:$4 sm:$0xff]   ;;  %v6605_v23 = vld [vmem:[%s9514_s1 + $0x354] ss:$20 sps:$4 sm:$0xff]   ;;  %v6603_v25 = vld [vmem:[%s9514_s1 + $0x350] ss:$20 sps:$4 sm:$0xff]  }
  0x1e   :  { %v6594_v20 = vld [vmem:[%s9514_s1 + $0x320] ss:$20 sps:$4 sm:$0xff]   ;;  %v6600_v24 = vld [vmem:[%s9514_s1 + $0x348] ss:$20 sps:$4 sm:$0xff]   ;;  %v6606_v28 = vld [vmem:[%s9514_s1 + $0x370] ss:$20 sps:$4 sm:$0xff]  }
  0x1f   :  { %2689 = vmatpush1.bf16.msra.mxu0 %v6517_v30  ;;  %2904 = vmatpush1.bf16.msra.mxu1 %v6518_v31  ;;  %v6602_v22 = vld [vmem:[%s9514_s1 + $0x34c] ss:$20 sps:$4 sm:$0xff]   ;;  %v6608_v26 = vld [vmem:[%s9514_s1 + $0x374] ss:$20 sps:$4 sm:$0xff]   ;;  %v6611_v27 = vld [vmem:[%s9514_s1 + $0x37c] ss:$20 sps:$4 sm:$0xff]  }
  0x20   :  { %2690 = vmatprep.subr.bf16.mxu0 %v6519_v32  ;;  %2905 = vmatprep.subr.bf16.mxu1 %v6521_v33  ;;  %v6609_v29 = vld [vmem:[%s9514_s1 + $0x378] ss:$20 sps:$4 sm:$0xff]   ;;  %v6614_v31 = vld [vmem:[%s9514_s1 + $0x39c] ss:$20 sps:$4 sm:$0xff]  }
  0x21   :  { %v6668_v30 = vld [vmem:[%s9515_s0 + $0xc] ss:$40 sps:$4 sm:$0xff]   ;;  %v6617_v32 = vld [vmem:[%s9514_s1 + $0x3a4] ss:$20 sps:$4 sm:$0xff]   ;;  %v6638_v47 = vld [vmem:[%s9514_s1 + $0x43c] ss:$20 sps:$4 sm:$0xff]  }
  0x22   :  { %v6612_v33 = vld [vmem:[%s9514_s1 + $0x398] ss:$20 sps:$4 sm:$0xff]  }
  0x23   :  { %2691 = vmatpush1.bf16.msra.mxu0 %v6523_v34  ;;  %2906 = vmatpush1.bf16.msra.mxu1 %v6524_v35  ;;  %v6615_v34 = vld [vmem:[%s9514_s1 + $0x3a0] ss:$20 sps:$4 sm:$0xff]   ;;  %v6620_v35 = vld [vmem:[%s9514_s1 + $0x3c4] ss:$20 sps:$4 sm:$0xff]  }
  0x24   :  { %2692 = vmatprep.subr.bf16.mxu0 %v6525_v36  ;;  %2907 = vmatprep.subr.bf16.mxu1 %v6527_v37  ;;  %v6623_v36 = vld [vmem:[%s9514_s1 + $0x3cc] ss:$20 sps:$4 sm:$0xff]  }
  0x25   :  { %v6618_v37 = vld [vmem:[%s9514_s1 + $0x3c0] ss:$20 sps:$4 sm:$0xff]  }
  0x27   :  { %2693 = vmatpush1.bf16.msra.mxu0 %v6529_v38  ;;  %2908 = vmatpush1.bf16.msra.mxu1 %v6530_v39  ;;  %v6621_v38 = vld [vmem:[%s9514_s1 + $0x3c8] ss:$20 sps:$4 sm:$0xff]   ;;  %v6626_v39 = vld [vmem:[%s9514_s1 + $0x3ec] ss:$20 sps:$4 sm:$0xff]  }
  0x28   :  { %2694 = vmatprep.subr.bf16.mxu0 %v6531_v40  ;;  %2909 = vmatprep.subr.bf16.mxu1 %v6533_v41  ;;  %v6629_v40 = vld [vmem:[%s9514_s1 + $0x3f4] ss:$20 sps:$4 sm:$0xff]  }
  0x29   :  { %v6624_v41 = vld [vmem:[%s9514_s1 + $0x3e8] ss:$20 sps:$4 sm:$0xff]  }
  0x2b   :  { %2695 = vmatpush1.bf16.msra.mxu0 %v6535_v42  ;;  %2910 = vmatpush1.bf16.msra.mxu1 %v6536_v43  ;;  %v6627_v42 = vld [vmem:[%s9514_s1 + $0x3f0] ss:$20 sps:$4 sm:$0xff]   ;;  %v6632_v43 = vld [vmem:[%s9514_s1 + $0x414] ss:$20 sps:$4 sm:$0xff]  }
  0x2c   :  { %2696 = vmatprep.subr.bf16.mxu0 %v6537_v44  ;;  %2911 = vmatprep.subr.bf16.mxu1 %v6539_v45  ;;  %v6635_v44 = vld [vmem:[%s9514_s1 + $0x41c] ss:$20 sps:$4 sm:$0xff]  }
  0x2d   :  { %v6630_v45 = vld [vmem:[%s9514_s1 + $0x410] ss:$20 sps:$4 sm:$0xff]  }
  0x2f   :  { %2697 = vmatpush1.bf16.msra.mxu0 %v6541_v46  ;;  %2912 = vmatpush1.bf16.msra.mxu1 %v6542_v48  ;;  %v6633_v46 = vld [vmem:[%s9514_s1 + $0x418] ss:$20 sps:$4 sm:$0xff]  }
  0x30   :  { %2698 = vmatprep.subr.bf16.mxu0 %v6543_v49  ;;  %2913 = vmatprep.subr.bf16.mxu1 %v6545_v50  ;;  %v6641_v48 = vld [vmem:[%s9514_s1 + $0x444] ss:$20 sps:$4 sm:$0xff]   ;;  %v6639_v50 = vld [vmem:[%s9514_s1 + $0x440] ss:$20 sps:$4 sm:$0xff]  }
  0x31   :  { %v6636_v49 = vld [vmem:[%s9514_s1 + $0x438] ss:$20 sps:$4 sm:$0xff]  }
  0x33   :  { %2699 = vmatpush1.bf16.msra.mxu0 %v6547_v51  ;;  %2914 = vmatpush1.bf16.msra.mxu1 %v6548_v52  ;;  %v6644_v51 = vld [vmem:[%s9514_s1 + $0x464] ss:$20 sps:$4 sm:$0xff]   ;;  %v6647_v52 = vld [vmem:[%s9514_s1 + $0x46c] ss:$20 sps:$4 sm:$0xff]  }
  0x34   :  { %2700 = vmatprep.subr.bf16.mxu0 %v6549_v53  ;;  %2915 = vmatprep.subr.bf16.mxu1 %v6551_v54  ;;  %v6642_v53 = vld [vmem:[%s9514_s1 + $0x460] ss:$20 sps:$4 sm:$0xff]   ;;  %v6645_v54 = vld [vmem:[%s9514_s1 + $0x468] ss:$20 sps:$4 sm:$0xff]  }
  0x37   :  { %2701 = vmatpush1.bf16.msra.mxu0 %v6553_v55  ;;  %2916 = vmatpush1.bf16.msra.mxu1 %v6554_v56  ;;  %v6650_v55 = vld [vmem:[%s9514_s1 + $0x48c] ss:$20 sps:$4 sm:$0xff]   ;;  %v6653_v56 = vld [vmem:[%s9514_s1 + $0x494] ss:$20 sps:$4 sm:$0xff]  }
  0x38   :  { %2702 = vmatprep.subr.bf16.mxu0 %v6555_v57  ;;  %2917 = vmatprep.subr.bf16.mxu1 %v6557_v58  ;;  %v6648_v57 = vld [vmem:[%s9514_s1 + $0x488] ss:$20 sps:$4 sm:$0xff]   ;;  %v6651_v58 = vld [vmem:[%s9514_s1 + $0x490] ss:$20 sps:$4 sm:$0xff]  }
  0x3b   :  { %2703 = vmatpush1.bf16.msra.mxu0 %v6559_v59  ;;  %2918 = vmatpush1.bf16.msra.mxu1 %v6560_v60  ;;  %v6656_v59 = vld [vmem:[%s9514_s1 + $0x4b4] ss:$20 sps:$4 sm:$0xff]   ;;  %v6659_v60 = vld [vmem:[%s9514_s1 + $0x4bc] ss:$20 sps:$4 sm:$0xff]  }
  0x3c   :  { %2704 = vmatprep.subr.bf16.mxu0 %v6561_v61  ;;  %2919 = vmatprep.subr.bf16.mxu1 %v6563_v62  ;;  %v6654_v61 = vld [vmem:[%s9514_s1 + $0x4b0] ss:$20 sps:$4 sm:$0xff]   ;;  %v6657_v62 = vld [vmem:[%s9514_s1 + $0x4b8] ss:$20 sps:$4 sm:$0xff]  }
  0x3f   :  { %2705 = vmatpush1.bf16.msra.mxu0 %v6565_v63  ;;  %2920 = vmatpush1.bf16.msra.mxu1 %v6566_v0  ;;  %v6662_v63 = vld [vmem:[%s9514_s1 + $0x4dc] ss:$20 sps:$4 sm:$0xff]   ;;  %v6665_v0 = vld [vmem:[%s9514_s1 + $0x4e4] ss:$20 sps:$4 sm:$0xff]  }
  0x40   :  { %2717 = vmatprep.subr.bf16.mxu0 %v6571_v1  ;;  %2932 = vmatprep.subr.bf16.mxu1 %v6574_v2  ;;  %v6660_v1 = vld [vmem:[%s9514_s1 + $0x4d8] ss:$20 sps:$4 sm:$0xff]   ;;  %v6663_v2 = vld [vmem:[%s9514_s1 + $0x4e0] ss:$20 sps:$4 sm:$0xff]  }
  0x42   :  { %2707 = vmatmul.mubr.bf16.vlgmr.msra.gmra.mrb[0].mxu0 %v6575_v5  ;;  %2922 = vmatmul.mubr.bf16.vlgmr.msra.gmra.mrb[0].mxu1 %v6575_v5  ;;  %v6666_v5 = vld [vmem:[%s9515_s0 + $0x8] ss:$40 sps:$4 sm:$0xff]  }
  0x43   :  { %2718 = vmatpush1.bf16.msra.mxu0 %v6569_v3  ;;  %2933 = vmatpush1.bf16.msra.mxu1 %v6572_v4  ;;  %v6671_v3 = vld [vmem:[%s9514_s1 + $0x504] ss:$20 sps:$4 sm:$0xff]   ;;  %v6674_v4 = vld [vmem:[%s9514_s1 + $0x50c] ss:$20 sps:$4 sm:$0xff]  }
  0x44   :  { %2719 = vmatprep.subr.bf16.mxu0 %v6578_v6  ;;  %2934 = vmatprep.subr.bf16.mxu1 %v6581_v7  ;;  %v6669_v6 = vld [vmem:[%s9514_s1 + $0x500] ss:$20 sps:$4 sm:$0xff]   ;;  %v6672_v7 = vld [vmem:[%s9514_s1 + $0x508] ss:$20 sps:$4 sm:$0xff]  }
  0x45   :  { %2749 = vmatprep.mubr.bf16.mxu0 %v6668_v30  ;;  %2964 = vmatprep.mubr.bf16.mxu1 %v6668_v30  ;;  %v6710_v30 = vld [vmem:[%s9514_s1 + $0x5fc] ss:$20 sps:$4 sm:$0xff]  }
  0x47   :  { %2720 = vmatpush1.bf16.msra.mxu0 %v6576_v8  ;;  %2935 = vmatpush1.bf16.msra.mxu1 %v6579_v9  ;;  %v6677_v8 = vld [vmem:[%s9514_s1 + $0x52c] ss:$20 sps:$4 sm:$0xff]   ;;  %v6680_v9 = vld [vmem:[%s9514_s1 + $0x534] ss:$20 sps:$4 sm:$0xff]  }
  0x48   :  { %2721 = vmatprep.subr.bf16.mxu0 %v6584_v10  ;;  %2936 = vmatprep.subr.bf16.mxu1 %v6587_v11  ;;  %v6675_v10 = vld [vmem:[%s9514_s1 + $0x528] ss:$20 sps:$4 sm:$0xff]   ;;  %v6678_v11 = vld [vmem:[%s9514_s1 + $0x530] ss:$20 sps:$4 sm:$0xff]  }
  0x4b   :  { %2722 = vmatpush1.bf16.msra.mxu0 %v6582_v12  ;;  %2937 = vmatpush1.bf16.msra.mxu1 %v6585_v13  ;;  %v6767_v12 = vld [vmem:[%s9515_s0 + $0x14] ss:$40 sps:$4 sm:$0xff]  }
  0x4c   :  { %2723 = vmatprep.subr.bf16.mxu0 %v6590_v14  ;;  %2938 = vmatprep.subr.bf16.mxu1 %v6593_v15  ;;  %v6683_v13 = vld [vmem:[%s9514_s1 + $0x554] ss:$20 sps:$4 sm:$0xff]   ;;  %v6686_v14 = vld [vmem:[%s9514_s1 + $0x55c] ss:$20 sps:$4 sm:$0xff]  }
  0x4d   :  { %v6681_v15 = vld [vmem:[%s9514_s1 + $0x550] ss:$20 sps:$4 sm:$0xff]  }
  0x4f   :  { %2724 = vmatpush1.bf16.msra.mxu0 %v6588_v16  ;;  %2939 = vmatpush1.bf16.msra.mxu1 %v6591_v17  ;;  %v6684_v16 = vld [vmem:[%s9514_s1 + $0x558] ss:$20 sps:$4 sm:$0xff]   ;;  %v6689_v17 = vld [vmem:[%s9514_s1 + $0x57c] ss:$20 sps:$4 sm:$0xff]  }
  0x50   :  { %2725 = vmatprep.subr.bf16.mxu0 %v6596_v18  ;;  %2940 = vmatprep.subr.bf16.mxu1 %v6599_v19  ;;  %v6692_v18 = vld [vmem:[%s9514_s1 + $0x584] ss:$20 sps:$4 sm:$0xff]  }
  0x51   :  { %v6687_v19 = vld [vmem:[%s9514_s1 + $0x578] ss:$20 sps:$4 sm:$0xff]  }
  0x53   :  { %2726 = vmatpush1.bf16.msra.mxu0 %v6594_v20  ;;  %2941 = vmatpush1.bf16.msra.mxu1 %v6597_v21  ;;  %v6690_v20 = vld [vmem:[%s9514_s1 + $0x580] ss:$20 sps:$4 sm:$0xff]   ;;  %v6695_v21 = vld [vmem:[%s9514_s1 + $0x5a4] ss:$20 sps:$4 sm:$0xff]  }
  0x54   :  { %2727 = vmatprep.subr.bf16.mxu0 %v6602_v22  ;;  %2942 = vmatprep.subr.bf16.mxu1 %v6605_v23  ;;  %v6698_v22 = vld [vmem:[%s9514_s1 + $0x5ac] ss:$20 sps:$4 sm:$0xff]  }
  0x55   :  { %v6693_v23 = vld [vmem:[%s9514_s1 + $0x5a0] ss:$20 sps:$4 sm:$0xff]  }
  0x57   :  { %2728 = vmatpush1.bf16.msra.mxu0 %v6600_v24  ;;  %2943 = vmatpush1.bf16.msra.mxu1 %v6603_v25  ;;  %v6696_v24 = vld [vmem:[%s9514_s1 + $0x5a8] ss:$20 sps:$4 sm:$0xff]   ;;  %v6701_v25 = vld [vmem:[%s9514_s1 + $0x5cc] ss:$20 sps:$4 sm:$0xff]  }
  0x58   :  { %2729 = vmatprep.subr.bf16.mxu0 %v6608_v26  ;;  %2944 = vmatprep.subr.bf16.mxu1 %v6611_v27  ;;  %v6704_v26 = vld [vmem:[%s9514_s1 + $0x5d4] ss:$20 sps:$4 sm:$0xff]  }
  0x59   :  { %v6699_v27 = vld [vmem:[%s9514_s1 + $0x5c8] ss:$20 sps:$4 sm:$0xff]  }
  0x5b   :  { %2730 = vmatpush1.bf16.msra.mxu0 %v6606_v28  ;;  %2945 = vmatpush1.bf16.msra.mxu1 %v6609_v29  ;;  %v6702_v28 = vld [vmem:[%s9514_s1 + $0x5d0] ss:$20 sps:$4 sm:$0xff]   ;;  %v6707_v29 = vld [vmem:[%s9514_s1 + $0x5f4] ss:$20 sps:$4 sm:$0xff]  }
  0x5c   :  { %2731 = vmatprep.subr.bf16.mxu0 %v6614_v31  ;;  %2946 = vmatprep.subr.bf16.mxu1 %v6617_v32  ;;  %v6705_v31 = vld [vmem:[%s9514_s1 + $0x5f0] ss:$20 sps:$4 sm:$0xff]   ;;  %v6708_v32 = vld [vmem:[%s9514_s1 + $0x5f8] ss:$20 sps:$4 sm:$0xff]  }
  0x5f   :  { %2732 = vmatpush1.bf16.msra.mxu0 %v6612_v33  ;;  %2947 = vmatpush1.bf16.msra.mxu1 %v6615_v34  ;;  %v6713_v33 = vld [vmem:[%s9514_s1 + $0x61c] ss:$20 sps:$4 sm:$0xff]   ;;  %v6716_v34 = vld [vmem:[%s9514_s1 + $0x624] ss:$20 sps:$4 sm:$0xff]  }
  0x60   :  { %2733 = vmatprep.subr.bf16.mxu0 %v6620_v35  ;;  %2948 = vmatprep.subr.bf16.mxu1 %v6623_v36  ;;  %v6711_v35 = vld [vmem:[%s9514_s1 + $0x618] ss:$20 sps:$4 sm:$0xff]   ;;  %v6714_v36 = vld [vmem:[%s9514_s1 + $0x620] ss:$20 sps:$4 sm:$0xff]  }
  0x63   :  { %2734 = vmatpush1.bf16.msra.mxu0 %v6618_v37  ;;  %2949 = vmatpush1.bf16.msra.mxu1 %v6621_v38  ;;  %v6719_v37 = vld [vmem:[%s9514_s1 + $0x644] ss:$20 sps:$4 sm:$0xff]   ;;  %v6722_v38 = vld [vmem:[%s9514_s1 + $0x64c] ss:$20 sps:$4 sm:$0xff]  }
  0x64   :  { %2735 = vmatprep.subr.bf16.mxu0 %v6626_v39  ;;  %2950 = vmatprep.subr.bf16.mxu1 %v6629_v40  ;;  %v6717_v39 = vld [vmem:[%s9514_s1 + $0x640] ss:$20 sps:$4 sm:$0xff]   ;;  %v6720_v40 = vld [vmem:[%s9514_s1 + $0x648] ss:$20 sps:$4 sm:$0xff]  }
  0x67   :  { %2736 = vmatpush1.bf16.msra.mxu0 %v6624_v41  ;;  %2951 = vmatpush1.bf16.msra.mxu1 %v6627_v42  ;;  %v6725_v41 = vld [vmem:[%s9514_s1 + $0x66c] ss:$20 sps:$4 sm:$0xff]   ;;  %v6728_v42 = vld [vmem:[%s9514_s1 + $0x674] ss:$20 sps:$4 sm:$0xff]  }
  0x68   :  { %2737 = vmatprep.subr.bf16.mxu0 %v6632_v43  ;;  %2952 = vmatprep.subr.bf16.mxu1 %v6635_v44  ;;  %v6723_v43 = vld [vmem:[%s9514_s1 + $0x668] ss:$20 sps:$4 sm:$0xff]   ;;  %v6726_v44 = vld [vmem:[%s9514_s1 + $0x670] ss:$20 sps:$4 sm:$0xff]  }
  0x6b   :  { %2738 = vmatpush1.bf16.msra.mxu0 %v6630_v45  ;;  %2953 = vmatpush1.bf16.msra.mxu1 %v6633_v46  ;;  %v6731_v45 = vld [vmem:[%s9514_s1 + $0x694] ss:$20 sps:$4 sm:$0xff]   ;;  %v6734_v46 = vld [vmem:[%s9514_s1 + $0x69c] ss:$20 sps:$4 sm:$0xff]  }
  0x6c   :  { %2739 = vmatprep.subr.bf16.mxu0 %v6638_v47  ;;  %2954 = vmatprep.subr.bf16.mxu1 %v6641_v48  ;;  %v6729_v47 = vld [vmem:[%s9514_s1 + $0x690] ss:$20 sps:$4 sm:$0xff]   ;;  %v6732_v48 = vld [vmem:[%s9514_s1 + $0x698] ss:$20 sps:$4 sm:$0xff]  }
  0x6f   :  { %2740 = vmatpush1.bf16.msra.mxu0 %v6636_v49  ;;  %2955 = vmatpush1.bf16.msra.mxu1 %v6639_v50  ;;  %v6737_v49 = vld [vmem:[%s9514_s1 + $0x6bc] ss:$20 sps:$4 sm:$0xff]   ;;  %v6740_v50 = vld [vmem:[%s9514_s1 + $0x6c4] ss:$20 sps:$4 sm:$0xff]  }
  0x70   :  { %2741 = vmatprep.subr.bf16.mxu0 %v6644_v51  ;;  %2956 = vmatprep.subr.bf16.mxu1 %v6647_v52  ;;  %v6735_v51 = vld [vmem:[%s9514_s1 + $0x6b8] ss:$20 sps:$4 sm:$0xff]   ;;  %v6738_v52 = vld [vmem:[%s9514_s1 + $0x6c0] ss:$20 sps:$4 sm:$0xff]  }
  0x73   :  { %2742 = vmatpush1.bf16.msra.mxu0 %v6642_v53  ;;  %2957 = vmatpush1.bf16.msra.mxu1 %v6645_v54  ;;  %v6743_v53 = vld [vmem:[%s9514_s1 + $0x6e4] ss:$20 sps:$4 sm:$0xff]   ;;  %v6746_v54 = vld [vmem:[%s9514_s1 + $0x6ec] ss:$20 sps:$4 sm:$0xff]  }
  0x74   :  { %2743 = vmatprep.subr.bf16.mxu0 %v6650_v55  ;;  %2958 = vmatprep.subr.bf16.mxu1 %v6653_v56  ;;  %v6741_v55 = vld [vmem:[%s9514_s1 + $0x6e0] ss:$20 sps:$4 sm:$0xff]   ;;  %v6744_v56 = vld [vmem:[%s9514_s1 + $0x6e8] ss:$20 sps:$4 sm:$0xff]  }
  0x77   :  { %2744 = vmatpush1.bf16.msra.mxu0 %v6648_v57  ;;  %2959 = vmatpush1.bf16.msra.mxu1 %v6651_v58  ;;  %v6749_v57 = vld [vmem:[%s9514_s1 + $0x70c] ss:$20 sps:$4 sm:$0xff]   ;;  %v6752_v58 = vld [vmem:[%s9514_s1 + $0x714] ss:$20 sps:$4 sm:$0xff]  }
  0x78   :  { %2745 = vmatprep.subr.bf16.mxu0 %v6656_v59  ;;  %2960 = vmatprep.subr.bf16.mxu1 %v6659_v60  ;;  %v6747_v59 = vld [vmem:[%s9514_s1 + $0x708] ss:$20 sps:$4 sm:$0xff]   ;;  %v6750_v60 = vld [vmem:[%s9514_s1 + $0x710] ss:$20 sps:$4 sm:$0xff]  }
  0x7b   :  { %2746 = vmatpush1.bf16.msra.mxu0 %v6654_v61  ;;  %2961 = vmatpush1.bf16.msra.mxu1 %v6657_v62  ;;  %v6755_v61 = vld [vmem:[%s9514_s1 + $0x734] ss:$20 sps:$4 sm:$0xff]   ;;  %v6758_v62 = vld [vmem:[%s9514_s1 + $0x73c] ss:$20 sps:$4 sm:$0xff]  }
  0x7c   :  { %2747 = vmatprep.subr.bf16.mxu0 %v6662_v63  ;;  %2962 = vmatprep.subr.bf16.mxu1 %v6665_v0  ;;  %v6753_v63 = vld [vmem:[%s9514_s1 + $0x730] ss:$20 sps:$4 sm:$0xff]   ;;  %v6756_v0 = vld [vmem:[%s9514_s1 + $0x738] ss:$20 sps:$4 sm:$0xff]  }
  0x7f   :  { %2748 = vmatpush1.bf16.msra.mxu0 %v6660_v1  ;;  %2963 = vmatpush1.bf16.msra.mxu1 %v6663_v2  ;;  %v6761_v1 = vld [vmem:[%s9514_s1 + $0x75c] ss:$20 sps:$4 sm:$0xff]   ;;  %v6764_v2 = vld [vmem:[%s9514_s1 + $0x764] ss:$20 sps:$4 sm:$0xff]  }
  0x80   :  { %2760 = vmatprep.subr.bf16.mxu0 %v6671_v3  ;;  %2975 = vmatprep.subr.bf16.mxu1 %v6674_v4  ;;  %v6759_v3 = vld [vmem:[%s9514_s1 + $0x758] ss:$20 sps:$4 sm:$0xff]   ;;  %v6762_v4 = vld [vmem:[%s9514_s1 + $0x760] ss:$20 sps:$4 sm:$0xff]  }
  0x82   :  { %2750 = vmatmul.mubr.bf16.vlgmr.msra.gmra.mrb[0].mxu0 %v6666_v5  ;;  %2965 = vmatmul.mubr.bf16.vlgmr.msra.gmra.mrb[0].mxu1 %v6666_v5  ;;  %v6770_v5 = vld [vmem:[%s9514_s1 + $0x784] ss:$20 sps:$4 sm:$0xff]  }
  0x83   :  { %2761 = vmatpush1.bf16.msra.mxu0 %v6669_v6  ;;  %2976 = vmatpush1.bf16.msra.mxu1 %v6672_v7  ;;  %v6773_v6 = vld [vmem:[%s9514_s1 + $0x78c] ss:$20 sps:$4 sm:$0xff]   ;;  %v6765_v7 = vld [vmem:[%s9515_s0 + $0x10] ss:$40 sps:$4 sm:$0xff]  }
  0x84   :  { %2762 = vmatprep.subr.bf16.mxu0 %v6677_v8  ;;  %2977 = vmatprep.subr.bf16.mxu1 %v6680_v9  ;;  %v6768_v8 = vld [vmem:[%s9514_s1 + $0x780] ss:$20 sps:$4 sm:$0xff]   ;;  %v6771_v9 = vld [vmem:[%s9514_s1 + $0x788] ss:$20 sps:$4 sm:$0xff]  }
  0x85   :  { %2792 = vmatprep.mubr.bf16.mxu0 %v6767_v12  ;;  %3007 = vmatprep.mubr.bf16.mxu1 %v6767_v12  ;;  %v6866_v12 = vld [vmem:[%s9515_s0 + $0x1c] ss:$40 sps:$4 sm:$0xff]  }
  0x87   :  { %2763 = vmatpush1.bf16.msra.mxu0 %v6675_v10  ;;  %2978 = vmatpush1.bf16.msra.mxu1 %v6678_v11  ;;  %v6776_v10 = vld [vmem:[%s9514_s1 + $0x7ac] ss:$20 sps:$4 sm:$0xff]   ;;  %v6779_v11 = vld [vmem:[%s9514_s1 + $0x7b4] ss:$20 sps:$4 sm:$0xff]  }
  0x88   :  { %2764 = vmatprep.subr.bf16.mxu0 %v6683_v13  ;;  %2979 = vmatprep.subr.bf16.mxu1 %v6686_v14  ;;  %v6774_v13 = vld [vmem:[%s9514_s1 + $0x7a8] ss:$20 sps:$4 sm:$0xff]   ;;  %v6777_v14 = vld [vmem:[%s9514_s1 + $0x7b0] ss:$20 sps:$4 sm:$0xff]  }
  0x8b   :  { %2765 = vmatpush1.bf16.msra.mxu0 %v6681_v15  ;;  %2980 = vmatpush1.bf16.msra.mxu1 %v6684_v16  ;;  %v6782_v15 = vld [vmem:[%s9514_s1 + $0x7d4] ss:$20 sps:$4 sm:$0xff]   ;;  %v6785_v16 = vld [vmem:[%s9514_s1 + $0x7dc] ss:$20 sps:$4 sm:$0xff]  }
  0x8c   :  { %2766 = vmatprep.subr.bf16.mxu0 %v6689_v17  ;;  %2981 = vmatprep.subr.bf16.mxu1 %v6692_v18  ;;  %v6780_v17 = vld [vmem:[%s9514_s1 + $0x7d0] ss:$20 sps:$4 sm:$0xff]   ;;  %v6783_v18 = vld [vmem:[%s9514_s1 + $0x7d8] ss:$20 sps:$4 sm:$0xff]  }
  0x8f   :  { %2767 = vmatpush1.bf16.msra.mxu0 %v6687_v19  ;;  %2982 = vmatpush1.bf16.msra.mxu1 %v6690_v20  ;;  %v6788_v19 = vld [vmem:[%s9514_s1 + $0x7fc] ss:$20 sps:$4 sm:$0xff]   ;;  %v6791_v20 = vld [vmem:[%s9514_s1 + $0x804] ss:$20 sps:$4 sm:$0xff]  }
  0x90   :  { %2768 = vmatprep.subr.bf16.mxu0 %v6695_v21  ;;  %2983 = vmatprep.subr.bf16.mxu1 %v6698_v22  ;;  %v6786_v21 = vld [vmem:[%s9514_s1 + $0x7f8] ss:$20 sps:$4 sm:$0xff]   ;;  %v6789_v22 = vld [vmem:[%s9514_s1 + $0x800] ss:$20 sps:$4 sm:$0xff]  }
  0x93   :  { %2769 = vmatpush1.bf16.msra.mxu0 %v6693_v23  ;;  %2984 = vmatpush1.bf16.msra.mxu1 %v6696_v24  ;;  %v6794_v23 = vld [vmem:[%s9514_s1 + $0x824] ss:$20 sps:$4 sm:$0xff]   ;;  %v6797_v24 = vld [vmem:[%s9514_s1 + $0x82c] ss:$20 sps:$4 sm:$0xff]  }
  0x94   :  { %2770 = vmatprep.subr.bf16.mxu0 %v6701_v25  ;;  %2985 = vmatprep.subr.bf16.mxu1 %v6704_v26  ;;  %v6792_v25 = vld [vmem:[%s9514_s1 + $0x820] ss:$20 sps:$4 sm:$0xff]   ;;  %v6795_v26 = vld [vmem:[%s9514_s1 + $0x828] ss:$20 sps:$4 sm:$0xff]  }
  0x97   :  { %2771 = vmatpush1.bf16.msra.mxu0 %v6699_v27  ;;  %2986 = vmatpush1.bf16.msra.mxu1 %v6702_v28  ;;  %v6800_v27 = vld [vmem:[%s9514_s1 + $0x84c] ss:$20 sps:$4 sm:$0xff]   ;;  %v6803_v28 = vld [vmem:[%s9514_s1 + $0x854] ss:$20 sps:$4 sm:$0xff]  }
  0x98   :  { %2772 = vmatprep.subr.bf16.mxu0 %v6707_v29  ;;  %2987 = vmatprep.subr.bf16.mxu1 %v6710_v30  ;;  %v6798_v29 = vld [vmem:[%s9514_s1 + $0x848] ss:$20 sps:$4 sm:$0xff]   ;;  %v6801_v30 = vld [vmem:[%s9514_s1 + $0x850] ss:$20 sps:$4 sm:$0xff]  }
  0x9b   :  { %2773 = vmatpush1.bf16.msra.mxu0 %v6705_v31  ;;  %2988 = vmatpush1.bf16.msra.mxu1 %v6708_v32  ;;  %v6806_v31 = vld [vmem:[%s9514_s1 + $0x874] ss:$20 sps:$4 sm:$0xff]   ;;  %v6809_v32 = vld [vmem:[%s9514_s1 + $0x87c] ss:$20 sps:$4 sm:$0xff]  }
  0x9c   :  { %2774 = vmatprep.subr.bf16.mxu0 %v6713_v33  ;;  %2989 = vmatprep.subr.bf16.mxu1 %v6716_v34  ;;  %v6804_v33 = vld [vmem:[%s9514_s1 + $0x870] ss:$20 sps:$4 sm:$0xff]   ;;  %v6807_v34 = vld [vmem:[%s9514_s1 + $0x878] ss:$20 sps:$4 sm:$0xff]  }
  0x9f   :  { %2775 = vmatpush1.bf16.msra.mxu0 %v6711_v35  ;;  %2990 = vmatpush1.bf16.msra.mxu1 %v6714_v36  ;;  %v6812_v35 = vld [vmem:[%s9514_s1 + $0x89c] ss:$20 sps:$4 sm:$0xff]   ;;  %v6815_v36 = vld [vmem:[%s9514_s1 + $0x8a4] ss:$20 sps:$4 sm:$0xff]  }
  0xa0   :  { %2776 = vmatprep.subr.bf16.mxu0 %v6719_v37  ;;  %2991 = vmatprep.subr.bf16.mxu1 %v6722_v38  ;;  %v6810_v37 = vld [vmem:[%s9514_s1 + $0x898] ss:$20 sps:$4 sm:$0xff]   ;;  %v6813_v38 = vld [vmem:[%s9514_s1 + $0x8a0] ss:$20 sps:$4 sm:$0xff]  }
  0xa3   :  { %2777 = vmatpush1.bf16.msra.mxu0 %v6717_v39  ;;  %2992 = vmatpush1.bf16.msra.mxu1 %v6720_v40  ;;  %v6818_v39 = vld [vmem:[%s9514_s1 + $0x8c4] ss:$20 sps:$4 sm:$0xff]   ;;  %v6821_v40 = vld [vmem:[%s9514_s1 + $0x8cc] ss:$20 sps:$4 sm:$0xff]  }
  0xa4   :  { %2778 = vmatprep.subr.bf16.mxu0 %v6725_v41  ;;  %2993 = vmatprep.subr.bf16.mxu1 %v6728_v42  ;;  %v6816_v41 = vld [vmem:[%s9514_s1 + $0x8c0] ss:$20 sps:$4 sm:$0xff]   ;;  %v6819_v42 = vld [vmem:[%s9514_s1 + $0x8c8] ss:$20 sps:$4 sm:$0xff]  }
  0xa7   :  { %2779 = vmatpush1.bf16.msra.mxu0 %v6723_v43  ;;  %2994 = vmatpush1.bf16.msra.mxu1 %v6726_v44  ;;  %v6824_v43 = vld [vmem:[%s9514_s1 + $0x8ec] ss:$20 sps:$4 sm:$0xff]   ;;  %v6827_v44 = vld [vmem:[%s9514_s1 + $0x8f4] ss:$20 sps:$4 sm:$0xff]  }
  0xa8   :  { %2780 = vmatprep.subr.bf16.mxu0 %v6731_v45  ;;  %2995 = vmatprep.subr.bf16.mxu1 %v6734_v46  ;;  %v6822_v45 = vld [vmem:[%s9514_s1 + $0x8e8] ss:$20 sps:$4 sm:$0xff]   ;;  %v6825_v46 = vld [vmem:[%s9514_s1 + $0x8f0] ss:$20 sps:$4 sm:$0xff]  }
  0xab   :  { %2781 = vmatpush1.bf16.msra.mxu0 %v6729_v47  ;;  %2996 = vmatpush1.bf16.msra.mxu1 %v6732_v48  ;;  %v6830_v47 = vld [vmem:[%s9514_s1 + $0x914] ss:$20 sps:$4 sm:$0xff]   ;;  %v6833_v48 = vld [vmem:[%s9514_s1 + $0x91c] ss:$20 sps:$4 sm:$0xff]  }
  0xac   :  { %2782 = vmatprep.subr.bf16.mxu0 %v6737_v49  ;;  %2997 = vmatprep.subr.bf16.mxu1 %v6740_v50  ;;  %v6828_v49 = vld [vmem:[%s9514_s1 + $0x910] ss:$20 sps:$4 sm:$0xff]   ;;  %v6831_v50 = vld [vmem:[%s9514_s1 + $0x918] ss:$20 sps:$4 sm:$0xff]  }
  0xaf   :  { %2783 = vmatpush1.bf16.msra.mxu0 %v6735_v51  ;;  %2998 = vmatpush1.bf16.msra.mxu1 %v6738_v52  ;;  %v6836_v51 = vld [vmem:[%s9514_s1 + $0x93c] ss:$20 sps:$4 sm:$0xff]   ;;  %v6839_v52 = vld [vmem:[%s9514_s1 + $0x944] ss:$20 sps:$4 sm:$0xff]  }
  0xb0   :  { %2784 = vmatprep.subr.bf16.mxu0 %v6743_v53  ;;  %2999 = vmatprep.subr.bf16.mxu1 %v6746_v54  ;;  %v6834_v53 = vld [vmem:[%s9514_s1 + $0x938] ss:$20 sps:$4 sm:$0xff]   ;;  %v6837_v54 = vld [vmem:[%s9514_s1 + $0x940] ss:$20 sps:$4 sm:$0xff]  }
  0xb3   :  { %2785 = vmatpush1.bf16.msra.mxu0 %v6741_v55  ;;  %3000 = vmatpush1.bf16.msra.mxu1 %v6744_v56  ;;  %v6842_v55 = vld [vmem:[%s9514_s1 + $0x964] ss:$20 sps:$4 sm:$0xff]   ;;  %v6845_v56 = vld [vmem:[%s9514_s1 + $0x96c] ss:$20 sps:$4 sm:$0xff]  }
  0xb4   :  { %2786 = vmatprep.subr.bf16.mxu0 %v6749_v57  ;;  %3001 = vmatprep.subr.bf16.mxu1 %v6752_v58  ;;  %v6840_v57 = vld [vmem:[%s9514_s1 + $0x960] ss:$20 sps:$4 sm:$0xff]   ;;  %v6843_v58 = vld [vmem:[%s9514_s1 + $0x968] ss:$20 sps:$4 sm:$0xff]  }
  0xb7   :  { %2787 = vmatpush1.bf16.msra.mxu0 %v6747_v59  ;;  %3002 = vmatpush1.bf16.msra.mxu1 %v6750_v60  ;;  %v6848_v59 = vld [vmem:[%s9514_s1 + $0x98c] ss:$20 sps:$4 sm:$0xff]   ;;  %v6851_v60 = vld [vmem:[%s9514_s1 + $0x994] ss:$20 sps:$4 sm:$0xff]  }
  0xb8   :  { %2788 = vmatprep.subr.bf16.mxu0 %v6755_v61  ;;  %3003 = vmatprep.subr.bf16.mxu1 %v6758_v62  ;;  %v6846_v61 = vld [vmem:[%s9514_s1 + $0x988] ss:$20 sps:$4 sm:$0xff]   ;;  %v6849_v62 = vld [vmem:[%s9514_s1 + $0x990] ss:$20 sps:$4 sm:$0xff]  }
  0xbb   :  { %2789 = vmatpush1.bf16.msra.mxu0 %v6753_v63  ;;  %3004 = vmatpush1.bf16.msra.mxu1 %v6756_v0  ;;  %v6854_v63 = vld [vmem:[%s9514_s1 + $0x9b4] ss:$20 sps:$4 sm:$0xff]   ;;  %v6857_v0 = vld [vmem:[%s9514_s1 + $0x9bc] ss:$20 sps:$4 sm:$0xff]  }
  0xbc   :  { %2790 = vmatprep.subr.bf16.mxu0 %v6761_v1  ;;  %3005 = vmatprep.subr.bf16.mxu1 %v6764_v2  ;;  %v6852_v1 = vld [vmem:[%s9514_s1 + $0x9b0] ss:$20 sps:$4 sm:$0xff]   ;;  %v6855_v2 = vld [vmem:[%s9514_s1 + $0x9b8] ss:$20 sps:$4 sm:$0xff]  }
  0xbf   :  { %2791 = vmatpush1.bf16.msra.mxu0 %v6759_v3  ;;  %3006 = vmatpush1.bf16.msra.mxu1 %v6762_v4  ;;  %v6860_v3 = vld [vmem:[%s9514_s1 + $0x9dc] ss:$20 sps:$4 sm:$0xff]   ;;  %v6863_v4 = vld [vmem:[%s9514_s1 + $0x9e4] ss:$20 sps:$4 sm:$0xff]  }
  0xc0   :  { %2803 = vmatprep.subr.bf16.mxu0 %v6770_v5  ;;  %3018 = vmatprep.subr.bf16.mxu1 %v6773_v6  ;;  %v6858_v5 = vld [vmem:[%s9514_s1 + $0x9d8] ss:$20 sps:$4 sm:$0xff]   ;;  %v6861_v6 = vld [vmem:[%s9514_s1 + $0x9e0] ss:$20 sps:$4 sm:$0xff]  }
  0xc2   :  { %2793 = vmatmul.mubr.bf16.vlgmr.msra.gmra.mrb[0].mxu0 %v6765_v7  ;;  %3008 = vmatmul.mubr.bf16.vlgmr.msra.gmra.mrb[0].mxu1 %v6765_v7  ;;  %v6869_v7 = vld [vmem:[%s9514_s1 + $0xa04] ss:$20 sps:$4 sm:$0xff]  }
  0xc3   :  { %2804 = vmatpush1.bf16.msra.mxu0 %v6768_v8  ;;  %3019 = vmatpush1.bf16.msra.mxu1 %v6771_v9  ;;  %v6864_v8 = vld [vmem:[%s9515_s0 + $0x18] ss:$40 sps:$4 sm:$0xff]  }
  0xc4   :  { %2805 = vmatprep.subr.bf16.mxu0 %v6776_v10  ;;  %3020 = vmatprep.subr.bf16.mxu1 %v6779_v11  ;;  %v6872_v9 = vld [vmem:[%s9514_s1 + $0xa0c] ss:$20 sps:$4 sm:$0xff]   ;;  %v6870_v11 = vld [vmem:[%s9514_s1 + $0xa08] ss:$20 sps:$4 sm:$0xff]  }
  0xc5   :  { %2835 = vmatprep.mubr.bf16.mxu0 %v6866_v12  ;;  %3050 = vmatprep.mubr.bf16.mxu1 %v6866_v12  ;;  %v6867_v10 = vld [vmem:[%s9514_s1 + $0xa00] ss:$20 sps:$4 sm:$0xff]  }
  0xc6   :  { %v6875_v12 = vld [vmem:[%s9514_s1 + $0xa2c] ss:$20 sps:$4 sm:$0xff]  }
  0xc7   :  { %2806 = vmatpush1.bf16.msra.mxu0 %v6774_v13  ;;  %3021 = vmatpush1.bf16.msra.mxu1 %v6777_v14  ;;  %v6878_v13 = vld [vmem:[%s9514_s1 + $0xa34] ss:$20 sps:$4 sm:$0xff]  }
  0xc8   :  { %2807 = vmatprep.subr.bf16.mxu0 %v6782_v15  ;;  %3022 = vmatprep.subr.bf16.mxu1 %v6785_v16  ;;  %v6873_v14 = vld [vmem:[%s9514_s1 + $0xa28] ss:$20 sps:$4 sm:$0xff]   ;;  %v6965_v15 = vld [vmem:[%s9515_s0 + $0x24] ss:$40 sps:$4 sm:$0xff]  }
  0xc9   :  { %v6876_v16 = vld [vmem:[%s9514_s1 + $0xa30] ss:$20 sps:$4 sm:$0xff]  }
  0xcb   :  { %2808 = vmatpush1.bf16.msra.mxu0 %v6780_v17  ;;  %3023 = vmatpush1.bf16.msra.mxu1 %v6783_v18  ;;  %v6881_v17 = vld [vmem:[%s9514_s1 + $0xa54] ss:$20 sps:$4 sm:$0xff]   ;;  %v6884_v18 = vld [vmem:[%s9514_s1 + $0xa5c] ss:$20 sps:$4 sm:$0xff]  }
  0xcc   :  { %2809 = vmatprep.subr.bf16.mxu0 %v6788_v19  ;;  %3024 = vmatprep.subr.bf16.mxu1 %v6791_v20  ;;  %v6879_v19 = vld [vmem:[%s9514_s1 + $0xa50] ss:$20 sps:$4 sm:$0xff]   ;;  %v6882_v20 = vld [vmem:[%s9514_s1 + $0xa58] ss:$20 sps:$4 sm:$0xff]  }
  0xcf   :  { %2810 = vmatpush1.bf16.msra.mxu0 %v6786_v21  ;;  %3025 = vmatpush1.bf16.msra.mxu1 %v6789_v22  ;;  %v6887_v21 = vld [vmem:[%s9514_s1 + $0xa7c] ss:$20 sps:$4 sm:$0xff]   ;;  %v6890_v22 = vld [vmem:[%s9514_s1 + $0xa84] ss:$20 sps:$4 sm:$0xff]  }
  0xd0   :  { %2811 = vmatprep.subr.bf16.mxu0 %v6794_v23  ;;  %3026 = vmatprep.subr.bf16.mxu1 %v6797_v24  ;;  %v6885_v23 = vld [vmem:[%s9514_s1 + $0xa78] ss:$20 sps:$4 sm:$0xff]   ;;  %v6888_v24 = vld [vmem:[%s9514_s1 + $0xa80] ss:$20 sps:$4 sm:$0xff]  }
  0xd3   :  { %2812 = vmatpush1.bf16.msra.mxu0 %v6792_v25  ;;  %3027 = vmatpush1.bf16.msra.mxu1 %v6795_v26  ;;  %v6893_v25 = vld [vmem:[%s9514_s1 + $0xaa4] ss:$20 sps:$4 sm:$0xff]   ;;  %v6896_v26 = vld [vmem:[%s9514_s1 + $0xaac] ss:$20 sps:$4 sm:$0xff]  }
  0xd4   :  { %2813 = vmatprep.subr.bf16.mxu0 %v6800_v27  ;;  %3028 = vmatprep.subr.bf16.mxu1 %v6803_v28  ;;  %v6891_v27 = vld [vmem:[%s9514_s1 + $0xaa0] ss:$20 sps:$4 sm:$0xff]   ;;  %v6894_v28 = vld [vmem:[%s9514_s1 + $0xaa8] ss:$20 sps:$4 sm:$0xff]  }
  0xd7   :  { %2814 = vmatpush1.bf16.msra.mxu0 %v6798_v29  ;;  %3029 = vmatpush1.bf16.msra.mxu1 %v6801_v30  ;;  %v6899_v29 = vld [vmem:[%s9514_s1 + $0xacc] ss:$20 sps:$4 sm:$0xff]   ;;  %v6902_v30 = vld [vmem:[%s9514_s1 + $0xad4] ss:$20 sps:$4 sm:$0xff]  }
  0xd8   :  { %2815 = vmatprep.subr.bf16.mxu0 %v6806_v31  ;;  %3030 = vmatprep.subr.bf16.mxu1 %v6809_v32  ;;  %v6897_v31 = vld [vmem:[%s9514_s1 + $0xac8] ss:$20 sps:$4 sm:$0xff]   ;;  %v6900_v32 = vld [vmem:[%s9514_s1 + $0xad0] ss:$20 sps:$4 sm:$0xff]  }
  0xdb   :  { %2816 = vmatpush1.bf16.msra.mxu0 %v6804_v33  ;;  %3031 = vmatpush1.bf16.msra.mxu1 %v6807_v34  ;;  %v6905_v33 = vld [vmem:[%s9514_s1 + $0xaf4] ss:$20 sps:$4 sm:$0xff]   ;;  %v6908_v34 = vld [vmem:[%s9514_s1 + $0xafc] ss:$20 sps:$4 sm:$0xff]  }
  0xdc   :  { %2817 = vmatprep.subr.bf16.mxu0 %v6812_v35  ;;  %3032 = vmatprep.subr.bf16.mxu1 %v6815_v36  ;;  %v6903_v35 = vld [vmem:[%s9514_s1 + $0xaf0] ss:$20 sps:$4 sm:$0xff]   ;;  %v6906_v36 = vld [vmem:[%s9514_s1 + $0xaf8] ss:$20 sps:$4 sm:$0xff]  }
  0xdf   :  { %2818 = vmatpush1.bf16.msra.mxu0 %v6810_v37  ;;  %3033 = vmatpush1.bf16.msra.mxu1 %v6813_v38  ;;  %v6911_v37 = vld [vmem:[%s9514_s1 + $0xb1c] ss:$20 sps:$4 sm:$0xff]   ;;  %v6914_v38 = vld [vmem:[%s9514_s1 + $0xb24] ss:$20 sps:$4 sm:$0xff]  }
  0xe0   :  { %2819 = vmatprep.subr.bf16.mxu0 %v6818_v39  ;;  %3034 = vmatprep.subr.bf16.mxu1 %v6821_v40  ;;  %v6909_v39 = vld [vmem:[%s9514_s1 + $0xb18] ss:$20 sps:$4 sm:$0xff]   ;;  %v6912_v40 = vld [vmem:[%s9514_s1 + $0xb20] ss:$20 sps:$4 sm:$0xff]  }
  0xe3   :  { %2820 = vmatpush1.bf16.msra.mxu0 %v6816_v41  ;;  %3035 = vmatpush1.bf16.msra.mxu1 %v6819_v42  ;;  %v6917_v41 = vld [vmem:[%s9514_s1 + $0xb44] ss:$20 sps:$4 sm:$0xff]   ;;  %v6920_v42 = vld [vmem:[%s9514_s1 + $0xb4c] ss:$20 sps:$4 sm:$0xff]  }
  0xe4   :  { %2821 = vmatprep.subr.bf16.mxu0 %v6824_v43  ;;  %3036 = vmatprep.subr.bf16.mxu1 %v6827_v44  ;;  %v6915_v43 = vld [vmem:[%s9514_s1 + $0xb40] ss:$20 sps:$4 sm:$0xff]   ;;  %v6918_v44 = vld [vmem:[%s9514_s1 + $0xb48] ss:$20 sps:$4 sm:$0xff]  }
  0xe7   :  { %2822 = vmatpush1.bf16.msra.mxu0 %v6822_v45  ;;  %3037 = vmatpush1.bf16.msra.mxu1 %v6825_v46  ;;  %v6923_v45 = vld [vmem:[%s9514_s1 + $0xb6c] ss:$20 sps:$4 sm:$0xff]   ;;  %v6926_v46 = vld [vmem:[%s9514_s1 + $0xb74] ss:$20 sps:$4 sm:$0xff]  }
  0xe8   :  { %2823 = vmatprep.subr.bf16.mxu0 %v6830_v47  ;;  %3038 = vmatprep.subr.bf16.mxu1 %v6833_v48  ;;  %v6921_v47 = vld [vmem:[%s9514_s1 + $0xb68] ss:$20 sps:$4 sm:$0xff]   ;;  %v6924_v48 = vld [vmem:[%s9514_s1 + $0xb70] ss:$20 sps:$4 sm:$0xff]  }
  0xeb   :  { %2824 = vmatpush1.bf16.msra.mxu0 %v6828_v49  ;;  %3039 = vmatpush1.bf16.msra.mxu1 %v6831_v50  ;;  %v6929_v49 = vld [vmem:[%s9514_s1 + $0xb94] ss:$20 sps:$4 sm:$0xff]   ;;  %v6932_v50 = vld [vmem:[%s9514_s1 + $0xb9c] ss:$20 sps:$4 sm:$0xff]  }
  0xec   :  { %2825 = vmatprep.subr.bf16.mxu0 %v6836_v51  ;;  %3040 = vmatprep.subr.bf16.mxu1 %v6839_v52  ;;  %v6927_v51 = vld [vmem:[%s9514_s1 + $0xb90] ss:$20 sps:$4 sm:$0xff]   ;;  %v6930_v52 = vld [vmem:[%s9514_s1 + $0xb98] ss:$20 sps:$4 sm:$0xff]  }
  0xef   :  { %2826 = vmatpush1.bf16.msra.mxu0 %v6834_v53  ;;  %3041 = vmatpush1.bf16.msra.mxu1 %v6837_v54  ;;  %v6935_v53 = vld [vmem:[%s9514_s1 + $0xbbc] ss:$20 sps:$4 sm:$0xff]   ;;  %v6938_v54 = vld [vmem:[%s9514_s1 + $0xbc4] ss:$20 sps:$4 sm:$0xff]  }
  0xf0   :  { %2827 = vmatprep.subr.bf16.mxu0 %v6842_v55  ;;  %3042 = vmatprep.subr.bf16.mxu1 %v6845_v56  ;;  %v6933_v55 = vld [vmem:[%s9514_s1 + $0xbb8] ss:$20 sps:$4 sm:$0xff]   ;;  %v6936_v56 = vld [vmem:[%s9514_s1 + $0xbc0] ss:$20 sps:$4 sm:$0xff]  }
  0xf3   :  { %2828 = vmatpush1.bf16.msra.mxu0 %v6840_v57  ;;  %3043 = vmatpush1.bf16.msra.mxu1 %v6843_v58  ;;  %v6941_v57 = vld [vmem:[%s9514_s1 + $0xbe4] ss:$20 sps:$4 sm:$0xff]   ;;  %v6944_v58 = vld [vmem:[%s9514_s1 + $0xbec] ss:$20 sps:$4 sm:$0xff]  }
  0xf4   :  { %2829 = vmatprep.subr.bf16.mxu0 %v6848_v59  ;;  %3044 = vmatprep.subr.bf16.mxu1 %v6851_v60  ;;  %v6939_v59 = vld [vmem:[%s9514_s1 + $0xbe0] ss:$20 sps:$4 sm:$0xff]   ;;  %v6942_v60 = vld [vmem:[%s9514_s1 + $0xbe8] ss:$20 sps:$4 sm:$0xff]  }
  0xf7   :  { %2830 = vmatpush1.bf16.msra.mxu0 %v6846_v61  ;;  %3045 = vmatpush1.bf16.msra.mxu1 %v6849_v62  ;;  %v6947_v61 = vld [vmem:[%s9514_s1 + $0xc0c] ss:$20 sps:$4 sm:$0xff]   ;;  %v6950_v62 = vld [vmem:[%s9514_s1 + $0xc14] ss:$20 sps:$4 sm:$0xff]  }
  0xf8   :  { %2831 = vmatprep.subr.bf16.mxu0 %v6854_v63  ;;  %3046 = vmatprep.subr.bf16.mxu1 %v6857_v0  ;;  %v6945_v63 = vld [vmem:[%s9514_s1 + $0xc08] ss:$20 sps:$4 sm:$0xff]   ;;  %v6948_v0 = vld [vmem:[%s9514_s1 + $0xc10] ss:$20 sps:$4 sm:$0xff]  }
  0xfb   :  { %2832 = vmatpush1.bf16.msra.mxu0 %v6852_v1  ;;  %3047 = vmatpush1.bf16.msra.mxu1 %v6855_v2  ;;  %v6953_v1 = vld [vmem:[%s9514_s1 + $0xc34] ss:$20 sps:$4 sm:$0xff]   ;;  %v6956_v2 = vld [vmem:[%s9514_s1 + $0xc3c] ss:$20 sps:$4 sm:$0xff]  }
  0xfc   :  { %2833 = vmatprep.subr.bf16.mxu0 %v6860_v3  ;;  %3048 = vmatprep.subr.bf16.mxu1 %v6863_v4  ;;  %v6951_v3 = vld [vmem:[%s9514_s1 + $0xc30] ss:$20 sps:$4 sm:$0xff]   ;;  %v6954_v4 = vld [vmem:[%s9514_s1 + $0xc38] ss:$20 sps:$4 sm:$0xff]  }
  0xff   :  { %2834 = vmatpush1.bf16.msra.mxu0 %v6858_v5  ;;  %3049 = vmatpush1.bf16.msra.mxu1 %v6861_v6  ;;  %v6959_v5 = vld [vmem:[%s9514_s1 + $0xc5c] ss:$20 sps:$4 sm:$0xff]   ;;  %v6962_v6 = vld [vmem:[%s9514_s1 + $0xc64] ss:$20 sps:$4 sm:$0xff]  }
 0x100   :  { %2846 = vmatprep.subr.bf16.mxu0 %v6869_v7  ;;  %3061 = vmatprep.subr.bf16.mxu1 %v6872_v9  ;;  %v6957_v7 = vld [vmem:[%s9514_s1 + $0xc58] ss:$20 sps:$4 sm:$0xff]   ;;  %v6966_v9 = vld [vmem:[%s9514_s1 + $0x150] ss:$20 sps:$4 sm:$0xff]  }
 0x102   :  { %2836 = vmatmul.mubr.bf16.vlgmr.msra.gmra.mrb[0].mxu0 %v6864_v8  ;;  %3051 = vmatmul.mubr.bf16.vlgmr.msra.gmra.mrb[0].mxu1 %v6864_v8  ;;  %v6960_v8 = vld [vmem:[%s9514_s1 + $0xc60] ss:$20 sps:$4 sm:$0xff]  }
 0x103   :  { %2847 = vmatpush1.bf16.msra.mxu0 %v6867_v10  ;;  %3062 = vmatpush1.bf16.msra.mxu1 %v6870_v11  ;;  %v6968_v10 = vld [vmem:[%s9514_s1 + $0x3d0] ss:$20 sps:$4 sm:$0xff]   ;;  %v8422_v11 = vld [vmem:[%s9515_s0 + $0x20] ss:$40 sps:$4 sm:$0xff]  }
 0x104   :  { %2848 = vmatprep.subr.bf16.mxu0 %v6875_v12  ;;  %3063 = vmatprep.subr.bf16.mxu1 %v6878_v13  ;;  %v6967_v12 = vld [vmem:[%s9514_s1 + $0x10] ss:$20 sps:$4 sm:$0xff]  }
 0x105   :  { %2878 = vmatprep.mubr.bf16.mxu0 %v6965_v15  ;;  %3093 = vmatprep.mubr.bf16.mxu1 %v6965_v15  ;;  %v6969_v13 = vld [vmem:[%s9514_s1 + $0x290] ss:$20 sps:$4 sm:$0xff]   ;;  %v6972_v15 = vld [vmem:[%s9514_s1 + $0x3f8] ss:$20 sps:$4 sm:$0xff]  }
 0x107   :  { %2849 = vmatpush1.bf16.msra.mxu0 %v6873_v14  ;;  %3064 = vmatpush1.bf16.msra.mxu1 %v6876_v16  ;;  %v6970_v14 = vld [vmem:[%s9514_s1 + $0x178] ss:$20 sps:$4 sm:$0xff]  }
 0x108   :  { %2850 = vmatprep.subr.bf16.mxu0 %v6881_v17  ;;  %3065 = vmatprep.subr.bf16.mxu1 %v6884_v18  ;;  %v6971_v16 = vld [vmem:[%s9514_s1 + $0x38] ss:$20 sps:$4 sm:$0xff]   ;;  %v6974_v18 = vld [vmem:[%s9514_s1 + $0x1a0] ss:$20 sps:$4 sm:$0xff]  }
 0x109   :  { %v6973_v17 = vld [vmem:[%s9514_s1 + $0x2b8] ss:$20 sps:$4 sm:$0xff]  }
 0x10b   :  { %2851 = vmatpush1.bf16.msra.mxu0 %v6879_v19  ;;  %3066 = vmatpush1.bf16.msra.mxu1 %v6882_v20  ;;  %v6976_v19 = vld [vmem:[%s9514_s1 + $0x420] ss:$20 sps:$4 sm:$0xff]   ;;  %v7374_v20 = vld [vmem:[%s9515_s0 + $0x4] ss:$40 sps:$4 sm:$0xff]  }
 0x10c   :  { %2852 = vmatprep.subr.bf16.mxu0 %v6887_v21  ;;  %3067 = vmatprep.subr.bf16.mxu1 %v6890_v22  ;;  %v7375_v21 = vld [vmem:[%s9515_s0 + $0xc] ss:$40 sps:$4 sm:$0xff]  }
 0x10d   :  { %v6975_v22 = vld [vmem:[%s9514_s1 + $0x60] ss:$20 sps:$4 sm:$0xff]  }
 0x10f   :  { %2853 = vmatpush1.bf16.msra.mxu0 %v6885_v23  ;;  %3068 = vmatpush1.bf16.msra.mxu1 %v6888_v24  ;;  %v6977_v23 = vld [vmem:[%s9514_s1 + $0x2e0] ss:$20 sps:$4 sm:$0xff]   ;;  %v6978_v24 = vld [vmem:[%s9514_s1 + $0x1c8] ss:$20 sps:$4 sm:$0xff]  }
 0x110   :  { %2854 = vmatprep.subr.bf16.mxu0 %v6893_v25  ;;  %3069 = vmatprep.subr.bf16.mxu1 %v6896_v26  ;;  %v6980_v25 = vld [vmem:[%s9514_s1 + $0x448] ss:$20 sps:$4 sm:$0xff]  }
 0x111   :  { %v6979_v26 = vld [vmem:[%s9514_s1 + $0x88] ss:$20 sps:$4 sm:$0xff]  }
 0x113   :  { %2855 = vmatpush1.bf16.msra.mxu0 %v6891_v27  ;;  %3070 = vmatpush1.bf16.msra.mxu1 %v6894_v28  ;;  %v6981_v27 = vld [vmem:[%s9514_s1 + $0x308] ss:$20 sps:$4 sm:$0xff]   ;;  %v6982_v28 = vld [vmem:[%s9514_s1 + $0x1f0] ss:$20 sps:$4 sm:$0xff]  }
 0x114   :  { %2856 = vmatprep.subr.bf16.mxu0 %v6899_v29  ;;  %3071 = vmatprep.subr.bf16.mxu1 %v6902_v30  ;;  %v6984_v29 = vld [vmem:[%s9514_s1 + $0x470] ss:$20 sps:$4 sm:$0xff]  }
 0x115   :  { %v6983_v30 = vld [vmem:[%s9514_s1 + $0xb0] ss:$20 sps:$4 sm:$0xff]  }
 0x117   :  { %2857 = vmatpush1.bf16.msra.mxu0 %v6897_v31  ;;  %3072 = vmatpush1.bf16.msra.mxu1 %v6900_v32  ;;  %v6985_v31 = vld [vmem:[%s9514_s1 + $0x330] ss:$20 sps:$4 sm:$0xff]   ;;  %v6986_v32 = vld [vmem:[%s9514_s1 + $0x218] ss:$20 sps:$4 sm:$0xff]  }
 0x118   :  { %2858 = vmatprep.subr.bf16.mxu0 %v6905_v33  ;;  %3073 = vmatprep.subr.bf16.mxu1 %v6908_v34  ;;  %v6988_v33 = vld [vmem:[%s9514_s1 + $0x498] ss:$20 sps:$4 sm:$0xff]  }
 0x119   :  { %v6987_v34 = vld [vmem:[%s9514_s1 + $0xd8] ss:$20 sps:$4 sm:$0xff]  }
 0x11b   :  { %2859 = vmatpush1.bf16.msra.mxu0 %v6903_v35  ;;  %3074 = vmatpush1.bf16.msra.mxu1 %v6906_v36  ;;  %v6989_v35 = vld [vmem:[%s9514_s1 + $0x358] ss:$20 sps:$4 sm:$0xff]   ;;  %v6990_v36 = vld [vmem:[%s9514_s1 + $0x240] ss:$20 sps:$4 sm:$0xff]  }
 0x11c   :  { %2860 = vmatprep.subr.bf16.mxu0 %v6911_v37  ;;  %3075 = vmatprep.subr.bf16.mxu1 %v6914_v38  ;;  %v6992_v37 = vld [vmem:[%s9514_s1 + $0x4c0] ss:$20 sps:$4 sm:$0xff]  }
 0x11d   :  { %v6991_v38 = vld [vmem:[%s9514_s1 + $0x100] ss:$20 sps:$4 sm:$0xff]  }
 0x11f   :  { %2861 = vmatpush1.bf16.msra.mxu0 %v6909_v39  ;;  %3076 = vmatpush1.bf16.msra.mxu1 %v6912_v40  ;;  %v6993_v39 = vld [vmem:[%s9514_s1 + $0x380] ss:$20 sps:$4 sm:$0xff]   ;;  %v6994_v40 = vld [vmem:[%s9514_s1 + $0x268] ss:$20 sps:$4 sm:$0xff]  }
 0x120   :  { %2862 = vmatprep.subr.bf16.mxu0 %v6917_v41  ;;  %3077 = vmatprep.subr.bf16.mxu1 %v6920_v42  ;;  %v6996_v41 = vld [vmem:[%s9514_s1 + $0x4e8] ss:$20 sps:$4 sm:$0xff]  }
 0x121   :  { %v6995_v42 = vld [vmem:[%s9514_s1 + $0x128] ss:$20 sps:$4 sm:$0xff]  }
 0x123   :  { %2863 = vmatpush1.bf16.msra.mxu0 %v6915_v43  ;;  %3078 = vmatpush1.bf16.msra.mxu1 %v6918_v44  ;;  %v6997_v43 = vld [vmem:[%s9514_s1 + $0x3a8] ss:$20 sps:$4 sm:$0xff]   ;;  %v6998_v44 = vld [vmem:[%s9514_s1 + $0x650] ss:$20 sps:$4 sm:$0xff]  }
 0x124   :  { %2864 = vmatprep.subr.bf16.mxu0 %v6923_v45  ;;  %3079 = vmatprep.subr.bf16.mxu1 %v6926_v46  ;;  %v7000_v45 = vld [vmem:[%s9514_s1 + $0x8d0] ss:$20 sps:$4 sm:$0xff]  }
 0x125   :  { %v6999_v46 = vld [vmem:[%s9514_s1 + $0x510] ss:$20 sps:$4 sm:$0xff]  }
 0x127   :  { %2865 = vmatpush1.bf16.msra.mxu0 %v6921_v47  ;;  %3080 = vmatpush1.bf16.msra.mxu1 %v6924_v48  ;;  %v7001_v47 = vld [vmem:[%s9514_s1 + $0x790] ss:$20 sps:$4 sm:$0xff]   ;;  %v7002_v48 = vld [vmem:[%s9514_s1 + $0x678] ss:$20 sps:$4 sm:$0xff]  }
 0x128   :  { %2866 = vmatprep.subr.bf16.mxu0 %v6929_v49  ;;  %3081 = vmatprep.subr.bf16.mxu1 %v6932_v50  ;;  %v7004_v49 = vld [vmem:[%s9514_s1 + $0x8f8] ss:$20 sps:$4 sm:$0xff]  }
 0x129   :  { %v7003_v50 = vld [vmem:[%s9514_s1 + $0x538] ss:$20 sps:$4 sm:$0xff]  }
 0x12b   :  { %2867 = vmatpush1.bf16.msra.mxu0 %v6927_v51  ;;  %3082 = vmatpush1.bf16.msra.mxu1 %v6930_v52  ;;  %v7005_v51 = vld [vmem:[%s9514_s1 + $0x7b8] ss:$20 sps:$4 sm:$0xff]   ;;  %v7376_v52 = vld [vmem:[%s9515_s0] ss:$40 sps:$4 sm:$0xff]  }
 0x12c   :  { %2868 = vmatprep.subr.bf16.mxu0 %v6935_v53  ;;  %3083 = vmatprep.subr.bf16.mxu1 %v6938_v54  ;;  %v7377_v53 = vld [vmem:[%s9515_s0 + $0x8] ss:$40 sps:$4 sm:$0xff]   ;;  %v7006_v54 = vld [vmem:[%s9514_s1 + $0x6a0] ss:$20 sps:$4 sm:$0xff]  }
 0x12f   :  { %2869 = vmatpush1.bf16.msra.mxu0 %v6933_v55  ;;  %3084 = vmatpush1.bf16.msra.mxu1 %v6936_v56  ;;  %v7008_v55 = vld [vmem:[%s9514_s1 + $0x920] ss:$20 sps:$4 sm:$0xff]  }
 0x130   :  { %2870 = vmatprep.subr.bf16.mxu0 %v6941_v57  ;;  %3085 = vmatprep.subr.bf16.mxu1 %v6944_v58  ;;  %v7007_v56 = vld [vmem:[%s9514_s1 + $0x560] ss:$20 sps:$4 sm:$0xff]  }
 0x131   :  { %v7009_v57 = vld [vmem:[%s9514_s1 + $0x7e0] ss:$20 sps:$4 sm:$0xff]  }
 0x132   :  { %v7378_v58 = vld [vmem:[%s9515_s0 + $0x14] ss:$40 sps:$4 sm:$0xff]  }
 0x133   :  { %2871 = vmatpush1.bf16.msra.mxu0 %v6939_v59  ;;  %3086 = vmatpush1.bf16.msra.mxu1 %v6942_v60  ;;  %v7379_v59 = vld [vmem:[%s9515_s0 + $0x1c] ss:$40 sps:$4 sm:$0xff]  }
 0x134   :  { %2872 = vmatprep.subr.bf16.mxu0 %v6947_v61  ;;  %3087 = vmatprep.subr.bf16.mxu1 %v6950_v62  ;;  %v7010_v60 = vld [vmem:[%s9514_s1 + $0x6c8] ss:$20 sps:$4 sm:$0xff]  }
 0x135   :  { %v7012_v61 = vld [vmem:[%s9514_s1 + $0x948] ss:$20 sps:$4 sm:$0xff]  }
 0x136   :  { %v7011_v62 = vld [vmem:[%s9514_s1 + $0x588] ss:$20 sps:$4 sm:$0xff]  }
 0x137   :  { %2873 = vmatpush1.bf16.msra.mxu0 %v6945_v63  ;;  %3088 = vmatpush1.bf16.msra.mxu1 %v6948_v0  ;;  %v7013_v63 = vld [vmem:[%s9514_s1 + $0x808] ss:$20 sps:$4 sm:$0xff]   ;;  %v7014_v0 = vld [vmem:[%s9514_s1 + $0x6f0] ss:$20 sps:$4 sm:$0xff]  }
 0x138   :  { %2874 = vmatprep.subr.bf16.mxu0 %v6953_v1  ;;  %3089 = vmatprep.subr.bf16.mxu1 %v6956_v2  ;;  %v7016_v1 = vld [vmem:[%s9514_s1 + $0x970] ss:$20 sps:$4 sm:$0xff]  }
 0x139   :  { %v7015_v2 = vld [vmem:[%s9514_s1 + $0x5b0] ss:$20 sps:$4 sm:$0xff]  }
 0x13b   :  { %2875 = vmatpush1.bf16.msra.mxu0 %v6951_v3  ;;  %3090 = vmatpush1.bf16.msra.mxu1 %v6954_v4  ;;  %v7017_v3 = vld [vmem:[%s9514_s1 + $0x830] ss:$20 sps:$4 sm:$0xff]   ;;  %v7018_v4 = vld [vmem:[%s9514_s1 + $0x718] ss:$20 sps:$4 sm:$0xff]  }
 0x13c   :  { %2876 = vmatprep.subr.bf16.mxu0 %v6959_v5  ;;  %3091 = vmatprep.subr.bf16.mxu1 %v6962_v6  ;;  %v7020_v5 = vld [vmem:[%s9514_s1 + $0x998] ss:$20 sps:$4 sm:$0xff]  }
 0x13d   :  { %v7019_v6 = vld [vmem:[%s9514_s1 + $0x5d8] ss:$20 sps:$4 sm:$0xff]  }
 0x13f   :  { %2877 = vmatpush1.bf16.msra.mxu0 %v6957_v7  ;;  %3092 = vmatpush1.bf16.msra.mxu1 %v6960_v8  ;;  %v7021_v7 = vld [vmem:[%s9514_s1 + $0x858] ss:$20 sps:$4 sm:$0xff]   ;;  %v7022_v8 = vld [vmem:[%s9514_s1 + $0x740] ss:$20 sps:$4 sm:$0xff]  }
 0x140   :  { %6148 = vmatprep.subr.bf16.mxu0 %v6966_v9  ;;  %6170 = vmatprep.subr.bf16.mxu1 %v6968_v10  ;;  %v7024_v9 = vld [vmem:[%s9514_s1 + $0x9c0] ss:$20 sps:$4 sm:$0xff]  }
 0x141   :  { %v7023_v10 = vld [vmem:[%s9514_s1 + $0x600] ss:$20 sps:$4 sm:$0xff]  }
 0x142   :  { %2879 = vmatmul.mubr.bf16.vlgmr.msra.gmra.mrb[0].mxu0 %v8422_v11  ;;  %3094 = vmatmul.mubr.bf16.vlgmr.msra.gmra.mrb[0].mxu1 %v8422_v11 }
 0x143   :  { %6149 = vmatpush3.bf16.msra.mxu0 %v6967_v12  ;;  %6171 = vmatpush3.bf16.msra.mxu1 %v6969_v13  ;;  %v7025_v12 = vld [vmem:[%s9514_s1 + $0x880] ss:$20 sps:$4 sm:$0xff]   ;;  %v7026_v13 = vld [vmem:[%s9514_s1 + $0x768] ss:$20 sps:$4 sm:$0xff]  }
 0x144   :  { %6150 = vmatprep.subr.bf16.mxu0 %v6970_v14  ;;  %6172 = vmatprep.subr.bf16.mxu1 %v6972_v15  ;;  %v7028_v14 = vld [vmem:[%s9514_s1 + $0x9e8] ss:$20 sps:$4 sm:$0xff]  }
 0x145   :  { %3136 = vmatprep.mubr.bf16.mxu0 %v7374_v20  ;;  %3177 = vmatprep.mubr.bf16.mxu1 %v7375_v21  ;;  %v7027_v15 = vld [vmem:[%s9514_s1 + $0x628] ss:$20 sps:$4 sm:$0xff]   ;;  %v7032_v20 = vld [vmem:[%s9514_s1 + $0xb78] ss:$20 sps:$4 sm:$0xff]   ;;  %v7046_v21 = vld [vmem:[%s9516_s3] ss:$20 sps:$4 sm:$0xff]  }
 0x147   :  { %6151 = vmatpush3.bf16.msra.mxu0 %v6971_v16  ;;  %6173 = vmatpush3.bf16.msra.mxu1 %v6973_v17  ;;  %v7029_v16 = vld [vmem:[%s9514_s1 + $0x8a8] ss:$20 sps:$4 sm:$0xff]   ;;  %v7030_v17 = vld [vmem:[%s9514_s1 + $0xb50] ss:$20 sps:$4 sm:$0xff]  }
 0x148   :  { %6152 = vmatprep.subr.bf16.mxu0 %v6974_v18  ;;  %6174 = vmatprep.subr.bf16.mxu1 %v6976_v19  ;;  %v7048_v18 = vld [vmem:[%s9516_s3 + $0x4] ss:$20 sps:$4 sm:$0xff]  }
 0x149   :  { %v7031_v19 = vld [vmem:[%s9514_s1 + $0xa10] ss:$20 sps:$4 sm:$0xff]  }
 0x14b   :  { %6153 = vmatpush3.bf16.msra.mxu0 %v6975_v22  ;;  %6175 = vmatpush3.bf16.msra.mxu1 %v6977_v23  ;;  %v7054_v22 = vld [vmem:[%s9516_s3 + $0x2c] ss:$20 sps:$4 sm:$0xff]  }
 0x14c   :  { %6154 = vmatprep.subr.bf16.mxu0 %v6978_v24  ;;  %6176 = vmatprep.subr.bf16.mxu1 %v6980_v25  ;;  %v7033_v23 = vld [vmem:[%s9514_s1 + $0xa38] ss:$20 sps:$4 sm:$0xff]  }
 0x14d   :  { %v7380_v24 = vld [vmem:[%s9515_s0 + $0x10] ss:$40 sps:$4 sm:$0xff]  }
 0x14e   :  { %v7381_v25 = vld [vmem:[%s9515_s0 + $0x18] ss:$40 sps:$4 sm:$0xff]  }
 0x14f   :  { %6155 = vmatpush3.bf16.msra.mxu0 %v6979_v26  ;;  %6177 = vmatpush3.bf16.msra.mxu1 %v6981_v27  ;;  %v7034_v26 = vld [vmem:[%s9514_s1 + $0xba0] ss:$20 sps:$4 sm:$0xff]   ;;  %v7052_v27 = vld [vmem:[%s9516_s3 + $0x28] ss:$20 sps:$4 sm:$0xff]  }
 0x150   :  { %6156 = vmatprep.subr.bf16.mxu0 %v6982_v28  ;;  %6178 = vmatprep.subr.bf16.mxu1 %v6984_v29  ;;  %v7382_v28 = vld [vmem:[%s9515_s0 + $0x24] ss:$40 sps:$4 sm:$0xff]   ;;  %v7060_v29 = vld [vmem:[%s9516_s3 + $0x54] ss:$20 sps:$4 sm:$0xff]  }
 0x153   :  { %6157 = vmatpush3.bf16.msra.mxu0 %v6983_v30  ;;  %6179 = vmatpush3.bf16.msra.mxu1 %v6985_v31  ;;  %v7035_v30 = vld [vmem:[%s9514_s1 + $0xa60] ss:$20 sps:$4 sm:$0xff]   ;;  %v7036_v31 = vld [vmem:[%s9514_s1 + $0xbc8] ss:$20 sps:$4 sm:$0xff]  }
 0x154   :  { %6158 = vmatprep.subr.bf16.mxu0 %v6986_v32  ;;  %6180 = vmatprep.subr.bf16.mxu1 %v6988_v33  ;;  %v7058_v32 = vld [vmem:[%s9516_s3 + $0x50] ss:$20 sps:$4 sm:$0xff]  }
 0x155   :  { %v7066_v33 = vld [vmem:[%s9516_s3 + $0x7c] ss:$20 sps:$4 sm:$0xff]  }
 0x157   :  { %6159 = vmatpush3.bf16.msra.mxu0 %v6987_v34  ;;  %6181 = vmatpush3.bf16.msra.mxu1 %v6989_v35  ;;  %v7037_v34 = vld [vmem:[%s9514_s1 + $0xa88] ss:$20 sps:$4 sm:$0xff]   ;;  %v7038_v35 = vld [vmem:[%s9514_s1 + $0xbf0] ss:$20 sps:$4 sm:$0xff]  }
 0x158   :  { %6160 = vmatprep.subr.bf16.mxu0 %v6990_v36  ;;  %6182 = vmatprep.subr.bf16.mxu1 %v6992_v37  ;;  %v7064_v36 = vld [vmem:[%s9516_s3 + $0x78] ss:$20 sps:$4 sm:$0xff]  }
 0x159   :  { %v7072_v37 = vld [vmem:[%s9516_s3 + $0xa4] ss:$20 sps:$4 sm:$0xff]  }
 0x15b   :  { %6161 = vmatpush3.bf16.msra.mxu0 %v6991_v38  ;;  %6183 = vmatpush3.bf16.msra.mxu1 %v6993_v39  ;;  %v7039_v38 = vld [vmem:[%s9514_s1 + $0xab0] ss:$20 sps:$4 sm:$0xff]   ;;  %v7040_v39 = vld [vmem:[%s9514_s1 + $0xc18] ss:$20 sps:$4 sm:$0xff]  }
 0x15c   :  { %6162 = vmatprep.subr.bf16.mxu0 %v6994_v40  ;;  %6184 = vmatprep.subr.bf16.mxu1 %v6996_v41  ;;  %v7070_v40 = vld [vmem:[%s9516_s3 + $0xa0] ss:$20 sps:$4 sm:$0xff]  }
 0x15d   :  { %v7078_v41 = vld [vmem:[%s9516_s3 + $0xcc] ss:$20 sps:$4 sm:$0xff]  }
 0x15f   :  { %6163 = vmatpush3.bf16.msra.mxu0 %v6995_v42  ;;  %6185 = vmatpush3.bf16.msra.mxu1 %v6997_v43  ;;  %v7041_v42 = vld [vmem:[%s9514_s1 + $0xad8] ss:$20 sps:$4 sm:$0xff]   ;;  %v7042_v43 = vld [vmem:[%s9514_s1 + $0xc40] ss:$20 sps:$4 sm:$0xff]  }
 0x160   :  { %6192 = vmatprep.subr.bf16.mxu0 %v6998_v44  ;;  %6214 = vmatprep.subr.bf16.mxu1 %v7000_v45  ;;  %v7076_v44 = vld [vmem:[%s9516_s3 + $0xc8] ss:$20 sps:$4 sm:$0xff]  }
 0x161   :  { %v7084_v45 = vld [vmem:[%s9516_s3 + $0xf4] ss:$20 sps:$4 sm:$0xff]  }
 0x162   :  { %3137 = vmatmul.mubr.bf16.vlgmr.msra.gmra.mrb[4].mxu0 %v7376_v52  ;;  %3178 = vmatmul.mubr.bf16.vlgmr.msra.gmra.mrb[4].mxu1 %v7377_v53  ;;  %v7088_v52 = vld [vmem:[%s9516_s3 + $0x118] ss:$20 sps:$4 sm:$0xff]  }
 0x163   :  { %6193 = vmatpush3.bf16.msra.mxu0 %v6999_v46  ;;  %6215 = vmatpush3.bf16.msra.mxu1 %v7001_v47  ;;  %v7043_v46 = vld [vmem:[%s9514_s1 + $0xb00] ss:$20 sps:$4 sm:$0xff]   ;;  %v7044_v47 = vld [vmem:[%s9514_s1 + $0xc68] ss:$20 sps:$4 sm:$0xff]   ;;  %v7096_v53 = vld [vmem:[%s9516_s3 + $0x144] ss:$20 sps:$4 sm:$0xff]  }
 0x164   :  { %6194 = vmatprep.subr.bf16.mxu0 %v7002_v48  ;;  %6216 = vmatprep.subr.bf16.mxu1 %v7004_v49  ;;  %v7082_v48 = vld [vmem:[%s9516_s3 + $0xf0] ss:$20 sps:$4 sm:$0xff]  }
 0x165   :  { %3218 = vmatprep.mubr.bf16.mxu0 %v7378_v58  ;;  %3259 = vmatprep.mubr.bf16.mxu1 %v7379_v59  ;;  %v7090_v49 = vld [vmem:[%s9516_s3 + $0x11c] ss:$20 sps:$4 sm:$0xff]  }
 0x166   :  { %v7055_v58 = vld [vmem:[%s9516_s3 + $0x30] ss:$20 sps:$4 sm:$0xff]  }
 0x167   :  { %6195 = vmatpush3.bf16.msra.mxu0 %v7003_v50  ;;  %6217 = vmatpush3.bf16.msra.mxu1 %v7005_v51  ;;  %v7045_v50 = vld [vmem:[%s9514_s1 + $0xb28] ss:$20 sps:$4 sm:$0xff]   ;;  %v7051_v51 = vld [vmem:[%s9516_s3 + $0xc] ss:$20 sps:$4 sm:$0xff]  }
 0x168   :  { %6196 = vmatprep.subr.bf16.mxu0 %v7006_v54  ;;  %6218 = vmatprep.subr.bf16.mxu1 %v7008_v55  ;;  %v7049_v54 = vld [vmem:[%s9516_s3 + $0x8] ss:$20 sps:$4 sm:$0xff]  }
 0x169   :  { %v7057_v55 = vld [vmem:[%s9516_s3 + $0x34] ss:$20 sps:$4 sm:$0xff]   ;;  %v7063_v59 = vld [vmem:[%s9516_s3 + $0x5c] ss:$20 sps:$4 sm:$0xff]  }
 0x16b   :  { %6197 = vmatpush3.bf16.msra.mxu0 %v7007_v56  ;;  %6219 = vmatpush3.bf16.msra.mxu1 %v7009_v57  ;;  %v7094_v56 = vld [vmem:[%s9516_s3 + $0x140] ss:$20 sps:$4 sm:$0xff]  }
 0x16c   :  { %6198 = vmatprep.subr.bf16.mxu0 %v7010_v60  ;;  %6220 = vmatprep.subr.bf16.mxu1 %v7012_v61  ;;  %v7102_v57 = vld [vmem:[%s9516_s3 + $0x16c] ss:$20 sps:$4 sm:$0xff]   ;;  %v7100_v60 = vld [vmem:[%s9516_s3 + $0x168] ss:$20 sps:$4 sm:$0xff]  }
 0x16d   :  { %v7061_v61 = vld [vmem:[%s9516_s3 + $0x58] ss:$20 sps:$4 sm:$0xff]  }
 0x16f   :  { %6199 = vmatpush3.bf16.msra.mxu0 %v7011_v62  ;;  %6221 = vmatpush3.bf16.msra.mxu1 %v7013_v63  ;;  %v7069_v62 = vld [vmem:[%s9516_s3 + $0x84] ss:$20 sps:$4 sm:$0xff]  }
 0x170   :  { %6200 = vmatprep.subr.bf16.mxu0 %v7014_v0  ;;  %6222 = vmatprep.subr.bf16.mxu1 %v7016_v1  ;;  %v7106_v63 = vld [vmem:[%s9516_s3 + $0x190] ss:$20 sps:$4 sm:$0xff]   ;;  %v7067_v1 = vld [vmem:[%s9516_s3 + $0x80] ss:$20 sps:$4 sm:$0xff]  }
 0x171   :  { %v7114_v0 = vld [vmem:[%s9516_s3 + $0x1bc] ss:$20 sps:$4 sm:$0xff]  }
 0x173   :  { %6201 = vmatpush3.bf16.msra.mxu0 %v7015_v2  ;;  %6223 = vmatpush3.bf16.msra.mxu1 %v7017_v3  ;;  %v7075_v2 = vld [vmem:[%s9516_s3 + $0xac] ss:$20 sps:$4 sm:$0xff]  }
 0x174   :  { %6202 = vmatprep.subr.bf16.mxu0 %v7018_v4  ;;  %6224 = vmatprep.subr.bf16.mxu1 %v7020_v5  ;;  %v7112_v3 = vld [vmem:[%s9516_s3 + $0x1b8] ss:$20 sps:$4 sm:$0xff]   ;;  %v7073_v5 = vld [vmem:[%s9516_s3 + $0xa8] ss:$20 sps:$4 sm:$0xff]  }
 0x175   :  { %v7120_v4 = vld [vmem:[%s9516_s3 + $0x1e4] ss:$20 sps:$4 sm:$0xff]  }
 0x177   :  { %6203 = vmatpush3.bf16.msra.mxu0 %v7019_v6  ;;  %6225 = vmatpush3.bf16.msra.mxu1 %v7021_v7  ;;  %v7081_v6 = vld [vmem:[%s9516_s3 + $0xd4] ss:$20 sps:$4 sm:$0xff]  }
 0x178   :  { %6204 = vmatprep.subr.bf16.mxu0 %v7022_v8  ;;  %6226 = vmatprep.subr.bf16.mxu1 %v7024_v9  ;;  %v7118_v7 = vld [vmem:[%s9516_s3 + $0x1e0] ss:$20 sps:$4 sm:$0xff]   ;;  %v7079_v9 = vld [vmem:[%s9516_s3 + $0xd0] ss:$20 sps:$4 sm:$0xff]  }
 0x179   :  { %v7126_v8 = vld [vmem:[%s9516_s3 + $0x20c] ss:$20 sps:$4 sm:$0xff]  }
 0x17b   :  { %6205 = vmatpush3.bf16.msra.mxu0 %v7023_v10  ;;  %6227 = vmatpush3.bf16.msra.mxu1 %v7025_v12  ;;  %v7087_v10 = vld [vmem:[%s9516_s3 + $0xfc] ss:$20 sps:$4 sm:$0xff]  }
 0x17c   :  { %6206 = vmatprep.subr.bf16.mxu0 %v7026_v13  ;;  %6228 = vmatprep.subr.bf16.mxu1 %v7028_v14  ;;  %v7124_v12 = vld [vmem:[%s9516_s3 + $0x208] ss:$20 sps:$4 sm:$0xff]   ;;  %v7085_v14 = vld [vmem:[%s9516_s3 + $0xf8] ss:$20 sps:$4 sm:$0xff]  }
 0x17d   :  { %v7132_v13 = vld [vmem:[%s9516_s3 + $0x234] ss:$20 sps:$4 sm:$0xff]  }
 0x17f   :  { %6207 = vmatpush3.bf16.msra.mxu0 %v7027_v15  ;;  %6229 = vmatpush3.bf16.msra.mxu1 %v7029_v16  ;;  %v7093_v15 = vld [vmem:[%s9516_s3 + $0x124] ss:$20 sps:$4 sm:$0xff]  }
 0x180   :  { %6236 = vmatprep.subr.bf16.mxu0 %v7030_v17  ;;  %4631 = vmatprep.subr.bf16.mxu1 %v7048_v18  ;;  %v7130_v16 = vld [vmem:[%s9516_s3 + $0x230] ss:$20 sps:$4 sm:$0xff]   ;;  %v7091_v18 = vld [vmem:[%s9516_s3 + $0x120] ss:$20 sps:$4 sm:$0xff]  }
 0x181   :  { %v7138_v17 = vld [vmem:[%s9516_s3 + $0x25c] ss:$20 sps:$4 sm:$0xff]  }
 0x182   :  { %3219 = vmatmul.mubr.bf16.vlgmr.msra.gmra.mrb[8].mxu0 %v7380_v24  ;;  %3260 = vmatmul.mubr.bf16.vlgmr.msra.gmra.mrb[8].mxu1 %v7381_v25  ;;  %v7103_v24 = vld [vmem:[%s9516_s3 + $0x170] ss:$20 sps:$4 sm:$0xff]  }
 0x183   :  { %6237 = vmatpush3.bf16.msra.mxu0 %v7031_v19  ;;  %3300 = vmatprep.mubr.bf16.mxu0 %v7382_v28  ;;  %v7099_v19 = vld [vmem:[%s9516_s3 + $0x14c] ss:$20 sps:$4 sm:$0xff]   ;;  %v7111_v25 = vld [vmem:[%s9516_s3 + $0x19c] ss:$20 sps:$4 sm:$0xff]  }
 0x184   :  { %6238 = vmatprep.subr.bf16.mxu0 %v7032_v20  ;;  %4632 = vmatpush1.bf16.msra.mxu1 %v7046_v21  ;;  %v7136_v20 = vld [vmem:[%s9516_s3 + $0x258] ss:$20 sps:$4 sm:$0xff]   ;;  %v7115_v28 = vld [vmem:[%s9516_s3 + $0x1c0] ss:$20 sps:$4 sm:$0xff]  }
 0x185   :  { %4633 = vmatprep.subr.bf16.mxu1 %v7054_v22  ;;  %v7144_v21 = vld [vmem:[%s9516_s3 + $0x284] ss:$20 sps:$4 sm:$0xff]   ;;  %v7097_v22 = vld [vmem:[%s9516_s3 + $0x148] ss:$20 sps:$4 sm:$0xff]  }
 0x187   :  { %6239 = vmatpush3.bf16.msra.mxu0 %v7033_v23  ;;  %v7105_v23 = vld [vmem:[%s9516_s3 + $0x174] ss:$20 sps:$4 sm:$0xff]  }
 0x188   :  { %6240 = vmatprep.subr.bf16.mxu0 %v7034_v26  ;;  %4634 = vmatpush1.bf16.msra.mxu1 %v7052_v27  ;;  %v7109_v26 = vld [vmem:[%s9516_s3 + $0x198] ss:$20 sps:$4 sm:$0xff]  }
 0x189   :  { %4635 = vmatprep.subr.bf16.mxu1 %v7060_v29  ;;  %v7117_v27 = vld [vmem:[%s9516_s3 + $0x1c4] ss:$20 sps:$4 sm:$0xff]   ;;  %v7123_v29 = vld [vmem:[%s9516_s3 + $0x1ec] ss:$20 sps:$4 sm:$0xff]  }
 0x18b   :  { %6241 = vmatpush3.bf16.msra.mxu0 %v7035_v30  ;;  %v7121_v30 = vld [vmem:[%s9516_s3 + $0x1e8] ss:$20 sps:$4 sm:$0xff]  }
 0x18c   :  { %6242 = vmatprep.subr.bf16.mxu0 %v7036_v31  ;;  %4636 = vmatpush1.bf16.msra.mxu1 %v7058_v32  ;;  %v7129_v31 = vld [vmem:[%s9516_s3 + $0x214] ss:$20 sps:$4 sm:$0xff]   ;;  %v7127_v32 = vld [vmem:[%s9516_s3 + $0x210] ss:$20 sps:$4 sm:$0xff]  }
 0x18d   :  { %4637 = vmatprep.subr.bf16.mxu1 %v7066_v33  ;;  %v7135_v33 = vld [vmem:[%s9516_s3 + $0x23c] ss:$20 sps:$4 sm:$0xff]  }
 0x18f   :  { %6243 = vmatpush3.bf16.msra.mxu0 %v7037_v34  ;;  %v7133_v34 = vld [vmem:[%s9516_s3 + $0x238] ss:$20 sps:$4 sm:$0xff]  }
 0x190   :  { %6244 = vmatprep.subr.bf16.mxu0 %v7038_v35  ;;  %4638 = vmatpush1.bf16.msra.mxu1 %v7064_v36  ;;  %v7141_v35 = vld [vmem:[%s9516_s3 + $0x264] ss:$20 sps:$4 sm:$0xff]   ;;  %v7139_v36 = vld [vmem:[%s9516_s3 + $0x260] ss:$20 sps:$4 sm:$0xff]  }
 0x191   :  { %4639 = vmatprep.subr.bf16.mxu1 %v7072_v37  ;;  %v7147_v37 = vld [vmem:[%s9516_s3 + $0x28c] ss:$20 sps:$4 sm:$0xff]  }
 0x193   :  { %6245 = vmatpush3.bf16.msra.mxu0 %v7039_v38  ;;  %v519_v38 = vlaneseq }
 0x194   :  { %6246 = vmatprep.subr.bf16.mxu0 %v7040_v39  ;;  %4640 = vmatpush1.bf16.msra.mxu1 %v7070_v40 }
 0x195   :  { %4641 = vmatprep.subr.bf16.mxu1 %v7078_v41  ;;  %v8886_v39 = vshrl.u32 %v519_v38, 7 }
 0x197   :  { %6247 = vmatpush3.bf16.msra.mxu0 %v7041_v42  ;;  %v521_v40 = vsub.s32 0, %v8886_v39  ;;  %v529_v41 = vsub.s32 2, %v8886_v39  ;;  %v8893_v42 = vld [vmem:[%s9517_s2] sm:$0x1f] }
 0x198   :  { %6248 = vmatprep.subr.bf16.mxu0 %v7042_v43  ;;  %4642 = vmatpush1.bf16.msra.mxu1 %v7076_v44  ;;  %v525_v43 = vsub.s32 1, %v8886_v39  ;;  %v533_v44 = vsub.s32 3, %v8886_v39 }
 0x199   :  { %4643 = vmatprep.subr.bf16.mxu1 %v7084_v45  ;;  %v522_v45 = vrot.slane %v8893_v42, %v521_v40 }
 0x19b   :  { %6249 = vmatpush3.bf16.msra.mxu0 %v7043_v46  ;;  %v530_v46 = vrot.slane %v8893_v42, %v529_v41 }
 0x19c   :  { %6250 = vmatprep.subr.bf16.mxu0 %v7044_v47  ;;  %4644 = vmatpush1.bf16.msra.mxu1 %v7082_v48  ;;  %v526_v47 = vrot.slane %v8893_v42, %v525_v43  ;;  %v534_v48 = vrot.slane %v8893_v42, %v533_v44 }
 0x19d   :  { %4645 = vmatprep.subr.bf16.mxu1 %v7090_v49 }
 0x19f   :  { %6251 = vmatpush3.bf16.msra.mxu0 %v7045_v50 }
 0x1a0   :  { %4760 = vmatprep.subr.bf16.mxu0 %v7051_v51  ;;  %4646 = vmatpush1.bf16.msra.mxu1 %v7088_v52 }
 0x1a1   :  { %4647 = vmatprep.subr.bf16.mxu1 %v7096_v53 }
 0x1a2   :  { %3301 = vmatmul.mubr.bf16.vlgmr.msra.gmra.mrb[12].mxu0 %v8422_v11  ;;  %v7108_v11 = vld [vmem:[%s9516_s3 + $0x194] ss:$20 sps:$4 sm:$0xff]  }
 0x1a3   :  { %4761 = vmatpush1.bf16.msra.mxu0 %v7049_v54 }
 0x1a4   :  { %4762 = vmatprep.subr.bf16.mxu0 %v7057_v55  ;;  %4648 = vmatpush1.bf16.msra.mxu1 %v7094_v56 }
 0x1a5   :  { %4649 = vmatprep.subr.bf16.mxu1 %v7102_v57 }
 0x1a7   :  { %4763 = vmatpush1.bf16.msra.mxu0 %v7055_v58 }
 0x1a8   :  { %4764 = vmatprep.subr.bf16.mxu0 %v7063_v59  ;;  %4650 = vmatpush1.bf16.msra.mxu1 %v7100_v60 }
 0x1a9   :  { %4651 = vmatprep.subr.bf16.mxu1 %v7108_v11 }
 0x1ab   :  { %4765 = vmatpush1.bf16.msra.mxu0 %v7061_v61 }
 0x1ac   :  { %4766 = vmatprep.subr.bf16.mxu0 %v7069_v62  ;;  %4652 = vmatpush1.bf16.msra.mxu1 %v7106_v63 }
 0x1ad   :  { %4653 = vmatprep.subr.bf16.mxu1 %v7114_v0 }
 0x1af   :  { %4767 = vmatpush1.bf16.msra.mxu0 %v7067_v1 }
 0x1b0   :  { %4768 = vmatprep.subr.bf16.mxu0 %v7075_v2  ;;  %4654 = vmatpush1.bf16.msra.mxu1 %v7112_v3 }
 0x1b1   :  { %4655 = vmatprep.subr.bf16.mxu1 %v7120_v4 }
 0x1b3   :  { %4769 = vmatpush1.bf16.msra.mxu0 %v7073_v5 }
 0x1b4   :  { %4770 = vmatprep.subr.bf16.mxu0 %v7081_v6  ;;  %4656 = vmatpush1.bf16.msra.mxu1 %v7118_v7 }
 0x1b5   :  { %4657 = vmatprep.subr.bf16.mxu1 %v7126_v8 }
 0x1b7   :  { %4771 = vmatpush1.bf16.msra.mxu0 %v7079_v9 }
 0x1b8   :  { %4772 = vmatprep.subr.bf16.mxu0 %v7087_v10  ;;  %4658 = vmatpush1.bf16.msra.mxu1 %v7124_v12 }
 0x1b9   :  { %4659 = vmatprep.subr.bf16.mxu1 %v7132_v13  ;;  %v7142_v13 = vld [vmem:[%s9516_s3 + $0x280] ss:$20 sps:$4 sm:$0xff]  }
 0x1bb   :  { %4773 = vmatpush1.bf16.msra.mxu0 %v7085_v14  ;;  %v7145_v14 = vld [vmem:[%s9516_s3 + $0x288] ss:$20 sps:$4 sm:$0xff]  }
 0x1bc   :  { %4774 = vmatprep.subr.bf16.mxu0 %v7093_v15  ;;  %4660 = vmatpush1.bf16.msra.mxu1 %v7130_v16  ;;  %v7150_v15 = vld [vmem:[%s9516_s3 + $0x2ac] ss:$20 sps:$4 sm:$0xff]   ;;  %v7153_v16 = vld [vmem:[%s9516_s3 + $0x2b4] ss:$20 sps:$4 sm:$0xff]  }
 0x1bd   :  { %4661 = vmatprep.subr.bf16.mxu1 %v7138_v17  ;;  %v7148_v17 = vld [vmem:[%s9516_s3 + $0x2a8] ss:$20 sps:$4 sm:$0xff]  }
 0x1bf   :  { %4775 = vmatpush1.bf16.msra.mxu0 %v7091_v18  ;;  %v7151_v18 = vld [vmem:[%s9516_s3 + $0x2b0] ss:$20 sps:$4 sm:$0xff]  }
 0x1c0   :  { %4776 = vmatprep.subr.bf16.mxu0 %v7099_v19  ;;  %4662 = vmatpush1.bf16.msra.mxu1 %v7136_v20  ;;  %v7156_v19 = vld [vmem:[%s9516_s3 + $0x2d4] ss:$20 sps:$4 sm:$0xff]   ;;  %v7159_v20 = vld [vmem:[%s9516_s3 + $0x2dc] ss:$20 sps:$4 sm:$0xff]  }
 0x1c1   :  { %4674 = vmatprep.subr.bf16.mxu1 %v7144_v21  ;;  %v7154_v21 = vld [vmem:[%s9516_s3 + $0x2d0] ss:$20 sps:$4 sm:$0xff]  }
 0x1c3   :  { %4777 = vmatpush1.bf16.msra.mxu0 %v7097_v22  ;;  %v7157_v22 = vld [vmem:[%s9516_s3 + $0x2d8] ss:$20 sps:$4 sm:$0xff]  }
 0x1c4   :  { %4778 = vmatprep.subr.bf16.mxu0 %v7105_v23  ;;  %v7162_v23 = vld [vmem:[%s9516_s3 + $0x2fc] ss:$20 sps:$4 sm:$0xff]  }
 0x1c7   :  { %4779 = vmatpush1.bf16.msra.mxu0 %v7103_v24  ;;  %v7165_v24 = vld [vmem:[%s9516_s3 + $0x304] ss:$20 sps:$4 sm:$0xff]  }
 0x1c8   :  { %4780 = vmatprep.subr.bf16.mxu0 %v7111_v25  ;;  %v7160_v25 = vld [vmem:[%s9516_s3 + $0x2f8] ss:$20 sps:$4 sm:$0xff]  }
 0x1cb   :  { %4781 = vmatpush1.bf16.msra.mxu0 %v7109_v26  ;;  %v7163_v26 = vld [vmem:[%s9516_s3 + $0x300] ss:$20 sps:$4 sm:$0xff]  }
 0x1cc   :  { %4782 = vmatprep.subr.bf16.mxu0 %v7117_v27  ;;  %v7168_v27 = vld [vmem:[%s9516_s3 + $0x324] ss:$20 sps:$4 sm:$0xff]  }
 0x1cf   :  { %4783 = vmatpush1.bf16.msra.mxu0 %v7115_v28  ;;  %v7171_v28 = vld [vmem:[%s9516_s3 + $0x32c] ss:$20 sps:$4 sm:$0xff]  }
 0x1d0   :  { %4784 = vmatprep.subr.bf16.mxu0 %v7123_v29  ;;  %v7166_v29 = vld [vmem:[%s9516_s3 + $0x320] ss:$20 sps:$4 sm:$0xff]  }
 0x1d3   :  { %4785 = vmatpush1.bf16.msra.mxu0 %v7121_v30  ;;  %v7169_v30 = vld [vmem:[%s9516_s3 + $0x328] ss:$20 sps:$4 sm:$0xff]  }
 0x1d4   :  { %4786 = vmatprep.subr.bf16.mxu0 %v7129_v31  ;;  %v7174_v31 = vld [vmem:[%s9516_s3 + $0x34c] ss:$20 sps:$4 sm:$0xff]  }
 0x1d7   :  { %4787 = vmatpush1.bf16.msra.mxu0 %v7127_v32  ;;  %v7177_v32 = vld [vmem:[%s9516_s3 + $0x354] ss:$20 sps:$4 sm:$0xff]  }
 0x1d8   :  { %4788 = vmatprep.subr.bf16.mxu0 %v7135_v33  ;;  %v7172_v33 = vld [vmem:[%s9516_s3 + $0x348] ss:$20 sps:$4 sm:$0xff]  }
 0x1db   :  { %4789 = vmatpush1.bf16.msra.mxu0 %v7133_v34  ;;  %v7175_v34 = vld [vmem:[%s9516_s3 + $0x350] ss:$20 sps:$4 sm:$0xff]  }
 0x1dc   :  { %4790 = vmatprep.subr.bf16.mxu0 %v7141_v35  ;;  %v537_v35 = vsub.s32 4, %v8886_v39  ;;  %v7365_v39 = vld [vmem:[%s9518_s5 + $0x138] sm:$0xff]  }
 0x1df   :  { %4791 = vmatpush1.bf16.msra.mxu0 %v7139_v36  ;;  %v7180_v36 = vld [vmem:[%s9516_s3 + $0x374] ss:$20 sps:$4 sm:$0xff]  }
 0x1e0   :  { %4803 = vmatprep.subr.bf16.mxu0 %v7147_v37  ;;  %v7183_v37 = vld [vmem:[%s9516_s3 + $0x37c] ss:$20 sps:$4 sm:$0xff]  }
 0x215   :  { %v2880_v49 = vpop.f32.mrb[0].mxu0  ;;  %v3095_v50 = vpop.f32.mrb[0].mxu1 }
 0x216   :  { %v6404_v51 = vadd.f32 %v2880_v49, %v522_v45  ;;  %v6408_v52 = vadd.f32 %v3095_v50, %v530_v46  ;;  %v2882_v53 = vpop.f32.mrb[1].mxu0  ;;  %v3097_v54 = vpop.f32.mrb[1].mxu1 }
 0x217   :  { %v6405_v55 = vadd.f32 %v2882_v53, %v526_v47  ;;  %v6409_v56 = vadd.f32 %v3097_v54, %v534_v48  ;;  %v2884_v57 = vpop.f32.mrb[2].mxu0  ;;  %v3099_v58 = vpop.f32.mrb[2].mxu1 }
 0x218   :  { %v6406_v59 = vadd.f32 %v2884_v57, %v522_v45  ;;  %v6410_v60 = vadd.f32 %v3099_v58, %v530_v46  ;;  %v2886_v11 = vpop.f32.mrb[3].mxu0  ;;  %v3101_v61 = vpop.f32.mrb[3].mxu1  ;;  %v3309_v0 = vmax.f32 %v6404_v51, 0.0  ;;  %v3311_v1 = vmax.f32 %v6408_v52, 0.0  ;;  %v7186_v51 = vld [vmem:[%s9516_s3 + $0x39c] ss:$20 sps:$4 sm:$0xff]  }
 0x219   :  { %v6407_v62 = vadd.f32 %v2886_v11, %v526_v47  ;;  %v6411_v63 = vadd.f32 %v3101_v61, %v534_v48  ;;  %v3310_v4 = vmax.f32 %v6405_v55, 0.0  ;;  %v3312_v5 = vmax.f32 %v6409_v56, 0.0  ;;  %v7178_v47 = vld [vmem:[%s9516_s3 + $0x370] ss:$20 sps:$4 sm:$0xff]   ;;  %v7181_v48 = vld [vmem:[%s9516_s3 + $0x378] ss:$20 sps:$4 sm:$0xff]  }
 0x21a   :  { %v3314_v2 = vmax.f32 %v6406_v59, 0.0  ;;  %v3316_v3 = vmax.f32 %v6410_v60, 0.0  ;;  %v538_v45 = vrot.slane %v8893_v42, %v537_v35  ;;  %v7189_v42 = vld [vmem:[%s9516_s3 + $0x3a4] ss:$20 sps:$4 sm:$0xff]   ;;  %v7187_v61 = vld [vmem:[%s9516_s3 + $0x3a0] ss:$20 sps:$4 sm:$0xff]  }
 0x21b   :  { %v3315_v6 = vmax.f32 %v6407_v62, 0.0  ;;  %v3317_v7 = vmax.f32 %v6411_v63, 0.0  ;;  %v7184_v11 = vld [vmem:[%s9516_s3 + $0x398] ss:$20 sps:$4 sm:$0xff]  }
 0x21c   :  { %v8909_v8 = vpack.c.bf16 %v3314_v2, %v3309_v0  ;;  %v8911_v9 = vpack.c.bf16 %v3316_v3, %v3311_v1  ;;  %v7192_v62 = vld [vmem:[%s9516_s3 + $0x3c4] ss:$20 sps:$4 sm:$0xff]   ;;  %v7195_v63 = vld [vmem:[%s9516_s3 + $0x3cc] ss:$20 sps:$4 sm:$0xff]  }
 0x21d   :  { %v8913_v10 = vpack.c.bf16 %v3315_v6, %v3310_v4  ;;  %v8915_v12 = vpack.c.bf16 %v3317_v7, %v3312_v5  ;;  %v7190_v3 = vld [vmem:[%s9516_s3 + $0x3c0] ss:$20 sps:$4 sm:$0xff]   ;;  %v7193_v4 = vld [vmem:[%s9516_s3 + $0x3c8] ss:$20 sps:$4 sm:$0xff]  }
 0x21e   :  { %v7198_v5 = vld [vmem:[%s9516_s3 + $0x3ec] ss:$20 sps:$4 sm:$0xff]   ;;  %v7201_v6 = vld [vmem:[%s9516_s3 + $0x3f4] ss:$20 sps:$4 sm:$0xff]  }
 0x21f   :  { %4663 = vmatprep.mubr.bf16.mxu1 %v8913_v10  ;;  %4792 = vmatprep.mubr.bf16.mxu0 %v8913_v10  ;;  %v7196_v7 = vld [vmem:[%s9516_s3 + $0x3e8] ss:$20 sps:$4 sm:$0xff]  }
 0x220   :  { %4664 = vmatmul.mubr.bf16.vlgmr.msra.gmra.mrb[12].mxu1 %v8909_v8  ;;  %4793 = vmatmul.mubr.bf16.vlgmr.msra.gmra.mrb[16].mxu0 %v8909_v8 }
 0x221   :  { %4675 = vmatpush1.bf16.msra.mxu1 %v7142_v13  ;;  %4804 = vmatpush1.bf16.msra.mxu0 %v7145_v14  ;;  %v7199_v13 = vld [vmem:[%s9516_s3 + $0x3f0] ss:$20 sps:$4 sm:$0xff]   ;;  %v7204_v14 = vld [vmem:[%s9516_s3 + $0x414] ss:$20 sps:$4 sm:$0xff]  }
 0x222   :  { %4706 = vmatprep.mubr.bf16.mxu1 %v8915_v12  ;;  %4835 = vmatprep.mubr.bf16.mxu0 %v8915_v12 }
 0x223   :  { %4676 = vmatprep.subr.bf16.mxu1 %v7150_v15  ;;  %4805 = vmatprep.subr.bf16.mxu0 %v7153_v16  ;;  %v7207_v15 = vld [vmem:[%s9516_s3 + $0x41c] ss:$20 sps:$4 sm:$0xff]  }
 0x224   :  { %v7202_v16 = vld [vmem:[%s9516_s3 + $0x410] ss:$20 sps:$4 sm:$0xff]  }
 0x225   :  { %4677 = vmatpush1.bf16.msra.mxu1 %v7148_v17  ;;  %4806 = vmatpush1.bf16.msra.mxu0 %v7151_v18  ;;  %v7205_v17 = vld [vmem:[%s9516_s3 + $0x418] ss:$20 sps:$4 sm:$0xff]   ;;  %v7210_v18 = vld [vmem:[%s9516_s3 + $0x43c] ss:$20 sps:$4 sm:$0xff]  }
 0x226   :  { %4678 = vmatprep.subr.bf16.mxu1 %v7156_v19  ;;  %4807 = vmatprep.subr.bf16.mxu0 %v7159_v20  ;;  %v7213_v19 = vld [vmem:[%s9516_s3 + $0x444] ss:$20 sps:$4 sm:$0xff]  }
 0x227   :  { %v7208_v20 = vld [vmem:[%s9516_s3 + $0x438] ss:$20 sps:$4 sm:$0xff]  }
 0x229   :  { %4679 = vmatpush1.bf16.msra.mxu1 %v7154_v21  ;;  %4808 = vmatpush1.bf16.msra.mxu0 %v7157_v22  ;;  %v7211_v21 = vld [vmem:[%s9516_s3 + $0x440] ss:$20 sps:$4 sm:$0xff]   ;;  %v7216_v22 = vld [vmem:[%s9516_s3 + $0x464] ss:$20 sps:$4 sm:$0xff]  }
 0x22a   :  { %4680 = vmatprep.subr.bf16.mxu1 %v7162_v23  ;;  %4809 = vmatprep.subr.bf16.mxu0 %v7165_v24  ;;  %v7219_v23 = vld [vmem:[%s9516_s3 + $0x46c] ss:$20 sps:$4 sm:$0xff]  }
 0x22b   :  { %v7214_v24 = vld [vmem:[%s9516_s3 + $0x460] ss:$20 sps:$4 sm:$0xff]  }
 0x22d   :  { %4681 = vmatpush1.bf16.msra.mxu1 %v7160_v25  ;;  %4810 = vmatpush1.bf16.msra.mxu0 %v7163_v26  ;;  %v7217_v25 = vld [vmem:[%s9516_s3 + $0x468] ss:$20 sps:$4 sm:$0xff]   ;;  %v7222_v26 = vld [vmem:[%s9516_s3 + $0x48c] ss:$20 sps:$4 sm:$0xff]  }
 0x22e   :  { %4682 = vmatprep.subr.bf16.mxu1 %v7168_v27  ;;  %4811 = vmatprep.subr.bf16.mxu0 %v7171_v28  ;;  %v7225_v27 = vld [vmem:[%s9516_s3 + $0x494] ss:$20 sps:$4 sm:$0xff]  }
 0x22f   :  { %v7220_v28 = vld [vmem:[%s9516_s3 + $0x488] ss:$20 sps:$4 sm:$0xff]  }
 0x231   :  { %4683 = vmatpush1.bf16.msra.mxu1 %v7166_v29  ;;  %4812 = vmatpush1.bf16.msra.mxu0 %v7169_v30  ;;  %v7223_v29 = vld [vmem:[%s9516_s3 + $0x490] ss:$20 sps:$4 sm:$0xff]   ;;  %v7228_v30 = vld [vmem:[%s9516_s3 + $0x4b4] ss:$20 sps:$4 sm:$0xff]  }
 0x232   :  { %4684 = vmatprep.subr.bf16.mxu1 %v7174_v31  ;;  %4813 = vmatprep.subr.bf16.mxu0 %v7177_v32  ;;  %v7231_v31 = vld [vmem:[%s9516_s3 + $0x4bc] ss:$20 sps:$4 sm:$0xff]  }
 0x233   :  { %v7226_v32 = vld [vmem:[%s9516_s3 + $0x4b0] ss:$20 sps:$4 sm:$0xff]  }
 0x235   :  { %4685 = vmatpush1.bf16.msra.mxu1 %v7172_v33  ;;  %4814 = vmatpush1.bf16.msra.mxu0 %v7175_v34  ;;  %v6164_v38 = vpop.f32.mrb[4].mxu0  ;;  %v6186_v46 = vpop.f32.mrb[4].mxu1  ;;  %v7229_v33 = vld [vmem:[%s9516_s3 + $0x4b8] ss:$20 sps:$4 sm:$0xff]   ;;  %v7234_v34 = vld [vmem:[%s9516_s3 + $0x4dc] ss:$20 sps:$4 sm:$0xff]  }
 0x236   :  { %v6165_v49 = vpop.f32.mrb[5].mxu0  ;;  %4686 = vmatprep.subr.bf16.mxu1 %v7180_v36  ;;  %4815 = vmatprep.subr.bf16.mxu0 %v7183_v37  ;;  %v6187_v50 = vpop.f32.mrb[5].mxu1 }
 0x237   :  { %v6166_v52 = vadd.f32 %v6165_v49, %v6164_v38  ;;  %v6167_v53 = vpop.f32.mrb[6].mxu0  ;;  %v6188_v54 = vadd.f32 %v6187_v50, %v6186_v46  ;;  %v6189_v55 = vpop.f32.mrb[6].mxu1  ;;  %v7237_v46 = vld [vmem:[%s9516_s3 + $0x4e4] ss:$20 sps:$4 sm:$0xff]  }
 0x238   :  { %v6168_v56 = vpop.f32.mrb[7].mxu0  ;;  %v6190_v57 = vpop.f32.mrb[7].mxu1 }
 0x239   :  { %v3139_v58 = vadd.f32 %v6166_v52, %v538_v45  ;;  %v6169_v59 = vadd.f32 %v6168_v56, %v6167_v53  ;;  %4687 = vmatpush1.bf16.msra.mxu1 %v7178_v47  ;;  %4816 = vmatpush1.bf16.msra.mxu0 %v7181_v48  ;;  %v6191_v60 = vadd.f32 %v6190_v57, %v6189_v55  ;;  %v7243_v55 = vld [vmem:[%s9516_s3 + $0x50c] ss:$20 sps:$4 sm:$0xff]  }
 0x23a   :  { %4688 = vmatprep.subr.bf16.mxu1 %v7186_v51  ;;  %4817 = vmatprep.subr.bf16.mxu0 %v7189_v42  ;;  %v7232_v51 = vld [vmem:[%s9516_s3 + $0x4d8] ss:$20 sps:$4 sm:$0xff]   ;;  %v7235_v42 = vld [vmem:[%s9516_s3 + $0x4e0] ss:$20 sps:$4 sm:$0xff]  }
 0x23b   :  { %v3142_v0 = vadd.f32 %v6169_v59, %v538_v45  ;;  %v9023_v1 = vadd.f32 %v6188_v54, %v3139_v58  ;;  %v7240_v54 = vld [vmem:[%s9516_s3 + $0x504] ss:$20 sps:$4 sm:$0xff]  }
 0x23d   :  { %v9025_v2 = vadd.f32 %v6191_v60, %v3142_v0  ;;  %4689 = vmatpush1.bf16.msra.mxu1 %v7184_v11  ;;  %4818 = vmatpush1.bf16.msra.mxu0 %v7187_v61  ;;  %v7238_v11 = vld [vmem:[%s9516_s3 + $0x500] ss:$20 sps:$4 sm:$0xff]   ;;  %v7241_v61 = vld [vmem:[%s9516_s3 + $0x508] ss:$20 sps:$4 sm:$0xff]  }
 0x23e   :  { %4690 = vmatprep.subr.bf16.mxu1 %v7192_v62  ;;  %4819 = vmatprep.subr.bf16.mxu0 %v7195_v63  ;;  %v7246_v62 = vld [vmem:[%s9516_s3 + $0x52c] ss:$20 sps:$4 sm:$0xff]   ;;  %v7249_v63 = vld [vmem:[%s9516_s3 + $0x534] ss:$20 sps:$4 sm:$0xff]  }
 0x241   :  { %4691 = vmatpush1.bf16.msra.mxu1 %v7190_v3  ;;  %4820 = vmatpush1.bf16.msra.mxu0 %v7193_v4  ;;  %v7252_v3 = vld [vmem:[%s9516_s3 + $0x554] ss:$20 sps:$4 sm:$0xff]   ;;  %v7255_v4 = vld [vmem:[%s9516_s3 + $0x55c] ss:$20 sps:$4 sm:$0xff]  }
 0x242   :  { %4692 = vmatprep.subr.bf16.mxu1 %v7198_v5  ;;  %4821 = vmatprep.subr.bf16.mxu0 %v7201_v6  ;;  %v7383_v5 = vmov 0   ;;  %v7250_v6 = vld [vmem:[%s9516_s3 + $0x550] ss:$20 sps:$4 sm:$0xff]  }
 0x245   :  { %4693 = vmatpush1.bf16.msra.mxu1 %v7196_v7  ;;  %4822 = vmatpush1.bf16.msra.mxu0 %v7199_v13  ;;  %v7253_v7 = vld [vmem:[%s9516_s3 + $0x558] ss:$20 sps:$4 sm:$0xff]   ;;  %v7258_v13 = vld [vmem:[%s9516_s3 + $0x57c] ss:$20 sps:$4 sm:$0xff]  }
 0x246   :  { %4694 = vmatprep.subr.bf16.mxu1 %v7204_v14  ;;  %4823 = vmatprep.subr.bf16.mxu0 %v7207_v15  ;;  %v7261_v14 = vld [vmem:[%s9516_s3 + $0x584] ss:$20 sps:$4 sm:$0xff]  }
 0x247   :  { %v7256_v15 = vld [vmem:[%s9516_s3 + $0x578] ss:$20 sps:$4 sm:$0xff]  }
 0x249   :  { %4695 = vmatpush1.bf16.msra.mxu1 %v7202_v16  ;;  %4824 = vmatpush1.bf16.msra.mxu0 %v7205_v17  ;;  %v7259_v16 = vld [vmem:[%s9516_s3 + $0x580] ss:$20 sps:$4 sm:$0xff]   ;;  %v7264_v17 = vld [vmem:[%s9516_s3 + $0x5a4] ss:$20 sps:$4 sm:$0xff]  }
 0x24a   :  { %4696 = vmatprep.subr.bf16.mxu1 %v7210_v18  ;;  %4825 = vmatprep.subr.bf16.mxu0 %v7213_v19  ;;  %v7267_v18 = vld [vmem:[%s9516_s3 + $0x5ac] ss:$20 sps:$4 sm:$0xff]  }
 0x24b   :  { %v7262_v19 = vld [vmem:[%s9516_s3 + $0x5a0] ss:$20 sps:$4 sm:$0xff]  }
 0x24d   :  { %4697 = vmatpush1.bf16.msra.mxu1 %v7208_v20  ;;  %4826 = vmatpush1.bf16.msra.mxu0 %v7211_v21  ;;  %v7265_v20 = vld [vmem:[%s9516_s3 + $0x5a8] ss:$20 sps:$4 sm:$0xff]   ;;  %v7270_v21 = vld [vmem:[%s9516_s3 + $0x5cc] ss:$20 sps:$4 sm:$0xff]  }
 0x24e   :  { %4698 = vmatprep.subr.bf16.mxu1 %v7216_v22  ;;  %4827 = vmatprep.subr.bf16.mxu0 %v7219_v23  ;;  %v7273_v22 = vld [vmem:[%s9516_s3 + $0x5d4] ss:$20 sps:$4 sm:$0xff]  }
 0x24f   :  { %v7268_v23 = vld [vmem:[%s9516_s3 + $0x5c8] ss:$20 sps:$4 sm:$0xff]  }
 0x251   :  { %4699 = vmatpush1.bf16.msra.mxu1 %v7214_v24  ;;  %4828 = vmatpush1.bf16.msra.mxu0 %v7217_v25  ;;  %v7271_v24 = vld [vmem:[%s9516_s3 + $0x5d0] ss:$20 sps:$4 sm:$0xff]   ;;  %v7276_v25 = vld [vmem:[%s9516_s3 + $0x5f4] ss:$20 sps:$4 sm:$0xff]  }
 0x252   :  { %4700 = vmatprep.subr.bf16.mxu1 %v7222_v26  ;;  %4829 = vmatprep.subr.bf16.mxu0 %v7225_v27  ;;  %v7279_v26 = vld [vmem:[%s9516_s3 + $0x5fc] ss:$20 sps:$4 sm:$0xff]  }
 0x255   :  { %4701 = vmatpush1.bf16.msra.mxu1 %v7220_v28  ;;  %4830 = vmatpush1.bf16.msra.mxu0 %v7223_v29  ;;  %v6208_v36 = vpop.f32.mrb[8].mxu0  ;;  %v6230_v37 = vpop.f32.mrb[8].mxu1  ;;  %v7274_v28 = vld [vmem:[%s9516_s3 + $0x5f0] ss:$20 sps:$4 sm:$0xff]   ;;  %v7277_v29 = vld [vmem:[%s9516_s3 + $0x5f8] ss:$20 sps:$4 sm:$0xff]  }
 0x256   :  { %v6209_v38 = vpop.f32.mrb[9].mxu0  ;;  %4702 = vmatprep.subr.bf16.mxu1 %v7228_v30  ;;  %4831 = vmatprep.subr.bf16.mxu0 %v7231_v31  ;;  %v6231_v45 = vpop.f32.mrb[9].mxu1  ;;  %v7282_v31 = vld [vmem:[%s9516_s3 + $0x61c] ss:$20 sps:$4 sm:$0xff]  }
 0x257   :  { %v6210_v47 = vadd.f32 %v6209_v38, %v6208_v36  ;;  %v6211_v48 = vpop.f32.mrb[10].mxu0  ;;  %v6232_v49 = vadd.f32 %v6231_v45, %v6230_v37  ;;  %v6233_v50 = vpop.f32.mrb[10].mxu1  ;;  %v7280_v45 = vld [vmem:[%s9516_s3 + $0x618] ss:$20 sps:$4 sm:$0xff]  }
 0x258   :  { %v6212_v52 = vpop.f32.mrb[11].mxu0  ;;  %v6234_v53 = vpop.f32.mrb[11].mxu1 }
 0x259   :  { %v3221_v56 = vadd.f32 %v6210_v47, %v9023_v1  ;;  %v6213_v57 = vadd.f32 %v6212_v52, %v6211_v48  ;;  %4703 = vmatpush1.bf16.msra.mxu1 %v7226_v32  ;;  %4832 = vmatpush1.bf16.msra.mxu0 %v7229_v33  ;;  %v6235_v58 = vadd.f32 %v6234_v53, %v6233_v50  ;;  %v7244_v1 = vld [vmem:[%s9516_s3 + $0x528] ss:$20 sps:$4 sm:$0xff]   ;;  %v7285_v32 = vld [vmem:[%s9516_s3 + $0x624] ss:$20 sps:$4 sm:$0xff]  }
 0x25a   :  { %4704 = vmatprep.subr.bf16.mxu1 %v7234_v34  ;;  %4833 = vmatprep.subr.bf16.mxu0 %v7237_v46  ;;  %v7283_v46 = vld [vmem:[%s9516_s3 + $0x620] ss:$20 sps:$4 sm:$0xff]   ;;  %v7286_v47 = vld [vmem:[%s9516_s3 + $0x150] ss:$20 sps:$4 sm:$0xff]  }
 0x25b   :  { %v3224_v59 = vadd.f32 %v6213_v57, %v9025_v2  ;;  %v9125_v60 = vadd.f32 %v6232_v49, %v3221_v56  ;;  %v7247_v2 = vld [vmem:[%s9516_s3 + $0x530] ss:$20 sps:$4 sm:$0xff]   ;;  %v7292_v56 = vld [vmem:[%s9516_s3 + $0x38] ss:$20 sps:$4 sm:$0xff]  }
 0x25c   :  { %v7287_v48 = vld [vmem:[%s9516_s3 + $0x3d0] ss:$20 sps:$4 sm:$0xff]   ;;  %v7293_v57 = vld [vmem:[%s9516_s3 + $0x2b8] ss:$20 sps:$4 sm:$0xff]  }
 0x25d   :  { %v9139_v0 = vadd.f32 %v6235_v58, %v3224_v59  ;;  %4705 = vmatpush1.bf16.msra.mxu1 %v7232_v51  ;;  %4834 = vmatpush1.bf16.msra.mxu0 %v7235_v42  ;;  %v7288_v42 = vld [vmem:[%s9516_s3 + $0x10] ss:$20 sps:$4 sm:$0xff]   ;;  %v7294_v58 = vld [vmem:[%s9516_s3 + $0x1a0] ss:$20 sps:$4 sm:$0xff]  }
 0x25e   :  { %4717 = vmatprep.subr.bf16.mxu1 %v7240_v54  ;;  %4846 = vmatprep.subr.bf16.mxu0 %v7243_v55  ;;  %v7289_v52 = vld [vmem:[%s9516_s3 + $0x290] ss:$20 sps:$4 sm:$0xff]   ;;  %v7290_v54 = vld [vmem:[%s9516_s3 + $0x178] ss:$20 sps:$4 sm:$0xff]   ;;  %v7295_v59 = vld [vmem:[%s9516_s3 + $0x420] ss:$20 sps:$4 sm:$0xff]  }
 0x25f   :  { %v7291_v55 = vld [vmem:[%s9516_s3 + $0x3f8] ss:$20 sps:$4 sm:$0xff]  }
 0x260   :  { %4707 = vmatmul.mubr.bf16.vlgmr.msra.gmra.mrb[12].mxu1 %v8911_v9  ;;  %4836 = vmatmul.mubr.bf16.vlgmr.msra.gmra.mrb[16].mxu0 %v8911_v9 }
 0x261   :  { %4718 = vmatpush1.bf16.msra.mxu1 %v7238_v11  ;;  %4847 = vmatpush1.bf16.msra.mxu0 %v7241_v61  ;;  %v7299_v11 = vld [vmem:[%s9516_s3 + $0x448] ss:$20 sps:$4 sm:$0xff]  }
 0x262   :  { %4719 = vmatprep.subr.bf16.mxu1 %v7246_v62  ;;  %4848 = vmatprep.subr.bf16.mxu0 %v7249_v63  ;;  %v7300_v61 = vld [vmem:[%s9516_s3 + $0x88] ss:$20 sps:$4 sm:$0xff]   ;;  %v7302_v63 = vld [vmem:[%s9516_s3 + $0x1f0] ss:$20 sps:$4 sm:$0xff]  }
 0x263   :  { %4749 = vmatprep.mubr.bf16.mxu1 %v7383_v5  ;;  %4878 = vmatprep.mubr.bf16.mxu0 %v7383_v5  ;;  %v7301_v62 = vld [vmem:[%s9516_s3 + $0x308] ss:$20 sps:$4 sm:$0xff]   ;;  %v7308_v5 = vld [vmem:[%s9516_s3 + $0xd8] ss:$20 sps:$4 sm:$0xff]  }
 0x265   :  { %4720 = vmatpush1.bf16.msra.mxu1 %v7244_v1  ;;  %4849 = vmatpush1.bf16.msra.mxu0 %v7247_v2  ;;  %v7304_v1 = vld [vmem:[%s9516_s3 + $0xb0] ss:$20 sps:$4 sm:$0xff]  }
 0x266   :  { %4721 = vmatprep.subr.bf16.mxu1 %v7252_v3  ;;  %4850 = vmatprep.subr.bf16.mxu0 %v7255_v4  ;;  %v7305_v2 = vld [vmem:[%s9516_s3 + $0x330] ss:$20 sps:$4 sm:$0xff]   ;;  %v7306_v3 = vld [vmem:[%s9516_s3 + $0x218] ss:$20 sps:$4 sm:$0xff]  }
 0x267   :  { %v7307_v4 = vld [vmem:[%s9516_s3 + $0x498] ss:$20 sps:$4 sm:$0xff]  }
 0x269   :  { %4722 = vmatpush1.bf16.msra.mxu1 %v7250_v6  ;;  %4851 = vmatpush1.bf16.msra.mxu0 %v7253_v7  ;;  %v7309_v6 = vld [vmem:[%s9516_s3 + $0x358] ss:$20 sps:$4 sm:$0xff]   ;;  %v7310_v7 = vld [vmem:[%s9516_s3 + $0x240] ss:$20 sps:$4 sm:$0xff]  }
 0x26a   :  { %4723 = vmatprep.subr.bf16.mxu1 %v7258_v13  ;;  %4852 = vmatprep.subr.bf16.mxu0 %v7261_v14  ;;  %v7311_v13 = vld [vmem:[%s9516_s3 + $0x4c0] ss:$20 sps:$4 sm:$0xff]  }
 0x26b   :  { %v7312_v14 = vld [vmem:[%s9516_s3 + $0x100] ss:$20 sps:$4 sm:$0xff]  }
 0x26d   :  { %4724 = vmatpush1.bf16.msra.mxu1 %v7256_v15  ;;  %4853 = vmatpush1.bf16.msra.mxu0 %v7259_v16  ;;  %v7313_v15 = vld [vmem:[%s9516_s3 + $0x380] ss:$20 sps:$4 sm:$0xff]   ;;  %v7314_v16 = vld [vmem:[%s9516_s3 + $0x268] ss:$20 sps:$4 sm:$0xff]  }
 0x26e   :  { %4725 = vmatprep.subr.bf16.mxu1 %v7264_v17  ;;  %4854 = vmatprep.subr.bf16.mxu0 %v7267_v18  ;;  %v7315_v17 = vld [vmem:[%s9516_s3 + $0x4e8] ss:$20 sps:$4 sm:$0xff]  }
 0x26f   :  { %v7316_v18 = vld [vmem:[%s9516_s3 + $0x128] ss:$20 sps:$4 sm:$0xff]  }
 0x271   :  { %4726 = vmatpush1.bf16.msra.mxu1 %v7262_v19  ;;  %4855 = vmatpush1.bf16.msra.mxu0 %v7265_v20  ;;  %v7317_v19 = vld [vmem:[%s9516_s3 + $0x3a8] ss:$20 sps:$4 sm:$0xff]   ;;  %v7326_v20 = vld [vmem:[%s9518_s5 + $0x40] sm:$0xff]  }
 0x272   :  { %4727 = vmatprep.subr.bf16.mxu1 %v7270_v21  ;;  %4856 = vmatprep.subr.bf16.mxu0 %v7273_v22  ;;  %v7318_v21 = vld [vmem:[%s9516_s3 + $0x510] ss:$20 sps:$4 sm:$0xff]   ;;  %v7384_v22 = vmov 0.0  }
 0x275   :  { %v6252_v27 = vpop.f32.mrb[12].mxu0  ;;  %4728 = vmatpush1.bf16.msra.mxu1 %v7268_v23  ;;  %4857 = vmatpush1.bf16.msra.mxu0 %v7271_v24  ;;  %v7328_v23 = vld [vmem:[%s9518_s5] sm:$0xff]   ;;  %v7330_v24 = vld [vmem:[%s9518_s5 + $0x48] sm:$0xff]  }
 0x276   :  { %v6253_v30 = vpop.f32.mrb[13].mxu0  ;;  %4729 = vmatprep.subr.bf16.mxu1 %v7276_v25  ;;  %4858 = vmatprep.subr.bf16.mxu0 %v7279_v26  ;;  %v7319_v25 = vld [vmem:[%s9516_s3 + $0x538] ss:$20 sps:$4 sm:$0xff]  }
 0x277   :  { %v6254_v33 = vadd.f32 %v6253_v30, %v6252_v27  ;;  %v6255_v34 = vpop.f32.mrb[14].mxu0  ;;  %v7332_v26 = vld [vmem:[%s9518_s5 + $0x8] sm:$0xff]   ;;  %v7336_v27 = vld [vmem:[%s9518_s5 + $0x10] sm:$0xff]   ;;  %v7340_v30 = vld [vmem:[%s9518_s5 + $0x18] sm:$0xff]  }
 0x278   :  { %v6256_v36 = vpop.f32.mrb[15].mxu0 }
 0x279   :  { %v3303_v37 = vadd.f32 %v6254_v33, %v9125_v60  ;;  %v6257_v38 = vadd.f32 %v6256_v36, %v6255_v34  ;;  %4730 = vmatpush1.bf16.msra.mxu1 %v7274_v28  ;;  %4859 = vmatpush1.bf16.msra.mxu0 %v7277_v29  ;;  %v7296_v60 = vld [vmem:[%s9516_s3 + $0x60] ss:$20 sps:$4 sm:$0xff]   ;;  %v7338_v28 = vld [vmem:[%s9518_s5 + $0x58] sm:$0xff]   ;;  %v7346_v34 = vld [vmem:[%s9518_s5 + $0x68] sm:$0xff]  }
 0x27a   :  { %4731 = vmatprep.subr.bf16.mxu1 %v7282_v31  ;;  %4860 = vmatprep.subr.bf16.mxu0 %v7285_v32  ;;  %v7321_v29 = vld [vmem:[%s9516_s3 + $0x588] ss:$20 sps:$4 sm:$0xff]   ;;  %v7342_v31 = vld [vmem:[%s9518_s5 + $0x60] sm:$0xff]   ;;  %v7323_v36 = vld [vmem:[%s9516_s3 + $0x5d8] ss:$20 sps:$4 sm:$0xff]  }
 0x27b   :  { %v3306_v49 = vadd.f32 %v6257_v38, %v9139_v0  ;;  %v3313_v50 = vmax.f32 %v3303_v37, 0.0  ;;  %v7303_v0 = vld [vmem:[%s9516_s3 + $0x470] ss:$20 sps:$4 sm:$0xff]   ;;  %v7324_v37 = vld [vmem:[%s9516_s3 + $0x600] ss:$20 sps:$4 sm:$0xff]  }
 0x27c   :  { %v7322_v32 = vld [vmem:[%s9516_s3 + $0x5b0] ss:$20 sps:$4 sm:$0xff]   ;;  %v7325_v38 = vld [vmem:[%s9516_s3 + $0x628] ss:$20 sps:$4 sm:$0xff]  }
 0x27d   :  { %v3318_v51 = vmax.f32 %v3306_v49, 0.0  ;;  %4732 = vmatpush1.bf16.msra.mxu1 %v7280_v45  ;;  %4861 = vmatpush1.bf16.msra.mxu0 %v7283_v46  ;;  %v7344_v33 = vld [vmem:[%s9518_s5 + $0x20] sm:$0xff]   ;;  %v7335_v49 = vld [vmem:[%s9518_s5 + $0xd0] sm:$0xff]  }
 0x27e   :  { %6258 = vmatprep.subr.bf16.mxu1 %v7286_v47  ;;  %6280 = vmatprep.subr.bf16.mxu0 %v7287_v48  ;;  %v7327_v45 = vld [vmem:[%s9518_s5 + $0xc0] sm:$0xff]   ;;  %v7331_v47 = vld [vmem:[%s9518_s5 + $0xc8] sm:$0xff]  }
 0x27f   :  { %v9235_v53 = vpack.c.bf16 %v3318_v51, %v3313_v50  ;;  %v7329_v46 = vld [vmem:[%s9518_s5 + $0x80] sm:$0xff]   ;;  %v7333_v48 = vld [vmem:[%s9518_s5 + $0x88] sm:$0xff]   ;;  %v7337_v50 = vld [vmem:[%s9518_s5 + $0x90] sm:$0xff]  }
 0x280   :  { %v7339_v51 = vld [vmem:[%s9518_s5 + $0xd8] sm:$0xff]  }
 0x281   :  { %4750 = vmatmul.mubr.bf16.vlgmr.msra.gmra.mrb[12].mxu1 %v9235_v53  ;;  %4879 = vmatmul.mubr.bf16.vlgmr.msra.gmra.mrb[16].mxu0 %v9235_v53 }
 0x282   :  { %6259 = vmatpush3.bf16.msra.mxu1 %v7288_v42  ;;  %6281 = vmatpush3.bf16.msra.mxu0 %v7289_v52  ;;  %v7341_v42 = vld [vmem:[%s9518_s5 + $0x98] sm:$0xff]   ;;  %v7343_v52 = vld [vmem:[%s9518_s5 + $0xe0] sm:$0xff]  }
 0x283   :  { %4921 = vmatprep.mubr.bf16.mxu1 %v8913_v10  ;;  %4962 = vmatprep.mubr.bf16.mxu0 %v8915_v12  ;;  %v7297_v10 = vld [vmem:[%s9516_s3 + $0x2e0] ss:$20 sps:$4 sm:$0xff]   ;;  %v7298_v12 = vld [vmem:[%s9516_s3 + $0x1c8] ss:$20 sps:$4 sm:$0xff]  }
 0x284   :  { %6260 = vmatprep.subr.bf16.mxu1 %v7290_v54  ;;  %6282 = vmatprep.subr.bf16.mxu0 %v7291_v55  ;;  %v7347_v54 = vld [vmem:[%s9518_s5 + $0xe8] sm:$0xff]  }
 0x285   :  { %v7348_v55 = vld [vmem:[%s9518_s5 + $0x28] sm:$0xff]  }
 0x286   :  { %6261 = vmatpush3.bf16.msra.mxu1 %v7292_v56  ;;  %6283 = vmatpush3.bf16.msra.mxu0 %v7293_v57  ;;  %v7349_v56 = vld [vmem:[%s9518_s5 + $0xa8] sm:$0xff]   ;;  %v7350_v57 = vld [vmem:[%s9518_s5 + $0x70] sm:$0xff]  }
 0x287   :  { %6262 = vmatprep.subr.bf16.mxu1 %v7294_v58  ;;  %6284 = vmatprep.subr.bf16.mxu0 %v7295_v59  ;;  %v7351_v58 = vld [vmem:[%s9518_s5 + $0xf0] sm:$0xff]  }
 0x288   :  { %v7352_v59 = vld [vmem:[%s9518_s5 + $0x30] sm:$0xff]  }
 0x28a   :  { %6263 = vmatpush3.bf16.msra.mxu1 %v7296_v60  ;;  %6285 = vmatpush3.bf16.msra.mxu0 %v7297_v10  ;;  %v7353_v60 = vld [vmem:[%s9518_s5 + $0xb0] sm:$0xff]   ;;  %v7354_v10 = vld [vmem:[%s9518_s5 + $0x78] sm:$0xff]  }
 0x28b   :  { %6264 = vmatprep.subr.bf16.mxu1 %v7298_v12  ;;  %6286 = vmatprep.subr.bf16.mxu0 %v7299_v11  ;;  %v7355_v12 = vld [vmem:[%s9518_s5 + $0xf8] sm:$0xff]  }
 0x28c   :  { %v7356_v11 = vld [vmem:[%s9518_s5 + $0x38] sm:$0xff]  }
 0x28e   :  { %6265 = vmatpush3.bf16.msra.mxu1 %v7300_v61  ;;  %6287 = vmatpush3.bf16.msra.mxu0 %v7301_v62  ;;  %v7357_v61 = vld [vmem:[%s9518_s5 + $0xb8] sm:$0xff]   ;;  %v3564_v62 = vld [vmem:[%s9519_s4] sm:$0x1f] }
 0x28f   :  { %6266 = vmatprep.subr.bf16.mxu1 %v7302_v63  ;;  %6288 = vmatprep.subr.bf16.mxu0 %v7303_v0  ;;  %v3569_v63 = vrot.slane %v3564_v62, %v521_v40  ;;  %v3577_v0 = vrot.slane %v3564_v62, %v529_v41 }
 0x292   :  { %6267 = vmatpush3.bf16.msra.mxu1 %v7304_v1  ;;  %6289 = vmatpush3.bf16.msra.mxu0 %v7305_v2  ;;  %v3573_v1 = vrot.slane %v3564_v62, %v525_v43  ;;  %v3581_v2 = vrot.slane %v3564_v62, %v533_v44 }
 0x293   :  { %6268 = vmatprep.subr.bf16.mxu1 %v7306_v3  ;;  %6290 = vmatprep.subr.bf16.mxu0 %v7307_v4 }
 0x296   :  { %6269 = vmatpush3.bf16.msra.mxu1 %v7308_v5  ;;  %6291 = vmatpush3.bf16.msra.mxu0 %v7309_v6 }
 0x297   :  { %6270 = vmatprep.subr.bf16.mxu1 %v7310_v7  ;;  %6292 = vmatprep.subr.bf16.mxu0 %v7311_v13 }
 0x29a   :  { %6271 = vmatpush3.bf16.msra.mxu1 %v7312_v14  ;;  %6293 = vmatpush3.bf16.msra.mxu0 %v7313_v15 }
 0x29b   :  { %6272 = vmatprep.subr.bf16.mxu1 %v7314_v16  ;;  %6294 = vmatprep.subr.bf16.mxu0 %v7315_v17 }
 0x29e   :  { %6273 = vmatpush3.bf16.msra.mxu1 %v7316_v18  ;;  %6295 = vmatpush3.bf16.msra.mxu0 %v7317_v19 }
 0x29f   :  { %6364 = vmatprep.subr.bf16.mxu1 %v7384_v22  ;;  %6311 = vmatprep.subr.bf16.mxu0 %v7326_v20 }
 0x2a1   :  { %4922 = vmatmul.mubr.bf16.vlgmr.msra.gmra.mrb[16].mxu1 %v8909_v8  ;;  %4963 = vmatmul.mubr.bf16.vlgmr.msra.gmra.mrb[20].mxu0 %v8911_v9  ;;  %v7334_v8 = vld [vmem:[%s9518_s5 + $0x50] sm:$0xff]  }
 0x2a2   :  { %6365 = vmatpush3.bf16.msra.mxu1 %v7318_v21  ;;  %6380 = vmatprep.mubr.msk.bf16.mxu1 %vm7385_vm0, %v7384_v22  ;;  %v7320_v9 = vld [vmem:[%s9516_s3 + $0x560] ss:$20 sps:$4 sm:$0xff]  }
 0x2a3   :  { %6366 = vmatprep.subr.bf16.mxu1 %v7384_v22  ;;  %6312 = vmatpush3.bf16.msra.mxu0 %v7328_v23 }
 0x2a4   :  { %6313 = vmatprep.subr.bf16.mxu0 %v7330_v24 }
 0x2a6   :  { %6367 = vmatpush3.bf16.msra.mxu1 %v7319_v25 }
 0x2a7   :  { %6368 = vmatprep.subr.bf16.mxu1 %v7384_v22  ;;  %6314 = vmatpush3.bf16.msra.mxu0 %v7332_v26 }
 0x2a8   :  { %6315 = vmatprep.subr.bf16.mxu0 %v7334_v8 }
 0x2aa   :  { %6369 = vmatpush3.bf16.msra.mxu1 %v7320_v9 }
 0x2ab   :  { %6370 = vmatprep.subr.bf16.mxu1 %v7384_v22  ;;  %6316 = vmatpush3.bf16.msra.mxu0 %v7336_v27 }
 0x2ac   :  { %6317 = vmatprep.subr.bf16.mxu0 %v7338_v28 }
 0x2ae   :  { %6371 = vmatpush3.bf16.msra.mxu1 %v7321_v29 }
 0x2af   :  { %6372 = vmatprep.subr.bf16.mxu1 %v7384_v22  ;;  %6318 = vmatpush3.bf16.msra.mxu0 %v7340_v30 }
 0x2b0   :  { %6319 = vmatprep.subr.bf16.mxu0 %v7342_v31  ;;  %v7358_v31 = vld [vmem:[%s9518_s5 + $0x100] sm:$0xff]  }
 0x2b2   :  { %6373 = vmatpush3.bf16.msra.mxu1 %v7322_v32  ;;  %v7359_v32 = vld [vmem:[%s9518_s5 + $0x108] sm:$0xff]  }
 0x2b3   :  { %6374 = vmatprep.subr.bf16.mxu1 %v7384_v22  ;;  %6320 = vmatpush3.bf16.msra.mxu0 %v7344_v33  ;;  %v7360_v33 = vld [vmem:[%s9518_s5 + $0x110] sm:$0xff]  }
 0x2b4   :  { %6321 = vmatprep.subr.bf16.mxu0 %v7346_v34  ;;  %v7361_v34 = vld [vmem:[%s9518_s5 + $0x118] sm:$0xff]  }
 0x2b6   :  { %6375 = vmatpush3.bf16.msra.mxu1 %v7323_v36  ;;  %v7362_v36 = vld [vmem:[%s9518_s5 + $0x120] sm:$0xff]  }
 0x2b7   :  { %6376 = vmatprep.subr.bf16.mxu1 %v7384_v22  ;;  %6322 = vmatpush3.bf16.msra.mxu0 %v7348_v55 }
 0x2b8   :  { %6323 = vmatprep.subr.bf16.mxu0 %v7350_v57 }
 0x2ba   :  { %6377 = vmatpush3.bf16.msra.mxu1 %v7324_v37  ;;  %v7363_v37 = vld [vmem:[%s9518_s5 + $0x128] sm:$0xff]  }
 0x2bb   :  { %6378 = vmatprep.subr.bf16.mxu1 %v7384_v22  ;;  %6324 = vmatpush3.bf16.msra.mxu0 %v7352_v59 }
 0x2bc   :  { %6325 = vmatprep.subr.bf16.mxu0 %v7354_v10 }
 0x2be   :  { %6379 = vmatpush3.bf16.msra.mxu1 %v7325_v38 }
 0x2bf   :  { %6333 = vmatprep.subr.bf16.mxu1 %v7327_v45  ;;  %6326 = vmatpush3.bf16.msra.mxu0 %v7356_v11 }
 0x2c0   :  { %6384 = vmatprep.subr.bf16.mxu0 %v7384_v22 }
 0x2c1   :  { %6381 = vmatmul.mubr.bf16.vlgmr.msra.gmra.mrb[20].mxu1 %v9235_v53  ;;  %v7345_v53 = vld [vmem:[%s9518_s5 + $0xa0] sm:$0xff]  }
 0x2c2   :  { %6334 = vmatpush3.bf16.msra.mxu1 %v7329_v46  ;;  %v3585_v46 = vrot.slane %v3564_v62, %v537_v35 }
 0x2c3   :  { %6335 = vmatprep.subr.bf16.mxu1 %v7331_v47  ;;  %v7364_v47 = vld [vmem:[%s9518_s5 + $0x130] sm:$0xff]  }
 0x2c6   :  { %6336 = vmatpush3.bf16.msra.mxu1 %v7333_v48 }
 0x2c7   :  { %6337 = vmatprep.subr.bf16.mxu1 %v7335_v49 }
 0x2ca   :  { %6338 = vmatpush3.bf16.msra.mxu1 %v7337_v50 }
 0x2cb   :  { %6339 = vmatprep.subr.bf16.mxu1 %v7339_v51 }
 0x2ce   :  { %6340 = vmatpush3.bf16.msra.mxu1 %v7341_v42 }
 0x2cf   :  { %6341 = vmatprep.subr.bf16.mxu1 %v7343_v52 }
 0x2d2   :  { %6342 = vmatpush3.bf16.msra.mxu1 %v7345_v53 }
 0x2d3   :  { %6343 = vmatprep.subr.bf16.mxu1 %v7347_v54 }
 0x2d6   :  { %6344 = vmatpush3.bf16.msra.mxu1 %v7349_v56 }
 0x2d7   :  { %6345 = vmatprep.subr.bf16.mxu1 %v7351_v58 }
 0x2da   :  { %6346 = vmatpush3.bf16.msra.mxu1 %v7353_v60 }
 0x2db   :  { %6347 = vmatprep.subr.bf16.mxu1 %v7355_v12 }
 0x2de   :  { %6348 = vmatpush3.bf16.msra.mxu1 %v7357_v61 }
 0x354   :  { %v4751_v3 = vpop.f32.mrb[12].mxu1  ;;  %v4880_v4 = vpop.f32.mrb[16].mxu0 }
 0x355   :  { %v6412_v5 = vadd.f32 %v4751_v3, %v3569_v63  ;;  %v6416_v6 = vadd.f32 %v4880_v4, %v3577_v0  ;;  %v4753_v7 = vpop.f32.mrb[13].mxu1  ;;  %v4882_v13 = vpop.f32.mrb[17].mxu0 }
 0x356   :  { %v6413_v14 = vadd.f32 %v4753_v7, %v3573_v1  ;;  %v6417_v15 = vadd.f32 %v4882_v13, %v3581_v2  ;;  %v4755_v16 = vpop.f32.mrb[14].mxu1  ;;  %v4884_v17 = vpop.f32.mrb[18].mxu0 }
 0x357   :  { %v6414_v40 = vadd.f32 %v4755_v16, %v3569_v63  ;;  %v6418_v18 = vadd.f32 %v4884_v17, %v3577_v0  ;;  %v4757_v19 = vpop.f32.mrb[15].mxu1  ;;  %v4886_v41 = vpop.f32.mrb[19].mxu0  ;;  %v5012_v43 = vmax.f32 %v6412_v5, 0.0  ;;  %v5014_v23 = vmax.f32 %v6416_v6, 0.0 }
 0x358   :  { %v6415_v20 = vadd.f32 %v4757_v19, %v3573_v1  ;;  %v6419_v21 = vadd.f32 %v4886_v41, %v3581_v2  ;;  %v5013_v25 = vmax.f32 %v6413_v14, 0.0  ;;  %v5015_v26 = vmax.f32 %v6417_v15, 0.0 }
 0x359   :  { %v5017_v24 = vmax.f32 %v6414_v40, 0.0  ;;  %v5019_v44 = vmax.f32 %v6418_v18, 0.0 }
 0x35a   :  { %v5018_v8 = vmax.f32 %v6415_v20, 0.0  ;;  %v5020_v9 = vmax.f32 %v6419_v21, 0.0 }
 0x35b   :  { %v5022_v27 = vpack.c.bf16 %v5017_v24, %v5012_v43  ;;  %v5024_v28 = vpack.c.bf16 %v5019_v44, %v5014_v23 }
 0x35c   :  { %v5023_v29 = vpack.c.bf16 %v5018_v8, %v5013_v25  ;;  %v5025_v30 = vpack.c.bf16 %v5020_v9, %v5015_v26 }
 0x35e   :  { %5386 = vmatprep.mubr.bf16.mxu0 %v5023_v29  ;;  %5427 = vmatprep.mubr.bf16.mxu1 %v5025_v30 }
 0x35f   :  { %5387 = vmatmul.mubr.bf16.vlgmr.msra.gmra.mrb[24].mxu0 %v5022_v27  ;;  %5428 = vmatmul.mubr.bf16.vlgmr.msra.gmra.mrb[24].mxu1 %v5024_v28 }
 0x360   :  { %6385 = vmatpush3.bf16.msra.mxu0 %v7358_v31  ;;  %6400 = vmatprep.mubr.msk.bf16.mxu0 %vm7385_vm0, %v7384_v22 }
 0x361   :  { %6386 = vmatprep.subr.bf16.mxu0 %v7384_v22 }
 0x364   :  { %6387 = vmatpush3.bf16.msra.mxu0 %v7359_v32 }
 0x365   :  { %6388 = vmatprep.subr.bf16.mxu0 %v7384_v22 }
 0x368   :  { %6389 = vmatpush3.bf16.msra.mxu0 %v7360_v33 }
 0x369   :  { %6390 = vmatprep.subr.bf16.mxu0 %v7384_v22 }
 0x36c   :  { %6391 = vmatpush3.bf16.msra.mxu0 %v7361_v34 }
 0x36d   :  { %6392 = vmatprep.subr.bf16.mxu0 %v7384_v22 }
 0x370   :  { %6393 = vmatpush3.bf16.msra.mxu0 %v7362_v36 }
 0x371   :  { %6394 = vmatprep.subr.bf16.mxu0 %v7384_v22 }
 0x374   :  { %v6274_v38 = vpop.f32.mrb[16].mxu1  ;;  %v6296_v45 = vpop.f32.mrb[20].mxu0  ;;  %6395 = vmatpush3.bf16.msra.mxu0 %v7363_v37 }
 0x375   :  { %v6275_v48 = vpop.f32.mrb[17].mxu1  ;;  %v6297_v49 = vpop.f32.mrb[21].mxu0  ;;  %6396 = vmatprep.subr.bf16.mxu0 %v7384_v22 }
 0x376   :  { %v6276_v50 = vadd.f32 %v6275_v48, %v6274_v38  ;;  %v6298_v51 = vadd.f32 %v6297_v49, %v6296_v45  ;;  %v6277_v42 = vpop.f32.mrb[18].mxu1  ;;  %v6299_v52 = vpop.f32.mrb[22].mxu0 }
 0x377   :  { %v6278_v53 = vpop.f32.mrb[19].mxu1  ;;  %v6300_v54 = vpop.f32.mrb[23].mxu0 }
 0x378   :  { %v4924_v55 = vadd.f32 %v6276_v50, %v3585_v46  ;;  %v6279_v56 = vadd.f32 %v6278_v53, %v6277_v42  ;;  %v6301_v57 = vadd.f32 %v6300_v54, %v6299_v52  ;;  %6397 = vmatpush3.bf16.msra.mxu0 %v7364_v47 }
 0x379   :  { %6398 = vmatprep.subr.bf16.mxu0 %v7384_v22  ;;  %v6105_v22 = vld [vmem:[%s9520_s6] ss:$0 sm:$0xff] }
 0x37a   :  { %v4927_v35 = vadd.f32 %v6279_v56, %v3585_v46  ;;  %v4965_v58 = vadd.f32 %v6298_v51, %v4924_v55 }
 0x37c   :  { %v4968_v59 = vadd.f32 %v6301_v57, %v4927_v35  ;;  %6399 = vmatpush3.bf16.msra.mxu0 %v7365_v39 }
 0x394   :  { %v5005_v60 = vpop.f32.mrb[20].mxu1 }
 0x395   :  { %v5006_v10 = vadd.f32 %v5005_v60, %v4965_v58  ;;  %v6382_v12 = vpop.f32.mrb[21].mxu1 }
 0x396   :  { %v5008_v11 = vpop.f32.mrb[22].mxu1 }
 0x397   :  { %v5009_v61 = vadd.f32 %v5008_v11, %v4968_v59  ;;  %v6383_v62 = vpop.f32.mrb[23].mxu1  ;;  %v5016_v63 = vmax.f32 %v5006_v10, 0.0 }
 0x399   :  { %v5021_v0 = vmax.f32 %v5009_v61, 0.0 }
 0x39b   :  { %v5026_v1 = vpack.c.bf16 %v5021_v0, %v5016_v63 }
 0x39d   :  { %6401 = vmatmul.mubr.bf16.vlgmr.msra.gmra.mrb[28].mxu0 %v5026_v1 }
 0x432   :  { %v6327_v2 = vpop.f32.mrb[24].mxu0  ;;  %v6349_v3 = vpop.f32.mrb[24].mxu1 }
 0x433   :  { %v6328_v4 = vpop.f32.mrb[25].mxu0  ;;  %v6350_v5 = vpop.f32.mrb[25].mxu1 }
 0x434   :  { %v6329_v6 = vadd.f32 %v6328_v4, %v6327_v2  ;;  %v6351_v7 = vadd.f32 %v6350_v5, %v6349_v3  ;;  %v6330_v13 = vpop.f32.mrb[26].mxu0  ;;  %v6352_v14 = vpop.f32.mrb[26].mxu1 }
 0x435   :  { %v6331_v15 = vpop.f32.mrb[27].mxu0  ;;  %v6353_v16 = vpop.f32.mrb[27].mxu1 }
 0x436   :  { %v5389_v17 = vadd.f32 %v6329_v6, %v6105_v22  ;;  %v6332_v40 = vadd.f32 %v6331_v15, %v6330_v13  ;;  %v6354_v18 = vadd.f32 %v6353_v16, %v6352_v14 }
 0x438   :  { %v5392_v19 = vadd.f32 %v6332_v40, %v6105_v22  ;;  %v5430_v41 = vadd.f32 %v6351_v7, %v5389_v17 }
 0x43a   :  { %v5433_v20 = vadd.f32 %v6354_v18, %v5392_v19 }
 0x470   :  { %v5470_v21 = vpop.f32.mrb[28].mxu0 }
 0x471   :  { %v5471_v43 = vadd.f32 %v5470_v21, %v5430_v41  ;;  %v6402_v23 = vpop.f32.mrb[29].mxu0 }
 0x472   :  { %v5473_v24 = vpop.f32.mrb[30].mxu0 }
 0x473   :  { %v6146_v44 = vmul.f32 -1.442695, %v5471_v43  ;;  %v5474_v25 = vadd.f32 %v5473_v24, %v5433_v20  ;;  %v6403_v26 = vpop.f32.mrb[31].mxu0 }
 0x475   :  { %7366 = vpow2.f32 %v6146_v44  ;;  %v6147_v8 = vmul.f32 -1.442695, %v5474_v25 }
 0x477   :  { %7368 = vpow2.f32 %v6147_v8 }
 0x47f   :  { %v7367_v9 = vpop.eup %7366 }
 0x480   :  { %v5483_v27 = vadd.f32 1.0, %v7367_v9 }
 0x481   :  { %v7369_v28 = vpop.eup %7368 }
 0x482   :  { %7370 = vrcp.f32 %v5483_v27  ;;  %v5484_v29 = vadd.f32 1.0, %v7369_v28 }
 0x484   :  { %7372 = vrcp.f32 %v5484_v29 }
 0x48c   :  { %v7371_v30 = vpop.eup %7370 }
 0x48d   :  { %5489 = vst [vmem:[%s9521_s7] sm:$0xff] %v7371_v30 }
 0x48e   :  { %v7373_v31 = vpop.eup %7372 }
 0x48f   :  { %5490 = vst [vmem:[%s9521_s7 + $0x8] sm:$0xff] %v7373_v31 }

</bundles_post_ra>
